<compile_context>
chip_gen: v5e
topology: v5e:2x2
jax: 0.10.0
libtpu: 0.0.40
codegen_flags: <defaults>
</compile_context>

<pallas_src>
import jax
import jax.numpy as jnp
from jax import lax
from jax.experimental import pallas as pl
from jax.experimental.pallas import tpu as pltpu

# ----- synthetic small shapes consistent with Meta.forward -----
B, K, N = 2, 2, 2            # batch, shots, ways
CH, T, WDIM = 4, 32, 3       # raw input: sup [B,K,CH,T,3,N], que [B,CH,T,3]
C = 8                        # embedding out channels  (plays the role of out_ch)
H = 16                       # embedding feature height (plays the role of out_h)
NB = N * B                   # ways folded into the matmul batch/M dimension

# RN head geometry, derived exactly like the PyTorch layers do:
K1, P1 = 30, 14                          # conv1 kernel / pad along H
K2, P2 = 15, 7                           # conv2 kernel / pad along H
H1 = H + 2 * P1 - K1 + 1                 # after conv1
H2 = (H1 + 2 * 1 - 3) // 3 + 1           # after AvgPool2d([3,1],[3,1],[1,0])
H3 = H2 + 2 * P2 - K2 + 1                # after conv2
OUT_VEC = 256 * H3                       # flatten size fed to the fc stack


def _elu(x):
    # nn.ELU(alpha=1)
    return jnp.where(x > 0, x, jnp.exp(x) - 1.0)


# -------------------- Pallas kernel: full RN relation head, all N ways folded --------------------
def rn_head_kernel(sup_ref, que_ref,
                   w1_ref, b1_ref, w2_ref, b2_ref,
                   wa_ref, ba_ref, wb_ref, bb_ref,
                   wc_ref, bc_ref, wd_ref, bd_ref,
                   out_ref):
    # sup_ref: (NB, K, H, C) channels-last support features, rows ordered b*N + n
    # que_ref: (NB, H, C)    channels-last query features tiled per way
    sup = sup_ref[...]                                  # (NB, K, H, C)
    que = que_ref[...]                                  # (NB, H, C)

    # prototype = torch.mean(sup_feature, 1)   (aggregation == 'mean')
    proto = jnp.mean(sup, axis=1)                       # (NB, H, C)

    # torch.cat((proto, que), dim=1)  (channels-last -> concat along last axis)
    x = jnp.concatenate([proto, que], axis=-1)          # (NB, H, 2C)

    # ---- conv1 (kernel [30,1], pad [14,0]) as a single im2col matmul ----
    zpad1 = jnp.zeros((NB, P1, 2 * C), jnp.float32)
    xp1 = jnp.concatenate([zpad1, x, zpad1], axis=1)    # (NB, H+2*P1, 2C)
    cols1 = jnp.concatenate([xp1[:, kh:kh + H1, :] for kh in range(K1)], axis=-1)
    cols1 = cols1.reshape(NB * H1, K1 * 2 * C)          # (NB*H1, 480)
    y1 = _elu(jnp.dot(cols1, w1_ref[...],
                      preferred_element_type=jnp.float32) + b1_ref[...])
    y1 = y1.reshape(NB, H1, 128)                        # channels-last

    # ---- AvgPool2d([3,1],[3,1],[1,0])  (count_include_pad -> divide by 3) ----
    zrow = jnp.zeros((NB, 1, 128), jnp.float32)
    y1p = jnp.concatenate([zrow, y1, zrow], axis=1)     # (NB, H1+2, 128)
    pooled = y1p[:, :3 * H2, :].reshape(NB, H2, 3, 128).mean(axis=2)   # (NB, H2, 128)

    # ---- conv2 (kernel [15,1], pad [7,0]) as a single im2col matmul ----
    zpad2 = jnp.zeros((NB, P2, 128), jnp.float32)
    xp2 = jnp.concatenate([zpad2, pooled, zpad2], axis=1)              # (NB, H2+2*P2, 128)
    cols2 = jnp.concatenate([xp2[:, kh:kh + H3, :] for kh in range(K2)], axis=-1)
    cols2 = cols2.reshape(NB * H3, K2 * 128)                           # (NB*H3, 1920)
    y2 = _elu(jnp.dot(cols2, w2_ref[...],
                      preferred_element_type=jnp.float32) + b2_ref[...])
    y2 = y2.reshape(NB, H3, 256)
    # nn.Dropout(p=0.3) is identity in eval/inference mode.

    # ---- Flatten + fc stack (fc1 rows permuted to channels-last order in the wrapper) ----
    flat = jnp.concatenate([y2[:, h, :] for h in range(H3)], axis=-1)  # (NB, 256*H3)
    z = _elu(jnp.dot(flat, wa_ref[...], preferred_element_type=jnp.float32) + ba_ref[...])
    z = _elu(jnp.dot(z, wb_ref[...], preferred_element_type=jnp.float32) + bb_ref[...])
    z = _elu(jnp.dot(z, wc_ref[...], preferred_element_type=jnp.float32) + bc_ref[...])
    out_ref[...] = jnp.dot(z, wd_ref[...],
                           preferred_element_type=jnp.float32) + bd_ref[...]   # (NB, 1)


def rn_head_pallas(sup_bn, que_bn, kernel_params):
    # sup_bn: (NB, K, H, C) channels-last; que_bn: (NB, H, C); rows ordered b*N + n
    (w1m, b1, w2m, b2, wa_p, ba, wb, bb, wc, bc, wd, bd) = kernel_params
    out = pl.pallas_call(
        rn_head_kernel,
        out_shape=jax.ShapeDtypeStruct((NB, 1), jnp.float32),
        compiler_params=pltpu.CompilerParams(vmem_limit_bytes=32 * 1024 * 1024),
    )(sup_bn, que_bn, w1m, b1, w2m, b2, wa_p, ba, wb, bb, wc, bc, wd, bd)
    return out.reshape(B, N)                            # like torch.cat(pred, -1)


# -------------------- embedding stand-in (external module in the original code) --------------------
def embed(x, w_emb):
    # x: (batch, CH, T, 3) NCHW -> feature (batch, C, H)   (width dim == 1, squeezed)
    # TODO(synk): embedding.EEGNet / HS_CNN / DeepconvNet and aux.* are external modules not
    # provided with Meta; this is a deterministic linear+pool stand-in producing the same
    # kind of [*, out_ch, out_h, 1] feature map the RN head consumes.
    x = x.mean(axis=-1)                                              # (batch, CH, T)
    x = x.reshape(x.shape[0], CH, H, T // H).mean(axis=-1)           # (batch, CH, H)
    return jnp.einsum('bct,ec->bet', x, w_emb)                       # (batch, C, H)


# -------------------- deterministic parameter init (xavier_normal like _init_weight) --------------------
def make_params(key):
    ks = jax.random.split(key, 8)

    def xavier(k, shape, fan_in, fan_out):
        std = (2.0 / (fan_in + fan_out)) ** 0.5
        return std * jax.random.normal(k, shape, jnp.float32)

    w_emb = xavier(ks[0], (C, CH), CH, C)
    # conv1: torch weight (128, 2C, 30, 1);  conv2: (256, 128, 15, 1)  (kernel width 1 dropped)
    w1 = xavier(ks[1], (128, 2 * C, K1), 2 * C * K1, 128 * K1)
    b1 = jnp.zeros((1, 128), jnp.float32)
    w2 = xavier(ks[2], (256, 128, K2), 128 * K2, 256 * K2)
    b2 = jnp.zeros((1, 256), jnp.float32)
    # fc stack: stored as (in, out) so kernel does x @ W
    wa = xavier(ks[3], (OUT_VEC, 512), OUT_VEC, 512)
    ba = jnp.zeros((1, 512), jnp.float32)
    wb = xavier(ks[4], (512, 256), 512, 256)
    bb = jnp.zeros((1, 256), jnp.float32)
    wc = xavier(ks[5], (256, 64), 256, 64)
    bc = jnp.zeros((1, 64), jnp.float32)
    wd = xavier(ks[6], (64, 1), 64, 1)
    bd = jnp.zeros((1, 1), jnp.float32)

    torch_params = (w1, b1, w2, b2, wa, ba, wb, bb, wc, bc, wd, bd)

    # kernel-side weight plumbing (pure layout, no change in math):
    #   im2col weight matrices: row index = tap*Cin + cin, matching the kernel's concat order
    w1m = jnp.transpose(w1, (2, 1, 0)).reshape(K1 * 2 * C, 128)      # (480, 128)
    w2m = jnp.transpose(w2, (2, 1, 0)).reshape(K2 * 128, 256)        # (1920, 256)
    # NCHW flatten index is c*H3+h; kernel flatten index is h*256+c -> permute fc1 rows
    wa_p = wa.reshape(256, H3, 512).transpose(1, 0, 2).reshape(H3 * 256, 512)
    kernel_params = (w1m, b1, w2m, b2, wa_p, ba, wb, bb, wc, bc, wd, bd)
    return w_emb, torch_params, kernel_params


# -------------------- Meta.forward --------------------
def meta_forward(sup, que, w_emb, kernel_params):
    # sup: (B, K, CH, T, 3, N), que: (B, CH, T, 3)
    que_f = embed(que, w_emb)                                        # (B, C, H)
    que_l = jnp.transpose(que_f, (0, 2, 1))                          # (B, H, C)
    sup_feats = []
    for n in range(N):                                               # loop over ways, like the PyTorch code
        sup_n = sup[..., n].reshape(B * K, CH, T, WDIM)
        f = embed(sup_n, w_emb).reshape(B, K, C, H)
        sup_feats.append(jnp.transpose(f, (0, 1, 3, 2)))             # (B, K, H, C)
    sup_l = jnp.stack(sup_feats, axis=1)                             # (B, N, K, H, C)
    sup_bn = sup_l.reshape(NB, K, H, C)                              # rows ordered b*N + n
    que_bn = jnp.broadcast_to(que_l[:, None], (B, N, H, C)).reshape(NB, H, C)
    return rn_head_pallas(sup_bn, que_bn, kernel_params)             # (B, N)


# -------------------- pure-JAX reference (NCHW, lax.conv) for verification --------------------
def reference_forward(sup, que, w_emb, torch_params):
    w1, b1, w2, b2, wa, ba, wb, bb, wc, bc, wd, bd = torch_params
    que_f = embed(que, w_emb)
    scores = []
    for n in range(N):
        sup_n = sup[..., n].reshape(B * K, CH, T, WDIM)
        sup_f = embed(sup_n, w_emb).reshape(B, K, C, H)
        proto = sup_f.mean(axis=1)
        x = jnp.concatenate([proto, que_f], axis=1)[..., None]       # (B, 2C, H, 1) NCHW
        y = lax.conv_general_dilated(x, w1[..., None], (1, 1), ((P1, P1), (0, 0)),
                                     dimension_numbers=('NCHW', 'OIHW', 'NCHW'))
        y = jax.nn.elu(y + b1.reshape(1, 128, 1, 1))
        y = lax.reduce_window(y, 0.0, lax.add, (1, 1, 3, 1), (1, 1, 3, 1),
                              ((0, 0), (0, 0), (1, 1), (0, 0))) / 3.0
        y = lax.conv_general_dilated(y, w2[..., None], (1, 1), ((P2, P2), (0, 0)),
                                     dimension_numbers=('NCHW', 'OIHW', 'NCHW'))
        y = jax.nn.elu(y + b2.reshape(1, 256, 1, 1))
        flat = y.reshape(B, -1)
        z = jax.nn.elu(flat @ wa + ba)
        z = jax.nn.elu(z @ wb + bb)
        z = jax.nn.elu(z @ wc + bc)
        scores.append(z @ wd + bd)
    return jnp.concatenate(scores, axis=-1)                          # (B, N)


if __name__ == "__main__":
    key = jax.random.PRNGKey(0)
    k_sup, k_que, k_par = jax.random.split(key, 3)
    sup = jax.random.normal(k_sup, (B, K, CH, T, WDIM, N), jnp.float32)
    que = jax.random.normal(k_que, (B, CH, T, WDIM), jnp.float32)
    w_emb, torch_params, kernel_params = make_params(k_par)

    out = jax.jit(meta_forward)(sup, que, w_emb, kernel_params)
    out = jax.block_until_ready(out)
    assert out.shape == (B, N)

    ref = reference_forward(sup, que, w_emb, torch_params)
    if not jnp.allclose(out, ref, rtol=5e-2, atol=5e-3):
        raise AssertionError(f"mismatch:\n{out}\nvs\n{ref}")
    print("KERNEL_OK")
</pallas_src>

<mosaic_0001>
module attributes {stable_mosaic.version = 11 : i64} {
  func.func @rn_head_kernel(%arg0: memref<4x2x16x8xf32, #tpu.memory_space<vmem>>, %arg1: memref<4x16x8xf32, #tpu.memory_space<vmem>>, %arg2: memref<480x128xf32, #tpu.memory_space<vmem>>, %arg3: memref<1x128xf32, #tpu.memory_space<vmem>>, %arg4: memref<1920x256xf32, #tpu.memory_space<vmem>>, %arg5: memref<1x256xf32, #tpu.memory_space<vmem>>, %arg6: memref<1280x512xf32, #tpu.memory_space<vmem>>, %arg7: memref<1x512xf32, #tpu.memory_space<vmem>>, %arg8: memref<512x256xf32, #tpu.memory_space<vmem>>, %arg9: memref<1x256xf32, #tpu.memory_space<vmem>>, %arg10: memref<256x64xf32, #tpu.memory_space<vmem>>, %arg11: memref<1x64xf32, #tpu.memory_space<vmem>>, %arg12: memref<64x1xf32, #tpu.memory_space<vmem>>, %arg13: memref<1x1xf32, #tpu.memory_space<vmem>>, %arg14: memref<4x1xf32, #tpu.memory_space<vmem>>) attributes {dimension_semantics = [], scalar_prefetch = 0 : i64, scratch_operands = 0 : i64, tpu.core_type = #tpu.core_type<tc>} {
    %c0 = arith.constant 0 : index
    %c0_0 = arith.constant 0 : index
    %c0_1 = arith.constant 0 : index
    %c0_2 = arith.constant 0 : index
    %0 = vector.load %arg0[%c0, %c0_0, %c0_1, %c0_2] : memref<4x2x16x8xf32, #tpu.memory_space<vmem>>, vector<4x2x16x8xf32>
    %c0_3 = arith.constant 0 : index
    %c0_4 = arith.constant 0 : index
    %c0_5 = arith.constant 0 : index
    %1 = vector.load %arg1[%c0_3, %c0_4, %c0_5] : memref<4x16x8xf32, #tpu.memory_space<vmem>>, vector<4x16x8xf32>
    %cst = arith.constant dense<0.000000e+00> : vector<4x16x8xf32>
    %2 = vector.multi_reduction <add>, %0, %cst [1] : vector<4x2x16x8xf32> to vector<4x16x8xf32>
    %cst_6 = arith.constant 2.000000e+00 : f32
    %3 = vector.broadcast %cst_6 : f32 to vector<4x16x8xf32>
    %4 = arith.divf %2, %3 : vector<4x16x8xf32>
    %5 = tpu.concatenate %4, %1 in 2 : vector<4x16x8xf32>, vector<4x16x8xf32> -> vector<4x16x16xf32>
    %cst_7 = arith.constant 0.000000e+00 : f32
    %6 = vector.broadcast %cst_7 : f32 to vector<4x14x16xf32>
    %7 = tpu.concatenate %6, %5, %6 in 1 : vector<4x14x16xf32>, vector<4x16x16xf32>, vector<4x14x16xf32> -> vector<4x44x16xf32>
    %8 = vector.extract_strided_slice %7 {offsets = [0, 0, 0], sizes = [4, 15, 16], strides = [1, 1, 1]} : vector<4x44x16xf32> to vector<4x15x16xf32>
    %9 = vector.extract_strided_slice %7 {offsets = [0, 1, 0], sizes = [4, 15, 16], strides = [1, 1, 1]} : vector<4x44x16xf32> to vector<4x15x16xf32>
    %10 = vector.extract_strided_slice %7 {offsets = [0, 2, 0], sizes = [4, 15, 16], strides = [1, 1, 1]} : vector<4x44x16xf32> to vector<4x15x16xf32>
    %11 = vector.extract_strided_slice %7 {offsets = [0, 3, 0], sizes = [4, 15, 16], strides = [1, 1, 1]} : vector<4x44x16xf32> to vector<4x15x16xf32>
    %12 = vector.extract_strided_slice %7 {offsets = [0, 4, 0], sizes = [4, 15, 16], strides = [1, 1, 1]} : vector<4x44x16xf32> to vector<4x15x16xf32>
    %13 = vector.extract_strided_slice %7 {offsets = [0, 5, 0], sizes = [4, 15, 16], strides = [1, 1, 1]} : vector<4x44x16xf32> to vector<4x15x16xf32>
    %14 = vector.extract_strided_slice %7 {offsets = [0, 6, 0], sizes = [4, 15, 16], strides = [1, 1, 1]} : vector<4x44x16xf32> to vector<4x15x16xf32>
    %15 = vector.extract_strided_slice %7 {offsets = [0, 7, 0], sizes = [4, 15, 16], strides = [1, 1, 1]} : vector<4x44x16xf32> to vector<4x15x16xf32>
    %16 = vector.extract_strided_slice %7 {offsets = [0, 8, 0], sizes = [4, 15, 16], strides = [1, 1, 1]} : vector<4x44x16xf32> to vector<4x15x16xf32>
    %17 = vector.extract_strided_slice %7 {offsets = [0, 9, 0], sizes = [4, 15, 16], strides = [1, 1, 1]} : vector<4x44x16xf32> to vector<4x15x16xf32>
    %18 = vector.extract_strided_slice %7 {offsets = [0, 10, 0], sizes = [4, 15, 16], strides = [1, 1, 1]} : vector<4x44x16xf32> to vector<4x15x16xf32>
    %19 = vector.extract_strided_slice %7 {offsets = [0, 11, 0], sizes = [4, 15, 16], strides = [1, 1, 1]} : vector<4x44x16xf32> to vector<4x15x16xf32>
    %20 = vector.extract_strided_slice %7 {offsets = [0, 12, 0], sizes = [4, 15, 16], strides = [1, 1, 1]} : vector<4x44x16xf32> to vector<4x15x16xf32>
    %21 = vector.extract_strided_slice %7 {offsets = [0, 13, 0], sizes = [4, 15, 16], strides = [1, 1, 1]} : vector<4x44x16xf32> to vector<4x15x16xf32>
    %22 = vector.extract_strided_slice %7 {offsets = [0, 14, 0], sizes = [4, 15, 16], strides = [1, 1, 1]} : vector<4x44x16xf32> to vector<4x15x16xf32>
    %23 = vector.extract_strided_slice %7 {offsets = [0, 15, 0], sizes = [4, 15, 16], strides = [1, 1, 1]} : vector<4x44x16xf32> to vector<4x15x16xf32>
    %24 = vector.extract_strided_slice %7 {offsets = [0, 16, 0], sizes = [4, 15, 16], strides = [1, 1, 1]} : vector<4x44x16xf32> to vector<4x15x16xf32>
    %25 = vector.extract_strided_slice %7 {offsets = [0, 17, 0], sizes = [4, 15, 16], strides = [1, 1, 1]} : vector<4x44x16xf32> to vector<4x15x16xf32>
    %26 = vector.extract_strided_slice %7 {offsets = [0, 18, 0], sizes = [4, 15, 16], strides = [1, 1, 1]} : vector<4x44x16xf32> to vector<4x15x16xf32>
    %27 = vector.extract_strided_slice %7 {offsets = [0, 19, 0], sizes = [4, 15, 16], strides = [1, 1, 1]} : vector<4x44x16xf32> to vector<4x15x16xf32>
    %28 = vector.extract_strided_slice %7 {offsets = [0, 20, 0], sizes = [4, 15, 16], strides = [1, 1, 1]} : vector<4x44x16xf32> to vector<4x15x16xf32>
    %29 = vector.extract_strided_slice %7 {offsets = [0, 21, 0], sizes = [4, 15, 16], strides = [1, 1, 1]} : vector<4x44x16xf32> to vector<4x15x16xf32>
    %30 = vector.extract_strided_slice %7 {offsets = [0, 22, 0], sizes = [4, 15, 16], strides = [1, 1, 1]} : vector<4x44x16xf32> to vector<4x15x16xf32>
    %31 = vector.extract_strided_slice %7 {offsets = [0, 23, 0], sizes = [4, 15, 16], strides = [1, 1, 1]} : vector<4x44x16xf32> to vector<4x15x16xf32>
    %32 = vector.extract_strided_slice %7 {offsets = [0, 24, 0], sizes = [4, 15, 16], strides = [1, 1, 1]} : vector<4x44x16xf32> to vector<4x15x16xf32>
    %33 = vector.extract_strided_slice %7 {offsets = [0, 25, 0], sizes = [4, 15, 16], strides = [1, 1, 1]} : vector<4x44x16xf32> to vector<4x15x16xf32>
    %34 = vector.extract_strided_slice %7 {offsets = [0, 26, 0], sizes = [4, 15, 16], strides = [1, 1, 1]} : vector<4x44x16xf32> to vector<4x15x16xf32>
    %35 = vector.extract_strided_slice %7 {offsets = [0, 27, 0], sizes = [4, 15, 16], strides = [1, 1, 1]} : vector<4x44x16xf32> to vector<4x15x16xf32>
    %36 = vector.extract_strided_slice %7 {offsets = [0, 28, 0], sizes = [4, 15, 16], strides = [1, 1, 1]} : vector<4x44x16xf32> to vector<4x15x16xf32>
    %37 = vector.extract_strided_slice %7 {offsets = [0, 29, 0], sizes = [4, 15, 16], strides = [1, 1, 1]} : vector<4x44x16xf32> to vector<4x15x16xf32>
    %38 = tpu.concatenate %8, %9, %10, %11, %12, %13, %14, %15, %16, %17, %18, %19, %20, %21, %22, %23 in 2 : vector<4x15x16xf32>, vector<4x15x16xf32>, vector<4x15x16xf32>, vector<4x15x16xf32>, vector<4x15x16xf32>, vector<4x15x16xf32>, vector<4x15x16xf32>, vector<4x15x16xf32>, vector<4x15x16xf32>, vector<4x15x16xf32>, vector<4x15x16xf32>, vector<4x15x16xf32>, vector<4x15x16xf32>, vector<4x15x16xf32>, vector<4x15x16xf32>, vector<4x15x16xf32> -> vector<4x15x256xf32>
    %39 = tpu.concatenate %24, %25, %26, %27, %28, %29, %30, %31, %32, %33, %34, %35, %36, %37 in 2 : vector<4x15x16xf32>, vector<4x15x16xf32>, vector<4x15x16xf32>, vector<4x15x16xf32>, vector<4x15x16xf32>, vector<4x15x16xf32>, vector<4x15x16xf32>, vector<4x15x16xf32>, vector<4x15x16xf32>, vector<4x15x16xf32>, vector<4x15x16xf32>, vector<4x15x16xf32>, vector<4x15x16xf32>, vector<4x15x16xf32> -> vector<4x15x224xf32>
    %40 = tpu.concatenate %38, %39 in 2 : vector<4x15x256xf32>, vector<4x15x224xf32> -> vector<4x15x480xf32>
    %41 = vector.shape_cast %40 : vector<4x15x480xf32> to vector<60x480xf32>
    %c0_8 = arith.constant 0 : index
    %c0_9 = arith.constant 0 : index
    %42 = vector.load %arg2[%c0_8, %c0_9] : memref<480x128xf32, #tpu.memory_space<vmem>>, vector<480x128xf32>
    %cst_10 = arith.constant dense<0.000000e+00> : vector<60x128xf32>
    %43 = tpu.matmul %41, %42, %cst_10 {dimension_numbers = #tpu.dot_dimension_numbers<[1], [0], [0], [1], [0, 0, 1, 1], [], []>} : vector<60x480xf32>, vector<480x128xf32>, vector<60x128xf32> -> vector<60x128xf32>
    %c0_11 = arith.constant 0 : index
    %c0_12 = arith.constant 0 : index
    %44 = vector.load %arg3[%c0_11, %c0_12] : memref<1x128xf32, #tpu.memory_space<vmem>>, vector<1x128xf32>
    %45 = vector.broadcast %44 : vector<1x128xf32> to vector<60x128xf32>
    %46 = arith.addf %43, %45 : vector<60x128xf32>
    %cst_13 = arith.constant 0.000000e+00 : f32
    %47 = vector.broadcast %cst_13 : f32 to vector<60x128xf32>
    %48 = arith.cmpf ogt, %46, %47 : vector<60x128xf32>
    %49 = math.exp %46 : vector<60x128xf32>
    %cst_14 = arith.constant 1.000000e+00 : f32
    %50 = vector.broadcast %cst_14 : f32 to vector<60x128xf32>
    %51 = arith.subf %49, %50 : vector<60x128xf32>
    %52 = arith.select %48, %46, %51 : vector<60x128xi1>, vector<60x128xf32>
    %53 = vector.shape_cast %52 : vector<60x128xf32> to vector<4x15x128xf32>
    %cst_15 = arith.constant 0.000000e+00 : f32
    %54 = vector.broadcast %cst_15 : f32 to vector<4x1x128xf32>
    %55 = tpu.concatenate %54, %53, %54 in 1 : vector<4x1x128xf32>, vector<4x15x128xf32>, vector<4x1x128xf32> -> vector<4x17x128xf32>
    %56 = vector.extract_strided_slice %55 {offsets = [0, 0, 0], sizes = [4, 15, 128], strides = [1, 1, 1]} : vector<4x17x128xf32> to vector<4x15x128xf32>
    %57 = vector.shape_cast %56 : vector<4x15x128xf32> to vector<4x5x3x128xf32>
    %cst_16 = arith.constant dense<0.000000e+00> : vector<4x5x128xf32>
    %58 = vector.multi_reduction <add>, %57, %cst_16 [2] : vector<4x5x3x128xf32> to vector<4x5x128xf32>
    %cst_17 = arith.constant 3.000000e+00 : f32
    %59 = vector.broadcast %cst_17 : f32 to vector<4x5x128xf32>
    %60 = arith.divf %58, %59 : vector<4x5x128xf32>
    %cst_18 = arith.constant 0.000000e+00 : f32
    %61 = vector.broadcast %cst_18 : f32 to vector<4x7x128xf32>
    %62 = tpu.concatenate %61, %60, %61 in 1 : vector<4x7x128xf32>, vector<4x5x128xf32>, vector<4x7x128xf32> -> vector<4x19x128xf32>
    %63 = vector.extract_strided_slice %62 {offsets = [0, 0, 0], sizes = [4, 5, 128], strides = [1, 1, 1]} : vector<4x19x128xf32> to vector<4x5x128xf32>
    %64 = vector.extract_strided_slice %62 {offsets = [0, 1, 0], sizes = [4, 5, 128], strides = [1, 1, 1]} : vector<4x19x128xf32> to vector<4x5x128xf32>
    %65 = vector.extract_strided_slice %62 {offsets = [0, 2, 0], sizes = [4, 5, 128], strides = [1, 1, 1]} : vector<4x19x128xf32> to vector<4x5x128xf32>
    %66 = vector.extract_strided_slice %62 {offsets = [0, 3, 0], sizes = [4, 5, 128], strides = [1, 1, 1]} : vector<4x19x128xf32> to vector<4x5x128xf32>
    %67 = vector.extract_strided_slice %62 {offsets = [0, 4, 0], sizes = [4, 5, 128], strides = [1, 1, 1]} : vector<4x19x128xf32> to vector<4x5x128xf32>
    %68 = vector.extract_strided_slice %62 {offsets = [0, 5, 0], sizes = [4, 5, 128], strides = [1, 1, 1]} : vector<4x19x128xf32> to vector<4x5x128xf32>
    %69 = vector.extract_strided_slice %62 {offsets = [0, 6, 0], sizes = [4, 5, 128], strides = [1, 1, 1]} : vector<4x19x128xf32> to vector<4x5x128xf32>
    %70 = vector.extract_strided_slice %62 {offsets = [0, 7, 0], sizes = [4, 5, 128], strides = [1, 1, 1]} : vector<4x19x128xf32> to vector<4x5x128xf32>
    %71 = vector.extract_strided_slice %62 {offsets = [0, 8, 0], sizes = [4, 5, 128], strides = [1, 1, 1]} : vector<4x19x128xf32> to vector<4x5x128xf32>
    %72 = vector.extract_strided_slice %62 {offsets = [0, 9, 0], sizes = [4, 5, 128], strides = [1, 1, 1]} : vector<4x19x128xf32> to vector<4x5x128xf32>
    %73 = vector.extract_strided_slice %62 {offsets = [0, 10, 0], sizes = [4, 5, 128], strides = [1, 1, 1]} : vector<4x19x128xf32> to vector<4x5x128xf32>
    %74 = vector.extract_strided_slice %62 {offsets = [0, 11, 0], sizes = [4, 5, 128], strides = [1, 1, 1]} : vector<4x19x128xf32> to vector<4x5x128xf32>
    %75 = vector.extract_strided_slice %62 {offsets = [0, 12, 0], sizes = [4, 5, 128], strides = [1, 1, 1]} : vector<4x19x128xf32> to vector<4x5x128xf32>
    %76 = vector.extract_strided_slice %62 {offsets = [0, 13, 0], sizes = [4, 5, 128], strides = [1, 1, 1]} : vector<4x19x128xf32> to vector<4x5x128xf32>
    %77 = vector.extract_strided_slice %62 {offsets = [0, 14, 0], sizes = [4, 5, 128], strides = [1, 1, 1]} : vector<4x19x128xf32> to vector<4x5x128xf32>
    %78 = tpu.concatenate %63, %64, %65, %66, %67, %68, %69, %70, %71, %72, %73, %74, %75, %76, %77 in 2 : vector<4x5x128xf32>, vector<4x5x128xf32>, vector<4x5x128xf32>, vector<4x5x128xf32>, vector<4x5x128xf32>, vector<4x5x128xf32>, vector<4x5x128xf32>, vector<4x5x128xf32>, vector<4x5x128xf32>, vector<4x5x128xf32>, vector<4x5x128xf32>, vector<4x5x128xf32>, vector<4x5x128xf32>, vector<4x5x128xf32>, vector<4x5x128xf32> -> vector<4x5x1920xf32>
    %79 = vector.shape_cast %78 : vector<4x5x1920xf32> to vector<20x1920xf32>
    %c0_19 = arith.constant 0 : index
    %c0_20 = arith.constant 0 : index
    %80 = vector.load %arg4[%c0_19, %c0_20] : memref<1920x256xf32, #tpu.memory_space<vmem>>, vector<1920x256xf32>
    %cst_21 = arith.constant dense<0.000000e+00> : vector<20x256xf32>
    %81 = tpu.matmul %79, %80, %cst_21 {dimension_numbers = #tpu.dot_dimension_numbers<[1], [0], [0], [1], [0, 0, 1, 1], [], []>} : vector<20x1920xf32>, vector<1920x256xf32>, vector<20x256xf32> -> vector<20x256xf32>
    %c0_22 = arith.constant 0 : index
    %c0_23 = arith.constant 0 : index
    %82 = vector.load %arg5[%c0_22, %c0_23] : memref<1x256xf32, #tpu.memory_space<vmem>>, vector<1x256xf32>
    %83 = vector.broadcast %82 : vector<1x256xf32> to vector<20x256xf32>
    %84 = arith.addf %81, %83 : vector<20x256xf32>
    %cst_24 = arith.constant 0.000000e+00 : f32
    %85 = vector.broadcast %cst_24 : f32 to vector<20x256xf32>
    %86 = arith.cmpf ogt, %84, %85 : vector<20x256xf32>
    %87 = math.exp %84 : vector<20x256xf32>
    %cst_25 = arith.constant 1.000000e+00 : f32
    %88 = vector.broadcast %cst_25 : f32 to vector<20x256xf32>
    %89 = arith.subf %87, %88 : vector<20x256xf32>
    %90 = arith.select %86, %84, %89 : vector<20x256xi1>, vector<20x256xf32>
    %91 = vector.shape_cast %90 : vector<20x256xf32> to vector<4x5x256xf32>
    %92 = vector.extract_strided_slice %91 {offsets = [0, 0, 0], sizes = [4, 1, 256], strides = [1, 1, 1]} : vector<4x5x256xf32> to vector<4x1x256xf32>
    %93 = vector.shape_cast %92 : vector<4x1x256xf32> to vector<4x256xf32>
    %94 = vector.extract_strided_slice %91 {offsets = [0, 1, 0], sizes = [4, 1, 256], strides = [1, 1, 1]} : vector<4x5x256xf32> to vector<4x1x256xf32>
    %95 = vector.shape_cast %94 : vector<4x1x256xf32> to vector<4x256xf32>
    %96 = vector.extract_strided_slice %91 {offsets = [0, 2, 0], sizes = [4, 1, 256], strides = [1, 1, 1]} : vector<4x5x256xf32> to vector<4x1x256xf32>
    %97 = vector.shape_cast %96 : vector<4x1x256xf32> to vector<4x256xf32>
    %98 = vector.extract_strided_slice %91 {offsets = [0, 3, 0], sizes = [4, 1, 256], strides = [1, 1, 1]} : vector<4x5x256xf32> to vector<4x1x256xf32>
    %99 = vector.shape_cast %98 : vector<4x1x256xf32> to vector<4x256xf32>
    %100 = vector.extract_strided_slice %91 {offsets = [0, 4, 0], sizes = [4, 1, 256], strides = [1, 1, 1]} : vector<4x5x256xf32> to vector<4x1x256xf32>
    %101 = vector.shape_cast %100 : vector<4x1x256xf32> to vector<4x256xf32>
    %102 = tpu.concatenate %93, %95, %97, %99, %101 in 1 : vector<4x256xf32>, vector<4x256xf32>, vector<4x256xf32>, vector<4x256xf32>, vector<4x256xf32> -> vector<4x1280xf32>
    %c0_26 = arith.constant 0 : index
    %c0_27 = arith.constant 0 : index
    %103 = vector.load %arg6[%c0_26, %c0_27] : memref<1280x512xf32, #tpu.memory_space<vmem>>, vector<1280x512xf32>
    %cst_28 = arith.constant dense<0.000000e+00> : vector<4x512xf32>
    %104 = tpu.matmul %102, %103, %cst_28 {dimension_numbers = #tpu.dot_dimension_numbers<[1], [0], [0], [1], [0, 0, 1, 1], [], []>} : vector<4x1280xf32>, vector<1280x512xf32>, vector<4x512xf32> -> vector<4x512xf32>
    %c0_29 = arith.constant 0 : index
    %c0_30 = arith.constant 0 : index
    %105 = vector.load %arg7[%c0_29, %c0_30] : memref<1x512xf32, #tpu.memory_space<vmem>>, vector<1x512xf32>
    %106 = vector.broadcast %105 : vector<1x512xf32> to vector<4x512xf32>
    %107 = arith.addf %104, %106 : vector<4x512xf32>
    %cst_31 = arith.constant 0.000000e+00 : f32
    %108 = vector.broadcast %cst_31 : f32 to vector<4x512xf32>
    %109 = arith.cmpf ogt, %107, %108 : vector<4x512xf32>
    %110 = math.exp %107 : vector<4x512xf32>
    %cst_32 = arith.constant 1.000000e+00 : f32
    %111 = vector.broadcast %cst_32 : f32 to vector<4x512xf32>
    %112 = arith.subf %110, %111 : vector<4x512xf32>
    %113 = arith.select %109, %107, %112 : vector<4x512xi1>, vector<4x512xf32>
    %c0_33 = arith.constant 0 : index
    %c0_34 = arith.constant 0 : index
    %114 = vector.load %arg8[%c0_33, %c0_34] : memref<512x256xf32, #tpu.memory_space<vmem>>, vector<512x256xf32>
    %cst_35 = arith.constant dense<0.000000e+00> : vector<4x256xf32>
    %115 = tpu.matmul %113, %114, %cst_35 {dimension_numbers = #tpu.dot_dimension_numbers<[1], [0], [0], [1], [0, 0, 1, 1], [], []>} : vector<4x512xf32>, vector<512x256xf32>, vector<4x256xf32> -> vector<4x256xf32>
    %c0_36 = arith.constant 0 : index
    %c0_37 = arith.constant 0 : index
    %116 = vector.load %arg9[%c0_36, %c0_37] : memref<1x256xf32, #tpu.memory_space<vmem>>, vector<1x256xf32>
    %117 = vector.broadcast %116 : vector<1x256xf32> to vector<4x256xf32>
    %118 = arith.addf %115, %117 : vector<4x256xf32>
    %cst_38 = arith.constant 0.000000e+00 : f32
    %119 = vector.broadcast %cst_38 : f32 to vector<4x256xf32>
    %120 = arith.cmpf ogt, %118, %119 : vector<4x256xf32>
    %121 = math.exp %118 : vector<4x256xf32>
    %cst_39 = arith.constant 1.000000e+00 : f32
    %122 = vector.broadcast %cst_39 : f32 to vector<4x256xf32>
    %123 = arith.subf %121, %122 : vector<4x256xf32>
    %124 = arith.select %120, %118, %123 : vector<4x256xi1>, vector<4x256xf32>
    %c0_40 = arith.constant 0 : index
    %c0_41 = arith.constant 0 : index
    %125 = vector.load %arg10[%c0_40, %c0_41] : memref<256x64xf32, #tpu.memory_space<vmem>>, vector<256x64xf32>
    %cst_42 = arith.constant dense<0.000000e+00> : vector<4x64xf32>
    %126 = tpu.matmul %124, %125, %cst_42 {dimension_numbers = #tpu.dot_dimension_numbers<[1], [0], [0], [1], [0, 0, 1, 1], [], []>} : vector<4x256xf32>, vector<256x64xf32>, vector<4x64xf32> -> vector<4x64xf32>
    %c0_43 = arith.constant 0 : index
    %c0_44 = arith.constant 0 : index
    %127 = vector.load %arg11[%c0_43, %c0_44] : memref<1x64xf32, #tpu.memory_space<vmem>>, vector<1x64xf32>
    %128 = vector.broadcast %127 : vector<1x64xf32> to vector<4x64xf32>
    %129 = arith.addf %126, %128 : vector<4x64xf32>
    %cst_45 = arith.constant 0.000000e+00 : f32
    %130 = vector.broadcast %cst_45 : f32 to vector<4x64xf32>
    %131 = arith.cmpf ogt, %129, %130 : vector<4x64xf32>
    %132 = math.exp %129 : vector<4x64xf32>
    %cst_46 = arith.constant 1.000000e+00 : f32
    %133 = vector.broadcast %cst_46 : f32 to vector<4x64xf32>
    %134 = arith.subf %132, %133 : vector<4x64xf32>
    %135 = arith.select %131, %129, %134 : vector<4x64xi1>, vector<4x64xf32>
    %c0_47 = arith.constant 0 : index
    %c0_48 = arith.constant 0 : index
    %136 = vector.load %arg12[%c0_47, %c0_48] : memref<64x1xf32, #tpu.memory_space<vmem>>, vector<64x1xf32>
    %cst_49 = arith.constant dense<0.000000e+00> : vector<4x1xf32>
    %137 = tpu.matmul %135, %136, %cst_49 {dimension_numbers = #tpu.dot_dimension_numbers<[1], [0], [0], [1], [0, 0, 1, 1], [], []>} : vector<4x64xf32>, vector<64x1xf32>, vector<4x1xf32> -> vector<4x1xf32>
    %c0_50 = arith.constant 0 : index
    %c0_51 = arith.constant 0 : index
    %138 = vector.load %arg13[%c0_50, %c0_51] : memref<1x1xf32, #tpu.memory_space<vmem>>, vector<1x1xf32>
    %139 = vector.broadcast %138 : vector<1x1xf32> to vector<4x1xf32>
    %140 = arith.addf %137, %139 : vector<4x1xf32>
    %c0_52 = arith.constant 0 : index
    %c0_53 = arith.constant 0 : index
    %141 = vector.load %arg14[%c0_52, %c0_53] : memref<4x1xf32, #tpu.memory_space<vmem>>, vector<4x1xf32>
    tpu.vector_store %arg14[%c0_52, %c0_53], %140 {strides = array<i32>} : memref<4x1xf32, #tpu.memory_space<vmem>>, vector<4x1xf32>,
    return
  }
}

</mosaic_0001>

<bundles_post_ra>
// kernel: meta_forward.1
= control target key start
LH: loop header
LB: loop body
LE: loop exit
PB: predicated region body
PF: predicated region fallthrough
CT: control target
= control target key end

     0   :  { %s10236_s0 = inlined_call_operand.vmem [shape: f32[4,2,16,8], index: 0, kind: input, shape index: {}]   ;;  %s10237_s1 = inlined_call_operand.vmem [shape: f32[4,16,8], index: 1, kind: input, shape index: {}]   ;;  %s10238_s2 = inlined_call_operand.hbm [shape: f32[480,128], index: 2, kind: input, shape index: {}]   ;;  %s10239_s3 = inlined_call_operand.hbm [shape: f32[1,128], index: 3, kind: input, shape index: {}]   ;;  %s10240_s4 = inlined_call_operand.hbm [shape: f32[1920,256], index: 4, kind: input, shape index: {}]   ;;  %s10241_s5 = inlined_call_operand.hbm [shape: f32[1,256], index: 5, kind: input, shape index: {}]   ;;  %s10242_s6 = inlined_call_operand.hbm [shape: f32[1280,512], index: 6, kind: input, shape index: {}]   ;;  %s10243_s7 = inlined_call_operand.hbm [shape: f32[1,512], index: 7, kind: input, shape index: {}]   ;;  %s10244_s8 = inlined_call_operand.hbm [shape: f32[512,256], index: 8, kind: input, shape index: {}]   ;;  %s10245_s9 = inlined_call_operand.hbm [shape: f32[1,256], index: 9, kind: input, shape index: {}]   ;;  %s10246_s10 = inlined_call_operand.vmem [shape: f32[256,64], index: 10, kind: input, shape index: {}]   ;;  %s10247_s11 = inlined_call_operand.hbm [shape: f32[1,64], index: 11, kind: input, shape index: {}]   ;;  %s10248_s12 = inlined_call_operand.vmem [shape: f32[64,1], index: 12, kind: input, shape index: {}]   ;;  %s10249_s13 = inlined_call_operand.<no memory space> [shape: f32[1,1], index: 13, kind: input, shape index: {}]   ;;  %s10250_s14 = inlined_call_operand.vmem [shape: f32[4,1], index: 14, kind: output, shape index: {}]  }
   0x1   :  { %v19_v0 = vstv %s10249_s13 }
   0x2   :  { %20 = vst [vmem:[#allocation2] sm:$0x1] %v19_v0 }
   0x3   :  { %21 = vsyncpa [#allocation4], 0 }
   0x4   :  { %22 = vsyncpa [#allocation6], 0 }
   0x5   :  { %23 = vsyncpa [#allocation9], 0 }
   0x6   :  { %24 = vsyncpa [#allocation12], 0  ;;  %s48_s17 = sshll.u32 %s10239_s3, 4  ;;  %s49_s17 = int_to_ptr.hbm [resolvable:$true] %s48_s17 }
   0x7   :  { %25 = vsyncpa [#allocation15], 0  ;;  %s6554_s18 = smov [#allocation5]   ;;  %s72_s22 = sshll.u32 %s10241_s5, 4  ;;  %s73_s22 = int_to_ptr.hbm [resolvable:$true] %s72_s22 }
   0x8   :  { %s50_s19 = sshll.u32 %s6554_s18, 4  ;;  %s6555_s13 = smov [#allocation8]   ;;  %s51_s19 = int_to_ptr.vmem [resolvable:$true] %s50_s19 }
   0x9   :  { %53 = dma.hbm_to_vmem [thread:$0]  %s49_s17, 16, %s51_s19, [#allocation6]  }
   0xa   :  { %s74_s23 = sshll.u32 %s6555_s13, 4  ;;  %s96_s26 = sshll.u32 %s10243_s7, 4  ;;  %s75_s23 = int_to_ptr.vmem [resolvable:$true] %s74_s23  ;;  %s97_s26 = int_to_ptr.hbm [resolvable:$true] %s96_s26 }
   0xb   :  { %77 = dma.hbm_to_vmem [thread:$0]  %s73_s22, 32, %s75_s23, [#allocation9]  }
   0xc   :  { %s120_s28 = sshll.u32 %s10245_s9, 4  ;;  %s6556_s29 = smov [#allocation11]   ;;  %s121_s28 = int_to_ptr.hbm [resolvable:$true] %s120_s28 }
   0xd   :  { %s98_s30 = sshll.u32 %s6556_s29, 4  ;;  %s6557_s5 = smov [#allocation14]   ;;  %s99_s30 = int_to_ptr.vmem [resolvable:$true] %s98_s30 }
   0xe   :  { %101 = dma.hbm_to_vmem [thread:$0]  %s97_s26, 64, %s99_s30, [#allocation12]  }
   0xf   :  { %s122_s15 = sshll.u32 %s6557_s5, 4  ;;  %s34_s18 = sshll.u32 %s10238_s2, 4  ;;  %s123_s15 = int_to_ptr.vmem [resolvable:$true] %s122_s15  ;;  %s35_s18 = int_to_ptr.hbm [resolvable:$true] %s34_s18 }
  0x10   :  { %125 = dma.hbm_to_vmem [thread:$0]  %s121_s28, 32, %s123_s15, [#allocation15]  }
  0x11   :  { %s6558_s7 = smov [#allocation3]   ;;  %s58_s9 = sshll.u32 %s10240_s4, 4  ;;  %s59_s9 = int_to_ptr.hbm [resolvable:$true] %s58_s9 }
  0x12   :  { %s36_s19 = sshll.u32 %s6558_s7, 4  ;;  %s6559_s22 = smov 128   ;;  %s37_s19 = int_to_ptr.vmem [resolvable:$true] %s36_s19 }
  0x13   :  { %s6560_s13 = smov 8   ;;  %s6561_s23 = smov [#allocation7]  }
  0x14   :  { %42 = dma.hbm_to_vmem [thread:$0]  %s35_s18, 7680, %s37_s19, [#allocation4], %s6559_s22, %s6559_s22, %s6560_s13  }
  0x15   :  { %s60_s24 = sshll.u32 %s6561_s23, 4  ;;  %s6562_s25 = smov 256   ;;  %s61_s24 = int_to_ptr.vmem [resolvable:$true] %s60_s24 }
  0x16   :  { %s6563_s2 = smov 16   ;;  %s82_s27 = sshll.u32 %s10242_s6, 4  ;;  %s83_s27 = int_to_ptr.hbm [resolvable:$true] %s82_s27 }
  0x17   :  { %66 = dma.hbm_to_vmem [thread:$0]  %s59_s9, 61440, %s61_s24, [#allocation6], %s6562_s25, %s6562_s25, %s6563_s2  }
  0x18   :  { %s6564_s28 = smov [#allocation10]   ;;  %s106_s5 = sshll.u32 %s10244_s8, 4  ;;  %s107_s5 = int_to_ptr.hbm [resolvable:$true] %s106_s5 }
  0x19   :  { %s84_s29 = sshll.u32 %s6564_s28, 4  ;;  %s6565_s15 = smov 512   ;;  %s85_s29 = int_to_ptr.vmem [resolvable:$true] %s84_s29 }
  0x1a   :  { %s6566_s16 = smov 32   ;;  %s6567_s17 = smov [#allocation13]  }
  0x1b   :  { %90 = dma.hbm_to_vmem [thread:$0]  %s83_s27, 81920, %s85_s29, [#allocation9], %s6565_s15, %s6565_s15, %s6566_s16  }
  0x1c   :  { %s108_s18 = sshll.u32 %s6567_s17, 4  ;;  %s133_s20 = sshll.u32 %s10247_s11, 4  ;;  %s109_s18 = int_to_ptr.vmem [resolvable:$true] %s108_s18  ;;  %s134_s20 = int_to_ptr.hbm [resolvable:$true] %s133_s20 }
  0x1d   :  { %114 = dma.hbm_to_vmem [thread:$0]  %s107_s5, 16384, %s109_s18, [#allocation12], %s6562_s25, %s6562_s25, %s6563_s2  }
  0x1e   :  { %s6568_s6 = smov [#allocation16]  }
  0x1f   :  { %s135_s21 = sshll.u32 %s6568_s6, 4  ;;  %s136_s21 = int_to_ptr.vmem [resolvable:$true] %s135_s21 }
  0x20   :  { %138 = dma.hbm_to_vmem [thread:$0]  %s134_s20, 16, %s136_s21, [#allocation15]  }
  0x21   :  { %6544 = dma.done.wait [#allocation4], 7680  }
  0x22   :  { %6545 = vsyncadd [#allocation4], 4294959616 }
  0x23   :  { %6546 = dma.done.wait [#allocation6], 61456  }
  0x24   :  { %6547 = vsyncadd [#allocation6], 4294905840 }
  0x25   :  { %6548 = dma.done.wait [#allocation9], 81952  }
  0x26   :  { %6549 = vsyncadd [#allocation9], 4294885344 }
  0x27   :  { %6550 = dma.done.wait [#allocation12], 16448  }
  0x28   :  { %6551 = vsyncadd [#allocation12], 4294950848 }
  0x29   :  { %6552 = dma.done.wait [#allocation15], 48  }
  0x2a   :  { %6553 = vsyncadd [#allocation15], 4294967248  ;;  %v195_v1 = vld [vmem:[%s10237_s1] sm:$0xff]  ;;  %v197_v2 = vld [vmem:[%s10237_s1 + $0x10] sm:$0xff]  ;;  %v6569_v8 = vmov 0.0   ;;  %v6570_v11 = vmov 2.0  }
  0x2b   :  { %251 = vrot.lane.b32.xlu0 %v195_v1, %s6560_s13  ;;  %255 = vrot.lane.b32.xlu1 %v197_v2, %s6560_s13  ;;  %v199_v3 = vld [vmem:[%s10237_s1 + $0x20] sm:$0xff]  ;;  %v196_v4 = vld [vmem:[%s10237_s1 + $0x8] sm:$0xff]  ;;  %v6715_v9 = vrot.slane %v6569_v8, 1  ;;  %v6720_v10 = vrot.slane %v6569_v8, 2  ;;  %6280 = vrcp.f32 %v6570_v11  ;;  %v6728_v13 = vrot.slane %v6569_v8, 3  ;;  %s6571_s17 = smov 48  }
  0x2c   :  { %259 = vrot.lane.b32.xlu2 %v199_v3, %s6560_s13  ;;  %v198_v5 = vld [vmem:[%s10237_s1 + $0x18] sm:$0xff]  ;;  %v200_v6 = vld [vmem:[%s10237_s1 + $0x28] sm:$0xff]  ;;  %v201_v7 = vld [vmem:[%s10237_s1 + $0x30] sm:$0xff]  ;;  %vm203_vm0 = vcmask 64512   ;;  %vm10258_vm2 = vcmask 1045504   ;;  %vm10260_vm3 = vcmask 1046528  }
  0x2d   :  { %v202_v12 = vld [vmem:[%s10237_s1 + $0x38] sm:$0xff]  ;;  %v179_v18 = vld [vmem:[%s10236_s0] sm:$0xff]  ;;  %v181_v19 = vld [vmem:[%s10236_s0 + $0x10] sm:$0xff]  ;;  %vm10263_vm4 = vcmask 1044480   ;;  %vm10257_vm5 = vcmask 1043456   ;;  %s6572_s8 = smov 64  }
  0x2e   :  { %v204_v21 = vsel %vm203_vm0, %v179_v18, 0.0  ;;  %v205_v22 = vsel %vm203_vm0, %v181_v19, 0.0  ;;  %v180_v25 = vld [vmem:[%s10236_s0 + $0x8] sm:$0xff]  ;;  %v182_v26 = vld [vmem:[%s10236_s0 + $0x18] sm:$0xff]  ;;  %vm10256_vm6 = vcmask 1042432   ;;  %s6573_s11 = smov 80  }
  0x2f   :  { %v206_v23 = vadd.f32 %v205_v22, %v204_v21  ;;  %v207_v28 = vsel %vm203_vm0, %v180_v25, 0.0  ;;  %v208_v29 = vsel %vm203_vm0, %v182_v26, 0.0  ;;  %vm530_vm7 = vcmask 1041408   ;;  %s6574_s28 = smov 96   ;;  %s6575_s29 = smov 112  }
  0x30   :  { %v209_v32 = vadd.f32 %v208_v29, %v207_v28  ;;  %vm572_vm8 = vcmask 1040384   ;;  %vm10255_vm9 = vcmask 130048   ;;  %vm10259_vm10 = vcmask 261120  }
  0x31   :  { %v6281_v14 = vpop.eup %6280  ;;  %vm10262_vm11 = vcmask 392192   ;;  %vm797_vm12 = vcmask 523264   ;;  %vm10264_vm13 = vcmask 654336   ;;  %vm815_vm14 = vcmask 785408  }
  0x32   :  { %v229_v15 = vmul.f32 2.0, %v6281_v14  ;;  %vm233_vm1 = vweird.f32 %v6281_v14  ;;  %vm824_vm15 = vcmask 916480  }
  0x33   :  { %253 = vrot.lane.b32.xlu0 %v196_v4, %s6560_s13  ;;  %257 = vrot.lane.b32.xlu1 %v198_v5, %s6560_s13  ;;  %v6813_v5 = vrot.slane %v6569_v8, 4 }
  0x34   :  { %261 = vrot.lane.b32.xlu2 %v200_v6, %s6560_s13  ;;  %v230_v16 = vsub.f32 1.0, %v229_v15 }
  0x35   :  { %10290 = vst [vmem:[#allocation22_spill] sm:$0xff] %v6813_v5 }
  0x36   :  { %v231_v17 = vmul.f32 %v6281_v14, %v230_v16  ;;  %v184_v16 = vld [vmem:[%s10236_s0 + $0x28] sm:$0xff] }
  0x37   :  { %v213_v22 = vsel %vm203_vm0, %v184_v16, 0.0  ;;  %v192_v16 = vld [vmem:[%s10236_s0 + $0x68] sm:$0xff] }
  0x38   :  { %v232_v20 = vadd.f32 %v6281_v14, %v231_v17  ;;  %v186_v17 = vld [vmem:[%s10236_s0 + $0x38] sm:$0xff] }
  0x3a   :  { %v6741_v24 = vsel %vm233_vm1, %v6281_v14, %v232_v20  ;;  %v185_v14 = vld [vmem:[%s10236_s0 + $0x30] sm:$0xff]  ;;  %vm1187_vm1 = vcmask 1041409  }
  0x3b   :  { %263 = vrot.lane.b32.xlu0 %v201_v7, %s6560_s13  ;;  %265 = vrot.lane.b32.xlu1 %v202_v12, %s6560_s13  ;;  %v235_v27 = vmul.f32 %v6741_v24, %v206_v23  ;;  %v236_v36 = vmul.f32 %v6741_v24, %v209_v32  ;;  %v183_v12 = vld [vmem:[%s10236_s0 + $0x20] sm:$0xff]  ;;  %v211_v21 = vsel %vm203_vm0, %v185_v14, 0.0  ;;  %v214_v23 = vsel %vm203_vm0, %v186_v17, 0.0  ;;  %v194_v17 = vld [vmem:[%s10236_s0 + $0x78] sm:$0xff] }
  0x3c   :  { %1041 = vrot.lane.b32.xlu2 %v6728_v13, %s6571_s17  ;;  %v210_v20 = vsel %vm203_vm0, %v183_v12, 0.0  ;;  %v215_v29 = vadd.f32 %v214_v23, %v213_v22 }
  0x3d   :  { %v212_v28 = vadd.f32 %v211_v21, %v210_v20 }
  0x43   :  { %1023 = vrot.lane.b32.xlu0 %v6715_v9, %s6563_s2 }
  0x4b   :  { %1037 = vrot.lane.b32.xlu0 %v6720_v10, %s6566_s16 }
  0x9d   :  { %v252_v30 = vpop.permute.xlu0 %251  ;;  %v256_v18 = vpop.permute.xlu1 %255 }
  0x9e   :  { %v275_v31 = vsel %vm203_vm0, %v235_v27, %v252_v30 }
  0x9f   :  { %v292_v33 = vrot.slane %v275_v31, 2  ;;  %v6852_v31 = vrot.slane %v6569_v8, 5 }
  0xa1   :  { %v6754_v34 = vsel %vm10258_vm2, 0.0, %v292_v33  ;;  %10291 = vst [vmem:[#allocation23_spill] sm:$0xff] %v6852_v31 }
  0xa2   :  { %v331_v35 = vrot.slane %v6754_v34, 1  ;;  %v364_v46 = vrot.slane %v6754_v34, 2  ;;  %v406_v52 = vrot.slane %v6754_v34, 3  ;;  %v448_v63 = vrot.slane %v6754_v34, 4 }
  0xa3   :  { %v490_v0 = vrot.slane %v6754_v34, 5  ;;  %v532_v19 = vrot.slane %v6754_v34, 6 }
  0xa4   :  { %341 = vrot.lane.b32.xlu0 %v331_v35, %s6563_s2  ;;  %v332_v49 = vsel %vm10260_vm3, %v6715_v9, %v331_v35  ;;  %v365_v60 = vsel %vm10258_vm2, %v6720_v10, %v364_v46  ;;  %v407_v6 = vsel %vm10263_vm4, %v6728_v13, %v406_v52  ;;  %v449_v11 = vsel %vm10257_vm5, %v6813_v5, %v448_v63 }
  0xa5   :  { %v254_v37 = vpop.permute.xlu0 %253 }
  0xa6   :  { %v276_v38 = vsel %vm203_vm0, %v236_v36, %v254_v37  ;;  %v237_v36 = vmul.f32 %v6741_v24, %v212_v28  ;;  %v238_v37 = vmul.f32 %v6741_v24, %v215_v29 }
  0xa7   :  { %v293_v39 = vrot.slane %v276_v38, 2  ;;  %v258_v38 = vpop.permute.xlu1 %257 }
  0xa9   :  { %v6761_v40 = vsel %vm10258_vm2, %v292_v33, %v293_v39  ;;  %v6764_v41 = vsel %vm10258_vm2, %v293_v39, 0.0 }
  0xaa   :  { %v889_v42 = vrot.slane %v6764_v41, 1  ;;  %v614_v43 = vrot.slane %v6761_v40, 1  ;;  %v366_v45 = vrot.slane %v6761_v40, 2  ;;  %v650_v50 = vrot.slane %v6764_v41, 2 }
  0xab   :  { %v408_v51 = vrot.slane %v6761_v40, 3  ;;  %v670_v56 = vrot.slane %v6764_v41, 3  ;;  %v450_v57 = vrot.slane %v6761_v40, 4  ;;  %v690_v58 = vrot.slane %v6764_v41, 4 }
  0xac   :  { %899 = vrot.lane.b32.xlu2 %v889_v42, %s6563_s2  ;;  %624 = vrot.lane.b32.xlu1 %v614_v43, %s6563_s2  ;;  %v890_v44 = vsel %vm10260_vm3, %v614_v43, %v889_v42  ;;  %v615_v47 = vsel %vm10260_vm3, %v331_v35, %v614_v43  ;;  %v367_v48 = vsel %vm10258_vm2, %v364_v46, %v366_v45  ;;  %v492_v62 = vrot.slane %v6761_v40, 5 }
  0xad   :  { %897 = vrot.lane.b32.xlu0 %v890_v44, %s6563_s2  ;;  %v651_v53 = vsel %vm10258_vm2, %v366_v45, %v650_v50  ;;  %v409_v54 = vsel %vm10263_vm4, %v406_v52, %v408_v51  ;;  %v1017_v55 = vsel %vm10260_vm3, %v889_v42, %v6715_v9  ;;  %v671_v59 = vsel %vm10263_vm4, %v408_v51, %v670_v56  ;;  %v264_v30 = vpop.permute.xlu0 %263  ;;  %v6876_v51 = vpop.permute.xlu2 %259  ;;  %v191_v52 = vld [vmem:[%s10236_s0 + $0x60] sm:$0xff] }
  0xae   :  { %v691_v61 = vsel %vm10257_vm5, %v450_v57, %v690_v58  ;;  %v451_v1 = vsel %vm10257_vm5, %v448_v63, %v450_v57  ;;  %v921_v2 = vsel %vm10258_vm2, %v650_v50, %v6720_v10  ;;  %v493_v3 = vsel %vm10256_vm6, %v490_v0, %v492_v62 }
  0xaf   :  { %v710_v4 = vrot.slane %v6764_v41, 5  ;;  %v534_v15 = vrot.slane %v6761_v40, 6  ;;  %v937_v25 = vsel %vm10263_vm4, %v670_v56, %v6728_v13  ;;  %v953_v27 = vsel %vm10257_vm5, %v690_v58, %v6813_v5 }
  0xb0   :  { %v730_v32 = vrot.slane %v6764_v41, 6  ;;  %v576_v33 = vrot.slane %v6761_v40, 7  ;;  %v750_v35 = vrot.slane %v6764_v41, 7  ;;  %v491_v42 = vsel %vm10256_vm6, %v6852_v31, %v490_v0 }
  0xb1   :  { %v711_v7 = vsel %vm10256_vm6, %v492_v62, %v710_v4  ;;  %v535_v26 = vsel %vm530_vm7, %v532_v19, %v534_v15  ;;  %v277_v44 = vsel %vm203_vm0, %v237_v36, %v256_v18  ;;  %v278_v45 = vsel %vm203_vm0, %v238_v37, %v258_v38 }
  0xb2   :  { %v731_v39 = vsel %vm530_vm7, %v534_v15, %v730_v32  ;;  %v751_v43 = vsel %vm572_vm8, %v576_v33, %v750_v35  ;;  %v6874_v50 = vrot.slane %v6569_v8, 7  ;;  %v222_v56 = vsel %vm203_vm0, %v191_v52, 0.0 }
  0xb3   :  { %v225_v18 = vsel %vm203_vm0, %v192_v16, 0.0 }
  0xb4   :  { %622 = vrot.lane.b32.xlu2 %v615_v47, %s6563_s2  ;;  %382 = vrot.lane.b32.xlu1 %v367_v48, %s6566_s16  ;;  %v295_v47 = vrot.slane %v277_v44, 2  ;;  %v296_v48 = vrot.slane %v278_v45, 2 }
  0xb5   :  { %339 = vrot.lane.b32.xlu0 %v332_v49, %s6563_s2  ;;  %v1024_v46 = vpop.permute.xlu0 %1023  ;;  %v574_v49 = vrot.slane %v6754_v34, 7 }
  0xb6   :  { %v1109_v58 = vsel %vm10255_vm9, 0.0, %v1024_v46  ;;  %v6901_v62 = vsel %vm10258_vm2, %v296_v48, 0.0 }
  0xb7   :  { %v6942_v22 = vrot.slane %v6901_v62, 1  ;;  %v712_v16 = vrot.slane %v6901_v62, 5 }
  0xb9   :  { %v1018_v52 = vsel %vm10260_vm3, %v6942_v22, %v6715_v9 }
  0xbc   :  { %658 = vrot.lane.b32.xlu2 %v651_v53, %s6566_s16  ;;  %424 = vrot.lane.b32.xlu1 %v409_v54, %s6571_s17  ;;  %v193_v53 = vld [vmem:[%s10236_s0 + $0x70] sm:$0xff]  ;;  %v969_v54 = vsel %vm10256_vm6, %v710_v4, %v6852_v31 }
  0xbd   :  { %1021 = vrot.lane.b32.xlu0 %v1017_v55, %s6563_s2  ;;  %v577_v55 = vsel %vm572_vm8, %v574_v49, %v576_v33  ;;  %v223_v57 = vsel %vm203_vm0, %v193_v53, 0.0  ;;  %v1038_v63 = vpop.permute.xlu0 %1037 }
  0xbe   :  { %v224_v0 = vadd.f32 %v223_v57, %v222_v56  ;;  %v692_v56 = vrot.slane %v6901_v62, 4 }
  0xc0   :  { %v241_v12 = vmul.f32 %v6741_v24, %v224_v0 }
  0xc2   :  { %v6939_v20 = vsel %vm203_vm0, %v241_v12, %v264_v30 }
  0xc3   :  { %v10252_v28 = vrot.slane %v6939_v20, 2 }
  0xc4   :  { %678 = vrot.lane.b32.xlu2 %v671_v59, %s6571_s17  ;;  %380 = vrot.lane.b32.xlu1 %v365_v60, %s6566_s16  ;;  %v6891_v59 = vsel %vm10258_vm2, 0.0, %v295_v47  ;;  %v6894_v60 = vsel %vm10258_vm2, %v295_v47, %v296_v48 }
  0xc5   :  { %698 = vrot.lane.b32.xlu0 %v691_v61, %s6572_s8  ;;  %v575_v61 = vsel %vm572_vm8, %v6874_v50, %v574_v49  ;;  %v6912_v4 = vrot.slane %v6894_v60, 1  ;;  %v368_v23 = vrot.slane %v6891_v59, 2  ;;  %v410_v48 = vrot.slane %v6891_v59, 3 }
  0xc6   :  { %v452_v57 = vrot.slane %v6891_v59, 4 }
  0xc7   :  { %v892_v30 = vsel %vm10260_vm3, %v6912_v4, %v6942_v22  ;;  %v369_v37 = vsel %vm10258_vm2, %v6720_v10, %v368_v23  ;;  %v411_v53 = vsel %vm10263_vm4, %v6728_v13, %v410_v48 }
  0xc8   :  { %v453_v12 = vsel %vm10257_vm5, %v6813_v5, %v452_v57 }
  0xcc   :  { %466 = vrot.lane.b32.xlu2 %v451_v1, %s6572_s8  ;;  %925 = vrot.lane.b32.xlu1 %v921_v2, %s6566_s16  ;;  %v1114_v1 = vsel %vm10259_vm10, %v1109_v58, %v1038_v63  ;;  %v6906_v2 = vrot.slane %v6569_v8, 6 }
  0xcd   :  { %508 = vrot.lane.b32.xlu0 %v493_v3, %s6573_s11  ;;  %v6909_v3 = vrot.slane %v6891_v59, 1 }
  0xce   :  { %10292 = vst [vmem:[#allocation24_spill] sm:$0xff] %v6906_v2  ;;  %v533_v8 = vsel %vm530_vm7, %v6906_v2, %v532_v19  ;;  %v226_v19 = vsel %vm203_vm0, %v194_v17, 0.0  ;;  %v494_v17 = vrot.slane %v6891_v59, 5 }
  0xcf   :  { %v617_v14 = vsel %vm10260_vm3, %v6909_v3, %v6912_v4  ;;  %v227_v21 = vadd.f32 %v226_v19, %v225_v18  ;;  %v334_v45 = vsel %vm10260_vm3, %v6715_v9, %v6909_v3 }
  0xd4   :  { %422 = vrot.lane.b32.xlu2 %v407_v6, %s6571_s17  ;;  %718 = vrot.lane.b32.xlu1 %v711_v7, %s6573_s11  ;;  %v412_v6 = vrot.slane %v6894_v60, 3  ;;  %v672_v7 = vrot.slane %v6901_v62, 3 }
  0xd5   :  { %464 = vrot.lane.b32.xlu0 %v449_v11, %s6572_s8  ;;  %v6916_v11 = vpop.permute.xlu2 %261 }
  0xd6   :  { %v673_v15 = vsel %vm10263_vm4, %v412_v6, %v672_v7  ;;  %v413_v49 = vsel %vm10263_vm4, %v410_v48, %v412_v6  ;;  %v938_v63 = vsel %vm10263_vm4, %v672_v7, %v6728_v13  ;;  %v985_v6 = vsel %vm530_vm7, %v730_v32, %v6906_v2 }
  0xd7   :  { %v496_v32 = vrot.slane %v6894_v60, 5  ;;  %v752_v48 = vrot.slane %v6901_v62, 7 }
  0xdc   :  { %941 = vrot.lane.b32.xlu2 %v937_v25, %s6571_s17  ;;  %550 = vrot.lane.b32.xlu1 %v535_v26, %s6574_s28  ;;  %v370_v25 = vrot.slane %v6894_v60, 2  ;;  %v266_v26 = vpop.permute.xlu1 %265 }
  0xdd   :  { %957 = vrot.lane.b32.xlu0 %v953_v27, %s6572_s8  ;;  %v242_v27 = vmul.f32 %v6741_v24, %v227_v21  ;;  %v1042_v38 = vpop.permute.xlu2 %1041  ;;  %v713_v21 = vsel %vm10256_vm6, %v496_v32, %v712_v16 }
  0xde   :  { %v371_v33 = vsel %vm10258_vm2, %v368_v23, %v370_v25  ;;  %v497_v23 = vsel %vm10256_vm6, %v494_v17, %v496_v32  ;;  %v578_v32 = vrot.slane %v6891_v59, 7 }
  0xdf   :  { %v6949_v29 = vsel %vm203_vm0, %v242_v27, %v266_v26 }
  0xe0   :  { %v10251_v36 = vrot.slane %v6949_v29, 2 }
  0xe4   :  { %738 = vrot.lane.b32.xlu2 %v731_v39, %s6574_s28  ;;  %506 = vrot.lane.b32.xlu1 %v491_v42, %s6573_s11  ;;  %v6966_v39 = vsel %vm10258_vm2, %v10252_v28, %v10251_v36  ;;  %v652_v42 = vrot.slane %v6901_v62, 2  ;;  %v1447_v36 = vld [vmem:[#allocation3 + $0xa0] sm:$0xff] }
  0xe5   :  { %758 = vrot.lane.b32.xlu0 %v751_v43, %s6575_s29  ;;  %v6970_v43 = vsel %vm10262_vm11, %v1114_v1, %v1042_v38 }
  0xe6   :  { %v653_v44 = vsel %vm10258_vm2, %v370_v25, %v652_v42  ;;  %v922_v46 = vsel %vm10258_vm2, %v652_v42, %v6720_v10  ;;  %v954_v25 = vsel %vm10257_vm5, %v692_v56, %v6813_v5  ;;  %v189_v42 = vld [vmem:[%s10236_s0 + $0x50] sm:$0xff] }
  0xec   :  { %592 = vrot.lane.b32.xlu2 %v577_v55, %s6575_s29  ;;  %973 = vrot.lane.b32.xlu1 %v969_v54, %s6573_s11  ;;  %v454_v55 = vrot.slane %v6894_v60, 4 }
  0xed   :  { %590 = vrot.lane.b32.xlu0 %v575_v61, %s6575_s29 }
  0xee   :  { %v693_v58 = vsel %vm10257_vm5, %v454_v55, %v692_v56  ;;  %v455_v61 = vsel %vm10257_vm5, %v452_v57, %v454_v55 }
  0xf4   :  { %548 = vrot.lane.b32.xlu2 %v533_v8, %s6574_s28  ;;  %626 = vrot.lane.b32.xlu1 %v617_v14, %s6563_s2 }
  0xf5   :  { %680 = vrot.lane.b32.xlu0 %v673_v15, %s6571_s17 }
  0xfc   :  { %901 = vrot.lane.b32.xlu2 %v892_v30, %s6563_s2  ;;  %386 = vrot.lane.b32.xlu1 %v371_v33, %s6566_s16  ;;  %v187_v33 = vld [vmem:[%s10236_s0 + $0x40] sm:$0xff] }
  0xfd   :  { %384 = vrot.lane.b32.xlu0 %v369_v37, %s6566_s16 }
 0x104   :  { %660 = vrot.lane.b32.xlu2 %v653_v44, %s6566_s16  ;;  %343 = vrot.lane.b32.xlu1 %v334_v45, %s6563_s2  ;;  %v188_v44 = vld [vmem:[%s10236_s0 + $0x48] sm:$0xff]  ;;  %v190_v45 = vld [vmem:[%s10236_s0 + $0x58] sm:$0xff] }
 0x105   :  { %927 = vrot.lane.b32.xlu0 %v922_v46, %s6566_s16  ;;  %v580_v46 = vrot.slane %v6894_v60, 7  ;;  %v219_v55 = vsel %vm203_vm0, %v188_v44, 0.0  ;;  %v220_v56 = vsel %vm203_vm0, %v190_v45, 0.0  ;;  %v1457_v45 = vld [vmem:[#allocation3 + $0xf0] sm:$0xff] }
 0x106   :  { %v6981_v47 = vpop.permute.xlu2 %899 }
 0x107   :  { %v753_v57 = vsel %vm572_vm8, %v580_v46, %v752_v48 }
 0x10c   :  { %428 = vrot.lane.b32.xlu2 %v413_v49, %s6571_s17  ;;  %1025 = vrot.lane.b32.xlu1 %v1018_v52, %s6563_s2  ;;  %v1001_v49 = vsel %vm572_vm8, %v750_v35, %v6874_v50  ;;  %v216_v52 = vsel %vm203_vm0, %v187_v33, 0.0 }
 0x10d   :  { %426 = vrot.lane.b32.xlu0 %v411_v53, %s6571_s17  ;;  %v217_v53 = vsel %vm203_vm0, %v189_v42, 0.0 }
 0x10e   :  { %v6993_v54 = vpop.permute.xlu2 %622  ;;  %v218_v35 = vadd.f32 %v217_v53, %v216_v52  ;;  %v1440_v52 = vld [vmem:[#allocation3 + $0x68] sm:$0xff] }
 0x10f   :  { %v1456_v53 = vld [vmem:[#allocation3 + $0xe8] sm:$0xff] }
 0x114   :  { %700 = vrot.lane.b32.xlu2 %v693_v58, %s6572_s8  ;;  %470 = vrot.lane.b32.xlu1 %v455_v61, %s6572_s8  ;;  %v221_v58 = vadd.f32 %v220_v56, %v219_v55  ;;  %v1472_v55 = vld [vmem:[#allocation3 + $0x168] sm:$0xff] }
 0x115   :  { %943 = vrot.lane.b32.xlu0 %v938_v63, %s6571_s17 }
 0x116   :  { %v342_v0 = vpop.permute.xlu0 %341  ;;  %v7005_v1 = vpop.permute.xlu2 %658  ;;  %v240_v33 = vmul.f32 %v6741_v24, %v221_v58 }
 0x117   :  { %v772_v26 = vsel %vm10255_vm9, %v6754_v34, %v342_v0 }
 0x11c   :  { %1045 = vrot.lane.b32.xlu2 %v6813_v5, %s6572_s8  ;;  %989 = vrot.lane.b32.xlu1 %v985_v6, %s6574_s28 }
 0x11d   :  { %468 = vrot.lane.b32.xlu0 %v453_v12, %s6572_s8  ;;  %v538_v12 = vrot.slane %v6894_v60, 6 }
 0x11e   :  { %v625_v7 = vpop.permute.xlu1 %624  ;;  %v7017_v8 = vpop.permute.xlu2 %678 }
 0x11f   :  { %v834_v14 = vsel %vm10255_vm9, %v6761_v40, %v625_v7  ;;  %v7021_v15 = vpop.permute.xlu0 %897  ;;  %v732_v7 = vrot.slane %v6901_v62, 6 }
 0x120   :  { %v842_v18 = vsel %vm10259_vm10, %v834_v14, %v7005_v1  ;;  %v536_v14 = vrot.slane %v6891_v59, 6 }
 0x121   :  { %v7030_v19 = vsel %vm10262_vm11, %v842_v18, %v7017_v8  ;;  %v733_v42 = vsel %vm530_vm7, %v538_v12, %v732_v7 }
 0x122   :  { %v539_v44 = vsel %vm530_vm7, %v536_v14, %v538_v12 }
 0x124   :  { %720 = vrot.lane.b32.xlu2 %v713_v21, %s6573_s11  ;;  %512 = vrot.lane.b32.xlu1 %v497_v23, %s6573_s11  ;;  %v1442_v21 = vld [vmem:[#allocation3 + $0x78] sm:$0xff] }
 0x125   :  { %959 = vrot.lane.b32.xlu0 %v954_v25, %s6572_s8  ;;  %v1458_v23 = vld [vmem:[#allocation3 + $0xf8] sm:$0xff]  ;;  %1630 = vmatpush.msra.mxu0 %v1442_v21  ;;  %v1455_v21 = vld [vmem:[#allocation3 + $0xe0] sm:$0xff] }
 0x126   :  { %v7045_v27 = vpop.permute.xlu2 %466  ;;  %v7047_v30 = vpop.permute.xlu1 %382  ;;  %v1474_v25 = vld [vmem:[#allocation3 + $0x178] sm:$0xff]  ;;  %1671 = vmatpush.msra.mxu1 %v1458_v23  ;;  %v1471_v23 = vld [vmem:[#allocation3 + $0x160] sm:$0xff] }
 0x127   :  { %v781_v37 = vsel %vm10259_vm10, %v772_v26, %v7047_v30  ;;  %v7054_v38 = vpop.permute.xlu0 %339  ;;  %v239_v26 = vmul.f32 %v6741_v24, %v218_v35  ;;  %1712 = vmatpush.msra.mxu2 %v1474_v25  ;;  %v579_v24 = vsel %vm572_vm8, %v6874_v50, %v578_v32  ;;  %v1486_v25 = vld [vmem:[#allocation3 + $0x1d8] sm:$0xff] }
 0x128   :  { %1672 = vmatpush.msra.mxu1 %v1457_v45  ;;  %1757 = vmatpush.msra.mxu3 %v1486_v25  ;;  %v1437_v45 = vld [vmem:[#allocation3 + $0x50] sm:$0xff] }
 0x129   :  { %v7115_v56 = vsel %vm203_vm0, %v239_v26, %v6876_v51 }
 0x12a   :  { %1673 = vmatpush.msra.mxu1 %v1456_v53  ;;  %v298_v26 = vrot.slane %v7115_v56, 2  ;;  %v1463_v56 = vld [vmem:[#allocation3 + $0x120] sm:$0xff] }
 0x12c   :  { %1049 = vrot.lane.b32.xlu2 %v6852_v31, %s6573_s11  ;;  %1005 = vrot.lane.b32.xlu1 %v1001_v49, %s6575_s29  ;;  %v1473_v49 = vld [vmem:[#allocation3 + $0x170] sm:$0xff] }
 0x12d   :  { %760 = vrot.lane.b32.xlu0 %v753_v57, %s6575_s29  ;;  %v280_v57 = vsel %vm203_vm0, %v240_v33, %v6916_v11  ;;  %1713 = vmatpush.msra.mxu2 %v1473_v49  ;;  %v1438_v11 = vld [vmem:[#allocation3 + $0x58] sm:$0xff]  ;;  %v1453_v49 = vld [vmem:[#allocation3 + $0xd0] sm:$0xff]  ;;  %vm10272_vm0 = vcmask 1042434  }
 0x12e   :  { %v7084_v61 = vpop.permute.xlu2 %422  ;;  %v7086_v63 = vpop.permute.xlu1 %424  ;;  %v299_v33 = vrot.slane %v280_v57, 2  ;;  %1674 = vmatpush.msra.mxu1 %v1455_v21  ;;  %v1436_v57 = vld [vmem:[#allocation3 + $0x48] sm:$0xff] }
 0x12f   :  { %v790_v0 = vsel %vm10262_vm11, %v781_v37, %v7086_v63  ;;  %v7090_v6 = vpop.permute.xlu0 %1021  ;;  %v1441_v37 = vld [vmem:[#allocation3 + $0x70] sm:$0xff]  ;;  %1714 = vmatpush.msra.mxu2 %v1472_v55 }
 0x130   :  { %v7098_v18 = vsel %vm797_vm12, %v790_v0, %v7045_v27  ;;  %1631 = vmatpush.msra.mxu0 %v1441_v37  ;;  %v1439_v0 = vld [vmem:[#allocation3 + $0x60] sm:$0xff]  ;;  %v1454_v37 = vld [vmem:[#allocation3 + $0xd8] sm:$0xff] }
 0x131   :  { %1715 = vmatpush.msra.mxu2 %v1471_v23  ;;  %1675 = vmatpush.msra.mxu1 %v1454_v37  ;;  %v1468_v23 = vld [vmem:[#allocation3 + $0x148] sm:$0xff] }
 0x132   :  { %1632 = vmatpush.msra.mxu0 %v1440_v52  ;;  %v1053_v52 = vsel %vm10255_vm9, %v6764_v41, %v6981_v47 }
 0x133   :  { %1676 = vmatpush.msra.mxu1 %v1453_v49  ;;  %v1483_v49 = vld [vmem:[#allocation3 + $0x1c0] sm:$0xff] }
 0x134   :  { %740 = vrot.lane.b32.xlu2 %v733_v42, %s6574_s28  ;;  %554 = vrot.lane.b32.xlu1 %v539_v44, %s6574_s28  ;;  %v581_v42 = vsel %vm572_vm8, %v578_v32, %v580_v46  ;;  %v1470_v44 = vld [vmem:[#allocation3 + $0x158] sm:$0xff]  ;;  %v7146_v46 = vsel %vm10258_vm2, %v299_v33, 0.0  ;;  %v1485_v32 = vld [vmem:[#allocation3 + $0x1d0] sm:$0xff] }
 0x135   :  { %594 = vrot.lane.b32.xlu0 %v579_v24, %s6575_s29  ;;  %1633 = vmatpush.msra.mxu0 %v1439_v0  ;;  %v7143_v24 = vsel %vm10258_vm2, %v298_v26, %v299_v33  ;;  %v1452_v0 = vld [vmem:[#allocation3 + $0xc8] sm:$0xff]  ;;  %v7170_v33 = vrot.slane %v7146_v46, 1 }
 0x136   :  { %v7119_v35 = vpop.permute.xlu2 %941  ;;  %v7121_v58 = vpop.permute.xlu1 %380  ;;  %1716 = vmatpush.msra.mxu2 %v1470_v44  ;;  %1758 = vmatpush.msra.mxu3 %v1485_v32  ;;  %v7167_v25 = vrot.slane %v7143_v24, 1  ;;  %v1467_v44 = vld [vmem:[#allocation3 + $0x140] sm:$0xff] }
 0x137   :  { %v7123_v12 = vpop.permute.xlu0 %698  ;;  %1634 = vmatpush.msra.mxu0 %v1438_v11  ;;  %v1484_v11 = vld [vmem:[#allocation3 + $0x1c8] sm:$0xff]  ;;  %1677 = vmatpush.msra.mxu1 %v1452_v0 }
 0x138   :  { %v7128_v51 = vsel %vm797_vm12, %v7030_v19, %v7123_v12  ;;  %v495_v19 = vsel %vm10256_vm6, %v6852_v31, %v494_v17  ;;  %v1469_v17 = vld [vmem:[#allocation3 + $0x150] sm:$0xff]  ;;  %1759 = vmatpush.msra.mxu3 %v1484_v11  ;;  %v894_v32 = vsel %vm10260_vm3, %v7167_v25, %v7170_v33 }
 0x139   :  { %1635 = vmatpush.msra.mxu0 %v1437_v45  ;;  %1717 = vmatpush.msra.mxu2 %v1469_v17  ;;  %v970_v45 = vsel %vm10256_vm6, %v712_v16, %v6852_v31  ;;  %v1434_v17 = vld [vmem:[#allocation3 + $0x38] sm:$0xff]  ;;  %v1433_v11 = vld [vmem:[#allocation3 + $0x30] sm:$0xff]  ;;  %vm10277_vm6 = vcmask 1044484  }
 0x13a   :  { %1760 = vmatpush.msra.mxu3 %v1483_v49  ;;  %v1481_v49 = vld [vmem:[#allocation3 + $0x1b0] sm:$0xff] }
 0x13b   :  { %1636 = vmatpush.msra.mxu0 %v1436_v57  ;;  %1718 = vmatpush.msra.mxu2 %v1468_v23  ;;  %v1466_v57 = vld [vmem:[#allocation3 + $0x138] sm:$0xff] }
 0x13c   :  { %596 = vrot.lane.b32.xlu2 %v581_v42, %s6575_s29  ;;  %510 = vrot.lane.b32.xlu1 %v495_v19, %s6573_s11  ;;  %v1435_v42 = vld [vmem:[#allocation3 + $0x40] sm:$0xff] }
 0x13d   :  { %345 = vrot.lane.b32.xlu0 %v6909_v3, %s6563_s2  ;;  %v1451_v19 = vld [vmem:[#allocation3 + $0xc0] sm:$0xff]  ;;  %1637 = vmatpush.msra.mxu0 %v1435_v42  ;;  %v1449_v42 = vld [vmem:[#allocation3 + $0xb0] sm:$0xff] }
 0x13e   :  { %v7153_v53 = vpop.permute.xlu2 %738  ;;  %v7155_v55 = vpop.permute.xlu1 %925  ;;  %1678 = vmatpush.msra.mxu1 %v1451_v19  ;;  %1719 = vmatpush.msra.mxu2 %v1467_v44  ;;  %v1465_v19 = vld [vmem:[#allocation3 + $0x130] sm:$0xff]  ;;  %v10254_v44 = vrot.slane %v7143_v24, 2 }
 0x13f   :  { %v1061_v21 = vsel %vm10259_vm10, %v1053_v52, %v7155_v55  ;;  %v7159_v3 = vpop.permute.xlu0 %508  ;;  %v1450_v52 = vld [vmem:[#allocation3 + $0xb8] sm:$0xff]  ;;  %1638 = vmatpush.msra.mxu0 %v1434_v17  ;;  %v1448_v17 = vld [vmem:[#allocation3 + $0xa8] sm:$0xff] }
 0x140   :  { %v7164_v47 = vsel %vm10264_vm13, %v7098_v18, %v7159_v3  ;;  %v7174_v37 = vsel %vm10262_vm11, %v1061_v21, %v7119_v35  ;;  %v537_v18 = vsel %vm530_vm7, %v6906_v2, %v536_v14  ;;  %v1482_v14 = vld [vmem:[#allocation3 + $0x1b8] sm:$0xff]  ;;  %1679 = vmatpush.msra.mxu1 %v1450_v52  ;;  %1720 = vmatpush.msra.mxu2 %v1466_v57  ;;  %v1480_v52 = vld [vmem:[#allocation3 + $0x1a8] sm:$0xff]  ;;  %v7208_v57 = vsel %vm10258_vm2, 0.0, %v298_v26 }
 0x141   :  { %1761 = vmatpush.msra.mxu3 %v1482_v14  ;;  %1639 = vmatpush.msra.mxu0 %v1433_v11  ;;  %v1479_v11 = vld [vmem:[#allocation3 + $0x1a0] sm:$0xff]  ;;  %v1430_v26 = vld [vmem:[#allocation3 + $0x18] sm:$0xff] }
 0x142   :  { %1680 = vmatpush.msra.mxu1 %v1449_v42  ;;  %1721 = vmatpush.msra.mxu2 %v1465_v19 }
 0x143   :  { %1762 = vmatpush.msra.mxu3 %v1481_v49  ;;  %v674_v49 = vrot.slane %v7146_v46, 3 }
 0x144   :  { %552 = vrot.lane.b32.xlu2 %v537_v18, %s6574_s28  ;;  %975 = vrot.lane.b32.xlu1 %v970_v45, %s6573_s11  ;;  %v10253_v18 = vrot.slane %v7146_v46, 2 }
 0x145   :  { %905 = vrot.lane.b32.xlu0 %v894_v32, %s6563_s2  ;;  %v1464_v32 = vld [vmem:[#allocation3 + $0x128] sm:$0xff]  ;;  %1681 = vmatpush.msra.mxu1 %v1448_v17  ;;  %v1446_v17 = vld [vmem:[#allocation3 + $0x98] sm:$0xff] }
 0x146   :  { %v7190_v16 = vpop.permute.xlu2 %592  ;;  %v7192_v0 = vpop.permute.xlu1 %718  ;;  %1722 = vmatpush.msra.mxu2 %v1464_v32  ;;  %v655_v14 = vsel %vm10258_vm2, %v10254_v44, %v10253_v18  ;;  %1763 = vmatpush.msra.mxu3 %v1480_v52  ;;  %v1462_v32 = vld [vmem:[#allocation3 + $0x118] sm:$0xff]  ;;  %v1052_v52 = vsel %vm10255_vm9, %v6761_v40, %v7021_v15  ;;  %v458_v44 = vrot.slane %v7143_v24, 4 }
 0x147   :  { %v866_v21 = vsel %vm10264_vm13, %v7128_v51, %v7192_v0  ;;  %v7197_v23 = vpop.permute.xlu0 %464  ;;  %v1432_v51 = vld [vmem:[#allocation3 + $0x28] sm:$0xff]  ;;  %1682 = vmatpush.msra.mxu1 %v1447_v36  ;;  %v1429_v36 = vld [vmem:[#allocation3 + $0x10] sm:$0xff] }
 0x148   :  { %v7203_v45 = vsel %vm815_vm14, %v866_v21, %v7153_v53  ;;  %1640 = vmatpush.msra.mxu0 %v1432_v51  ;;  %v1431_v21 = vld [vmem:[#allocation3 + $0x20] sm:$0xff]  ;;  %1723 = vmatpush.msra.mxu2 %v1463_v56  ;;  %v833_v51 = vsel %vm10255_vm9, %v6754_v34, %v6993_v54  ;;  %v1445_v56 = vld [vmem:[#allocation3 + $0x90] sm:$0xff]  ;;  %v986_v34 = vsel %vm530_vm7, %v732_v7, %v6906_v2 }
 0x149   :  { %1764 = vmatpush.msra.mxu3 %v1479_v11  ;;  %v1461_v11 = vld [vmem:[#allocation3 + $0x110] sm:$0xff]  ;;  %v841_v18 = vsel %vm10259_vm10, %v833_v51, %v7047_v30  ;;  %1683 = vmatpush.msra.mxu1 %v1446_v17  ;;  %v1060_v54 = vsel %vm10259_vm10, %v1052_v52, %v7005_v1  ;;  %v10293_v51 = vrot.slane %v7143_v24, 2  ;;  %v1444_v17 = vld [vmem:[#allocation3 + $0x88] sm:$0xff]  ;;  %v10295_v52 = vrot.slane %v7208_v57, 4 }
 0x14a   :  { %1641 = vmatpush.msra.mxu0 %v1431_v21  ;;  %v1478_v21 = vld [vmem:[#allocation3 + $0x198] sm:$0xff]  ;;  %1724 = vmatpush.msra.mxu2 %v1462_v32  ;;  %v1477_v30 = vld [vmem:[#allocation3 + $0x190] sm:$0xff]  ;;  %v771_v32 = vsel %vm10255_vm9, 0.0, %v7054_v38  ;;  %v1460_v38 = vld [vmem:[#allocation3 + $0x108] sm:$0xff] }
 0x14b   :  { %1765 = vmatpush.msra.mxu3 %v1478_v21  ;;  %1684 = vmatpush.msra.mxu1 %v1445_v56  ;;  %v1476_v56 = vld [vmem:[#allocation3 + $0x188] sm:$0xff] }
 0x14c   :  { %903 = vrot.lane.b32.xlu2 %v6942_v22, %s6563_s2  ;;  %628 = vrot.lane.b32.xlu1 %v6912_v4, %s6563_s2  ;;  %v7225_v22 = vrot.slane %v7208_v57, 1  ;;  %v416_v4 = vrot.slane %v7143_v24, 3 }
 0x14d   :  { %662 = vrot.lane.b32.xlu0 %v655_v14, %s6566_s16  ;;  %1642 = vmatpush.msra.mxu0 %v1430_v26  ;;  %v7267_v26 = vsel %vm572_vm8, %v752_v48, %v6874_v50  ;;  %v1428_v48 = vld [vmem:[#allocation3 + $0x8] sm:$0xff] }
 0x14e   :  { %v7220_v42 = vpop.permute.xlu2 %548  ;;  %v7222_v19 = vpop.permute.xlu1 %550  ;;  %v619_v7 = vsel %vm10260_vm3, %v7225_v22, %v7167_v25  ;;  %v675_v1 = vsel %vm10263_vm4, %v416_v4, %v674_v49  ;;  %1725 = vmatpush.msra.mxu2 %v1461_v11  ;;  %v780_v11 = vsel %vm10259_vm10, %v771_v32, %v7121_v58  ;;  %1766 = vmatpush.msra.mxu3 %v1477_v30 }
 0x14f   :  { %v817_v14 = vsel %vm815_vm14, %v7164_v47, %v7222_v19  ;;  %v7236_v28 = vpop.permute.xlu0 %957  ;;  %v414_v47 = vrot.slane %v7208_v57, 3  ;;  %1643 = vmatpush.msra.mxu0 %v1429_v36  ;;  %v7297_v36 = vsel %vm10260_vm3, %v6715_v9, %v7225_v22  ;;  %1685 = vmatpush.msra.mxu1 %v1444_v17  ;;  %vm10266_vm3 = vcmask 1043458  }
 0x150   :  { %v7245_v40 = vsel %vm824_vm15, %v817_v14, %v7190_v16  ;;  %v7250_v15 = vsel %vm797_vm12, %v7174_v37, %v7236_v28  ;;  %v849_v37 = vsel %vm10262_vm11, %v841_v18, %v7086_v63  ;;  %v10294_v63 = vrot.slane %v7208_v57, 2  ;;  %1726 = vmatpush.msra.mxu2 %v1460_v38  ;;  %1767 = vmatpush.msra.mxu3 %v1476_v56 }
 0x151   :  { %v459_v14 = vsel %vm10257_vm5, %v10295_v52, %v458_v44  ;;  %v7292_v21 = vsel %vm10263_vm4, %v414_v47, %v416_v4  ;;  %v1427_v4 = vld [vmem:[#allocation3] sm:$0xff]  ;;  %1644 = vmatpush.msra.mxu0 %v1428_v48  ;;  %vm10276_vm5 = vcmask 1045509  }
 0x152   :  { %v375_v18 = vsel %vm10258_vm2, %v10294_v63, %v10293_v51  ;;  %v1443_v51 = vld [vmem:[#allocation3 + $0x80] sm:$0xff]  ;;  %v1108_v63 = vsel %vm10255_vm9, %v6764_v41, %v7090_v6  ;;  %v789_v6 = vsel %vm10262_vm11, %v780_v11, %v7084_v61  ;;  %vm10265_vm9 = vcmask 1043459  }
 0x153   :  { %1645 = vmatpush.msra.mxu0 %v1427_v4  ;;  %1686 = vmatpush.msra.mxu1 %v1443_v51  ;;  %vm10261_vm2 = vcmask 1046534  }
 0x154   :  { %630 = vrot.lane.b32.xlu2 %v619_v7, %s6563_s2  ;;  %991 = vrot.lane.b32.xlu1 %v986_v34, %s6574_s28  ;;  %v1068_v34 = vsel %vm10262_vm11, %v1060_v54, %v7017_v8  ;;  %v857_v7 = vsel %vm797_vm12, %v849_v37, %v7045_v27  ;;  %v1459_v27 = vld [vmem:[#allocation3 + $0x100] sm:$0xff] }
 0x155   :  { %682 = vrot.lane.b32.xlu0 %v675_v1, %s6571_s17  ;;  %v1076_v52 = vsel %vm797_vm12, %v1068_v34, %v7123_v12  ;;  %v865_v58 = vsel %vm10264_vm13, %v857_v7, %v7159_v3  ;;  %v1475_v54 = vld [vmem:[#allocation3 + $0x180] sm:$0xff]  ;;  %v798_v3 = vsel %vm797_vm12, %v789_v6, %v7197_v23  ;;  %1727 = vmatpush.msra.mxu2 %v1459_v27 }
 0x156   :  { %v7313_v32 = vpop.permute.xlu2 %901  ;;  %v507_v8 = vpop.permute.xlu1 %506  ;;  %v1084_v37 = vsel %vm10264_vm13, %v1076_v52, %v7192_v0  ;;  %v873_v30 = vsel %vm815_vm14, %v865_v58, %v7222_v19  ;;  %1768 = vmatpush.msra.mxu3 %v1475_v54  ;;  %v1113_v19 = vsel %vm10259_vm10, %v1108_v63, %v7155_v55  ;;  %v415_v34 = vsel %vm10263_vm4, %v6728_v13, %v414_v47 }
 0x157   :  { %v759_v41 = vpop.permute.xlu0 %758  ;;  %v881_v61 = vsel %vm824_vm15, %v873_v30, %v7190_v16  ;;  %v807_v1 = vsel %vm10264_vm13, %v798_v3, %v507_v8  ;;  %v1118_v56 = vsel %vm10262_vm11, %v1113_v19, %v7119_v35  ;;  %vm1209_vm11 = vcmask 1045508  }
 0x158   :  { %v882_v12 = vsel %vm824_vm15, %v7203_v45, %v759_v41  ;;  %v1092_v45 = vsel %vm815_vm14, %v1084_v37, %v7153_v53  ;;  %v1162_v35 = vrot.slane %v881_v61, 7  ;;  %vm10271_vm10 = vcmask 1046533  }
 0x159   :  { %v1165_v0 = vrot.slane %v882_v12, 7  ;;  %v1100_v11 = vsel %vm824_vm15, %v1092_v45, %v759_v41  ;;  %v816_v4 = vsel %vm815_vm14, %v807_v1, %v7220_v42  ;;  %vm10270_vm4 = vcmask 1046529  }
 0x15a   :  { %v1163_v47 = vrot.slane %v1100_v11, 6 }
 0x15b   :  { %v7334_v48 = vsel %vm572_vm8, %v7245_v40, %v1165_v0  ;;  %v7338_v23 = vsel %vm1187_vm1, %v7245_v40, %v1165_v0  ;;  %v7342_v17 = vsel %vm10272_vm0, %v7245_v40, %v1165_v0  ;;  %v7346_v55 = vsel %vm10265_vm9, %v7245_v40, %v1165_v0 }
 0x15c   :  { %v7350_v16 = vsel %vm10277_vm6, %v7245_v40, %v1165_v0  ;;  %v7354_v53 = vsel %vm10276_vm5, %v7245_v40, %v1165_v0  ;;  %v7358_v38 = vsel %vm10261_vm2, %v7245_v40, %v1165_v0  ;;  %390 = vrot.lane.b32.xlu2 %v375_v18, %s6566_s16  ;;  %1007 = vrot.lane.b32.xlu1 %v7267_v26, %s6575_s29  ;;  %vm10267_vm2 = vcmask 1044483  }
 0x15d   :  { %474 = vrot.lane.b32.xlu0 %v459_v14, %s6572_s8  ;;  %v1123_v40 = vsel %vm797_vm12, %v1118_v56, %v7236_v28 }
 0x15e   :  { %v7373_v18 = vpop.permute.xlu2 %660  ;;  %v7375_v7 = vpop.permute.xlu1 %973 }
 0x15f   :  { %v1128_v26 = vsel %vm10264_vm13, %v1123_v40, %v7375_v7  ;;  %v591_v14 = vpop.permute.xlu0 %590  ;;  %vm10296_vm13 = vcmask 1042433  }
 0x160   :  { %v1164_v51 = vrot.slane %v1128_v26, 5  ;;  %v825_v28 = vsel %vm824_vm15, %v816_v4, %v591_v14 }
 0x161   :  { %v1183_v63 = vsel %vm572_vm8, %v825_v28, %v1162_v35  ;;  %v1188_v52 = vsel %vm1187_vm1, %v825_v28, %v1162_v35  ;;  %v1194_v58 = vsel %vm10272_vm0, %v825_v28, %v1162_v35  ;;  %v1200_v8 = vsel %vm10265_vm9, %v825_v28, %v1162_v35 }
 0x162   :  { %v1185_v27 = vsel %vm10272_vm0, %v1163_v47, %v1164_v51  ;;  %v1190_v54 = vsel %vm10265_vm9, %v1163_v47, %v1164_v51  ;;  %v1196_v37 = vsel %vm10277_vm6, %v1163_v47, %v1164_v51  ;;  %v1202_v42 = vsel %vm10276_vm5, %v1163_v47, %v1164_v51 }
 0x163   :  { %v1186_v30 = vsel %vm530_vm7, %v1183_v63, %v1185_v27  ;;  %v1192_v41 = vsel %vm10296_vm13, %v1188_v52, %v1190_v54  ;;  %v1198_v6 = vsel %vm10266_vm3, %v1194_v58, %v1196_v37  ;;  %v1204_v12 = vsel %vm10267_vm2, %v1200_v8, %v1202_v42 }
 0x164   :  { %v1193_v3 = vrot.slane %v1192_v41, 1  ;;  %v1199_v0 = vrot.slane %v1198_v6, 2  ;;  %v1205_v19 = vrot.slane %v1204_v12, 3  ;;  %v1206_v61 = vsel %vm10277_vm6, %v825_v28, %v1162_v35  ;;  %1491 = vst [vmem:[#allocation1] ss:$9 sm:$0xff] %v1186_v30  ;;  %432 = vrot.lane.b32.xlu2 %v7292_v21, %s6571_s17  ;;  %347 = vrot.lane.b32.xlu1 %v7297_v36, %s6563_s2 }
 0x165   :  { %vm10297_vm9 = vcmask 1046534   ;;  %v1212_v45 = vsel %vm10276_vm5, %v825_v28, %v1162_v35  ;;  %vm10298_vm13 = vcmask 1046528   ;;  %430 = vrot.lane.b32.xlu0 %v415_v34, %s6571_s17  ;;  %v1218_v14 = vsel %vm572_vm8, %v1163_v47, %v1164_v51 }
 0x166   :  { %v1208_v1 = vsel %vm10297_vm9, %v1163_v47, %v1164_v51  ;;  %v1213_v56 = vsel %vm10298_vm13, %v1164_v51, %v1163_v47  ;;  %vm10299_vm3 = vmmov %vm10297_vm9  ;;  %1493 = vst [vmem:[#allocation1 + $0x1] ss:$9 sm:$0xff] %v1193_v3  ;;  %v7408_v36 = vpop.permute.xlu2 %428  ;;  %v7410_v4 = vpop.permute.xlu1 %626  ;;  %vm10301_vm9 = vcmask 1045504   ;;  %v1222_v8 = vsel %vm1187_vm1, %v1163_v47, %v1164_v51 }
 0x167   :  { %v1217_v11 = vsel %vm10299_vm3, %v825_v28, %v1162_v35  ;;  %v1210_v40 = vsel %vm1209_vm11, %v1206_v61, %v1208_v1  ;;  %v1215_v26 = vsel %vm10271_vm10, %v1212_v45, %v1213_v56  ;;  %vm10300_vm2 = vmmov %vm10298_vm13  ;;  %1495 = vst [vmem:[#allocation1 + $0x2] ss:$9 sm:$0xff] %v1199_v0  ;;  %v7414_v34 = vpop.permute.xlu0 %680  ;;  %v694_v6 = vrot.slane %v7146_v46, 4 }
 0x168   :  { %v1221_v21 = vsel %vm10300_vm2, %v1162_v35, %v825_v28  ;;  %v1211_v63 = vrot.slane %v1210_v40, 4  ;;  %v1216_v52 = vrot.slane %v1215_v26, 5  ;;  %v1219_v58 = vsel %vm10301_vm9, %v1218_v14, %v1217_v11  ;;  %1497 = vst [vmem:[#allocation1 + $0x3] ss:$9 sm:$0xff] %v1205_v19  ;;  %vm10303_vm2 = vmmov %vm10301_vm9 }
 0x169   :  { %v1220_v27 = vrot.slane %v1219_v58, 6  ;;  %v1224_v54 = vsel %vm10270_vm4, %v1222_v8, %v1221_v21  ;;  %v10302_v35 = vrot.slane %v7208_v57, 2  ;;  %vm10304_vm3 = vmmov %vm10298_vm13  ;;  %vm10305_vm13 = vcmask 1044480  }
 0x16a   :  { %v1225_v37 = vrot.slane %v1224_v54, 7  ;;  %1499 = vst [vmem:[#allocation1 + $0x4] ss:$9 sm:$0xff] %v1211_v63  ;;  %v1019_v47 = vsel %vm10304_vm3, %v7170_v33, %v6715_v9  ;;  %v939_v51 = vsel %vm10305_vm13, %v674_v49, %v6728_v13  ;;  %v542_v12 = vrot.slane %v7143_v24, 6  ;;  %vm10307_vm9 = vmmov %vm10303_vm2 }
 0x16b   :  { %1501 = vst [vmem:[#allocation1 + $0x5] ss:$9 sm:$0xff] %v1216_v52  ;;  %v373_v28 = vsel %vm10303_vm2, %v6720_v10, %v10302_v35  ;;  %v734_v3 = vrot.slane %v7146_v46, 6  ;;  %v10306_v49 = vrot.slane %v7146_v46, 2  ;;  %vm10308_vm2 = vcmask 1043456  }
 0x16c   :  { %1503 = vst [vmem:[#allocation1 + $0x6] ss:$9 sm:$0xff] %v1220_v27  ;;  %388 = vrot.lane.b32.xlu2 %v373_v28, %s6566_s16  ;;  %1027 = vrot.lane.b32.xlu1 %v1019_v47, %s6563_s2  ;;  %v695_v56 = vsel %vm10308_vm2, %v458_v44, %v694_v6  ;;  %v500_v21 = vrot.slane %v7143_v24, 5  ;;  %v714_v63 = vrot.slane %v7146_v46, 5  ;;  %v498_v44 = vrot.slane %v7208_v57, 5 }
 0x16d   :  { %1505 = vst [vmem:[#allocation1 + $0x7] ss:$9 sm:$0xff] %v1225_v37  ;;  %945 = vrot.lane.b32.xlu0 %v939_v51, %s6571_s17  ;;  %v923_v45 = vsel %vm10307_vm9, %v10306_v49, %v6720_v10  ;;  %v735_v11 = vsel %vm530_vm7, %v542_v12, %v734_v3  ;;  %v582_v52 = vrot.slane %v7208_v57, 7  ;;  %v584_v58 = vrot.slane %v7143_v24, 7  ;;  %vm10312_vm9 = vmmov %vm10308_vm2 }
 0x16e   :  { %v7431_v42 = vpop.permute.xlu2 %700  ;;  %v7433_v30 = vpop.permute.xlu1 %386  ;;  %vm10309_vm3 = vcmask 1042432   ;;  %v540_v47 = vrot.slane %v7208_v57, 6  ;;  %vm10326_vm4 = vcmask 1046528  }
 0x16f   :  { %v7435_v41 = vpop.permute.xlu0 %384  ;;  %v715_v8 = vsel %vm10309_vm3, %v500_v21, %v714_v63  ;;  %vm10310_vm13 = vmmov %vm10309_vm3  ;;  %v585_v54 = vsel %vm572_vm8, %v582_v52, %v584_v58 }
 0x170   :  { %v501_v27 = vsel %vm10310_vm13, %v498_v44, %v500_v21  ;;  %v543_v51 = vsel %vm530_vm7, %v540_v47, %v542_v12  ;;  %vm10313_vm2 = vmmov %vm10309_vm3 }
 0x171   :  { %v499_v12 = vsel %vm10313_vm2, %v6852_v31, %v498_v44  ;;  %vm10314_vm3 = vmmov %vm10312_vm9 }
 0x172   :  { %vm10315_vm13 = vmmov %vm10313_vm2  ;;  %vm10318_vm2 = vcmask 654336  }
 0x173   :  { %v971_v44 = vsel %vm10315_vm13, %v714_v63, %v6852_v31 }
 0x174   :  { %v1506_v0 = vld [vmem:[#allocation1] sm:$0xff]  ;;  %v1507_v19 = vld [vmem:[#allocation1 + $0x9] sm:$0xff]  ;;  %v1508_v61 = vld [vmem:[#allocation1 + $0x12] sm:$0xff]  ;;  %929 = vrot.lane.b32.xlu2 %v923_v45, %s6566_s16  ;;  %702 = vrot.lane.b32.xlu1 %v695_v56, %s6572_s8  ;;  %v955_v56 = vsel %vm10314_vm3, %v694_v6, %v6813_v5 }
 0x175   :  { %v1509_v1 = vld [vmem:[#allocation1 + $0x1b] sm:$0xff]  ;;  %1646 = vmatmul.f32.vlgmr.msra.gmra.mxu0 %v1506_v0  ;;  %1687 = vmatmul.f32.vlgmr.msra.gmra.mxu1 %v1507_v19  ;;  %v10311_v0 = vrot.slane %v7208_v57, 4  ;;  %vm10319_vm3 = vmmov %vm10318_vm2 }
 0x176   :  { %1728 = vmatmul.f32.vlgmr.msra.gmra.mxu2 %v1508_v61  ;;  %6224 = vmatmul.msk.f32.vlgmr.msra.gmra.mxu3 %vm815_vm14, %v1509_v1  ;;  %v1046_v40 = vpop.permute.xlu2 %1045  ;;  %v7453_v26 = vpop.permute.xlu1 %343  ;;  %v541_v61 = vsel %vm530_vm7, %v6906_v2, %v540_v47 }
 0x177   :  { %742 = vrot.lane.b32.xlu0 %v735_v11, %s6574_s28  ;;  %v7456_v14 = vpop.permute.xlu0 %927  ;;  %v457_v19 = vsel %vm10312_vm9, %v6813_v5, %v10311_v0  ;;  %vm10317_vm9 = vcmask 1045504  }
 0x178   :  { %vm10320_vm13 = vmmov %vm10317_vm9 }
 0x17c   :  { %722 = vrot.lane.b32.xlu2 %v715_v8, %s6573_s11  ;;  %516 = vrot.lane.b32.xlu1 %v501_v27, %s6573_s11  ;;  %v754_v27 = vrot.slane %v7146_v46, 7 }
 0x17e   :  { %v7468_v37 = vpop.permute.xlu2 %720  ;;  %v7470_v35 = vpop.permute.xlu1 %1025  ;;  %v1003_v6 = vsel %vm572_vm8, %v754_v27, %v6874_v50 }
 0x17f   :  { %600 = vrot.lane.b32.xlu0 %v585_v54, %s6575_s29  ;;  %v7473_v28 = vpop.permute.xlu0 %426  ;;  %v755_v54 = vsel %vm572_vm8, %v584_v58, %v754_v27 }
 0x184   :  { %558 = vrot.lane.b32.xlu2 %v543_v51, %s6574_s28  ;;  %472 = vrot.lane.b32.xlu1 %v457_v19, %s6572_s8  ;;  %v10268_v19 = vrot.slane %v6966_v39, 2 }
 0x186   :  { %v1050_v1 = vpop.permute.xlu2 %1049  ;;  %v7485_v49 = vpop.permute.xlu1 %470 }
 0x187   :  { %556 = vrot.lane.b32.xlu0 %v541_v61, %s6574_s28  ;;  %v7488_v45 = vpop.permute.xlu0 %943  ;;  %v1124_v61 = vsel %vm797_vm12, %v6970_v43, %v1046_v40 }
 0x18c   :  { %514 = vrot.lane.b32.xlu2 %v499_v12, %s6573_s11  ;;  %961 = vrot.lane.b32.xlu1 %v955_v56, %s6572_s8  ;;  %v1085_v12 = vsel %vm10318_vm2, %v7250_v15, %v7375_v7  ;;  %v583_v56 = vsel %vm572_vm8, %v6874_v50, %v582_v52  ;;  %vm10322_vm2 = vcmask 1042433  }
 0x18e   :  { %v7496_v11 = vpop.permute.xlu2 %740  ;;  %v990_v21 = vpop.permute.xlu1 %989 }
 0x18f   :  { %907 = vrot.lane.b32.xlu0 %v7170_v33, %s6563_s2  ;;  %v7500_v8 = vpop.permute.xlu0 %468  ;;  %v10316_v33 = vrot.slane %v6939_v20, 2  ;;  %v1129_v20 = vsel %vm10319_vm3, %v1124_v61, %v1050_v1  ;;  %v1093_v27 = vsel %vm815_vm14, %v1085_v12, %v990_v21  ;;  %v987_v21 = vsel %vm530_vm7, %v734_v3, %v6906_v2 }
 0x190   :  { %v7547_v1 = vrot.slane %v1129_v20, 5  ;;  %vm10323_vm3 = vcmask 1043458  }
 0x191   :  { %v7517_v0 = vsel %vm10317_vm9, 0.0, %v10316_v33  ;;  %vm10321_vm9 = vcmask 1043459  }
 0x192   :  { %v10269_v58 = vrot.slane %v7517_v0, 2 }
 0x194   :  { %977 = vrot.lane.b32.xlu2 %v971_v44, %s6573_s11  ;;  %762 = vrot.lane.b32.xlu1 %v755_v54, %s6575_s29  ;;  %v379_v43 = vsel %vm10320_vm13, %v10269_v58, %v10268_v19  ;;  %v10275_v44 = vrot.slane %v7517_v0, 3  ;;  %v420_v54 = vrot.slane %v6966_v39, 3  ;;  %vm10324_vm13 = vcmask 1044483  }
 0x196   :  { %v7510_v47 = vpop.permute.xlu2 %596  ;;  %v7512_v51 = vpop.permute.xlu1 %512 }
 0x197   :  { %1009 = vrot.lane.b32.xlu0 %v1003_v6, %s6575_s29  ;;  %v7520_v63 = vpop.permute.xlu0 %959 }
 0x19c   :  { %632 = vrot.lane.b32.xlu2 %v7167_v25, %s6563_s2  ;;  %598 = vrot.lane.b32.xlu1 %v583_v56, %s6575_s29 }
 0x19e   :  { %v7541_v40 = vpop.permute.xlu2 %552  ;;  %v1006_v15 = vpop.permute.xlu1 %1005 }
 0x19f   :  { %394 = vrot.lane.b32.xlu0 %v379_v43, %s6566_s16  ;;  %v1101_v7 = vsel %vm824_vm15, %v1093_v27, %v1006_v15  ;;  %v7545_v52 = vpop.permute.xlu0 %760 }
 0x1a0   :  { %v1166_v25 = vrot.slane %v1101_v7, 6 }
 0x1a2   :  { %v1227_v6 = vsel %vm10272_vm0, %v1166_v25, %v7547_v1  ;;  %v1230_v33 = vsel %vm10321_vm9, %v1166_v25, %v7547_v1  ;;  %v1234_v61 = vsel %vm10277_vm6, %v1166_v25, %v7547_v1  ;;  %v1238_v12 = vsel %vm10276_vm5, %v1166_v25, %v7547_v1 }
 0x1a3   :  { %v1228_v20 = vsel %vm530_vm7, %v7334_v48, %v1227_v6  ;;  %v1231_v3 = vsel %vm10322_vm2, %v7338_v23, %v1230_v33  ;;  %v1235_v56 = vsel %vm10323_vm3, %v7342_v17, %v1234_v61  ;;  %v1239_v27 = vsel %vm10324_vm13, %v7346_v55, %v1238_v12 }
 0x1a4   :  { %v1232_v43 = vrot.slane %v1231_v3, 1  ;;  %v1236_v15 = vrot.slane %v1235_v56, 2  ;;  %v1240_v7 = vrot.slane %v1239_v27, 3  ;;  %vm10325_vm9 = vcmask 1046534   ;;  %1510 = vst [vmem:[#allocation1] ss:$9 sm:$0xff] %v1228_v20  ;;  %993 = vrot.lane.b32.xlu2 %v987_v21, %s6574_s28  ;;  %349 = vrot.lane.b32.xlu1 %v7225_v22, %s6563_s2 }
 0x1a5   :  { %v1242_v19 = vsel %vm10325_vm9, %v1166_v25, %v7547_v1  ;;  %v1246_v48 = vsel %vm10326_vm4, %v7547_v1, %v1166_v25  ;;  %v1250_v23 = vsel %vm572_vm8, %v1166_v25, %v7547_v1  ;;  %vm10327_vm2 = vcmask 1044480  }
 0x1a6   :  { %v1243_v58 = vsel %vm1209_vm11, %v7350_v16, %v1242_v19  ;;  %v421_v17 = vsel %vm10327_vm2, %v10275_v44, %v420_v54  ;;  %v10328_v55 = vrot.slane %v6949_v29, 2  ;;  %vm10329_vm3 = vcmask 1045504   ;;  %1511 = vst [vmem:[#allocation1 + $0x1] ss:$9 sm:$0xff] %v1232_v43  ;;  %v7596_v25 = vpop.permute.xlu2 %903  ;;  %v7598_v61 = vpop.permute.xlu1 %554 }
 0x1a7   :  { %v1244_v33 = vrot.slane %v1243_v58, 4  ;;  %v1247_v16 = vsel %vm10271_vm10, %v7354_v53, %v1246_v48  ;;  %vm10330_vm4 = vmmov %vm10329_vm3  ;;  %1512 = vst [vmem:[#allocation1 + $0x2] ss:$9 sm:$0xff] %v1236_v15  ;;  %436 = vrot.lane.b32.xlu0 %v421_v17, %s6571_s17  ;;  %v595_v58 = vpop.permute.xlu0 %594  ;;  %v7602_v53 = vrot.slane %v6966_v39, 1  ;;  %vm10331_vm13 = vcmask 130048  }
 0x1a8   :  { %v7587_v6 = vsel %vm10329_vm3, %v10328_v55, 0.0  ;;  %v1251_v19 = vsel %vm10330_vm4, %v1250_v23, %v7358_v38  ;;  %v1248_v29 = vrot.slane %v1247_v16, 5  ;;  %1513 = vst [vmem:[#allocation1 + $0x3] ss:$9 sm:$0xff] %v1240_v7  ;;  %v835_v38 = vsel %vm10331_vm13, %v6891_v59, %v7410_v4  ;;  %vm10332_vm9 = vmmov %vm10331_vm13 }
 0x1a9   :  { %v1252_v12 = vrot.slane %v1251_v19, 6  ;;  %v773_v22 = vsel %vm10332_vm9, 0.0, %v7453_v26  ;;  %1514 = vst [vmem:[#allocation1 + $0x4] ss:$9 sm:$0xff] %v1244_v33  ;;  %v7610_v21 = vrot.slane %v7587_v6, 1  ;;  %v7613_v20 = vrot.slane %v7517_v0, 1 }
 0x1aa   :  { %vm10333_vm2 = vcmask 261120   ;;  %1515 = vst [vmem:[#allocation1 + $0x5] ss:$9 sm:$0xff] %v1248_v29  ;;  %v10335_v4 = vrot.slane %v7517_v0, 2  ;;  %vm10336_vm13 = vcmask 392192   ;;  %vm10338_vm10 = vcmask 1046528  }
 0x1ab   :  { %v843_v3 = vsel %vm10333_vm2, %v835_v38, %v7433_v30  ;;  %1516 = vst [vmem:[#allocation1 + $0x6] ss:$9 sm:$0xff] %v1252_v12  ;;  %vm10334_vm3 = vmmov %vm10333_vm2  ;;  %v896_v15 = vsel %vm10338_vm10, %v7602_v53, %v7610_v21  ;;  %v656_v38 = vrot.slane %v7587_v6, 2 }
 0x1ac   :  { %v782_v56 = vsel %vm10334_vm3, %v773_v22, %v7435_v41  ;;  %v377_v26 = vsel %vm10330_vm4, %v6720_v10, %v10335_v4  ;;  %vm10337_vm9 = vmmov %vm10336_vm13  ;;  %vm10340_vm3 = vcmask 130048   ;;  %909 = vrot.lane.b32.xlu2 %v896_v15, %s6563_s2  ;;  %vm10342_vm4 = vcmask 654336  }
 0x1ad   :  { %v791_v27 = vsel %vm10336_vm13, %v782_v56, %v7473_v28  ;;  %v851_v43 = vsel %vm10337_vm9, %v843_v3, %v7408_v36  ;;  %vm10339_vm2 = vmmov %vm10338_vm10  ;;  %v1054_v41 = vsel %vm10340_vm3, %v6894_v60, %v7313_v32  ;;  %vm10341_vm10 = vcmask 261120  }
 0x1ae   :  { %v621_v7 = vsel %vm10339_vm2, %v7613_v20, %v7602_v53  ;;  %v859_v48 = vsel %vm797_vm12, %v851_v43, %v7485_v49  ;;  %v800_v28 = vsel %vm797_vm12, %v791_v27, %v7500_v8  ;;  %v7642_v23 = vpop.permute.xlu2 %630  ;;  %v511_v17 = vpop.permute.xlu1 %510  ;;  %v1062_v55 = vsel %vm10341_vm10, %v1054_v41, %v7373_v18  ;;  %vm10343_vm13 = vmmov %vm10342_vm4 }
 0x1af   :  { %634 = vrot.lane.b32.xlu1 %v621_v7, %s6563_s2  ;;  %v867_v33 = vsel %vm10342_vm4, %v859_v48, %v7512_v51  ;;  %392 = vrot.lane.b32.xlu0 %v377_v26, %s6566_s16  ;;  %v809_v32 = vsel %vm10343_vm13, %v800_v28, %v511_v17  ;;  %v346_v16 = vpop.permute.xlu0 %345  ;;  %v1070_v8 = vsel %vm10337_vm9, %v1062_v55, %v7414_v34  ;;  %vm10344_vm2 = vmmov %vm10340_vm3  ;;  %v10274_v56 = vrot.slane %v7587_v6, 3 }
 0x1b0   :  { %v875_v19 = vsel %vm815_vm14, %v867_v33, %v7598_v61  ;;  %v1078_v29 = vsel %vm797_vm12, %v1070_v8, %v7431_v42  ;;  %v1110_v12 = vsel %vm10344_vm2, %v6901_v62, %v7470_v35  ;;  %vm10345_vm3 = vmmov %vm10342_vm4  ;;  %v818_v3 = vsel %vm815_vm14, %v809_v32, %v7541_v40 }
 0x1b1   :  { %v1086_v22 = vsel %vm10345_vm3, %v1078_v29, %v7468_v37  ;;  %v883_v26 = vsel %vm824_vm15, %v875_v19, %v7510_v47  ;;  %v504_v27 = vrot.slane %v6966_v39, 5  ;;  %v10273_v35 = vrot.slane %v7587_v6, 5  ;;  %vm10347_vm13 = vmmov %vm10337_vm9 }
 0x1b2   :  { %v1094_v4 = vsel %vm815_vm14, %v1086_v22, %v7496_v11  ;;  %v1115_v43 = vsel %vm10341_vm10, %v1110_v12, %v7456_v14  ;;  %vm10346_vm4 = vcmask 1046528   ;;  %v827_v41 = vsel %vm824_vm15, %v818_v3, %v595_v58  ;;  %vm10348_vm9 = vmmov %vm10344_vm2 }
 0x1b3   :  { %v1102_v15 = vsel %vm824_vm15, %v1094_v4, %v7545_v52  ;;  %v338_v40 = vsel %vm10346_vm4, %v6715_v9, %v7613_v20  ;;  %v1120_v7 = vsel %vm10347_vm13, %v1115_v43, %v7488_v45  ;;  %v774_v48 = vsel %vm10348_vm9, %v6891_v59, %v346_v16  ;;  %vm10352_vm10 = vmmov %vm10346_vm4 }
 0x1b4   :  { %v10349_v28 = vrot.slane %v6966_v39, 2  ;;  %vm10350_vm2 = vcmask 1045504   ;;  %v1125_v55 = vsel %vm797_vm12, %v1120_v7, %v7520_v63  ;;  %v1168_v33 = vrot.slane %v883_v26, 7  ;;  %351 = vrot.lane.b32.xlu2 %v338_v40, %s6563_s2 }
 0x1b5   :  { %vm10351_vm3 = vmmov %vm10350_vm2  ;;  %v1020_v59 = vsel %vm10352_vm10, %v7610_v21, %v6715_v9  ;;  %v1169_v16 = vrot.slane %v1102_v15, 6  ;;  %vm10353_vm4 = vcmask 654336   ;;  %vm10354_vm13 = vcmask 1044480  }
 0x1b6   :  { %v657_v17 = vsel %vm10350_vm2, %v10349_v28, %v656_v38  ;;  %v924_v32 = vsel %vm10351_vm3, %v656_v38, %v6720_v10  ;;  %v7692_v8 = vpop.permute.xlu2 %390  ;;  %v7694_v58 = vpop.permute.xlu1 %975  ;;  %v677_v10 = vsel %vm10354_vm13, %v420_v54, %v10274_v56  ;;  %vm10355_vm9 = vcmask 1042432  }
 0x1b7   :  { %664 = vrot.lane.b32.xlu1 %v657_v17, %s6566_s16  ;;  %931 = vrot.lane.b32.xlu0 %v924_v32, %s6566_s16  ;;  %v1130_v19 = vsel %vm10353_vm4, %v1125_v55, %v7694_v58  ;;  %v7702_v29 = vpop.permute.xlu0 %905  ;;  %v717_v9 = vsel %vm10355_vm9, %v504_v27, %v10273_v35  ;;  %v1253_v12 = vsel %vm572_vm8, %v827_v41, %v1168_v33  ;;  %vm10356_vm2 = vcmask 261120  }
 0x1b8   :  { %v1256_v38 = vsel %vm1187_vm1, %v827_v41, %v1168_v33  ;;  %v783_v22 = vsel %vm10356_vm2, %v774_v48, %v7433_v30  ;;  %v1170_v3 = vrot.slane %v1130_v19, 5  ;;  %v1260_v4 = vsel %vm10272_vm0, %v827_v41, %v1168_v33 }
 0x1b9   :  { %vm10357_vm3 = vcmask 1043459   ;;  %v1268_v54 = vsel %vm10277_vm6, %v827_v41, %v1168_v33  ;;  %v1272_v43 = vsel %vm10276_vm5, %v827_v41, %v1168_v33  ;;  %vm10359_vm4 = vcmask 1042433  }
 0x1ba   :  { %v1264_v26 = vsel %vm10357_vm3, %v827_v41, %v1168_v33  ;;  %v1254_v15 = vsel %vm10272_vm0, %v1169_v16, %v1170_v3  ;;  %vm10358_vm10 = vmmov %vm10357_vm3  ;;  %v1261_v7 = vsel %vm10277_vm6, %v1169_v16, %v1170_v3  ;;  %v1265_v28 = vsel %vm10276_vm5, %v1169_v16, %v1170_v3 }
 0x1bb   :  { %v1257_v40 = vsel %vm10358_vm10, %v1169_v16, %v1170_v3  ;;  %v1255_v17 = vsel %vm530_vm7, %v1253_v12, %v1254_v15  ;;  %vm10360_vm13 = vcmask 1043458   ;;  %vm10361_vm9 = vcmask 1044483  }
 0x1bc   :  { %v1258_v30 = vsel %vm10359_vm4, %v1256_v38, %v1257_v40  ;;  %v1262_v48 = vsel %vm10360_vm13, %v1260_v4, %v1261_v7  ;;  %v1266_v55 = vsel %vm10361_vm9, %v1264_v26, %v1265_v28  ;;  %vm10362_vm2 = vcmask 1046534   ;;  %1517 = vst [vmem:[#allocation1 + $0x7] ss:$9 sm:$0xff] %v1255_v17  ;;  %1029 = vrot.lane.b32.xlu2 %v1020_v59, %s6563_s2 }
 0x1bd   :  { %v1276_v32 = vsel %vm10362_vm2, %v827_v41, %v1168_v33  ;;  %vm10363_vm3 = vcmask 1046528   ;;  %vm10364_vm0 = vcmask 392192   ;;  %vm10365_vm10 = vmmov %vm10362_vm2  ;;  %v1277_v38 = vsel %vm572_vm8, %v1169_v16, %v1170_v3 }
 0x1be   :  { %v1280_v19 = vsel %vm10363_vm3, %v1168_v33, %v827_v41  ;;  %v792_v35 = vsel %vm10364_vm0, %v783_v22, %v7408_v36  ;;  %v1269_v56 = vsel %vm10365_vm10, %v1169_v16, %v1170_v3  ;;  %vm10366_vm5 = vmmov %vm10363_vm3  ;;  %v1281_v4 = vsel %vm1187_vm1, %v1169_v16, %v1170_v3  ;;  %v7748_v36 = vpop.permute.xlu2 %432 }
 0x1bf   :  { %v1270_v44 = vsel %vm1209_vm11, %v1268_v54, %v1269_v56  ;;  %v1273_v12 = vsel %vm10366_vm5, %v1170_v3, %v1169_v16  ;;  %vm10367_vm4 = vcmask 1046533   ;;  %vm10368_vm13 = vcmask 1045504   ;;  %684 = vrot.lane.b32.xlu1 %v677_v10, %s6571_s17  ;;  %v629_v56 = vpop.permute.xlu1 %628  ;;  %724 = vrot.lane.b32.xlu0 %v717_v9, %s6573_s11  ;;  %v7753_v16 = vpop.permute.xlu0 %662 }
 0x1c0   :  { %v1274_v26 = vsel %vm10367_vm4, %v1272_v43, %v1273_v12  ;;  %v7741_v15 = vsel %vm10368_vm13, %v1277_v38, %v1276_v32  ;;  %vm10369_vm9 = vcmask 1046529   ;;  %v801_v33 = vsel %vm797_vm12, %v792_v35, %v7485_v49 }
 0x1c1   :  { %v7744_v41 = vsel %vm10369_vm9, %v1281_v4, %v1280_v19  ;;  %v462_v22 = vrot.slane %v6966_v39, 4  ;;  %v696_v3 = vrot.slane %v7587_v6, 4  ;;  %vm10370_vm5 = vcmask 130048  }
 0x1c2   :  { %v836_v54 = vsel %vm10370_vm5, %v6894_v60, %v629_v56  ;;  %v460_v59 = vrot.slane %v7517_v0, 4  ;;  %vm10371_vm0 = vmmov %vm10370_vm5  ;;  %vm10372_vm2 = vcmask 261120   ;;  %vm10373_vm3 = vcmask 654336  }
 0x1c3   :  { %v1055_v10 = vsel %vm10371_vm0, %v6901_v62, %v7596_v25  ;;  %v844_v49 = vsel %vm10372_vm2, %v836_v54, %v7373_v18  ;;  %v810_v35 = vsel %vm10373_vm3, %v801_v33, %v7512_v51  ;;  %vm10374_vm10 = vcmask 392192   ;;  %v1518_v7 = vld [vmem:[#allocation1] sm:$0xff]  ;;  %v1519_v28 = vld [vmem:[#allocation1 + $0x9] sm:$0xff]  ;;  %v1520_v17 = vld [vmem:[#allocation1 + $0x12] sm:$0xff] }
 0x1c4   :  { %v852_v9 = vsel %vm10374_vm10, %v844_v49, %v7414_v34  ;;  %v544_v43 = vrot.slane %v7517_v0, 6  ;;  %v546_v40 = vrot.slane %v6966_v39, 6  ;;  %v1259_v60 = vrot.slane %v1258_v30, 1  ;;  %vm10376_vm13 = vmmov %vm10372_vm2  ;;  %v1521_v34 = vld [vmem:[#allocation1 + $0x1b] sm:$0xff]  ;;  %1649 = vmatmul.f32.gmra.mxu0 %v1518_v7  ;;  %1690 = vmatmul.f32.gmra.mxu1 %v1519_v28 }
 0x1c5   :  { %v860_v62 = vsel %vm797_vm12, %v852_v9, %v7431_v42  ;;  %vm10375_vm4 = vcmask 1043456   ;;  %v1063_v51 = vsel %vm10376_vm13, %v1055_v10, %v7456_v14  ;;  %v1263_v25 = vrot.slane %v1262_v48, 2  ;;  %vm10377_vm9 = vmmov %vm10373_vm3  ;;  %1731 = vmatmul.f32.gmra.mxu2 %v1520_v17  ;;  %6225 = vmatmul.msk.f32.gmra.mxu3 %vm815_vm14, %v1521_v34 }
 0x1c6   :  { %v697_v18 = vsel %vm10375_vm4, %v462_v22, %v696_v3  ;;  %v868_v32 = vsel %vm10377_vm9, %v860_v62, %v7468_v37  ;;  %vm10378_vm5 = vmmov %vm10375_vm4  ;;  %v819_v42 = vsel %vm815_vm14, %v810_v35, %v7598_v61  ;;  %v1267_v19 = vrot.slane %v1266_v55, 3  ;;  %1522 = vst [vmem:[#allocation1] ss:$9 sm:$0xff] %v1259_v60  ;;  %v7797_v48 = vpop.permute.xlu2 %388 }
 0x1c7   :  { %v463_v30 = vsel %vm10378_vm5, %v460_v59, %v462_v22  ;;  %v876_v12 = vsel %vm815_vm14, %v868_v32, %v7496_v11  ;;  %v1271_v14 = vrot.slane %v1270_v44, 4  ;;  %1523 = vst [vmem:[#allocation1 + $0x1] ss:$9 sm:$0xff] %v1263_v25  ;;  %704 = vrot.lane.b32.xlu2 %v697_v18, %s6572_s8  ;;  %v547_v61 = vsel %vm530_vm7, %v544_v43, %v546_v40  ;;  %v992_v11 = vpop.permute.xlu1 %991  ;;  %v7800_v38 = vpop.permute.xlu0 %682  ;;  %vm10379_vm0 = vmmov %vm10374_vm10 }
 0x1c8   :  { %v884_v37 = vsel %vm824_vm15, %v876_v12, %v7545_v52  ;;  %478 = vrot.lane.b32.xlu1 %v463_v30, %s6572_s8  ;;  %v1275_v55 = vrot.slane %v1274_v26, 5  ;;  %1524 = vst [vmem:[#allocation1 + $0x2] ss:$9 sm:$0xff] %v1267_v19  ;;  %562 = vrot.lane.b32.xlu0 %v547_v61, %s6574_s28  ;;  %v502_v52 = vrot.slane %v7517_v0, 5  ;;  %v828_v4 = vsel %vm824_vm15, %v819_v42, %v7510_v47  ;;  %vm10384_vm13 = vmmov %vm10377_vm9 }
 0x1c9   :  { %v1171_v44 = vrot.slane %v884_v37, 7  ;;  %v1071_v56 = vsel %vm10379_vm0, %v1063_v51, %v7488_v45  ;;  %v1279_v33 = vrot.slane %v7741_v15, 6  ;;  %v1283_v22 = vrot.slane %v7744_v41, 7  ;;  %1525 = vst [vmem:[#allocation1 + $0x3] ss:$9 sm:$0xff] %v1271_v14 }
 0x1ca   :  { %1526 = vst [vmem:[#allocation1 + $0x4] ss:$9 sm:$0xff] %v1275_v55  ;;  %vm10380_vm2 = vcmask 1042434   ;;  %vm10381_vm3 = vcmask 1043459   ;;  %vm10382_vm10 = vcmask 1045509   ;;  %vm10383_vm4 = vcmask 1046534  }
 0x1cb   :  { %v1284_v26 = vsel %vm572_vm8, %v828_v4, %v1171_v44  ;;  %v1287_v54 = vsel %vm1187_vm1, %v828_v4, %v1171_v44  ;;  %v1291_v10 = vsel %vm10380_vm2, %v828_v4, %v1171_v44  ;;  %v1295_v49 = vsel %vm10381_vm3, %v828_v4, %v1171_v44  ;;  %1527 = vst [vmem:[#allocation1 + $0x5] ss:$9 sm:$0xff] %v1279_v33 }
 0x1cc   :  { %v1299_v47 = vsel %vm10277_vm6, %v828_v4, %v1171_v44  ;;  %v1303_v35 = vsel %vm10382_vm10, %v828_v4, %v1171_v44  ;;  %v1307_v45 = vsel %vm10383_vm4, %v828_v4, %v1171_v44  ;;  %1528 = vst [vmem:[#allocation1 + $0x6] ss:$9 sm:$0xff] %v1283_v22  ;;  %v1079_v15 = vsel %vm797_vm12, %v1071_v56, %v7520_v63 }
 0x1cd   :  { %v1087_v41 = vsel %vm10384_vm13, %v1079_v15, %v7694_v58  ;;  %vm10385_vm9 = vcmask 1042432   ;;  %v10386_v60 = vrot.slane %v7517_v0, 3  ;;  %vm10387_vm5 = vcmask 1044480  }
 0x1ce   :  { %v505_v9 = vsel %vm10385_vm9, %v502_v52, %v504_v27  ;;  %v1095_v28 = vsel %vm815_vm14, %v1087_v41, %v992_v11  ;;  %vm10388_vm0 = vmmov %vm10385_vm9  ;;  %v7836_v62 = vpop.permute.xlu2 %929  ;;  %vm10389_vm4 = vcmask 1042433   ;;  %vm10390_vm13 = vcmask 1043458  }
 0x1cf   :  { %v419_v7 = vsel %vm10387_vm5, %v6728_v13, %v10386_v60  ;;  %520 = vrot.lane.b32.xlu2 %v505_v9, %s6573_s11  ;;  %v503_v63 = vsel %vm10388_vm0, %v6852_v31, %v502_v52  ;;  %v1008_v17 = vpop.permute.xlu1 %1007  ;;  %v7834_v27 = vpop.permute.xlu0 %474  ;;  %vm10391_vm9 = vcmask 1044483   ;;  %vm10392_vm5 = vcmask 1046534  }
 0x1d0   :  { %434 = vrot.lane.b32.xlu1 %v419_v7, %s6571_s17  ;;  %518 = vrot.lane.b32.xlu0 %v503_v63, %s6573_s11  ;;  %v1103_v58 = vsel %vm824_vm15, %v1095_v28, %v1008_v17  ;;  %v10393_v37 = vrot.slane %v7587_v6, 3  ;;  %vm10394_vm0 = vcmask 1044480  }
 0x1d1   :  { %v1172_v18 = vrot.slane %v1103_v58, 6  ;;  %v588_v58 = vrot.slane %v6966_v39, 7 }
 0x1d2   :  { %v940_v61 = vsel %vm10394_vm0, %v10393_v37, %v6728_v13  ;;  %v10399_v13 = vrot.slane %v7587_v6, 5  ;;  %vm10403_vm0 = vcmask 261120  }
 0x1d3   :  { %v1285_v51 = vsel %vm10380_vm2, %v1172_v18, %v7547_v1  ;;  %v1288_v25 = vsel %vm10381_vm3, %v1172_v18, %v7547_v1  ;;  %v1292_v34 = vsel %vm10277_vm6, %v1172_v18, %v7547_v1  ;;  %v1296_v32 = vsel %vm10382_vm10, %v1172_v18, %v7547_v1 }
 0x1d4   :  { %v1286_v30 = vsel %vm530_vm7, %v1284_v26, %v1285_v51  ;;  %v1289_v42 = vsel %vm10389_vm4, %v1287_v54, %v1288_v25  ;;  %v1293_v19 = vsel %vm10390_vm13, %v1291_v10, %v1292_v34  ;;  %v1297_v12 = vsel %vm10391_vm9, %v1295_v49, %v1296_v32 }
 0x1d5   :  { %v1300_v14 = vsel %vm10392_vm5, %v1172_v18, %v7547_v1  ;;  %1529 = vst [vmem:[#allocation1 + $0x7] ss:$9 sm:$0xff] %v1286_v30  ;;  %vm10395_vm2 = vcmask 1046528   ;;  %v1308_v44 = vsel %vm572_vm8, %v1172_v18, %v7547_v1  ;;  %vm10396_vm3 = vcmask 1043456  }
 0x1d6   :  { %v1301_v11 = vsel %vm1209_vm11, %v1299_v47, %v1300_v14  ;;  %v1304_v55 = vsel %vm10395_vm2, %v7547_v1, %v1172_v18  ;;  %v461_v52 = vsel %vm10396_vm3, %v6813_v5, %v460_v59  ;;  %vm10397_vm10 = vcmask 1046533   ;;  %v7878_v59 = vpop.permute.xlu2 %722  ;;  %vm10401_vm9 = vmmov %vm10396_vm3 }
 0x1d7   :  { %v1305_v4 = vsel %vm10397_vm10, %v1303_v35, %v1304_v55  ;;  %vm10398_vm4 = vcmask 1045504   ;;  %476 = vrot.lane.b32.xlu2 %v461_v52, %s6572_s8  ;;  %vm10400_vm13 = vcmask 1042432   ;;  %v7873_v22 = vpop.permute.xlu1 %347  ;;  %v7876_v26 = vpop.permute.xlu0 %430  ;;  %v736_v54 = vrot.slane %v7587_v6, 6 }
 0x1d8   :  { %v1309_v56 = vsel %vm10398_vm4, %v1308_v44, %v1307_v45  ;;  %947 = vrot.lane.b32.xlu1 %v940_v61, %s6571_s17  ;;  %v972_v33 = vsel %vm10400_vm13, %v10399_v13, %v6852_v31  ;;  %v1290_v10 = vrot.slane %v1289_v42, 1  ;;  %v1294_v45 = vrot.slane %v1293_v19, 2  ;;  %vm10408_vm13 = vmmov %vm10403_vm0 }
 0x1d9   :  { %979 = vrot.lane.b32.xlu0 %v972_v33, %s6573_s11  ;;  %v1298_v41 = vrot.slane %v1297_v12, 3  ;;  %v956_v9 = vsel %vm10401_vm9, %v696_v3, %v6813_v5  ;;  %v737_v60 = vsel %vm530_vm7, %v546_v40, %v736_v54  ;;  %v1302_v7 = vrot.slane %v1301_v11, 4 }
 0x1da   :  { %v1306_v63 = vrot.slane %v1305_v4, 5  ;;  %v1310_v17 = vrot.slane %v1309_v56, 6  ;;  %v756_v18 = vrot.slane %v7587_v6, 7  ;;  %v586_v51 = vrot.slane %v7517_v0, 7 }
 0x1db   :  { %v545_v12 = vsel %vm530_vm7, %v6906_v2, %v544_v43  ;;  %vm10402_vm5 = vcmask 130048   ;;  %vm10405_vm3 = vcmask 392192  }
 0x1dc   :  { %v1530_v49 = vld [vmem:[#allocation1] sm:$0xff]  ;;  %v1531_v47 = vld [vmem:[#allocation1 + $0x9] sm:$0xff]  ;;  %v1532_v35 = vld [vmem:[#allocation1 + $0x12] sm:$0xff]  ;;  %v757_v25 = vsel %vm572_vm8, %v588_v58, %v756_v18  ;;  %v589_v34 = vsel %vm572_vm8, %v586_v51, %v588_v58  ;;  %v587_v19 = vsel %vm572_vm8, %v6874_v50, %v586_v51  ;;  %v1004_v43 = vsel %vm572_vm8, %v756_v18, %v6874_v50 }
 0x1dd   :  { %v1533_v15 = vld [vmem:[#allocation1 + $0x1b] sm:$0xff]  ;;  %1652 = vmatmul.f32.gmra.mxu0 %v1530_v49  ;;  %1693 = vmatmul.f32.gmra.mxu1 %v1531_v47  ;;  %v1056_v56 = vsel %vm10402_vm5, %v7143_v24, %v7702_v29  ;;  %vm10404_vm2 = vmmov %vm10402_vm5 }
 0x1de   :  { %1534 = vst [vmem:[#allocation1] ss:$9 sm:$0xff] %v1290_v10  ;;  %1734 = vmatmul.f32.gmra.mxu2 %v1532_v35  ;;  %6226 = vmatmul.msk.f32.gmra.mxu3 %vm815_vm14, %v1533_v15  ;;  %v7895_v40 = vpop.permute.xlu2 %558  ;;  %vm10406_vm10 = vmmov %vm10404_vm2 }
 0x1df   :  { %1535 = vst [vmem:[#allocation1 + $0x1] ss:$9 sm:$0xff] %v1294_v45  ;;  %963 = vrot.lane.b32.xlu2 %v956_v9, %s6572_s8  ;;  %v1028_v28 = vpop.permute.xlu1 %1027  ;;  %v7893_v3 = vpop.permute.xlu0 %945  ;;  %v775_v50 = vsel %vm10406_vm10, 0.0, %v7873_v22  ;;  %vm10407_vm4 = vmmov %vm10404_vm2  ;;  %vm10414_vm10 = vcmask 654336  }
 0x1e0   :  { %744 = vrot.lane.b32.xlu1 %v737_v60, %s6574_s28  ;;  %1536 = vst [vmem:[#allocation1 + $0x2] ss:$9 sm:$0xff] %v1298_v41  ;;  %vm10409_vm9 = vmmov %vm10405_vm3 }
 0x1e1   :  { %636 = vrot.lane.b32.xlu0 %v7602_v53, %s6563_s2  ;;  %1537 = vst [vmem:[#allocation1 + $0x3] ss:$9 sm:$0xff] %v1302_v7  ;;  %v988_v53 = vsel %vm530_vm7, %v736_v54, %v6906_v2  ;;  %v1111_v54 = vsel %vm10407_vm4, %v7146_v46, %v1028_v28  ;;  %vm10410_vm5 = vmmov %vm10404_vm2 }
 0x1e2   :  { %1538 = vst [vmem:[#allocation1 + $0x4] ss:$9 sm:$0xff] %v1306_v63  ;;  %vm10415_vm4 = vmmov %vm10414_vm10 }
 0x1e3   :  { %1539 = vst [vmem:[#allocation1 + $0x5] ss:$9 sm:$0xff] %v1310_v17 }
 0x1e6   :  { %v515_v32 = vpop.permute.xlu2 %514 }
 0x1e7   :  { %764 = vrot.lane.b32.xlu2 %v757_v25, %s6575_s29  ;;  %v703_v30 = vpop.permute.xlu1 %702 }
 0x1e8   :  { %604 = vrot.lane.b32.xlu1 %v589_v34, %s6575_s29 }
 0x1e9   :  { %995 = vrot.lane.b32.xlu0 %v988_v53, %s6574_s28  ;;  %v7907_v42 = vpop.permute.xlu0 %742 }
 0x1ee   :  { %v978_v14 = vpop.permute.xlu2 %977 }
 0x1ef   :  { %602 = vrot.lane.b32.xlu2 %v587_v19, %s6575_s29  ;;  %v7917_v37 = vpop.permute.xlu1 %516 }
 0x1f0   :  { %560 = vrot.lane.b32.xlu1 %v545_v12, %s6574_s28 }
 0x1f1   :  { %v7919_v61 = vpop.permute.xlu0 %600 }
 0x1f6   :  { %v633_v11 = vpop.permute.xlu2 %632 }
 0x1f7   :  { %353 = vrot.lane.b32.xlu2 %v7613_v20, %s6563_s2  ;;  %v473_v55 = vpop.permute.xlu1 %472  ;;  %v1064_v20 = vsel %vm10403_vm0, %v1056_v56, %v7753_v16  ;;  %vm10411_vm0 = vmmov %vm10404_vm2 }
 0x1f8   :  { %911 = vrot.lane.b32.xlu1 %v7610_v21, %s6563_s2  ;;  %v837_v21 = vsel %vm10404_vm2, %v7208_v57, %v7642_v23  ;;  %v1072_v33 = vsel %vm10405_vm3, %v1064_v20, %v7800_v38  ;;  %v838_v23 = vsel %vm10410_vm5, %v7143_v24, %v633_v11  ;;  %vm10412_vm2 = vmmov %vm10408_vm13  ;;  %vm10418_vm5 = vcmask 392192  }
 0x1f9   :  { %v557_v44 = vpop.permute.xlu0 %556  ;;  %v845_v29 = vsel %vm10408_vm13, %v837_v21, %v7692_v8  ;;  %v1080_v10 = vsel %vm797_vm12, %v1072_v33, %v703_v30  ;;  %v784_v35 = vsel %vm10412_vm2, %v775_v50, %v7797_v48  ;;  %vm10413_vm3 = vmmov %vm10412_vm2 }
 0x1fa   :  { %v853_v49 = vsel %vm10409_vm9, %v845_v29, %v7748_v36  ;;  %v1116_v45 = vsel %vm10413_vm3, %v1111_v54, %v7836_v62  ;;  %v1088_v15 = vsel %vm10414_vm10, %v1080_v10, %v7878_v59  ;;  %vm10416_vm13 = vmmov %vm10412_vm2  ;;  %v793_v48 = vsel %vm10418_vm5, %v784_v35, %v7876_v26 }
 0x1fb   :  { %v861_v22 = vsel %vm797_vm12, %v853_v49, %v7834_v27  ;;  %v846_v24 = vsel %vm10416_vm13, %v838_v23, %v7753_v16  ;;  %vm10417_vm9 = vmmov %vm10412_vm2  ;;  %v1096_v63 = vsel %vm815_vm14, %v1088_v15, %v7907_v42  ;;  %v802_v16 = vsel %vm797_vm12, %v793_v48, %v473_v55 }
 0x1fc   :  { %v869_v41 = vsel %vm10415_vm4, %v861_v22, %v7917_v37  ;;  %vm10422_vm10 = vmmov %vm10415_vm4 }
 0x1fd   :  { %v877_v17 = vsel %vm815_vm14, %v869_v41, %v7895_v40  ;;  %v811_v25 = vsel %vm10422_vm10, %v802_v16, %v515_v32  ;;  %vm10423_vm13 = vmmov %vm10415_vm4 }
 0x1fe   :  { %v994_v52 = vpop.permute.xlu2 %993  ;;  %v885_v51 = vsel %vm824_vm15, %v877_v17, %v7919_v61 }
 0x1ff   :  { %v962_v4 = vpop.permute.xlu1 %961  ;;  %v1173_v11 = vrot.slane %v885_v51, 7 }
 0x200   :  { %1011 = vrot.lane.b32.xlu1 %v1004_v43, %s6575_s29 }
 0x201   :  { %v908_v13 = vpop.permute.xlu0 %907 }
 0x202   :  { %v1057_v47 = vsel %vm10411_vm0, %v7146_v46, %v908_v13  ;;  %vm10419_vm0 = vmmov %vm10418_vm5  ;;  %vm10425_vm5 = vcmask 1042434  }
 0x203   :  { %v1065_v46 = vsel %vm10417_vm9, %v1057_v47, %v7836_v62  ;;  %v1121_v7 = vsel %vm10419_vm0, %v1116_v45, %v7893_v3  ;;  %vm10420_vm2 = vmmov %vm10419_vm0 }
 0x204   :  { %v1126_v62 = vsel %vm797_vm12, %v1121_v7, %v962_v4  ;;  %v854_v58 = vsel %vm10420_vm2, %v846_v24, %v7800_v38  ;;  %vm10421_vm3 = vmmov %vm10419_vm0  ;;  %v820_v38 = vsel %vm815_vm14, %v811_v25, %v557_v44  ;;  %vm10426_vm0 = vcmask 1043459  }
 0x205   :  { %v1073_v26 = vsel %vm10421_vm3, %v1065_v46, %v7893_v3  ;;  %v1131_v34 = vsel %vm10415_vm4, %v1126_v62, %v978_v14  ;;  %v862_v53 = vsel %vm797_vm12, %v854_v58, %v703_v30  ;;  %vm10424_vm9 = vmmov %vm10415_vm4  ;;  %vm10427_vm2 = vcmask 1042433  }
 0x206   :  { %v7965_v9 = vpop.permute.xlu2 %909  ;;  %v1081_v12 = vsel %vm797_vm12, %v1073_v26, %v962_v4  ;;  %v1175_v55 = vrot.slane %v1131_v34, 5  ;;  %v870_v56 = vsel %vm10423_vm13, %v862_v53, %v7878_v59  ;;  %vm10428_vm3 = vmmov %vm10425_vm5  ;;  %vm10430_vm4 = vcmask 1045509  }
 0x207   :  { %v763_v60 = vpop.permute.xlu1 %762  ;;  %v1089_v13 = vsel %vm10424_vm9, %v1081_v12, %v978_v14  ;;  %v878_v59 = vsel %vm815_vm14, %v870_v56, %v7907_v42  ;;  %vm10429_vm10 = vmmov %vm10426_vm0  ;;  %vm10431_vm13 = vcmask 130048  }
 0x208   :  { %v1104_v18 = vsel %vm824_vm15, %v1096_v63, %v763_v60  ;;  %v1097_v14 = vsel %vm815_vm14, %v1089_v13, %v994_v52  ;;  %v886_v29 = vsel %vm824_vm15, %v878_v59, %v763_v60  ;;  %vm10432_vm9 = vmmov %vm10430_vm4 }
 0x209   :  { %v1010_v28 = vpop.permute.xlu0 %1009  ;;  %v1174_v19 = vrot.slane %v1104_v18, 6  ;;  %v8009_v23 = vrot.slane %v886_v29, 7 }
 0x20a   :  { %v1105_v10 = vsel %vm824_vm15, %v1097_v14, %v1010_v28 }
 0x20b   :  { %v1312_v30 = vsel %vm10425_vm5, %v1174_v19, %v1175_v55  ;;  %v1315_v4 = vsel %vm10426_vm0, %v1174_v19, %v1175_v55  ;;  %v8011_v47 = vrot.slane %v1105_v10, 6  ;;  %v1319_v52 = vsel %vm10277_vm6, %v1174_v19, %v1175_v55 }
 0x20c   :  { %v1323_v46 = vsel %vm10432_vm9, %v1174_v19, %v1175_v55  ;;  %vm10433_vm5 = vcmask 1046534   ;;  %vm10434_vm0 = vcmask 1043458   ;;  %v1335_v18 = vsel %vm572_vm8, %v1174_v19, %v1175_v55 }
 0x20d   :  { %v1327_v60 = vsel %vm10433_vm5, %v1174_v19, %v1175_v55  ;;  %v1339_v12 = vsel %vm1187_vm1, %v1174_v19, %v1175_v55 }
 0x20e   :  { %v7989_v43 = vpop.permute.xlu2 %351 }
 0x20f   :  { %v599_v3 = vpop.permute.xlu1 %598 }
 0x210   :  { %v829_v32 = vsel %vm824_vm15, %v820_v38, %v599_v3 }
 0x211   :  { %v7995_v20 = vpop.permute.xlu0 %394  ;;  %v1311_v21 = vsel %vm572_vm8, %v829_v32, %v1173_v11  ;;  %v1314_v44 = vsel %vm1187_vm1, %v829_v32, %v1173_v11  ;;  %v1318_v49 = vsel %vm10428_vm3, %v829_v32, %v1173_v11  ;;  %v1322_v22 = vsel %vm10429_vm10, %v829_v32, %v1173_v11 }
 0x212   :  { %v1313_v33 = vsel %vm530_vm7, %v1311_v21, %v1312_v30  ;;  %v1316_v50 = vsel %vm10427_vm2, %v1314_v44, %v1315_v4  ;;  %v1326_v45 = vsel %vm10277_vm6, %v829_v32, %v1173_v11  ;;  %v1330_v15 = vsel %vm10430_vm4, %v829_v32, %v1173_v11  ;;  %vm10438_vm6 = vmmov %vm10433_vm5 }
 0x213   :  { %v1317_v54 = vrot.slane %v1316_v50, 1  ;;  %1540 = vst [vmem:[#allocation1 + $0x6] ss:$9 sm:$0xff] %v1313_v33  ;;  %v1320_v48 = vsel %vm10434_vm0, %v1318_v49, %v1319_v52  ;;  %vm10435_vm2 = vcmask 261120   ;;  %vm10436_vm3 = vcmask 1046528  }
 0x214   :  { %v1331_v28 = vsel %vm10436_vm3, %v1175_v55, %v1174_v19  ;;  %vm10437_vm10 = vcmask 1044483   ;;  %v1334_v17 = vsel %vm10438_vm6, %v829_v32, %v1173_v11  ;;  %vm10439_vm4 = vcmask 392192   ;;  %vm10441_vm9 = vmmov %vm10436_vm3 }
 0x215   :  { %1541 = vst [vmem:[#allocation1 + $0x7] ss:$9 sm:$0xff] %v1317_v54  ;;  %v1324_v63 = vsel %vm10437_vm10, %v1322_v22, %v1323_v46  ;;  %v1328_v16 = vsel %vm1209_vm11, %v1326_v45, %v1327_v60  ;;  %v1338_v58 = vsel %vm10441_vm9, %v1173_v11, %v829_v32  ;;  %vm10442_vm5 = vcmask 1043459  }
 0x216   :  { %v8014_v35 = vpop.permute.xlu2 %1029  ;;  %v1321_v51 = vrot.slane %v1320_v48, 2  ;;  %vm10443_vm6 = vcmask 654336   ;;  %v1325_v38 = vrot.slane %v1324_v63, 3  ;;  %vm10444_vm0 = vcmask 1045504   ;;  %vm10447_vm10 = vmmov %vm10442_vm5 }
 0x217   :  { %v350_v42 = vpop.permute.xlu1 %349  ;;  %v1336_v11 = vsel %vm10444_vm0, %v1335_v18, %v1334_v17  ;;  %v1329_v56 = vrot.slane %v1328_v16, 4  ;;  %vm10446_vm3 = vcmask 1042434   ;;  %vm10450_vm9 = vcmask 1044484  }
 0x218   :  { %v776_v41 = vsel %vm10431_vm13, %v7208_v57, %v350_v42  ;;  %vm10440_vm13 = vcmask 1046533   ;;  %v1337_v44 = vrot.slane %v1336_v11, 6  ;;  %vm10453_vm0 = vmmov %vm10450_vm9 }
 0x219   :  { %v8021_v24 = vpop.permute.xlu0 %436  ;;  %v785_v7 = vsel %vm10435_vm2, %v776_v41, %v7692_v8  ;;  %v1332_v62 = vsel %vm10440_vm13, %v1330_v15, %v1331_v28  ;;  %v1346_v8 = vsel %vm10442_vm5, %v8011_v47, %v7547_v1  ;;  %vm10445_vm2 = vcmask 1046529  }
 0x21a   :  { %v794_v57 = vsel %vm10439_vm4, %v785_v7, %v7748_v36  ;;  %v1333_v13 = vrot.slane %v1332_v62, 5  ;;  %v1340_v32 = vsel %vm10445_vm2, %v1339_v12, %v1338_v58  ;;  %vm10448_vm4 = vmmov %vm10446_vm3  ;;  %vm10449_vm13 = vcmask 1042433  }
 0x21b   :  { %v803_v26 = vsel %vm797_vm12, %v794_v57, %v7834_v27  ;;  %v1341_v59 = vrot.slane %v1340_v32, 7  ;;  %vm10451_vm5 = vcmask 1045509   ;;  %v1350_v52 = vsel %vm10453_vm0, %v8011_v47, %v7547_v1 }
 0x21c   :  { %v1542_v25 = vld [vmem:[#allocation1] sm:$0xff]  ;;  %v1543_v34 = vld [vmem:[#allocation1 + $0x9] sm:$0xff]  ;;  %v1544_v53 = vld [vmem:[#allocation1 + $0x12] sm:$0xff]  ;;  %v812_v36 = vsel %vm10443_vm6, %v803_v26, %v7917_v37  ;;  %vm10452_vm6 = vcmask 1046534   ;;  %v1366_v7 = vsel %vm572_vm8, %v8011_v47, %v7547_v1 }
 0x21d   :  { %v1545_v3 = vld [vmem:[#allocation1 + $0x1b] sm:$0xff]  ;;  %v821_v27 = vsel %vm815_vm14, %v812_v36, %v7895_v40  ;;  %1655 = vmatmul.f32.gmra.mxu0 %v1542_v25  ;;  %1696 = vmatmul.f32.gmra.mxu1 %v1543_v34  ;;  %vm10454_vm2 = vmmov %vm10451_vm5 }
 0x21e   :  { %1546 = vst [vmem:[#allocation1] ss:$9 sm:$0xff] %v1321_v51  ;;  %v830_v30 = vsel %vm824_vm15, %v821_v27, %v7919_v61  ;;  %1737 = vmatmul.f32.gmra.mxu2 %v1544_v53  ;;  %6227 = vmatmul.msk.f32.gmra.mxu3 %vm815_vm14, %v1545_v3  ;;  %v1343_v61 = vsel %vm10448_vm4, %v8011_v47, %v7547_v1  ;;  %vm10457_vm4 = vcmask 1044483  }
 0x21f   :  { %1547 = vst [vmem:[#allocation1 + $0x1] ss:$9 sm:$0xff] %v1325_v38  ;;  %v1342_v37 = vsel %vm572_vm8, %v830_v30, %v8009_v23  ;;  %v1345_v40 = vsel %vm1187_vm1, %v830_v30, %v8009_v23  ;;  %v1349_v19 = vsel %vm10446_vm3, %v830_v30, %v8009_v23  ;;  %v1353_v55 = vsel %vm10447_vm10, %v830_v30, %v8009_v23  ;;  %vm10456_vm10 = vmmov %vm10452_vm6 }
 0x220   :  { %1548 = vst [vmem:[#allocation1 + $0x2] ss:$9 sm:$0xff] %v1329_v56  ;;  %v1347_v33 = vsel %vm10449_vm13, %v1345_v40, %v1346_v8  ;;  %v1344_v14 = vsel %vm530_vm7, %v1342_v37, %v1343_v61  ;;  %v1357_v29 = vsel %vm10450_vm9, %v830_v30, %v8009_v23  ;;  %v1361_v10 = vsel %vm10451_vm5, %v830_v30, %v8009_v23 }
 0x221   :  { %v8060_v4 = vpop.permute.xlu2 %704  ;;  %v635_v21 = vpop.permute.xlu1 %634  ;;  %1549 = vst [vmem:[#allocation1 + $0x3] ss:$9 sm:$0xff] %v1333_v13  ;;  %v1348_v54 = vrot.slane %v1347_v33, 1  ;;  %v1365_v49 = vsel %vm10452_vm6, %v830_v30, %v8009_v23  ;;  %v1354_v15 = vsel %vm10454_vm2, %v8011_v47, %v7547_v1  ;;  %vm10455_vm3 = vcmask 1043458  }
 0x222   :  { %v8066_v50 = vpop.permute.xlu0 %392  ;;  %1550 = vst [vmem:[#allocation1 + $0x4] ss:$9 sm:$0xff] %v1337_v44  ;;  %v1351_v41 = vsel %vm10455_vm3, %v1349_v19, %v1350_v52  ;;  %v1358_v23 = vsel %vm10456_vm10, %v8011_v47, %v7547_v1  ;;  %v1355_v46 = vsel %vm10457_vm4, %v1353_v55, %v1354_v15  ;;  %vm10458_vm13 = vcmask 1046528  }
 0x223   :  { %1551 = vst [vmem:[#allocation1 + $0x5] ss:$9 sm:$0xff] %v1341_v59  ;;  %v1362_v60 = vsel %vm10458_vm13, %v7547_v1, %v8011_v47  ;;  %v1359_v48 = vsel %vm1209_vm11, %v1357_v29, %v1358_v23  ;;  %v1352_v28 = vrot.slane %v1351_v41, 2  ;;  %vm10459_vm9 = vcmask 1046533  }
 0x224   :  { %1552 = vst [vmem:[#allocation1 + $0x6] ss:$9 sm:$0xff] %v1344_v14  ;;  %v1363_v63 = vsel %vm10459_vm9, %v1361_v10, %v1362_v60  ;;  %v1356_v62 = vrot.slane %v1355_v46, 3  ;;  %vm10460_vm5 = vcmask 1045504   ;;  %v1360_v8 = vrot.slane %v1359_v48, 4 }
 0x225   :  { %1553 = vst [vmem:[#allocation1 + $0x7] ss:$9 sm:$0xff] %v1348_v54  ;;  %v1367_v58 = vsel %vm10460_vm5, %v1366_v7, %v1365_v49  ;;  %v1364_v18 = vrot.slane %v1363_v63, 5  ;;  %vm10461_vm6 = vcmask 130048   ;;  %vm10463_vm2 = vcmask 261120  }
 0x226   :  { %v1368_v25 = vrot.slane %v1367_v58, 6  ;;  %v839_v32 = vsel %vm10461_vm6, %v7517_v0, %v635_v21  ;;  %vm10462_vm0 = vmmov %vm10461_vm6  ;;  %vm10465_vm10 = vcmask 392192  }
 0x227   :  { %v1058_v30 = vsel %vm10462_vm0, %v6966_v39, %v7965_v9  ;;  %vm10464_vm3 = vmmov %vm10463_vm2 }
 0x228   :  { %v847_v55 = vsel %vm10464_vm3, %v839_v32, %v7995_v20  ;;  %vm10466_vm4 = vmmov %vm10462_vm0 }
 0x229   :  { %v8075_v22 = vpop.permute.xlu2 %520  ;;  %v665_v42 = vpop.permute.xlu1 %664  ;;  %vm10467_vm13 = vmmov %vm10463_vm2 }
 0x22a   :  { %v8080_v45 = vpop.permute.xlu0 %931  ;;  %v1066_v37 = vsel %vm10463_vm2, %v1058_v30, %v665_v42  ;;  %vm10468_vm9 = vmmov %vm10462_vm0 }
 0x22b   :  { %vm10469_vm5 = vmmov %vm10465_vm10 }
 0x22c   :  { %v1554_v17 = vld [vmem:[#allocation1] sm:$0xff]  ;;  %v1555_v57 = vld [vmem:[#allocation1 + $0x9] sm:$0xff]  ;;  %v1556_v16 = vld [vmem:[#allocation1 + $0x12] sm:$0xff] }
 0x22d   :  { %v1557_v26 = vld [vmem:[#allocation1 + $0x1b] sm:$0xff]  ;;  %1658 = vmatmul.f32.gmra.mxu0 %v1554_v17  ;;  %1699 = vmatmul.f32.gmra.mxu1 %v1555_v57  ;;  %vm10470_vm6 = vmmov %vm10463_vm2 }
 0x22e   :  { %1558 = vst [vmem:[#allocation1] ss:$9 sm:$0xff] %v1352_v28  ;;  %1740 = vmatmul.f32.gmra.mxu2 %v1556_v16  ;;  %6228 = vmatmul.msk.f32.gmra.mxu3 %vm815_vm14, %v1557_v26  ;;  %vm10471_vm0 = vmmov %vm10469_vm5 }
 0x22f   :  { %1559 = vst [vmem:[#allocation1 + $0x1] ss:$9 sm:$0xff] %v1356_v62  ;;  %v855_v29 = vsel %vm10471_vm0, %v847_v55, %v8021_v24  ;;  %vm10472_vm2 = vmmov %vm10471_vm0 }
 0x230   :  { %1560 = vst [vmem:[#allocation1 + $0x2] ss:$9 sm:$0xff] %v1360_v8  ;;  %vm10473_vm3 = vmmov %vm10466_vm4 }
 0x231   :  { %v477_v47 = vpop.permute.xlu2 %476  ;;  %v685_v51 = vpop.permute.xlu1 %684  ;;  %1561 = vst [vmem:[#allocation1 + $0x3] ss:$9 sm:$0xff] %v1364_v18 }
 0x232   :  { %v725_v34 = vpop.permute.xlu0 %724  ;;  %1562 = vst [vmem:[#allocation1 + $0x4] ss:$9 sm:$0xff] %v1368_v25  ;;  %v1074_v61 = vsel %vm10465_vm10, %v1066_v37, %v685_v51  ;;  %vm10474_vm10 = vmmov %vm10473_vm3 }
 0x233   :  { %v1082_v54 = vsel %vm797_vm12, %v1074_v61, %v8060_v4 }
 0x239   :  { %v8100_v53 = vpop.permute.xlu2 %963 }
 0x23a   :  { %v479_v36 = vpop.permute.xlu1 %478  ;;  %v563_v12 = vpop.permute.xlu0 %562 }
 0x241   :  { %v765_v38 = vpop.permute.xlu2 %764 }
 0x242   :  { %v435_v11 = vpop.permute.xlu1 %434  ;;  %v519_v3 = vpop.permute.xlu0 %518 }
 0x249   :  { %v603_v27 = vpop.permute.xlu2 %602 }
 0x24a   :  { %v8102_v56 = vpop.permute.xlu1 %947 }
 0x24b   :  { %v8104_v13 = vpop.permute.xlu0 %979 }
 0x251   :  { %v354_v40 = vpop.permute.xlu2 %353 }
 0x252   :  { %v745_v19 = vpop.permute.xlu1 %744  ;;  %v778_v44 = vsel %vm10466_vm4, %v7517_v0, %v354_v40  ;;  %vm10475_vm4 = vmmov %vm10470_vm6 }
 0x253   :  { %v637_v33 = vpop.permute.xlu0 %636  ;;  %v787_v21 = vsel %vm10467_vm13, %v778_v44, %v7995_v20  ;;  %v1112_v20 = vsel %vm10473_vm3, %v7587_v6, %v8014_v35  ;;  %vm10476_vm13 = vcmask 654336   ;;  %vm10481_vm3 = vmmov %vm10471_vm0 }
 0x254   :  { %v840_v59 = vsel %vm10468_vm9, %v6966_v39, %v637_v33  ;;  %v796_v9 = vsel %vm10469_vm5, %v787_v21, %v8021_v24  ;;  %v863_v39 = vsel %vm797_vm12, %v855_v29, %v479_v36  ;;  %v1117_v52 = vsel %vm10475_vm4, %v1112_v20, %v8080_v45  ;;  %vm10477_vm9 = vmmov %vm10476_vm13 }
 0x255   :  { %v848_v14 = vsel %vm10470_vm6, %v840_v59, %v665_v42  ;;  %v805_v10 = vsel %vm797_vm12, %v796_v9, %v479_v36  ;;  %v777_v42 = vsel %vm10474_vm10, 0.0, %v7989_v43  ;;  %vm10478_vm5 = vmmov %vm10475_vm4  ;;  %v1122_v23 = vsel %vm10471_vm0, %v1117_v52, %v8102_v56 }
 0x256   :  { %v856_v0 = vsel %vm10472_vm2, %v848_v14, %v685_v51  ;;  %v814_v15 = vsel %vm10477_vm9, %v805_v10, %v8075_v22  ;;  %v786_v41 = vsel %vm10478_vm5, %v777_v42, %v8066_v50  ;;  %vm10479_vm6 = vmmov %vm10477_vm9  ;;  %v1127_v50 = vsel %vm797_vm12, %v1122_v23, %v8100_v53 }
 0x257   :  { %v864_v49 = vsel %vm797_vm12, %v856_v0, %v8060_v4  ;;  %v1090_v35 = vsel %vm10479_vm6, %v1082_v54, %v725_v34  ;;  %vm10480_vm2 = vmmov %vm10479_vm6  ;;  %v795_v46 = vsel %vm10481_vm3, %v786_v41, %v435_v11  ;;  %v823_v28 = vsel %vm815_vm14, %v814_v15, %v563_v12  ;;  %v8197_v54 = vld [vmem:[#allocation5] ss:$0 sm:$0xff] }
 0x258   :  { %v872_v24 = vsel %vm10476_vm13, %v864_v49, %v725_v34  ;;  %v871_v43 = vsel %vm10480_vm2, %v863_v39, %v8075_v22  ;;  %v1098_v60 = vsel %vm815_vm14, %v1090_v35, %v745_v19  ;;  %v804_v16 = vsel %vm797_vm12, %v795_v46, %v477_v47  ;;  %vm10484_vm13 = vmmov %vm10480_vm2 }
 0x259   :  { %v880_v4 = vsel %vm815_vm14, %v872_v24, %v745_v19  ;;  %v879_v57 = vsel %vm815_vm14, %v871_v43, %v563_v12  ;;  %v1106_v22 = vsel %vm824_vm15, %v1098_v60, %v765_v38  ;;  %vm10482_vm10 = vcmask 1042434   ;;  %vm10488_vm0 = vmmov %vm10480_vm2  ;;  %v1688_v60 = vpop.f32.mrf.mxu1 }
 0x25a   :  { %v605_v48 = vpop.permute.xlu1 %604  ;;  %v888_v7 = vsel %vm824_vm15, %v880_v4, %v765_v38  ;;  %vm10483_vm4 = vcmask 1043459   ;;  %v1132_v18 = vsel %vm10484_vm13, %v1127_v50, %v8104_v13  ;;  %vm10485_vm9 = vcmask 1044484   ;;  %vm10489_vm2 = vmmov %vm10482_vm10 }
 0x25b   :  { %v1181_v63 = vrot.slane %v888_v7, 7  ;;  %v832_v17 = vsel %vm824_vm15, %v823_v28, %v605_v48  ;;  %vm10486_vm5 = vcmask 1045509   ;;  %vm10487_vm6 = vcmask 1046534   ;;  %vm10490_vm3 = vmmov %vm10483_vm4 }
 0x25c   :  { %v1179_v34 = vrot.slane %v1106_v22, 6  ;;  %v887_v36 = vsel %vm824_vm15, %v879_v57, %v605_v48  ;;  %v813_v12 = vsel %vm10488_vm0, %v804_v16, %v519_v3  ;;  %v1180_v38 = vrot.slane %v1132_v18, 5  ;;  %v996_v48 = vpop.permute.xlu0 %995  ;;  %v1729_v57 = vpop.f32.mrf.mxu2 }
 0x25d   :  { %v8162_v62 = vsel %vm572_vm8, %v832_v17, %v1181_v63  ;;  %v8165_v58 = vsel %vm1187_vm1, %v832_v17, %v1181_v63  ;;  %v8168_v26 = vsel %vm10482_vm10, %v832_v17, %v1181_v63  ;;  %v8171_v8 = vsel %vm10483_vm4, %v832_v17, %v1181_v63  ;;  %vm10491_vm10 = vmmov %vm10485_vm9 }
 0x25e   :  { %v8176_v51 = vsel %vm10485_vm9, %v832_v17, %v1181_v63  ;;  %v8179_v47 = vsel %vm10486_vm5, %v832_v17, %v1181_v63  ;;  %v8182_v25 = vsel %vm10487_vm6, %v832_v17, %v1181_v63  ;;  %v1178_v32 = vrot.slane %v887_v36, 7  ;;  %vm10492_vm4 = vmmov %vm10489_vm2 }
 0x25f   :  { %v1370_v37 = vsel %vm10489_vm2, %v1179_v34, %v1180_v38  ;;  %v1373_v40 = vsel %vm10490_vm3, %v1179_v34, %v1180_v38  ;;  %v1377_v55 = vsel %vm10491_vm10, %v1179_v34, %v1180_v38  ;;  %vm10493_vm13 = vcmask 1042433   ;;  %vm10495_vm5 = vmmov %vm10490_vm3 }
 0x260   :  { %vm10494_vm9 = vcmask 1043458   ;;  %vm10496_vm6 = vcmask 130048   ;;  %vm10497_vm0 = vmmov %vm10491_vm10  ;;  %vm10498_vm2 = vcmask 261120   ;;  %vm10499_vm3 = vcmask 1045509  }
 0x261   :  { %v1381_v42 = vsel %vm10499_vm3, %v1179_v34, %v1180_v38  ;;  %vm10500_vm10 = vmmov %vm10499_vm3  ;;  %vm10508_vm3 = vcmask 1046533   ;;  %v1397_v7 = vsel %vm1187_vm1, %v1179_v34, %v1180_v38 }
 0x262   :  { %v561_v11 = vpop.permute.xlu1 %560 }
 0x263   :  { %v822_v30 = vsel %vm815_vm14, %v813_v12, %v561_v11 }
 0x264   :  { %v831_v19 = vsel %vm824_vm15, %v822_v30, %v603_v27  ;;  %v1647_v27 = vpop.f32.mrf.mxu0 }
 0x265   :  { %v1369_v61 = vsel %vm572_vm8, %v831_v19, %v1178_v32  ;;  %v1372_v44 = vsel %vm1187_vm1, %v831_v19, %v1178_v32  ;;  %v1376_v33 = vsel %vm10492_vm4, %v831_v19, %v1178_v32  ;;  %v1380_v0 = vsel %vm10495_vm5, %v831_v19, %v1178_v32 }
 0x266   :  { %v1371_v3 = vsel %vm530_vm7, %v1369_v61, %v1370_v37  ;;  %v1374_v21 = vsel %vm10493_vm13, %v1372_v44, %v1373_v40  ;;  %v1378_v59 = vsel %vm10494_vm9, %v1376_v33, %v1377_v55  ;;  %v1384_v20 = vsel %vm10497_vm0, %v831_v19, %v1178_v32  ;;  %v1770_v61 = vpop.f32.mrf.mxu3 }
 0x267   :  { %v1375_v9 = vrot.slane %v1374_v21, 1  ;;  %v1379_v14 = vrot.slane %v1378_v59, 2  ;;  %1563 = vst [vmem:[#allocation1 + $0x5] ss:$9 sm:$0xff] %v1371_v3  ;;  %v1648_v49 = vadd.f32 %v8197_v54, %v1647_v27  ;;  %v1388_v52 = vsel %vm10500_vm10, %v831_v19, %v1178_v32 }
 0x268   :  { %vm10501_vm4 = vcmask 392192   ;;  %vm10502_vm13 = vcmask 1046534   ;;  %vm10503_vm9 = vcmask 1044483   ;;  %vm10509_vm10 = vcmask 1045504  }
 0x269   :  { %1564 = vst [vmem:[#allocation1 + $0x6] ss:$9 sm:$0xff] %v1375_v9  ;;  %v1385_v15 = vsel %vm10502_vm13, %v1179_v34, %v1180_v38  ;;  %v1382_v41 = vsel %vm10503_vm9, %v1380_v0, %v1381_v42  ;;  %vm10504_vm5 = vmmov %vm10502_vm13  ;;  %v1689_v12 = vadd.f32 %v1688_v60, %v1648_v49  ;;  %vm10511_vm13 = vcmask 1042434  }
 0x26a   :  { %1565 = vst [vmem:[#allocation1 + $0x7] ss:$9 sm:$0xff] %v1379_v14  ;;  %v912_v29 = vpop.permute.xlu1 %911  ;;  %v1386_v23 = vsel %vm1209_vm11, %v1384_v20, %v1385_v15  ;;  %v1383_v28 = vrot.slane %v1382_v41, 3  ;;  %vm10512_vm9 = vcmask 1043459  }
 0x26b   :  { %v1059_v10 = vsel %vm10496_vm6, %v7587_v6, %v912_v29  ;;  %v1392_v6 = vsel %vm10504_vm5, %v831_v19, %v1178_v32  ;;  %vm10505_vm6 = vcmask 1046528   ;;  %v1387_v16 = vrot.slane %v1386_v23, 4 }
 0x26c   :  { %v1067_v39 = vsel %vm10498_vm2, %v1059_v10, %v8080_v45  ;;  %v1389_v45 = vsel %vm10505_vm6, %v1180_v38, %v1179_v34  ;;  %vm10506_vm0 = vmmov %vm10505_vm6  ;;  %vm10507_vm2 = vcmask 654336   ;;  %v1730_v30 = vadd.f32 %v1729_v57, %v1689_v12  ;;  %v1650_v14 = vpop.f32.mrf.mxu0  ;;  %v1732_v10 = vpop.f32.mrf.mxu2 }
 0x26d   :  { %v1075_v24 = vsel %vm10501_vm4, %v1067_v39, %v8102_v56  ;;  %v1396_v4 = vsel %vm10506_vm0, %v1178_v32, %v831_v19  ;;  %v1393_v56 = vsel %vm572_vm8, %v1179_v34, %v1180_v38  ;;  %v1390_v46 = vsel %vm10508_vm3, %v1388_v52, %v1389_v45 }
 0x26e   :  { %v1083_v35 = vsel %vm797_vm12, %v1075_v24, %v8100_v53  ;;  %v1394_v53 = vsel %vm10509_vm10, %v1393_v56, %v1392_v6  ;;  %vm10510_vm4 = vcmask 1046529   ;;  %v1391_v11 = vrot.slane %v1390_v46, 5 }
 0x26f   :  { %v1091_v43 = vsel %vm10507_vm2, %v1083_v35, %v8104_v13  ;;  %v1398_v22 = vsel %vm10510_vm4, %v1397_v7, %v1396_v4  ;;  %v1395_v38 = vrot.slane %v1394_v53, 6  ;;  %vm10513_vm5 = vcmask 1044484   ;;  %v1773_v4 = vpop.f32.mrf.mxu3 }
 0x270   :  { %v1099_v13 = vsel %vm815_vm14, %v1091_v43, %v996_v48  ;;  %v1399_v37 = vrot.slane %v1398_v22, 7  ;;  %v1771_v33 = vadd.f32 %v1770_v61, %v1730_v30  ;;  %vm10515_vm6 = vcmask 1043458  }
 0x271   :  { %v1566_v50 = vld [vmem:[#allocation1] sm:$0xff]  ;;  %v1567_v63 = vld [vmem:[#allocation1 + $0x9] sm:$0xff]  ;;  %v1568_v17 = vld [vmem:[#allocation1 + $0x12] sm:$0xff]  ;;  %v1651_v29 = vadd.f32 %v8197_v54, %v1650_v14  ;;  %vm10516_vm0 = vcmask 1045509   ;;  %vm10517_vm2 = vcmask 1046534   ;;  %vm10518_vm3 = vcmask 1046528  }
 0x272   :  { %v1569_v18 = vld [vmem:[#allocation1 + $0x1b] sm:$0xff]  ;;  %1661 = vmatmul.f32.gmra.mxu0 %v1566_v50  ;;  %1702 = vmatmul.f32.gmra.mxu1 %v1567_v63  ;;  %v1012_v36 = vpop.permute.xlu1 %1011  ;;  %v1802_v27 = vmul.f32 1.442695, %v1771_v33  ;;  %vm10519_vm10 = vcmask 1044483   ;;  %vm10520_vm4 = vcmask 1046533  }
 0x273   :  { %1570 = vst [vmem:[#allocation1] ss:$9 sm:$0xff] %v1383_v28  ;;  %1743 = vmatmul.f32.gmra.mxu2 %v1568_v17  ;;  %6229 = vmatmul.msk.f32.gmra.mxu3 %vm815_vm14, %v1569_v18  ;;  %v1107_v34 = vsel %vm824_vm15, %v1099_v13, %v1012_v36  ;;  %vm10514_vm15 = vcmask 1042433  }
 0x274   :  { %1571 = vst [vmem:[#allocation1 + $0x1] ss:$9 sm:$0xff] %v1387_v16  ;;  %v1182_v32 = vrot.slane %v1107_v34, 6  ;;  %6282 = vpow2.f32 %v1802_v27  ;;  %v1653_v56 = vpop.f32.mrf.mxu0  ;;  %v1735_v28 = vpop.f32.mrf.mxu2 }
 0x275   :  { %1572 = vst [vmem:[#allocation1 + $0x2] ss:$9 sm:$0xff] %v1391_v11  ;;  %v1654_v60 = vadd.f32 %v8197_v54, %v1653_v56 }
 0x276   :  { %1573 = vst [vmem:[#allocation1 + $0x3] ss:$9 sm:$0xff] %v1395_v38  ;;  %v1401_v40 = vsel %vm10511_vm13, %v1182_v32, %v7547_v1  ;;  %v1404_v19 = vsel %vm10512_vm9, %v1182_v32, %v7547_v1  ;;  %v1408_v55 = vsel %vm10513_vm5, %v1182_v32, %v7547_v1  ;;  %v1412_v0 = vsel %vm10516_vm0, %v1182_v32, %v7547_v1 }
 0x277   :  { %1574 = vst [vmem:[#allocation1 + $0x4] ss:$9 sm:$0xff] %v1399_v37  ;;  %v1402_v44 = vsel %vm530_vm7, %v8162_v62, %v1401_v40  ;;  %v1405_v3 = vsel %vm10514_vm15, %v8165_v58, %v1404_v19  ;;  %v1409_v21 = vsel %vm10515_vm6, %v8168_v26, %v1408_v55  ;;  %v1416_v62 = vsel %vm10517_vm2, %v1182_v32, %v7547_v1  ;;  %v1691_v26 = vpop.f32.mrf.mxu1  ;;  %v1776_v38 = vpop.f32.mrf.mxu3 }
 0x278   :  { %1575 = vst [vmem:[#allocation1 + $0x5] ss:$9 sm:$0xff] %v1402_v44  ;;  %v1406_v59 = vrot.slane %v1405_v3, 1  ;;  %v1410_v9 = vrot.slane %v1409_v21, 2  ;;  %v1420_v58 = vsel %vm10518_vm3, %v7547_v1, %v1182_v32  ;;  %v1413_v20 = vsel %vm10519_vm10, %v8171_v8, %v1412_v0 }
 0x279   :  { %v1424_v39 = vsel %vm572_vm8, %v1182_v32, %v7547_v1  ;;  %v1692_v49 = vadd.f32 %v1691_v26, %v1651_v29  ;;  %v1417_v42 = vsel %vm1209_vm11, %v8176_v51, %v1416_v62  ;;  %v1421_v52 = vsel %vm10520_vm4, %v8179_v47, %v1420_v58 }
 0x27a   :  { %1576 = vst [vmem:[#allocation1 + $0x6] ss:$9 sm:$0xff] %v1406_v59  ;;  %v1414_v15 = vrot.slane %v1413_v20, 3  ;;  %vm10521_vm13 = vcmask 1045504   ;;  %v1418_v23 = vrot.slane %v1417_v42, 4  ;;  %v1422_v1 = vrot.slane %v1421_v52, 5  ;;  %v6283_v51 = vpop.eup %6282 }
 0x27b   :  { %1577 = vst [vmem:[#allocation1 + $0x7] ss:$9 sm:$0xff] %v1410_v9  ;;  %v1733_v24 = vadd.f32 %v1732_v10, %v1692_v49  ;;  %v1425_v41 = vsel %vm10521_vm13, %v1424_v39, %v8182_v25  ;;  %v6232_v25 = vadd.f32 -1.0, %v6283_v51  ;;  %vm1794_vm9 = vcmp.gt.f32.partialorder %v1771_v33, 0.0 }
 0x27c   :  { %v1426_v47 = vrot.slane %v1425_v41, 6  ;;  %vm10522_vm10 = vcmask 1042432  }
 0x27d   :  { %v1774_v43 = vadd.f32 %v1773_v4, %v1733_v24  ;;  %v1826_v48 = vsel %vm1794_vm9, %v1771_v33, %v6232_v25  ;;  %vm10523_vm4 = vmmov %vm10522_vm10 }
 0x27e   :  { %v1842_v17 = vrot.slane %v1826_v48, 1  ;;  %v1843_v22 = vrot.slane %v1826_v48, 2  ;;  %v1844_v18 = vrot.slane %v1826_v48, 3  ;;  %v1845_v36 = vrot.slane %v1826_v48, 4  ;;  %vm10524_vm13 = vmmov %vm10523_vm4 }
 0x27f   :  { %v1804_v46 = vmul.f32 1.442695, %v1774_v43  ;;  %v1694_v7 = vpop.f32.mrf.mxu1  ;;  %v1846_v12 = vrot.slane %v1826_v48, 5  ;;  %v1847_v34 = vrot.slane %v1826_v48, 6  ;;  %vm1795_vm5 = vcmp.gt.f32.partialorder %v1774_v43, 0.0  ;;  %vm10525_vm9 = vmmov %vm10523_vm4 }
 0x280   :  { %v1695_v57 = vadd.f32 %v1694_v7, %v1654_v60  ;;  %v1848_v55 = vrot.slane %v1826_v48, 7 }
 0x281   :  { %6284 = vpow2.f32 %v1804_v46 }
 0x282   :  { %v1578_v6 = vld [vmem:[#allocation1] sm:$0xff]  ;;  %v1579_v35 = vld [vmem:[#allocation1 + $0x9] sm:$0xff]  ;;  %v1580_v45 = vld [vmem:[#allocation1 + $0x12] sm:$0xff]  ;;  %v1736_v13 = vadd.f32 %v1735_v28, %v1695_v57 }
 0x283   :  { %v1581_v8 = vld [vmem:[#allocation1 + $0x1b] sm:$0xff]  ;;  %1664 = vmatmul.f32.gmra.mxu0 %v1578_v6  ;;  %1705 = vmatmul.f32.gmra.mxu1 %v1579_v35 }
 0x284   :  { %1582 = vst [vmem:[#allocation1] ss:$9 sm:$0xff] %v1414_v15  ;;  %1746 = vmatmul.f32.gmra.mxu2 %v1580_v45  ;;  %6230 = vmatmul.msk.f32.gmra.mxu3 %vm815_vm14, %v1581_v8  ;;  %v1777_v32 = vadd.f32 %v1776_v38, %v1736_v13 }
 0x285   :  { %1583 = vst [vmem:[#allocation1 + $0x1] ss:$9 sm:$0xff] %v1418_v23 }
 0x286   :  { %1584 = vst [vmem:[#allocation1 + $0x2] ss:$9 sm:$0xff] %v1422_v1  ;;  %v1806_v37 = vmul.f32 1.442695, %v1777_v32 }
 0x287   :  { %1585 = vst [vmem:[#allocation1 + $0x3] ss:$9 sm:$0xff] %v1426_v47  ;;  %v6285_v11 = vpop.eup %6284 }
 0x288   :  { %v6233_v30 = vadd.f32 -1.0, %v6285_v11  ;;  %6286 = vpow2.f32 %v1806_v37 }
 0x28a   :  { %v1827_v40 = vsel %vm1795_vm5, %v1774_v43, %v6233_v30  ;;  %vm10526_vm5 = vmmov %vm10523_vm4 }
 0x28b   :  { %v1849_v33 = vrot.slane %v1827_v40, 1  ;;  %v1850_v3 = vrot.slane %v1827_v40, 2  ;;  %v1851_v21 = vrot.slane %v1827_v40, 3  ;;  %v1852_v9 = vrot.slane %v1827_v40, 4 }
 0x28c   :  { %v1853_v27 = vrot.slane %v1827_v40, 5  ;;  %v1854_v62 = vrot.slane %v1827_v40, 6  ;;  %v1855_v42 = vrot.slane %v1827_v40, 7 }
 0x28e   :  { %v1586_v53 = vld [vmem:[#allocation1] sm:$0xff]  ;;  %v1587_v50 = vld [vmem:[#allocation1 + $0x9] sm:$0xff]  ;;  %v1588_v63 = vld [vmem:[#allocation1 + $0x12] sm:$0xff]  ;;  %v6287_v0 = vpop.eup %6286 }
 0x28f   :  { %v1589_v16 = vld [vmem:[#allocation1 + $0x1b] sm:$0xff]  ;;  %1667 = vmatmul.f32.gmra.mxu0 %v1586_v53  ;;  %1708 = vmatmul.f32.gmra.mxu1 %v1587_v50  ;;  %v6234_v20 = vadd.f32 -1.0, %v6287_v0 }
 0x290   :  { %1895 = vst [vmem:[#allocation1 + $0x1] ss:$9 sm:$0xff] %v1826_v48  ;;  %1749 = vmatmul.f32.gmra.mxu2 %v1588_v63  ;;  %6231 = vmatmul.msk.f32.gmra.mxu3 %vm815_vm14, %v1589_v16  ;;  %vm1796_vm14 = vcmp.gt.f32.partialorder %v1777_v32, 0.0 }
 0x291   :  { %1897 = vst [vmem:[#allocation1 + $0x2] ss:$9 sm:$0xff] %v1842_v17  ;;  %v1828_v49 = vsel %vm1796_vm14, %v1777_v32, %v6234_v20 }
 0x292   :  { %1899 = vst [vmem:[#allocation1 + $0x3] ss:$9 sm:$0xff] %v1843_v22  ;;  %v1856_v15 = vrot.slane %v1828_v49, 1  ;;  %v1857_v41 = vrot.slane %v1828_v49, 2  ;;  %v1858_v35 = vrot.slane %v1828_v49, 3  ;;  %v1859_v23 = vrot.slane %v1828_v49, 4 }
 0x293   :  { %1901 = vst [vmem:[#allocation1 + $0x4] ss:$9 sm:$0xff] %v1844_v18  ;;  %v1860_v8 = vrot.slane %v1828_v49, 5  ;;  %v1861_v48 = vrot.slane %v1828_v49, 6  ;;  %v1862_v7 = vrot.slane %v1828_v49, 7 }
 0x294   :  { %1903 = vst [vmem:[#allocation1 + $0x5] ss:$9 sm:$0xff] %v1845_v36 }
 0x295   :  { %1905 = vst [vmem:[#allocation1 + $0x6] ss:$9 sm:$0xff] %v1846_v12 }
 0x296   :  { %1907 = vst [vmem:[#allocation1 + $0x7] ss:$9 sm:$0xff] %v1847_v34 }
 0x29a   :  { %v1656_v19 = vpop.f32.mrf.mxu0  ;;  %v1697_v59 = vpop.f32.mrf.mxu1 }
 0x29b   :  { %v1657_v44 = vadd.f32 %v8197_v54, %v1656_v19 }
 0x29d   :  { %v8260_v61 = vld [vmem:[#allocation1] sm:$0xff]  ;;  %v1698_v14 = vadd.f32 %v1697_v59, %v1657_v44 }
 0x29e   :  { %1909 = vst [vmem:[#allocation1] ss:$9 sm:$0xff] %v1848_v55 }
 0x29f   :  { %1910 = vst [vmem:[#allocation1 + $0x1] ss:$9 sm:$0xff] %v1827_v40 }
 0x2a0   :  { %1911 = vst [vmem:[#allocation1 + $0x2] ss:$9 sm:$0xff] %v1849_v33 }
 0x2a1   :  { %1912 = vst [vmem:[#allocation1 + $0x3] ss:$9 sm:$0xff] %v1850_v3  ;;  %v1738_v29 = vpop.f32.mrf.mxu2  ;;  %v1779_v26 = vpop.f32.mrf.mxu3 }
 0x2a2   :  { %1913 = vst [vmem:[#allocation1 + $0x4] ss:$9 sm:$0xff] %v1851_v21  ;;  %v1739_v58 = vadd.f32 %v1738_v29, %v1698_v14 }
 0x2a3   :  { %1914 = vst [vmem:[#allocation1 + $0x5] ss:$9 sm:$0xff] %v1852_v9 }
 0x2a4   :  { %1915 = vst [vmem:[#allocation1 + $0x6] ss:$9 sm:$0xff] %v1853_v27  ;;  %v1780_v10 = vadd.f32 %v1779_v26, %v1739_v58 }
 0x2a5   :  { %1916 = vst [vmem:[#allocation1 + $0x7] ss:$9 sm:$0xff] %v1854_v62 }
 0x2a6   :  { %v1808_v39 = vmul.f32 1.442695, %v1780_v10  ;;  %vm1797_vm15 = vcmp.gt.f32.partialorder %v1780_v10, 0.0 }
 0x2a8   :  { %6288 = vpow2.f32 %v1808_v39 }
 0x2aa   :  { %v1659_v52 = vpop.f32.mrf.mxu0  ;;  %v1700_v1 = vpop.f32.mrf.mxu1 }
 0x2ab   :  { %v1660_v6 = vadd.f32 %v8197_v54, %v1659_v52 }
 0x2ac   :  { %v8263_v24 = vld [vmem:[#allocation1] sm:$0xff] }
 0x2ad   :  { %1918 = vst [vmem:[#allocation1 + $0x1] ss:$9 sm:$0xff] %v1855_v42  ;;  %v1701_v51 = vadd.f32 %v1700_v1, %v1660_v6 }
 0x2ae   :  { %1919 = vst [vmem:[#allocation1 + $0x2] ss:$9 sm:$0xff] %v1828_v49  ;;  %v6289_v45 = vpop.eup %6288 }
 0x2af   :  { %1920 = vst [vmem:[#allocation1 + $0x3] ss:$9 sm:$0xff] %v1856_v15  ;;  %v6235_v47 = vadd.f32 -1.0, %v6289_v45 }
 0x2b0   :  { %1921 = vst [vmem:[#allocation1 + $0x4] ss:$9 sm:$0xff] %v1857_v41 }
 0x2b1   :  { %1922 = vst [vmem:[#allocation1 + $0x5] ss:$9 sm:$0xff] %v1858_v35  ;;  %v1741_v4 = vpop.f32.mrf.mxu2  ;;  %v1782_v25 = vpop.f32.mrf.mxu3  ;;  %v1829_v46 = vsel %vm1797_vm15, %v1780_v10, %v6235_v47  ;;  %vm10527_vm15 = vmmov %vm10523_vm4 }
 0x2b2   :  { %1923 = vst [vmem:[#allocation1 + $0x6] ss:$9 sm:$0xff] %v1859_v23  ;;  %v1742_v43 = vadd.f32 %v1741_v4, %v1701_v51  ;;  %v1863_v53 = vrot.slane %v1829_v46, 1  ;;  %v1864_v50 = vrot.slane %v1829_v46, 2  ;;  %v1865_v63 = vrot.slane %v1829_v46, 3 }
 0x2b3   :  { %1924 = vst [vmem:[#allocation1 + $0x7] ss:$9 sm:$0xff] %v1860_v8  ;;  %v1866_v17 = vrot.slane %v1829_v46, 4  ;;  %v1867_v57 = vrot.slane %v1829_v46, 5  ;;  %v1868_v13 = vrot.slane %v1829_v46, 6  ;;  %v1869_v36 = vrot.slane %v1829_v46, 7 }
 0x2b4   :  { %v1783_v56 = vadd.f32 %v1782_v25, %v1742_v43 }
 0x2b6   :  { %v1810_v60 = vmul.f32 1.442695, %v1783_v56  ;;  %vm1798_vm6 = vcmp.gt.f32.partialorder %v1783_v56, 0.0 }
 0x2b8   :  { %6290 = vpow2.f32 %v1810_v60 }
 0x2ba   :  { %v8266_v28 = vld [vmem:[#allocation1] sm:$0xff] }
 0x2bb   :  { %1926 = vst [vmem:[#allocation1] ss:$9 sm:$0xff] %v1861_v48 }
 0x2bc   :  { %1927 = vst [vmem:[#allocation1 + $0x1] ss:$9 sm:$0xff] %v1862_v7 }
 0x2bd   :  { %1928 = vst [vmem:[#allocation1 + $0x2] ss:$9 sm:$0xff] %v1829_v46 }
 0x2be   :  { %1929 = vst [vmem:[#allocation1 + $0x3] ss:$9 sm:$0xff] %v1863_v53  ;;  %v6291_v16 = vpop.eup %6290 }
 0x2bf   :  { %1930 = vst [vmem:[#allocation1 + $0x4] ss:$9 sm:$0xff] %v1864_v50  ;;  %v6236_v22 = vadd.f32 -1.0, %v6291_v16 }
 0x2c0   :  { %1931 = vst [vmem:[#allocation1 + $0x5] ss:$9 sm:$0xff] %v1865_v63 }
 0x2c1   :  { %1932 = vst [vmem:[#allocation1 + $0x6] ss:$9 sm:$0xff] %v1866_v17  ;;  %v1830_v18 = vsel %vm1798_vm6, %v1783_v56, %v6236_v22  ;;  %vm10528_vm6 = vcmask 1046528  }
 0x2c2   :  { %1933 = vst [vmem:[#allocation1 + $0x7] ss:$9 sm:$0xff] %v1867_v57  ;;  %v1870_v11 = vrot.slane %v1830_v18, 1  ;;  %v1871_v34 = vrot.slane %v1830_v18, 2  ;;  %v1872_v38 = vrot.slane %v1830_v18, 3  ;;  %v1873_v32 = vrot.slane %v1830_v18, 4 }
 0x2c3   :  { %v1874_v30 = vrot.slane %v1830_v18, 5  ;;  %v1875_v37 = vrot.slane %v1830_v18, 6  ;;  %v1876_v19 = vrot.slane %v1830_v18, 7 }
 0x2c9   :  { %v8268_v12 = vld [vmem:[#allocation1] sm:$0xff] }
 0x2ca   :  { %1935 = vst [vmem:[#allocation1 + $0x1] ss:$9 sm:$0xff] %v1868_v13 }
 0x2cb   :  { %1936 = vst [vmem:[#allocation1 + $0x2] ss:$9 sm:$0xff] %v1869_v36 }
 0x2cc   :  { %1937 = vst [vmem:[#allocation1 + $0x3] ss:$9 sm:$0xff] %v1830_v18 }
 0x2cd   :  { %1938 = vst [vmem:[#allocation1 + $0x4] ss:$9 sm:$0xff] %v1870_v11 }
 0x2ce   :  { %1939 = vst [vmem:[#allocation1 + $0x5] ss:$9 sm:$0xff] %v1871_v34 }
 0x2cf   :  { %1940 = vst [vmem:[#allocation1 + $0x6] ss:$9 sm:$0xff] %v1872_v38 }
 0x2d0   :  { %1941 = vst [vmem:[#allocation1 + $0x7] ss:$9 sm:$0xff] %v1873_v32 }
 0x2d7   :  { %v8270_v40 = vld [vmem:[#allocation1] sm:$0xff] }
 0x2d8   :  { %1943 = vst [vmem:[#allocation1] ss:$9 sm:$0xff] %v1874_v30 }
 0x2d9   :  { %1944 = vst [vmem:[#allocation1 + $0x1] ss:$9 sm:$0xff] %v1875_v37 }
 0x2da   :  { %1945 = vst [vmem:[#allocation1 + $0x2] ss:$9 sm:$0xff] %v1876_v19  ;;  %v1973_v19 = vsel %vm572_vm8, 0.0, %v8260_v61  ;;  %v1988_v61 = vrot.slane %v8263_v24, 1 }
 0x2ef   :  { %v1662_v55 = vpop.f32.mrf.mxu0  ;;  %v1703_v33 = vpop.f32.mrf.mxu1 }
 0x2f0   :  { %v1663_v44 = vadd.f32 %v8197_v54, %v1662_v55  ;;  %v1981_v55 = vrot.slane %v1973_v19, 1 }
 0x2f2   :  { %v1704_v3 = vadd.f32 %v1703_v33, %v1663_v44  ;;  %v1982_v33 = vrot.slane %v1973_v19, 2 }
 0x2f6   :  { %v1744_v21 = vpop.f32.mrf.mxu2  ;;  %v1785_v9 = vpop.f32.mrf.mxu3 }
 0x2f7   :  { %v1745_v59 = vadd.f32 %v1744_v21, %v1704_v3  ;;  %v1983_v3 = vrot.slane %v1973_v19, 3  ;;  %v1984_v21 = vrot.slane %v1973_v19, 4 }
 0x2f9   :  { %v1786_v14 = vadd.f32 %v1785_v9, %v1745_v59  ;;  %v1985_v9 = vrot.slane %v1973_v19, 5 }
 0x2fb   :  { %v1812_v27 = vmul.f32 1.442695, %v1786_v14  ;;  %vm1799_vm0 = vcmp.gt.f32.partialorder %v1786_v14, 0.0 }
 0x2fd   :  { %6292 = vpow2.f32 %v1812_v27  ;;  %v1987_v27 = vrot.slane %v1973_v19, 7 }
 0x300   :  { %v1665_v29 = vpop.f32.mrf.mxu0  ;;  %v1706_v49 = vpop.f32.mrf.mxu1 }
 0x301   :  { %v1666_v58 = vadd.f32 %v8197_v54, %v1665_v29 }
 0x303   :  { %v6293_v0 = vpop.eup %6292  ;;  %v1707_v52 = vadd.f32 %v1706_v49, %v1666_v58  ;;  %v1990_v58 = vrot.slane %v8263_v24, 3  ;;  %v1974_v49 = vsel %vm572_vm8, 0.0, %v8266_v28  ;;  %v2001_v28 = vrot.slane %v8268_v12, 1 }
 0x304   :  { %v6237_v62 = vadd.f32 -1.0, %v6293_v0  ;;  %v1989_v0 = vrot.slane %v8263_v24, 2 }
 0x306   :  { %v1831_v26 = vsel %vm1799_vm0, %v1786_v14, %v6237_v62  ;;  %v1986_v14 = vrot.slane %v1973_v19, 6  ;;  %vm10529_vm0 = vcmask 1042434  }
 0x307   :  { %v1877_v10 = vrot.slane %v1831_v26, 1  ;;  %v1878_v20 = vrot.slane %v1831_v26, 2  ;;  %v1879_v39 = vrot.slane %v1831_v26, 3  ;;  %1946 = vst [vmem:[#allocation1 + $0x3] ss:$9 sm:$0xff] %v1831_v26  ;;  %v1880_v42 = vrot.slane %v1831_v26, 4  ;;  %v1747_v15 = vpop.f32.mrf.mxu2  ;;  %v1788_v6 = vpop.f32.mrf.mxu3 }
 0x308   :  { %v1748_v41 = vadd.f32 %v1747_v15, %v1707_v52  ;;  %v1881_v1 = vrot.slane %v1831_v26, 5  ;;  %v1882_v51 = vrot.slane %v1831_v26, 6  ;;  %v1883_v43 = vrot.slane %v1831_v26, 7 }
 0x309   :  { %1947 = vst [vmem:[#allocation1 + $0x4] ss:$9 sm:$0xff] %v1877_v10  ;;  %v1991_v26 = vrot.slane %v8263_v24, 4  ;;  %v1992_v10 = vrot.slane %v8263_v24, 5  ;;  %v1995_v15 = vrot.slane %v1974_v49, 2 }
 0x30a   :  { %1948 = vst [vmem:[#allocation1 + $0x5] ss:$9 sm:$0xff] %v1878_v20  ;;  %v1789_v35 = vadd.f32 %v1788_v6, %v1748_v41  ;;  %v1996_v41 = vrot.slane %v1974_v49, 3  ;;  %v1997_v6 = vrot.slane %v1974_v49, 4 }
 0x30b   :  { %1949 = vst [vmem:[#allocation1 + $0x6] ss:$9 sm:$0xff] %v1879_v39  ;;  %v1993_v39 = vrot.slane %v8263_v24, 6 }
 0x30c   :  { %1950 = vst [vmem:[#allocation1 + $0x7] ss:$9 sm:$0xff] %v1880_v42  ;;  %v1814_v45 = vmul.f32 1.442695, %v1789_v35  ;;  %v1668_v23 = vpop.f32.mrf.mxu0  ;;  %v1709_v47 = vpop.f32.mrf.mxu1  ;;  %vm1800_vm2 = vcmp.gt.f32.partialorder %v1789_v35, 0.0  ;;  %v1994_v42 = vrot.slane %v1974_v49, 1 }
 0x30d   :  { %v1669_v8 = vadd.f32 %v8197_v54, %v1668_v23  ;;  %v2000_v23 = vrot.slane %v1974_v49, 7 }
 0x30e   :  { %6294 = vpow2.f32 %v1814_v45  ;;  %v1998_v45 = vrot.slane %v1974_v49, 5 }
 0x30f   :  { %v1710_v25 = vadd.f32 %v1709_v47, %v1669_v8  ;;  %v2003_v47 = vrot.slane %v8268_v12, 3 }
 0x313   :  { %v8275_v4 = vld [vmem:[#allocation1] sm:$0xff]  ;;  %v1750_v56 = vpop.f32.mrf.mxu2  ;;  %v1791_v7 = vpop.f32.mrf.mxu3 }
 0x314   :  { %1952 = vst [vmem:[#allocation1 + $0x1] ss:$9 sm:$0xff] %v1881_v1  ;;  %v6295_v46 = vpop.eup %6294  ;;  %v1751_v60 = vadd.f32 %v1750_v56, %v1710_v25  ;;  %v2002_v1 = vrot.slane %v8268_v12, 2  ;;  %v2004_v56 = vrot.slane %v8268_v12, 4 }
 0x315   :  { %1953 = vst [vmem:[#allocation1 + $0x2] ss:$9 sm:$0xff] %v1882_v51  ;;  %v6238_v48 = vadd.f32 -1.0, %v6295_v46  ;;  %v2005_v46 = vrot.slane %v8268_v12, 5 }
 0x316   :  { %1954 = vst [vmem:[#allocation1 + $0x3] ss:$9 sm:$0xff] %v1883_v43  ;;  %v1792_v53 = vadd.f32 %v1791_v7, %v1751_v60  ;;  %v6576_v43 = vmov 3.0  }
 0x317   :  { %v1832_v50 = vsel %vm1800_vm2, %v1789_v35, %v6238_v48  ;;  %v2006_v48 = vrot.slane %v8268_v12, 6  ;;  %vm10530_vm2 = vcmask 1043459  }
 0x318   :  { %v1884_v63 = vrot.slane %v1832_v50, 1  ;;  %v1885_v54 = vrot.slane %v1832_v50, 2  ;;  %v1886_v17 = vrot.slane %v1832_v50, 3  ;;  %1955 = vst [vmem:[#allocation1 + $0x4] ss:$9 sm:$0xff] %v1832_v50  ;;  %v1887_v22 = vrot.slane %v1832_v50, 4 }
 0x319   :  { %v1816_v57 = vmul.f32 1.442695, %v1792_v53  ;;  %v1888_v18 = vrot.slane %v1832_v50, 5  ;;  %v1889_v11 = vrot.slane %v1832_v50, 6  ;;  %vm1801_vm3 = vcmp.gt.f32.partialorder %v1792_v53, 0.0 }
 0x31a   :  { %1956 = vst [vmem:[#allocation1 + $0x5] ss:$9 sm:$0xff] %v1884_v63  ;;  %v1890_v34 = vrot.slane %v1832_v50, 7 }
 0x31b   :  { %1957 = vst [vmem:[#allocation1 + $0x6] ss:$9 sm:$0xff] %v1885_v54  ;;  %6296 = vpow2.f32 %v1816_v57 }
 0x31c   :  { %1958 = vst [vmem:[#allocation1 + $0x7] ss:$9 sm:$0xff] %v1886_v17  ;;  %6298 = vrcp.f32 %v6576_v43 }
 0x321   :  { %v6297_v16 = vpop.eup %6296 }
 0x322   :  { %v6239_v36 = vadd.f32 -1.0, %v6297_v16  ;;  %v6299_v63 = vpop.eup %6298 }
 0x323   :  { %v8277_v13 = vld [vmem:[#allocation1] sm:$0xff]  ;;  %vm2280_vm14 = vweird.f32 %v6299_v63 }
 0x324   :  { %1960 = vst [vmem:[#allocation1] ss:$9 sm:$0xff] %v1887_v22  ;;  %v1833_v38 = vsel %vm1801_vm3, %v1792_v53, %v6239_v36  ;;  %vm10531_vm3 = vmmov %vm10523_vm4 }
 0x325   :  { %1961 = vst [vmem:[#allocation1 + $0x1] ss:$9 sm:$0xff] %v1888_v18  ;;  %v1891_v32 = vrot.slane %v1833_v38, 1  ;;  %v1892_v30 = vrot.slane %v1833_v38, 2  ;;  %v1893_v37 = vrot.slane %v1833_v38, 3  ;;  %v2276_v18 = vmul.f32 3.0, %v6299_v63 }
 0x326   :  { %1962 = vst [vmem:[#allocation1 + $0x2] ss:$9 sm:$0xff] %v1889_v11 }
 0x327   :  { %1963 = vst [vmem:[#allocation1 + $0x3] ss:$9 sm:$0xff] %v1890_v34 }
 0x328   :  { %1964 = vst [vmem:[#allocation1 + $0x4] ss:$9 sm:$0xff] %v1833_v38 }
 0x329   :  { %1965 = vst [vmem:[#allocation1 + $0x5] ss:$9 sm:$0xff] %v1891_v32 }
 0x32a   :  { %1966 = vst [vmem:[#allocation1 + $0x6] ss:$9 sm:$0xff] %v1892_v30  ;;  %v2277_v30 = vsub.f32 1.0, %v2276_v18  ;;  %v2018_v18 = vrot.slane %v8275_v4, 5 }
 0x32b   :  { %1967 = vst [vmem:[#allocation1 + $0x7] ss:$9 sm:$0xff] %v1893_v37 }
 0x332   :  { %v8281_v44 = vld [vmem:[#allocation1] sm:$0xff] }
 0x333   :  { %2033 = vst [vmem:[#allocation1] ss:$9 sm:$0xff] %v1973_v19 }
 0x334   :  { %2035 = vst [vmem:[#allocation1 + $0x1] ss:$9 sm:$0xff] %v1981_v55 }
 0x335   :  { %2037 = vst [vmem:[#allocation1 + $0x2] ss:$9 sm:$0xff] %v1982_v33 }
 0x33c   :  { %v2038_v59 = vld [vmem:[#allocation1] sm:$0xff] }
 0x33d   :  { %2039 = vst [vmem:[#allocation1] ss:$9 sm:$0xff] %v1983_v3  ;;  %v2135_v25 = vsel %vm10522_vm10, %v2038_v59, 0.0  ;;  %vm10532_vm10 = vmmov %vm10531_vm3 }
 0x33e   :  { %2040 = vst [vmem:[#allocation1 + $0x1] ss:$9 sm:$0xff] %v1984_v21  ;;  %v2136_v53 = vrot.slane %v2135_v25, 4 }
 0x33f   :  { %2041 = vst [vmem:[#allocation1 + $0x2] ss:$9 sm:$0xff] %v1985_v9  ;;  %v2278_v9 = vmul.f32 %v6299_v63, %v2277_v30 }
 0x340   :  { %v2137_v16 = vadd.f32 %v2136_v53, %v2135_v25  ;;  %v2015_v53 = vrot.slane %v8275_v4, 2 }
 0x342   :  { %v2138_v38 = vrot.slane %v2137_v16, 2 }
 0x344   :  { %v2139_v59 = vadd.f32 %v2138_v38, %v2137_v16 }
 0x346   :  { %v2042_v29 = vld [vmem:[#allocation1] sm:$0xff] }
 0x347   :  { %2043 = vst [vmem:[#allocation1] ss:$9 sm:$0xff] %v1986_v14  ;;  %v2142_v54 = vsel %vm10525_vm9, %v2042_v29, 0.0  ;;  %vm10535_vm9 = vmmov %vm10531_vm3 }
 0x348   :  { %2044 = vst [vmem:[#allocation1 + $0x1] ss:$9 sm:$0xff] %v1987_v27  ;;  %v2143_v36 = vrot.slane %v2142_v54, 4 }
 0x349   :  { %2045 = vst [vmem:[#allocation1 + $0x2] ss:$9 sm:$0xff] %v8263_v24  ;;  %v1999_v24 = vrot.slane %v1974_v49, 6 }
 0x34a   :  { %v2144_v55 = vadd.f32 %v2143_v36, %v2142_v54  ;;  %v2016_v54 = vrot.slane %v8275_v4, 3  ;;  %v2019_v36 = vrot.slane %v8275_v4, 6 }
 0x34c   :  { %v2145_v14 = vrot.slane %v2144_v55, 2 }
 0x350   :  { %v2046_v62 = vld [vmem:[#allocation1] sm:$0xff] }
 0x351   :  { %2047 = vst [vmem:[#allocation1] ss:$9 sm:$0xff] %v1988_v61  ;;  %v2149_v7 = vsel %vm10523_vm4, %v2046_v62, 0.0  ;;  %v2140_v61 = vrot.slane %v2139_v59, 1  ;;  %v2279_v62 = vadd.f32 %v6299_v63, %v2278_v9  ;;  %vm10533_vm4 = vcmask 1043456  }
 0x352   :  { %2048 = vst [vmem:[#allocation1 + $0x1] ss:$9 sm:$0xff] %v1989_v0  ;;  %v2150_v57 = vrot.slane %v2149_v7, 4 }
 0x353   :  { %2049 = vst [vmem:[#allocation1 + $0x2] ss:$9 sm:$0xff] %v1990_v58  ;;  %v2146_v58 = vadd.f32 %v2145_v14, %v2144_v55 }
 0x354   :  { %v2151_v34 = vadd.f32 %v2150_v57, %v2149_v7  ;;  %v2014_v7 = vrot.slane %v8275_v4, 1 }
 0x356   :  { %v2152_v21 = vrot.slane %v2151_v34, 2 }
 0x358   :  { %v2153_v29 = vadd.f32 %v2152_v21, %v2151_v34 }
 0x35a   :  { %v2050_v20 = vld [vmem:[#allocation1] sm:$0xff] }
 0x35b   :  { %2051 = vst [vmem:[#allocation1] ss:$9 sm:$0xff] %v1991_v26  ;;  %v2156_v50 = vsel %vm10524_vm13, %v2050_v20, 0.0  ;;  %vm10534_vm13 = vmmov %vm10531_vm3 }
 0x35c   :  { %2052 = vst [vmem:[#allocation1 + $0x1] ss:$9 sm:$0xff] %v1992_v10  ;;  %v2157_v22 = vrot.slane %v2156_v50, 4 }
 0x35d   :  { %2053 = vst [vmem:[#allocation1 + $0x2] ss:$9 sm:$0xff] %v1993_v39 }
 0x35e   :  { %v2158_v32 = vadd.f32 %v2157_v22, %v2156_v50  ;;  %v2017_v22 = vrot.slane %v8275_v4, 4 }
 0x364   :  { %v2054_v52 = vld [vmem:[#allocation1] sm:$0xff] }
 0x365   :  { %2055 = vst [vmem:[#allocation1] ss:$9 sm:$0xff] %v1974_v49  ;;  %v2163_v17 = vsel %vm10526_vm5, %v2054_v52, 0.0  ;;  %v2154_v49 = vrot.slane %v2153_v29, 1  ;;  %v2141_v52 = vadd.f32 %v2140_v61, %v2139_v59  ;;  %vm10536_vm5 = vmmov %vm10529_vm0 }
 0x366   :  { %2056 = vst [vmem:[#allocation1 + $0x1] ss:$9 sm:$0xff] %v1994_v42  ;;  %v2164_v11 = vrot.slane %v2163_v17, 4 }
 0x367   :  { %2057 = vst [vmem:[#allocation1 + $0x2] ss:$9 sm:$0xff] %v1995_v15 }
 0x368   :  { %v2165_v33 = vadd.f32 %v2164_v11, %v2163_v17 }
 0x36a   :  { %v2166_v27 = vrot.slane %v2165_v33, 2 }
 0x36c   :  { %v2167_v26 = vadd.f32 %v2166_v27, %v2165_v33 }
 0x36e   :  { %v8292_v35 = vld [vmem:[#allocation1] sm:$0xff] }
 0x36f   :  { %2059 = vst [vmem:[#allocation1] ss:$9 sm:$0xff] %v1996_v41  ;;  %v8326_v41 = vsel %vm2280_vm14, %v6299_v63, %v2279_v62  ;;  %v8342_v63 = vsel %vm572_vm8, 0.0, %v8277_v13  ;;  %vm10537_vm14 = vmmov %vm10533_vm4 }
 0x370   :  { %2060 = vst [vmem:[#allocation1 + $0x1] ss:$9 sm:$0xff] %v1997_v6  ;;  %v2147_v6 = vrot.slane %v2146_v58, 1  ;;  %v2021_v30 = vrot.slane %v8342_v63, 2  ;;  %v2023_v33 = vrot.slane %v8342_v63, 4  ;;  %v2025_v21 = vrot.slane %v8342_v63, 6 }
 0x371   :  { %2061 = vst [vmem:[#allocation1 + $0x2] ss:$9 sm:$0xff] %v1998_v45  ;;  %v2168_v45 = vrot.slane %v2167_v26, 1 }
 0x373   :  { %v2169_v43 = vadd.f32 %v2168_v45, %v2167_v26 }
 0x375   :  { %v2286_v16 = vmul.f32 %v8326_v41, %v2169_v43 }
 0x378   :  { %v8294_v8 = vld [vmem:[#allocation1] sm:$0xff] }
 0x379   :  { %2063 = vst [vmem:[#allocation1] ss:$9 sm:$0xff] %v1999_v24  ;;  %v2170_v24 = vsel %vm10527_vm15, %v8292_v35, 0.0  ;;  %vm10538_vm15 = vmmov %vm10531_vm3 }
 0x37a   :  { %2064 = vst [vmem:[#allocation1 + $0x1] ss:$9 sm:$0xff] %v2000_v23  ;;  %v2155_v23 = vadd.f32 %v2154_v49, %v2153_v29  ;;  %v2171_v25 = vrot.slane %v2170_v24, 4  ;;  %v2177_v29 = vsel %vm10531_vm3, %v8294_v8, 0.0 }
 0x37b   :  { %2065 = vst [vmem:[#allocation1 + $0x2] ss:$9 sm:$0xff] %v8268_v12  ;;  %v8314_v12 = vsel %vm572_vm8, 0.0, %v8270_v40  ;;  %v2159_v40 = vrot.slane %v2158_v32, 2  ;;  %v2178_v45 = vrot.slane %v2177_v29, 4 }
 0x37c   :  { %v2007_v37 = vrot.slane %v8314_v12, 1  ;;  %v2008_v3 = vrot.slane %v8314_v12, 2  ;;  %v2009_v10 = vrot.slane %v8314_v12, 3  ;;  %v2010_v20 = vrot.slane %v8314_v12, 4 }
 0x37d   :  { %v2160_v0 = vadd.f32 %v2159_v40, %v2158_v32  ;;  %v2011_v42 = vrot.slane %v8314_v12, 5  ;;  %v2172_v11 = vadd.f32 %v2171_v25, %v2170_v24  ;;  %v2020_v32 = vrot.slane %v8342_v63, 1  ;;  %v2841_v40 = vld [vmem:[#allocation7 + $0x1a0] sm:$0xff] }
 0x37f   :  { %v2161_v15 = vrot.slane %v2160_v0, 1  ;;  %v2173_v27 = vrot.slane %v2172_v11, 2 }
 0x382   :  { %v8299_v51 = vld [vmem:[#allocation1] sm:$0xff] }
 0x383   :  { %2067 = vst [vmem:[#allocation1] ss:$9 sm:$0xff] %v2001_v28  ;;  %v2162_v28 = vadd.f32 %v2161_v15, %v2160_v0 }
 0x384   :  { %2068 = vst [vmem:[#allocation1 + $0x1] ss:$9 sm:$0xff] %v2002_v1  ;;  %v2282_v1 = vmul.f32 %v8326_v41, %v2141_v52 }
 0x385   :  { %2069 = vst [vmem:[#allocation1 + $0x2] ss:$9 sm:$0xff] %v2003_v47  ;;  %v2148_v47 = vadd.f32 %v2147_v6, %v2146_v58  ;;  %v2285_v50 = vmul.f32 %v8326_v41, %v2162_v28  ;;  %v2174_v6 = vadd.f32 %v2173_v27, %v2172_v11  ;;  %v2913_v58 = vld [vmem:[#allocation7 + $0x3e0] sm:$0xff] }
 0x386   :  { %v8338_v35 = vsel %vm10528_vm6, 0.0, %v2282_v1  ;;  %vm10539_vm6 = vmmov %vm10533_vm4 }
 0x387   :  { %v2283_v57 = vmul.f32 %v8326_v41, %v2148_v47  ;;  %v2358_v34 = vrot.slane %v8338_v35, 2  ;;  %v2362_v38 = vrot.slane %v8338_v35, 3  ;;  %v2370_v52 = vrot.slane %v8338_v35, 4 }
 0x388   :  { %v2382_v24 = vrot.slane %v8338_v35, 5 }
 0x389   :  { %v8372_v0 = vrot.slane %v2358_v34, 6  ;;  %v8374_v62 = vrot.slane %v2362_v38, 5 }
 0x38c   :  { %v8305_v60 = vld [vmem:[#allocation1] sm:$0xff] }
 0x38d   :  { %2071 = vst [vmem:[#allocation1] ss:$9 sm:$0xff] %v2004_v56  ;;  %v2012_v56 = vrot.slane %v8314_v12, 6 }
 0x38e   :  { %2072 = vst [vmem:[#allocation1 + $0x1] ss:$9 sm:$0xff] %v2005_v46  ;;  %v2013_v46 = vrot.slane %v8314_v12, 7 }
 0x38f   :  { %2073 = vst [vmem:[#allocation1 + $0x2] ss:$9 sm:$0xff] %v2006_v48  ;;  %v2284_v48 = vmul.f32 %v8326_v41, %v2155_v23 }
 0x391   :  { %v2322_v13 = vsel %vm1187_vm1, %v2284_v48, %v2283_v57  ;;  %v2406_v48 = vrot.slane %v8338_v35, 7  ;;  %v2175_v57 = vrot.slane %v2174_v6, 1 }
 0x392   :  { %v2323_v55 = vsel %vm10529_vm0, %v2285_v50, %v2322_v13  ;;  %vm10540_vm0 = vmmov %vm10531_vm3 }
 0x393   :  { %v2324_v59 = vsel %vm10530_vm2, %v2286_v16, %v2323_v55  ;;  %vm10541_vm3 = vmmov %vm10536_vm5 }
 0x396   :  { %v8317_v19 = vld [vmem:[#allocation1] sm:$0xff] }
 0x397   :  { %2075 = vst [vmem:[#allocation1] ss:$9 sm:$0xff] %v8314_v12  ;;  %v2354_v12 = vrot.slane %v8338_v35, 1  ;;  %v2198_v15 = vsel %vm10535_vm9, %v8317_v19, 0.0 }
 0x398   :  { %2076 = vst [vmem:[#allocation1 + $0x1] ss:$9 sm:$0xff] %v2007_v37  ;;  %v2022_v37 = vrot.slane %v8342_v63, 3 }
 0x399   :  { %2077 = vst [vmem:[#allocation1 + $0x2] ss:$9 sm:$0xff] %v2008_v3  ;;  %v2024_v3 = vrot.slane %v8342_v63, 5  ;;  %v8370_v61 = vrot.slane %v2354_v12, 7 }
 0x39b   :  { %v2494_v1 = vsel %vm572_vm8, %v8338_v35, %v8370_v61  ;;  %v2507_v50 = vsel %vm1187_vm1, %v8338_v35, %v8370_v61 }
 0x3a0   :  { %v8323_v39 = vld [vmem:[#allocation1] sm:$0xff] }
 0x3a1   :  { %2079 = vst [vmem:[#allocation1] ss:$9 sm:$0xff] %v2009_v10  ;;  %v2184_v10 = vsel %vm10532_vm10, %v8299_v51, 0.0  ;;  %vm10542_vm10 = vcmask 1044484  }
 0x3a2   :  { %2080 = vst [vmem:[#allocation1 + $0x1] ss:$9 sm:$0xff] %v2010_v20  ;;  %v8381_v20 = vsel %vm10533_vm4, %v2324_v59, 0.0  ;;  %v2185_v23 = vrot.slane %v2184_v10, 4  ;;  %vm10543_vm4 = vmmov %vm10530_vm2 }
 0x3a3   :  { %2081 = vst [vmem:[#allocation1 + $0x2] ss:$9 sm:$0xff] %v2011_v42  ;;  %v2191_v42 = vsel %vm10534_vm13, %v8305_v60, 0.0  ;;  %v2371_v28 = vrot.slane %v8381_v20, 4  ;;  %v2495_v60 = vsel %vm10536_vm5, %v8372_v0, %v8374_v62  ;;  %v2383_v19 = vrot.slane %v8381_v20, 5  ;;  %vm10545_vm9 = vmmov %vm10542_vm10 }
 0x3a4   :  { %v2192_v47 = vrot.slane %v2191_v42, 4  ;;  %v2395_v43 = vrot.slane %v8381_v20, 6  ;;  %v2407_v25 = vrot.slane %v8381_v20, 7  ;;  %v2418_v16 = vrot.slane %v8381_v20, 1 }
 0x3a5   :  { %v8410_v11 = vsel %vm530_vm7, %v2494_v1, %v2495_v60  ;;  %v2186_v13 = vadd.f32 %v2185_v23, %v2184_v10  ;;  %v2422_v12 = vrot.slane %v8381_v20, 2  ;;  %v2426_v34 = vrot.slane %v8381_v20, 3 }
 0x3a6   :  { %v2193_v38 = vadd.f32 %v2192_v47, %v2191_v42  ;;  %v2384_v55 = vsel %vm10538_vm15, %v2382_v24, %v2383_v19  ;;  %v2434_v10 = vsel %vm10540_vm0, %v2383_v19, %v6852_v31  ;;  %v2438_v42 = vsel %vm530_vm7, %v2395_v43, %v6906_v2  ;;  %vm10548_vm15 = vmmov %vm10545_vm9 }
 0x3a7   :  { %v2187_v1 = vrot.slane %v2186_v13, 2  ;;  %v8429_v60 = vrot.slane %v2384_v55, 3  ;;  %v8435_v19 = vrot.slane %v2418_v16, 7  ;;  %vm10544_vm13 = vcmask 1045509  }
 0x3a8   :  { %v2194_v47 = vrot.slane %v2193_v38, 2  ;;  %vm10546_vm5 = vcmask 1046534   ;;  %vm10550_vm0 = vcmask 1043458  }
 0x3a9   :  { %v2188_v55 = vadd.f32 %v2187_v1, %v2186_v13 }
 0x3aa   :  { %v8345_v17 = vld [vmem:[#allocation1] sm:$0xff] }
 0x3ab   :  { %2083 = vst [vmem:[#allocation1] ss:$9 sm:$0xff] %v2012_v56  ;;  %v2199_v56 = vrot.slane %v2198_v15, 4  ;;  %v2189_v1 = vrot.slane %v2188_v55, 1 }
 0x3ac   :  { %2084 = vst [vmem:[#allocation1 + $0x1] ss:$9 sm:$0xff] %v2013_v46  ;;  %v2394_v46 = vrot.slane %v8338_v35, 6 }
 0x3ad   :  { %2085 = vst [vmem:[#allocation1 + $0x2] ss:$9 sm:$0xff] %v8275_v4  ;;  %v2200_v27 = vadd.f32 %v2199_v56, %v2198_v15  ;;  %v8439_v56 = vrot.slane %v2426_v34, 5  ;;  %v2540_v34 = vsel %vm10544_vm13, %v8372_v0, %v8374_v62  ;;  %v2190_v9 = vadd.f32 %v2189_v1, %v2188_v55  ;;  %v2911_v55 = vld [vmem:[#allocation7 + $0x3d0] sm:$0xff] }
 0x3ae   :  { %v2396_v59 = vsel %vm530_vm7, %v2394_v46, %v2395_v43 }
 0x3af   :  { %v8431_v15 = vrot.slane %v2396_v59, 2  ;;  %v2201_v46 = vrot.slane %v2200_v27, 2 }
 0x3b4   :  { %v8391_v51 = vld [vmem:[#allocation1] sm:$0xff] }
 0x3b5   :  { %2087 = vst [vmem:[#allocation1] ss:$9 sm:$0xff] %v2014_v7  ;;  %v2179_v7 = vadd.f32 %v2178_v45, %v2177_v29  ;;  %v2430_v29 = vsel %vm10539_vm6, %v2371_v28, %v6813_v5  ;;  %v2176_v45 = vadd.f32 %v2175_v57, %v2174_v6  ;;  %v2523_v57 = vsel %vm10541_vm3, %v8338_v35, %v8370_v61 }
 0x3b6   :  { %2088 = vst [vmem:[#allocation1 + $0x1] ss:$9 sm:$0xff] %v2015_v53  ;;  %v2372_v53 = vsel %vm10537_vm14, %v2370_v52, %v2371_v28  ;;  %v2508_v52 = vsel %vm10530_vm2, %v8372_v0, %v8374_v62  ;;  %v8443_v43 = vrot.slane %v2430_v29, 4  ;;  %vm10547_vm14 = vmmov %vm10541_vm3  ;;  %vm10549_vm6 = vcmask 1042433  }
 0x3b7   :  { %2089 = vst [vmem:[#allocation1 + $0x2] ss:$9 sm:$0xff] %v2016_v54  ;;  %v2408_v54 = vsel %vm572_vm8, %v2406_v48, %v2407_v25  ;;  %v2180_v23 = vrot.slane %v2179_v7, 2  ;;  %v8427_v24 = vrot.slane %v2372_v53, 4  ;;  %v8437_v25 = vrot.slane %v2422_v12, 6  ;;  %vm10552_vm3 = vmmov %vm10545_vm9 }
 0x3b8   :  { %v8433_v28 = vrot.slane %v2408_v54, 1  ;;  %v8445_v48 = vrot.slane %v2434_v10, 3  ;;  %v2524_v53 = vsel %vm10542_vm10, %v8372_v0, %v8374_v62  ;;  %v2539_v12 = vsel %vm10543_vm4, %v8338_v35, %v8370_v61  ;;  %vm10553_vm10 = vmmov %vm10546_vm5 }
 0x3b9   :  { %v2181_v16 = vadd.f32 %v2180_v23, %v2179_v7  ;;  %v2287_v59 = vmul.f32 %v8326_v41, %v2176_v45  ;;  %v2497_v7 = vsel %vm10545_vm9, %v8427_v24, %v8429_v60  ;;  %v2195_v54 = vadd.f32 %v2194_v47, %v2193_v38 }
 0x3ba   :  { %v2498_v29 = vsel %vm10546_vm5, %v8431_v15, %v8433_v28  ;;  %v2502_v13 = vsel %vm10547_vm14, %v8437_v25, %v8439_v56  ;;  %v2202_v10 = vadd.f32 %v2201_v46, %v2200_v27  ;;  %v2504_v45 = vsel %vm10548_vm15, %v8443_v43, %v8445_v48  ;;  %v2819_v46 = vld [vmem:[#allocation7 + $0xf0] sm:$0xff]  ;;  %vm10557_vm14 = vmmov %vm10544_vm13 }
 0x3bb   :  { %v8484_v4 = vsel %vm10549_vm6, %v2507_v50, %v2508_v52  ;;  %v2182_v38 = vrot.slane %v2181_v16, 1  ;;  %vm10551_vm2 = vcmask 1044483   ;;  %v2556_v27 = vsel %vm10553_vm10, %v8372_v0, %v8374_v62  ;;  %3412 = vmatpush.msrb.mxu3 %v2819_v46  ;;  %v2915_v0 = vld [vmem:[#allocation7 + $0x3f0] sm:$0xff] }
 0x3bc   :  { %v8490_v23 = vsel %vm10551_vm2, %v2539_v12, %v2540_v34  ;;  %vm10554_vm4 = vcmask 1046528   ;;  %v2499_v50 = vsel %vm1209_vm11, %v2497_v7, %v2498_v29  ;;  %v2196_v12 = vrot.slane %v2195_v54, 1  ;;  %3490 = vmatpush.msrb.mxu2 %v2915_v0  ;;  %v2909_v0 = vld [vmem:[#allocation7 + $0x3c0] sm:$0xff] }
 0x3bd   :  { %v8499_v47 = vsel %vm10554_vm4, 0.0, %v2287_v59  ;;  %vm10555_vm9 = vmmov %vm10554_vm4  ;;  %v2203_v62 = vrot.slane %v2202_v10, 1  ;;  %v2516_v59 = vsel %vm1187_vm1, %v8381_v20, %v8435_v19  ;;  %vm10556_vm5 = vcmask 1043459  }
 0x3be   :  { %v8441_v6 = vld [vmem:[#allocation1] sm:$0xff]  ;;  %v2517_v7 = vsel %vm10556_vm5, %v8437_v25, %v8439_v56  ;;  %v2519_v29 = vsel %vm10557_vm14, %v8443_v43, %v8445_v48  ;;  %v2183_v8 = vadd.f32 %v2182_v38, %v2181_v16  ;;  %v2355_v46 = vrot.slane %v8499_v47, 1  ;;  %3491 = vmatpush.msrb.mxu2 %v2913_v58  ;;  %v2877_v58 = vld [vmem:[#allocation7 + $0x2c0] sm:$0xff] }
 0x3bf   :  { %2091 = vst [vmem:[#allocation1] ss:$9 sm:$0xff] %v2017_v22  ;;  %v8464_v22 = vrot.slane %v2438_v42, 2  ;;  %v2555_v42 = vsel %vm10552_vm3, %v8338_v35, %v8370_v61  ;;  %v2510_v35 = vsel %vm10544_vm13, %v8427_v24, %v8429_v60  ;;  %v2511_v61 = vsel %vm10555_vm9, %v8433_v28, %v8431_v15 }
 0x3c0   :  { %2092 = vst [vmem:[#allocation1 + $0x1] ss:$9 sm:$0xff] %v2018_v18  ;;  %v2501_v18 = vsel %vm572_vm8, %v8381_v20, %v8435_v19  ;;  %vm10558_vm15 = vcmask 1043456   ;;  %v8526_v26 = vsel %vm1209_vm11, %v2555_v42, %v2556_v27  ;;  %vm10559_vm6 = vcmask 1042432   ;;  %3492 = vmatpush.msrb.mxu2 %v2911_v55 }
 0x3c1   :  { %2093 = vst [vmem:[#allocation1 + $0x2] ss:$9 sm:$0xff] %v2019_v36  ;;  %v8487_v36 = vsel %vm10550_vm0, %v2523_v57, %v2524_v53  ;;  %v2503_v52 = vsel %vm530_vm7, %v2501_v18, %v2502_v13  ;;  %v2851_v57 = vld [vmem:[#allocation7 + $0x1f0] sm:$0xff]  ;;  %v2505_v34 = vsel %vm1209_vm11, %v2504_v45, %v8464_v22  ;;  %v2817_v18 = vld [vmem:[#allocation7 + $0xe0] sm:$0xff]  ;;  %v8523_v49 = vsel %vm10558_vm15, %v8410_v11, %v2499_v50  ;;  %vm10560_vm0 = vmmov %vm10558_vm15 }
 0x3c2   :  { %v2883_v53 = vld [vmem:[#allocation7 + $0x2f0] sm:$0xff]  ;;  %3438 = vmatpush.msrb.mxu0 %v2851_v57  ;;  %v2849_v13 = vld [vmem:[#allocation7 + $0x1e0] sm:$0xff]  ;;  %v2205_v57 = vsel %vm10559_vm6, %v8323_v39, 0.0  ;;  %v8533_v16 = vsel %vm10560_vm0, %v2503_v52, %v2505_v34  ;;  %vm10561_vm2 = vcmask 1046533   ;;  %3413 = vmatpush.msrb.mxu3 %v2817_v18  ;;  %vm2513_vm3 = vcmask 1044481  }
 0x3c3   :  { %v2881_v45 = vld [vmem:[#allocation7 + $0x2e0] sm:$0xff]  ;;  %3464 = vmatpush.msrb.mxu1 %v2883_v53  ;;  %v2512_v38 = vsel %vm10561_vm2, %v2510_v35, %v2511_v61  ;;  %v2815_v11 = vld [vmem:[#allocation7 + $0xd0] sm:$0xff]  ;;  %v2197_v42 = vadd.f32 %v2196_v12, %v2195_v54  ;;  %vm10562_vm10 = vcmask 1042433   ;;  %vm10563_vm4 = vmmov %vm10561_vm2  ;;  %vm2529_vm13 = vcmask 1045506   ;;  %3493 = vmatpush.msrb.mxu2 %v2909_v0 }
 0x3c4   :  { %3439 = vmatpush.msrb.mxu0 %v2849_v13  ;;  %v2847_v50 = vld [vmem:[#allocation7 + $0x1d0] sm:$0xff]  ;;  %v2518_v27 = vsel %vm10562_vm10, %v2516_v59, %v2517_v7  ;;  %v2520_v53 = vsel %vm10563_vm4, %v2519_v29, %v8464_v22  ;;  %v2204_v1 = vadd.f32 %v2203_v62, %v2202_v10  ;;  %vm10564_vm9 = vcmask 1046534   ;;  %3414 = vmatpush.msrb.mxu3 %v2815_v11  ;;  %v2813_v12 = vld [vmem:[#allocation7 + $0xc0] sm:$0xff] }
 0x3c5   :  { %3465 = vmatpush.msrb.mxu1 %v2881_v45  ;;  %v2879_v39 = vld [vmem:[#allocation7 + $0x2d0] sm:$0xff]  ;;  %v2526_v52 = vsel %vm10564_vm9, %v8427_v24, %v8429_v60  ;;  %v2527_v54 = vsel %vm572_vm8, %v8431_v15, %v8433_v28  ;;  %v2845_v34 = vld [vmem:[#allocation7 + $0x1c0] sm:$0xff]  ;;  %v2206_v35 = vrot.slane %v2205_v57, 4  ;;  %vm10565_vm5 = vcmask 1042434   ;;  %vm10567_vm6 = vmmov %vm10564_vm9 }
 0x3c6   :  { %3440 = vmatpush.msrb.mxu0 %v2847_v50  ;;  %v2532_v10 = vsel %vm10565_vm5, %v8381_v20, %v8435_v19  ;;  %vm10566_vm14 = vcmask 1044484   ;;  %vm2545_vm15 = vcmask 1046531   ;;  %v2288_v62 = vmul.f32 %v8326_v41, %v2183_v8  ;;  %3415 = vmatpush.msrb.mxu3 %v2813_v12  ;;  %v2811_v29 = vld [vmem:[#allocation7 + $0xb0] sm:$0xff] }
 0x3c7   :  { %v2533_v61 = vsel %vm10566_vm14, %v8437_v25, %v8439_v56  ;;  %3466 = vmatpush.msrb.mxu1 %v2879_v39  ;;  %v2289_v59 = vmul.f32 %v8326_v41, %v2190_v9  ;;  %v2535_v7 = vsel %vm10567_vm6, %v8443_v43, %v8445_v48  ;;  %v2843_v18 = vld [vmem:[#allocation7 + $0x1b0] sm:$0xff]  ;;  %v2290_v45 = vmul.f32 %v8326_v41, %v2197_v42 }
 0x3c8   :  { %v8528_v14 = vld [vmem:[#allocation1] sm:$0xff]  ;;  %3441 = vmatpush.msrb.mxu0 %v2845_v34  ;;  %v2373_v11 = vrot.slane %v8499_v47, 4  ;;  %v8567_v8 = vsel %vm2513_vm3, %v8484_v4, %v2512_v38  ;;  %v8570_v9 = vsel %vm2513_vm3, %v2518_v27, %v2520_v53  ;;  %v2291_v39 = vmul.f32 %v8326_v41, %v2204_v1  ;;  %3416 = vmatpush.msrb.mxu3 %v2811_v29  ;;  %v2809_v34 = vld [vmem:[#allocation7 + $0xa0] sm:$0xff] }
 0x3c9   :  { %2095 = vst [vmem:[#allocation1] ss:$9 sm:$0xff] %v8342_v63  ;;  %v2875_v13 = vld [vmem:[#allocation7 + $0x2b0] sm:$0xff]  ;;  %3467 = vmatpush.msrb.mxu1 %v2877_v58  ;;  %v2385_v55 = vrot.slane %v8499_v47, 5  ;;  %vm10568_vm0 = vcmask 1045504   ;;  %vm10569_vm2 = vcmask 1043458   ;;  %v8576_v38 = vadd.f32 %v2206_v35, %v2205_v57 }
 0x3ca   :  { %2096 = vst [vmem:[#allocation1 + $0x1] ss:$9 sm:$0xff] %v2020_v32  ;;  %v2359_v32 = vrot.slane %v8499_v47, 2  ;;  %v2907_v50 = vld [vmem:[#allocation7 + $0x3b0] sm:$0xff]  ;;  %v2528_v12 = vsel %vm10568_vm0, %v2527_v54, %v2526_v52  ;;  %v2534_v42 = vsel %vm10569_vm2, %v2532_v10, %v2533_v61  ;;  %3442 = vmatpush.msrb.mxu0 %v2843_v18  ;;  %v2873_v4 = vld [vmem:[#allocation7 + $0x2a0] sm:$0xff]  ;;  %v2397_v27 = vrot.slane %v8499_v47, 6  ;;  %vm10570_vm10 = vmmov %vm10568_vm0  ;;  %3417 = vmatpush.msrb.mxu3 %v2809_v34 }
 0x3cb   :  { %2097 = vst [vmem:[#allocation1 + $0x2] ss:$9 sm:$0xff] %v2021_v30  ;;  %v2363_v30 = vrot.slane %v8499_v47, 3  ;;  %v2536_v53 = vsel %vm10570_vm10, %v8464_v22, %v2535_v7  ;;  %vm10571_vm4 = vcmask 1046528   ;;  %3468 = vmatpush.msrb.mxu1 %v2875_v13  ;;  %3494 = vmatpush.msrb.mxu2 %v2907_v50  ;;  %v2905_v52 = vld [vmem:[#allocation7 + $0x3a0] sm:$0xff]  ;;  %v2325_v54 = vsel %vm1187_vm1, %v2289_v59, %v2288_v62  ;;  %v2807_v10 = vld [vmem:[#allocation7 + $0x90] sm:$0xff]  ;;  %vm10576_vm2 = vmmov %vm10565_vm5 }
 0x3cc   :  { %v2542_v1 = vsel %vm10571_vm4, %v8429_v60, %v8427_v24  ;;  %v2409_v58 = vrot.slane %v8499_v47, 7  ;;  %v2543_v57 = vsel %vm1187_vm1, %v8431_v15, %v8433_v28  ;;  %vm10572_vm9 = vcmask 1043459   ;;  %3443 = vmatpush.msrb.mxu0 %v2841_v40  ;;  %v2839_v61 = vld [vmem:[#allocation7 + $0x190] sm:$0xff]  ;;  %vm10574_vm6 = vmmov %vm10571_vm4  ;;  %3418 = vmatpush.msrb.mxu3 %v2807_v10  ;;  %v2805_v34 = vld [vmem:[#allocation7 + $0x80] sm:$0xff] }
 0x3cd   :  { %v2548_v35 = vsel %vm10572_vm9, %v8381_v20, %v8435_v19  ;;  %v2871_v0 = vld [vmem:[#allocation7 + $0x290] sm:$0xff]  ;;  %v2326_v7 = vsel %vm10565_vm5, %v2290_v45, %v2325_v54  ;;  %v8595_v62 = vrot.slane %v2355_v46, 7  ;;  %vm10573_vm14 = vcmask 1045509   ;;  %3469 = vmatpush.msrb.mxu1 %v2873_v4  ;;  %3495 = vmatpush.msrb.mxu2 %v2905_v52  ;;  %vm10575_vm0 = vmmov %vm10572_vm9  ;;  %v2837_v4 = vld [vmem:[#allocation7 + $0x180] sm:$0xff] }
 0x3ce   :  { %v2549_v59 = vsel %vm10573_vm14, %v8437_v25, %v8439_v56  ;;  %v2551_v29 = vsel %vm10574_vm6, %v8445_v48, %v8443_v43  ;;  %v2903_v40 = vld [vmem:[#allocation7 + $0x390] sm:$0xff]  ;;  %v2327_v13 = vsel %vm10575_vm0, %v2291_v39, %v2326_v7  ;;  %v8606_v45 = vrot.slane %v2359_v32, 6  ;;  %3444 = vmatpush.msrb.mxu0 %v2839_v61  ;;  %3419 = vmatpush.msrb.mxu3 %v2805_v34  ;;  %v2801_v61 = vld [vmem:[#allocation7 + $0x60] sm:$0xff] }
 0x3cf   :  { %v2558_v46 = vsel %vm572_vm8, %v8427_v24, %v8429_v60  ;;  %v2559_v50 = vsel %vm10576_vm2, %v8431_v15, %v8433_v28  ;;  %v2208_v52 = vrot.slane %v8576_v38, 2  ;;  %v8617_v39 = vrot.slane %v2363_v30, 5  ;;  %3470 = vmatpush.msrb.mxu1 %v2871_v0  ;;  %3496 = vmatpush.msrb.mxu2 %v2903_v40  ;;  %v2869_v60 = vld [vmem:[#allocation7 + $0x280] sm:$0xff]  ;;  %v2899_v54 = vld [vmem:[#allocation7 + $0x370] sm:$0xff] }
 0x3d0   :  { %v8621_v32 = vsel %vm2529_vm13, %v8487_v36, %v2528_v12  ;;  %v8624_v24 = vsel %vm2529_vm13, %v2534_v42, %v2536_v53  ;;  %v2901_v15 = vld [vmem:[#allocation7 + $0x380] sm:$0xff]  ;;  %vm10577_vm10 = vcmask 1042432   ;;  %vm10578_vm4 = vcmask 1046529   ;;  %3445 = vmatpush.msrb.mxu0 %v2837_v4  ;;  %v2803_v36 = vld [vmem:[#allocation7 + $0x70] sm:$0xff] }
 0x3d1   :  { %v2544_v28 = vsel %vm10578_vm4, %v2543_v57, %v2542_v1  ;;  %vm10579_vm9 = vcmask 1044483   ;;  %v2835_v12 = vld [vmem:[#allocation7 + $0x170] sm:$0xff]  ;;  %vm10580_vm5 = vcmask 1043456   ;;  %vm10581_vm14 = vmmov %vm10578_vm4  ;;  %v2560_v1 = vsel %vm530_vm7, %v2558_v46, %v2559_v50  ;;  %3471 = vmatpush.msrb.mxu1 %v2869_v60  ;;  %3497 = vmatpush.msrb.mxu2 %v2901_v15  ;;  %v2833_v0 = vld [vmem:[#allocation7 + $0x160] sm:$0xff] }
 0x3d2   :  { %v8603_v18 = vld [vmem:[#allocation1] sm:$0xff]  ;;  %v2550_v30 = vsel %vm10579_vm9, %v2548_v35, %v2549_v59  ;;  %v8635_v53 = vsel %vm10580_vm5, %v2327_v13, 0.0  ;;  %vm10582_vm6 = vcmask 1044484   ;;  %vm10583_vm0 = vcmask 1046534   ;;  %3420 = vmatpush.msrb.mxu3 %v2803_v36  ;;  %3446 = vmatpush.msrb.mxu0 %v2835_v12  ;;  %v2865_v7 = vld [vmem:[#allocation7 + $0x260] sm:$0xff]  ;;  %vm10584_vm2 = vmmov %vm10580_vm5 }
 0x3d3   :  { %2099 = vst [vmem:[#allocation1] ss:$9 sm:$0xff] %v2022_v37  ;;  %v2212_v37 = vsel %vm10577_vm10, %v8345_v17, 0.0  ;;  %v2867_v42 = vld [vmem:[#allocation7 + $0x270] sm:$0xff]  ;;  %v2552_v17 = vsel %vm10581_vm14, %v8464_v22, %v2551_v29  ;;  %v2563_v35 = vsel %vm10582_vm6, %v8381_v20, %v8435_v19  ;;  %v2566_v10 = vsel %vm572_vm8, %v8443_v43, %v8445_v48  ;;  %3498 = vmatpush.msrb.mxu2 %v2899_v54  ;;  %v2897_v19 = vld [vmem:[#allocation7 + $0x360] sm:$0xff]  ;;  %vm10586_vm4 = vmmov %vm10584_vm2 }
 0x3d4   :  { %2100 = vst [vmem:[#allocation1 + $0x1] ss:$9 sm:$0xff] %v2023_v33  ;;  %v2213_v59 = vrot.slane %v2212_v37, 4  ;;  %v8655_v20 = vsel %vm2545_vm15, %v8490_v23, %v2544_v28  ;;  %3472 = vmatpush.msrb.mxu1 %v2867_v42  ;;  %v8662_v43 = vsel %vm2545_vm15, %v2550_v30, %v2552_v17  ;;  %v8666_v48 = vsel %vm10584_vm2, %v2560_v1, %v8526_v26  ;;  %v2799_v13 = vld [vmem:[#allocation7 + $0x50] sm:$0xff]  ;;  %v2797_v30 = vld [vmem:[#allocation7 + $0x40] sm:$0xff]  ;;  %vm10587_vm9 = vmmov %vm10584_vm2 }
 0x3d5   :  { %2101 = vst [vmem:[#allocation1 + $0x2] ss:$9 sm:$0xff] %v2024_v3  ;;  %v2564_v3 = vsel %vm10583_vm0, %v8437_v25, %v8439_v56  ;;  %v8658_v25 = vadd.f32 %v2208_v52, %v8576_v38  ;;  %v2374_v56 = vrot.slane %v8635_v53, 4  ;;  %3421 = vmatpush.msrb.mxu3 %v2801_v61  ;;  %3447 = vmatpush.msrb.mxu0 %v2833_v0  ;;  %v2831_v23 = vld [vmem:[#allocation7 + $0x150] sm:$0xff]  ;;  %v2386_v50 = vrot.slane %v8635_v53, 5  ;;  %v2829_v36 = vld [vmem:[#allocation7 + $0x140] sm:$0xff]  ;;  %vm10593_vm0 = vmmov %vm10584_vm2 }
 0x3d6   :  { %v2863_v46 = vld [vmem:[#allocation7 + $0x250] sm:$0xff]  ;;  %v2398_v34 = vrot.slane %v8635_v53, 6  ;;  %v2565_v38 = vsel %vm1209_vm11, %v2563_v35, %v2564_v3  ;;  %v2567_v4 = vsel %vm530_vm7, %v2566_v10, %v8464_v22  ;;  %3473 = vmatpush.msrb.mxu1 %v2865_v7  ;;  %3499 = vmatpush.msrb.mxu2 %v2897_v19  ;;  %v2410_v26 = vrot.slane %v8635_v53, 7  ;;  %v2861_v22 = vld [vmem:[#allocation7 + $0x240] sm:$0xff] }
 0x3d7   :  { %v2895_v52 = vld [vmem:[#allocation7 + $0x350] sm:$0xff]  ;;  %v2570_v15 = vsel %vm572_vm8, %v8499_v47, %v8595_v62  ;;  %vm10585_vm10 = vcmask 1042434   ;;  %3422 = vmatpush.msrb.mxu3 %v2799_v13  ;;  %3448 = vmatpush.msrb.mxu0 %v2831_v23  ;;  %v8681_v12 = vadd.f32 %v2213_v59, %v2212_v37  ;;  %v8688_v1 = vsel %vm1187_vm1, %v8499_v47, %v8595_v62  ;;  %v2893_v54 = vld [vmem:[#allocation7 + $0x340] sm:$0xff] }
 0x3d8   :  { %v2571_v28 = vsel %vm10585_vm10, %v8606_v45, %v8617_v39  ;;  %3474 = vmatpush.msrb.mxu1 %v2863_v46  ;;  %3500 = vmatpush.msrb.mxu2 %v2895_v52  ;;  %v2210_v3 = vrot.slane %v8658_v25, 1  ;;  %v2375_v37 = vsel %vm10586_vm4, %v2373_v11, %v2374_v56  ;;  %v8697_v10 = vsel %vm10587_vm9, %v2567_v4, %v2565_v38  ;;  %v2795_v0 = vld [vmem:[#allocation7 + $0x30] sm:$0xff]  ;;  %vm10592_vm6 = vmmov %vm10585_vm10  ;;  %v2793_v52 = vld [vmem:[#allocation7 + $0x20] sm:$0xff] }
 0x3d9   :  { %10588 = vst [vmem:[#allocation25_spill] sm:$0xff] %v8697_v10  ;;  %vm10589_vm5 = vcmask 1043459   ;;  %3423 = vmatpush.msrb.mxu3 %v2797_v30  ;;  %3449 = vmatpush.msrb.mxu0 %v2829_v36  ;;  %v2827_v7 = vld [vmem:[#allocation7 + $0x130] sm:$0xff]  ;;  %vm10590_vm14 = vcmask 1042432   ;;  %v2399_v11 = vsel %vm530_vm7, %v2397_v27, %v2398_v34  ;;  %v2419_v19 = vrot.slane %v8635_v53, 1  ;;  %v2885_v40 = vld [vmem:[#allocation7 + $0x300] sm:$0xff] }
 0x3da   :  { %v8702_v61 = vsel %vm10589_vm5, %v8606_v45, %v8617_v39  ;;  %v2387_v59 = vsel %vm10590_vm14, %v2385_v55, %v2386_v50  ;;  %v8716_v13 = vsel %vm530_vm7, %v2570_v15, %v2571_v28  ;;  %3475 = vmatpush.msrb.mxu1 %v2861_v22  ;;  %v2859_v23 = vld [vmem:[#allocation7 + $0x230] sm:$0xff]  ;;  %v2411_v55 = vsel %vm572_vm8, %v2409_v58, %v2410_v26  ;;  %v2825_v15 = vld [vmem:[#allocation7 + $0x120] sm:$0xff]  ;;  %vm10594_vm2 = vmmov %vm10590_vm14 }
 0x3db   :  { %v2891_v46 = vld [vmem:[#allocation7 + $0x330] sm:$0xff]  ;;  %v2423_v38 = vrot.slane %v8635_v53, 2  ;;  %v2427_v4 = vrot.slane %v8635_v53, 3  ;;  %v2598_v27 = vsel %vm10592_vm6, %v8499_v47, %v8595_v62  ;;  %3501 = vmatpush.msrb.mxu2 %v2893_v54  ;;  %3424 = vmatpush.msrb.mxu3 %v2795_v0  ;;  %v2431_v28 = vsel %vm10593_vm0, %v2374_v56, %v6813_v5  ;;  %vm10595_vm10 = vmmov %vm10594_vm2  ;;  %v2857_v0 = vld [vmem:[#allocation7 + $0x220] sm:$0xff] }
 0x3dc   :  { %v8690_v35 = vld [vmem:[#allocation1] sm:$0xff]  ;;  %v2435_v58 = vsel %vm10594_vm2, %v2386_v50, %v6852_v31  ;;  %v8734_v26 = vrot.slane %v2375_v37, 4  ;;  %3450 = vmatpush.msrb.mxu0 %v2827_v7  ;;  %3476 = vmatpush.msrb.mxu1 %v2859_v23  ;;  %v2219_v30 = vsel %vm10595_vm10, %v8391_v51, 0.0  ;;  %v2211_v36 = vadd.f32 %v2210_v3, %v8658_v25  ;;  %v2889_v56 = vld [vmem:[#allocation7 + $0x320] sm:$0xff]  ;;  %vm10596_vm4 = vmmov %vm10594_vm2 }
 0x3dd   :  { %2103 = vst [vmem:[#allocation1] ss:$9 sm:$0xff] %v2025_v21  ;;  %v10591_v21 = vrot.slane %v8342_v63, 7  ;;  %v2215_v63 = vrot.slane %v8681_v12, 2  ;;  %v8739_v22 = vrot.slane %v2387_v59, 3  ;;  %v8741_v54 = vrot.slane %v2399_v11, 2  ;;  %3502 = vmatpush.msrb.mxu2 %v2891_v46  ;;  %3425 = vmatpush.msrb.mxu3 %v2793_v52  ;;  %vm10598_vm5 = vmmov %vm10594_vm2 }
 0x3de   :  { %2105 = vst [vmem:[#allocation1 + $0x2] ss:$9 sm:$0xff] %v8281_v44  ;;  %v2226_v50 = vsel %vm10596_vm4, %v8441_v6, 0.0  ;;  %v8745_v37 = vrot.slane %v2411_v55, 1  ;;  %v8747_v7 = vrot.slane %v2419_v19, 7  ;;  %vm10597_vm9 = vcmask 1044484   ;;  %3451 = vmatpush.msrb.mxu0 %v2825_v15  ;;  %3477 = vmatpush.msrb.mxu1 %v2857_v0 }
 0x3df   :  { %2104 = vst [vmem:[#allocation1 + $0x1] ss:$9 sm:$0xff] %v10591_v21  ;;  %v2791_v21 = vld [vmem:[#allocation7 + $0x10] sm:$0xff]  ;;  %v2599_v51 = vsel %vm10597_vm9, %v8606_v45, %v8617_v39  ;;  %v2233_v11 = vsel %vm10598_vm5, %v8528_v14, 0.0  ;;  %v2439_v6 = vsel %vm530_vm7, %v2398_v34, %v6906_v2  ;;  %v8758_v23 = vrot.slane %v2423_v38, 6  ;;  %3503 = vmatpush.msrb.mxu2 %v2889_v56  ;;  %v2789_v46 = vld [vmem:[#allocation7] sm:$0xff]  ;;  %vm10603_vm10 = vmmov %vm10597_vm9 }
 0x3e0   :  { %v2823_v25 = vld [vmem:[#allocation7 + $0x110] sm:$0xff]  ;;  %v8760_v19 = vrot.slane %v2427_v4, 5  ;;  %3426 = vmatpush.msrb.mxu3 %v2791_v21  ;;  %v2821_v55 = vld [vmem:[#allocation7 + $0x100] sm:$0xff]  ;;  %v2216_v15 = vadd.f32 %v2215_v63, %v8681_v12  ;;  %v2220_v0 = vrot.slane %v2219_v30, 4  ;;  %v8763_v42 = vrot.slane %v2431_v28, 4  ;;  %vm10607_vm5 = vmmov %vm10603_vm10 }
 0x3e1   :  { %v2855_v3 = vld [vmem:[#allocation7 + $0x210] sm:$0xff]  ;;  %v2853_v52 = vld [vmem:[#allocation7 + $0x200] sm:$0xff]  ;;  %v8765_v14 = vrot.slane %v2435_v58, 3  ;;  %3452 = vmatpush.msrb.mxu0 %v2823_v25  ;;  %v2227_v38 = vrot.slane %v2226_v50, 4  ;;  %v2292_v4 = vmul.f32 %v8326_v41, %v2211_v36  ;;  %vm10599_vm14 = vcmask 1042433  }
 0x3e2   :  { %v2887_v59 = vld [vmem:[#allocation7 + $0x310] sm:$0xff]  ;;  %3478 = vmatpush.msrb.mxu1 %v2855_v3  ;;  %v8772_v21 = vsel %vm10599_vm14, %v8688_v1, %v8702_v61  ;;  %3427 = vmatpush.msrb.mxu3 %v2789_v46  ;;  %v2234_v63 = vrot.slane %v2233_v11, 4  ;;  %vm10600_vm6 = vcmask 1043458   ;;  %vm10601_vm0 = vcmask 1043459   ;;  %v2977_v17 = vld [vmem:[#allocation7 + $0x5e0] sm:$0xff] }
 0x3e3   :  { %v2947_v34 = vld [vmem:[#allocation7 + $0x4f0] sm:$0xff]  ;;  %3504 = vmatpush.msrb.mxu2 %v2887_v59  ;;  %v8775_v28 = vsel %vm10600_vm6, %v2598_v27, %v2599_v51  ;;  %v2613_v58 = vsel %vm10601_vm0, %v8499_v47, %v8595_v62  ;;  %vm10602_vm2 = vcmask 1045509   ;;  %3453 = vmatpush.msrb.mxu0 %v2821_v55  ;;  %v8783_v61 = vrot.slane %v2439_v6, 2  ;;  %vm10610_vm6 = vmmov %vm10607_vm5 }
 0x3e4   :  { %v2979_v12 = vld [vmem:[#allocation7 + $0x5f0] sm:$0xff]  ;;  %v2614_v36 = vsel %vm10602_vm2, %v8606_v45, %v8617_v39  ;;  %3479 = vmatpush.msrb.mxu1 %v2853_v52  ;;  %v2573_v3 = vsel %vm10603_vm10, %v8734_v26, %v8739_v22  ;;  %vm10604_vm4 = vcmask 1046534   ;;  %v2577_v51 = vsel %vm572_vm8, %v8635_v53, %v8747_v7  ;;  %3516 = vmatpush.msra.mxu3 %v2947_v34 }
 0x3e5   :  { %v3011_v25 = vld [vmem:[#allocation7 + $0x6f0] sm:$0xff]  ;;  %v2574_v27 = vsel %vm10604_vm4, %v8741_v54, %v8745_v37  ;;  %3505 = vmatpush.msrb.mxu2 %v2885_v40  ;;  %v10605_v59 = vrot.slane %v8281_v44, 1  ;;  %v2217_v46 = vrot.slane %v2216_v15, 1  ;;  %v2221_v6 = vadd.f32 %v2220_v0, %v2219_v30  ;;  %3542 = vmatpush.msra.mxu0 %v2979_v12  ;;  %vm10611_vm0 = vmmov %vm10604_vm4 }
 0x3e6   :  { %v2106_v1 = vld [vmem:[#allocation1] sm:$0xff]  ;;  %vm10606_vm9 = vcmask 1042434   ;;  %v2580_v52 = vsel %vm10607_vm5, %v8763_v42, %v8765_v14  ;;  %v10608_v57 = vrot.slane %v8281_v44, 2  ;;  %v2228_v40 = vadd.f32 %v2227_v38, %v2226_v50  ;;  %3568 = vmatpush.msra.mxu1 %v3011_v25 }
 0x3e7   :  { %2107 = vst [vmem:[#allocation1] ss:$9 sm:$0xff] %v10605_v59  ;;  %v2578_v55 = vsel %vm10606_vm9, %v8758_v23, %v8760_v19  ;;  %v3043_v56 = vld [vmem:[#allocation7 + $0x7f0] sm:$0xff]  ;;  %vm10609_vm14 = vcmask 1046528   ;;  %v2628_v30 = vsel %vm10610_vm6, %v8499_v47, %v8595_v62  ;;  %v2629_v0 = vsel %vm10611_vm0, %v8606_v45, %v8617_v39  ;;  %v2945_v59 = vld [vmem:[#allocation7 + $0x4e0] sm:$0xff]  ;;  %3543 = vmatpush.msra.mxu0 %v2977_v17 }
 0x3e8   :  { %2108 = vst [vmem:[#allocation1 + $0x1] ss:$9 sm:$0xff] %v10608_v57  ;;  %v8805_v34 = vsel %vm10609_vm14, 0.0, %v2292_v4  ;;  %v10612_v12 = vrot.slane %v8281_v44, 3  ;;  %vm10613_vm2 = vcmask 1042432   ;;  %v2235_v50 = vadd.f32 %v2234_v63, %v2233_v11  ;;  %vm10615_vm4 = vmmov %vm10609_vm14  ;;  %v3009_v62 = vld [vmem:[#allocation7 + $0x6e0] sm:$0xff]  ;;  %3594 = vmatpush.msra.mxu2 %v3043_v56  ;;  %3517 = vmatpush.msra.mxu3 %v2945_v59 }
 0x3e9   :  { %v2254_v57 = vsel %vm10613_vm2, %v2106_v1, 0.0  ;;  %vm10614_vm10 = vcmask 1045509   ;;  %v2587_v47 = vsel %vm10615_vm4, %v8745_v37, %v8741_v54  ;;  %v3041_v4 = vld [vmem:[#allocation7 + $0x7e0] sm:$0xff]  ;;  %v2575_v45 = vsel %vm1209_vm11, %v2573_v3, %v2574_v27  ;;  %v2943_v11 = vld [vmem:[#allocation7 + $0x4d0] sm:$0xff]  ;;  %vm10617_vm5 = vmmov %vm10613_vm2  ;;  %3569 = vmatpush.msra.mxu1 %v3009_v62 }
 0x3ea   :  { %2109 = vst [vmem:[#allocation1 + $0x2] ss:$9 sm:$0xff] %v10612_v12  ;;  %v2586_v38 = vsel %vm10614_vm10, %v8734_v26, %v8739_v22  ;;  %v2579_v39 = vsel %vm530_vm7, %v2577_v51, %v2578_v55  ;;  %v2581_v25 = vsel %vm1209_vm11, %v2580_v52, %v8783_v61  ;;  %vm10616_vm9 = vcmask 1044483   ;;  %v2975_v63 = vld [vmem:[#allocation7 + $0x5d0] sm:$0xff]  ;;  %3595 = vmatpush.msra.mxu2 %v3041_v4  ;;  %vm10623_vm4 = vmmov %vm10617_vm5 }
 0x3eb   :  { %v8827_v1 = vsel %vm10616_vm9, %v2613_v58, %v2614_v36  ;;  %v2247_v12 = vsel %vm10617_vm5, %v8690_v35, 0.0  ;;  %v2218_v60 = vadd.f32 %v2217_v46, %v2216_v15  ;;  %v2222_v29 = vrot.slane %v2221_v6, 2  ;;  %v3007_v3 = vld [vmem:[#allocation7 + $0x6d0] sm:$0xff]  ;;  %v2941_v36 = vld [vmem:[#allocation7 + $0x4c0] sm:$0xff]  ;;  %3518 = vmatpush.msra.mxu3 %v2943_v11  ;;  %3544 = vmatpush.msra.mxu0 %v2975_v63  ;;  %vm10626_vm5 = vmmov %vm10623_vm4 }
 0x3ec   :  { %v8832_v33 = vsel %vm1209_vm11, %v2628_v30, %v2629_v0  ;;  %v3039_v27 = vld [vmem:[#allocation7 + $0x7d0] sm:$0xff]  ;;  %v2229_v51 = vrot.slane %v2228_v40, 2  ;;  %v2255_v55 = vrot.slane %v2254_v57, 4  ;;  %vm10618_vm14 = vcmask 1046533   ;;  %v2973_v46 = vld [vmem:[#allocation7 + $0x5c0] sm:$0xff]  ;;  %3570 = vmatpush.msra.mxu1 %v3007_v3 }
 0x3ed   :  { %v2588_v56 = vsel %vm10618_vm14, %v2586_v38, %v2587_v47  ;;  %v2236_v52 = vrot.slane %v2235_v50, 2  ;;  %vm10619_vm6 = vcmask 1043456   ;;  %v3005_v30 = vld [vmem:[#allocation7 + $0x6c0] sm:$0xff]  ;;  %v2248_v0 = vrot.slane %v2247_v12, 4  ;;  %3596 = vmatpush.msra.mxu2 %v3039_v27  ;;  %3519 = vmatpush.msra.mxu3 %v2941_v36  ;;  %v2971_v11 = vld [vmem:[#allocation7 + $0x5b0] sm:$0xff] }
 0x3ee   :  { %v8839_v15 = vsel %vm10619_vm6, %v8716_v13, %v2575_v45  ;;  %vm10620_vm0 = vmmov %vm10619_vm6  ;;  %v2591_v59 = vsel %vm1187_vm1, %v8635_v53, %v8747_v7  ;;  %vm10622_vm2 = vcmask 1043459   ;;  %v2594_v13 = vsel %vm10614_vm10, %v8763_v42, %v8765_v14  ;;  %v3037_v47 = vld [vmem:[#allocation7 + $0x7c0] sm:$0xff]  ;;  %3545 = vmatpush.msra.mxu0 %v2973_v46  ;;  %3571 = vmatpush.msra.mxu1 %v3005_v30  ;;  %v3035_v27 = vld [vmem:[#allocation7 + $0x7b0] sm:$0xff] }
 0x3ef   :  { %v8842_v17 = vsel %vm10620_vm0, %v2579_v39, %v2581_v25  ;;  %v2592_v38 = vsel %vm10622_vm2, %v8758_v23, %v8760_v19  ;;  %v2240_v62 = vsel %vm10623_vm4, %v8603_v18, 0.0  ;;  %v2223_v4 = vadd.f32 %v2222_v29, %v2221_v6  ;;  %v2939_v25 = vld [vmem:[#allocation7 + $0x4b0] sm:$0xff]  ;;  %3597 = vmatpush.msra.mxu2 %v3037_v47 }
 0x3f0   :  { %10621 = vst [vmem:[#allocation26_spill] sm:$0xff] %v8842_v17  ;;  %v8856_v45 = vmul.f32 %v8326_v41, %v2218_v60  ;;  %v8860_v39 = vsel %vm2513_vm3, %v8772_v21, %v2588_v56  ;;  %v2230_v35 = vadd.f32 %v2229_v51, %v2228_v40  ;;  %v2256_v58 = vadd.f32 %v2255_v55, %v2254_v57  ;;  %v3003_v57 = vld [vmem:[#allocation7 + $0x6b0] sm:$0xff] }
 0x3f1   :  { %v2110_v63 = vld [vmem:[#allocation1] sm:$0xff]  ;;  %vm10624_vm9 = vcmask 1046534   ;;  %v10625_v29 = vrot.slane %v8281_v44, 4  ;;  %v2237_v21 = vadd.f32 %v2236_v52, %v2235_v50  ;;  %v2602_v6 = vsel %vm572_vm8, %v8741_v54, %v8745_v37  ;;  %3520 = vmatpush.msra.mxu3 %v2939_v25  ;;  %3546 = vmatpush.msra.mxu0 %v2971_v11  ;;  %v2937_v52 = vld [vmem:[#allocation7 + $0x4a0] sm:$0xff] }
 0x3f2   :  { %v2601_v18 = vsel %vm10624_vm9, %v8734_v26, %v8739_v22  ;;  %v2261_v60 = vsel %vm10626_vm5, %v2110_v63, 0.0  ;;  %vm10627_vm14 = vcmask 1042434   ;;  %v10628_v51 = vrot.slane %v8281_v44, 5  ;;  %vm10632_vm2 = vmmov %vm10624_vm9  ;;  %3572 = vmatpush.msra.mxu1 %v3003_v57  ;;  %3598 = vmatpush.msra.mxu2 %v3035_v27  ;;  %v2935_v31 = vld [vmem:[#allocation7 + $0x490] sm:$0xff] }
 0x3f3   :  { %2111 = vst [vmem:[#allocation1] ss:$9 sm:$0xff] %v10625_v29  ;;  %v2606_v40 = vsel %vm10627_vm14, %v8635_v53, %v8747_v7  ;;  %v2241_v55 = vrot.slane %v2240_v62, 4  ;;  %v2249_v56 = vadd.f32 %v2248_v0, %v2247_v12  ;;  %v2262_v36 = vrot.slane %v2261_v60, 4  ;;  %v2969_v0 = vld [vmem:[#allocation7 + $0x5a0] sm:$0xff]  ;;  %3521 = vmatpush.msra.mxu3 %v2937_v52  ;;  %v2967_v57 = vld [vmem:[#allocation7 + $0x590] sm:$0xff] }
 0x3f4   :  { %2112 = vst [vmem:[#allocation1 + $0x1] ss:$9 sm:$0xff] %v10628_v51  ;;  %vm10629_vm6 = vcmask 1044484   ;;  %v10630_v46 = vrot.slane %v8281_v44, 6  ;;  %v2224_v30 = vrot.slane %v2223_v4, 1  ;;  %vm10631_vm0 = vcmask 1042433   ;;  %3547 = vmatpush.msra.mxu0 %v2969_v0 }
 0x3f5   :  { %v2607_v50 = vsel %vm10629_vm6, %v8758_v23, %v8760_v19  ;;  %v2593_v47 = vsel %vm10631_vm0, %v2591_v59, %v2592_v38  ;;  %v2609_v63 = vsel %vm10632_vm2, %v8763_v42, %v8765_v14  ;;  %vm10633_vm10 = vcmask 1046528   ;;  %v3001_v29 = vld [vmem:[#allocation7 + $0x6a0] sm:$0xff]  ;;  %v2999_v27 = vld [vmem:[#allocation7 + $0x690] sm:$0xff]  ;;  %3522 = vmatpush.msra.mxu3 %v2935_v31 }
 0x3f6   :  { %2113 = vst [vmem:[#allocation1 + $0x2] ss:$9 sm:$0xff] %v10630_v46  ;;  %v2616_v12 = vsel %vm10633_vm10, %v8739_v22, %v8734_v26  ;;  %v2231_v51 = vrot.slane %v2230_v35, 1  ;;  %v2257_v25 = vrot.slane %v2256_v58, 2  ;;  %v2263_v11 = vadd.f32 %v2262_v36, %v2261_v60  ;;  %v3033_v59 = vld [vmem:[#allocation7 + $0x7a0] sm:$0xff]  ;;  %3573 = vmatpush.msra.mxu1 %v3001_v29  ;;  %3548 = vmatpush.msra.mxu0 %v2967_v57 }
 0x3f7   :  { %v2617_v44 = vsel %vm1187_vm1, %v8741_v54, %v8745_v37  ;;  %v2238_v38 = vrot.slane %v2237_v21, 1  ;;  %vm10634_vm4 = vcmask 1046533   ;;  %vm10635_vm9 = vcmask 1045504   ;;  %3599 = vmatpush.msra.mxu2 %v3033_v59 }
 0x3f8   :  { %v2595_v46 = vsel %vm10634_vm4, %v2594_v13, %v8783_v61  ;;  %v2603_v3 = vsel %vm10635_vm9, %v2602_v6, %v2601_v18  ;;  %vm10636_vm5 = vcmask 1043458   ;;  %v8896_v5 = vadd.f32 %v2241_v55, %v2240_v62  ;;  %vm10637_vm14 = vmmov %vm10635_vm9  ;;  %v3031_v6 = vld [vmem:[#allocation7 + $0x790] sm:$0xff]  ;;  %3574 = vmatpush.msra.mxu1 %v2999_v27 }
 0x3f9   :  { %v2608_v2 = vsel %vm10636_vm5, %v2606_v40, %v2607_v50  ;;  %v2250_v60 = vrot.slane %v2249_v56, 2  ;;  %v2264_v36 = vrot.slane %v2263_v11, 2  ;;  %v2610_v17 = vsel %vm10637_vm14, %v8783_v61, %v2609_v63  ;;  %v2933_v40 = vld [vmem:[#allocation7 + $0x480] sm:$0xff]  ;;  %3600 = vmatpush.msra.mxu2 %v3031_v6 }
 0x3fa   :  { %v2225_v10 = vadd.f32 %v2224_v30, %v2223_v4  ;;  %vm10638_vm6 = vcmask 1046529   ;;  %vm10639_vm0 = vcmask 1043459   ;;  %vm10640_vm2 = vcmask 1045509   ;;  %v2965_v30 = vld [vmem:[#allocation7 + $0x580] sm:$0xff]  ;;  %3523 = vmatpush.msra.mxu3 %v2933_v40 }
 0x3fb   :  { %v2618_v13 = vsel %vm10638_vm6, %v2617_v44, %v2616_v12  ;;  %v2621_v18 = vsel %vm10639_vm0, %v8635_v53, %v8747_v7  ;;  %v2622_v62 = vsel %vm10640_vm2, %v8758_v23, %v8760_v19  ;;  %v2232_v55 = vadd.f32 %v2231_v51, %v2230_v35  ;;  %v2997_v63 = vld [vmem:[#allocation7 + $0x680] sm:$0xff]  ;;  %3549 = vmatpush.msra.mxu0 %v2965_v30 }
 0x3fc   :  { %v8907_v50 = vadd.f32 %v2257_v25, %v2256_v58  ;;  %v8910_v52 = vsel %vm2513_vm3, %v2593_v47, %v2595_v46  ;;  %v8914_v4 = vsel %vm2529_vm13, %v8775_v28, %v2603_v3  ;;  %v2239_v12 = vadd.f32 %v2238_v38, %v2237_v21  ;;  %v3029_v35 = vld [vmem:[#allocation7 + $0x780] sm:$0xff]  ;;  %v2931_v47 = vld [vmem:[#allocation7 + $0x470] sm:$0xff]  ;;  %3575 = vmatpush.msra.mxu1 %v2997_v63 }
 0x3fd   :  { %v8916_v0 = vadd.f32 %v2264_v36, %v2263_v11  ;;  %v10641_v29 = vrot.slane %v8805_v34, 1  ;;  %v8923_v58 = vsel %vm2529_vm13, %v2608_v2, %v2610_v17  ;;  %v2114_v51 = vld [vmem:[#allocation1] sm:$0xff]  ;;  %v2243_v28 = vrot.slane %v8896_v5, 2  ;;  %v2929_v46 = vld [vmem:[#allocation7 + $0x460] sm:$0xff]  ;;  %3601 = vmatpush.msra.mxu2 %v3029_v35  ;;  %3524 = vmatpush.msra.mxu3 %v2931_v47 }
 0x3fe   :  { %v8926_v31 = vadd.f32 %v2250_v60, %v2249_v56  ;;  %v8930_v3 = vsel %vm2545_vm15, %v8827_v1, %v2618_v13  ;;  %vm10642_vm10 = vcmask 1044483   ;;  %v2963_v2 = vld [vmem:[#allocation7 + $0x570] sm:$0xff]  ;;  %vm10643_vm4 = vcmask 1042432   ;;  %3275 = vst [vmem:[#allocation1] ss:$9 sm:$0xff] %v8523_v49  ;;  %v2993_v49 = vld [vmem:[#allocation7 + $0x660] sm:$0xff] }
 0x3ff   :  { %v8920_v44 = vrot.slane %v10641_v29, 7  ;;  %v8933_v21 = vsel %vm10642_vm10, %v2621_v18, %v2622_v62  ;;  %v2995_v17 = vld [vmem:[#allocation7 + $0x670] sm:$0xff]  ;;  %v2268_v25 = vsel %vm10643_vm4, %v2114_v51, 0.0  ;;  %v2294_v11 = vmul.f32 %v8326_v41, %v2225_v10  ;;  %3550 = vmatpush.msra.mxu0 %v2963_v2  ;;  %3525 = vmatpush.msra.mxu3 %v2929_v46  ;;  %3285 = vst [vmem:[#allocation1 + $0x5] ss:$9 sm:$0xff] %v8839_v15 }
 0x400   :  { %v10644_v59 = vrot.slane %v8805_v34, 2  ;;  %v2631_v1 = vsel %vm572_vm8, %v8734_v26, %v8739_v22  ;;  %v3027_v56 = vld [vmem:[#allocation7 + $0x770] sm:$0xff]  ;;  %v2259_v60 = vrot.slane %v8907_v50, 1  ;;  %v2269_v36 = vrot.slane %v2268_v25, 4  ;;  %v2961_v26 = vld [vmem:[#allocation7 + $0x560] sm:$0xff]  ;;  %3576 = vmatpush.msra.mxu1 %v2995_v17 }
 0x401   :  { %v2295_v57 = vmul.f32 %v8326_v41, %v2232_v55  ;;  %vm10645_vm9 = vcmask 1042434   ;;  %v10646_v27 = vrot.slane %v8567_v8, 1  ;;  %v2266_v22 = vrot.slane %v8916_v0, 1  ;;  %v3025_v8 = vld [vmem:[#allocation7 + $0x760] sm:$0xff]  ;;  %3602 = vmatpush.msra.mxu2 %v3027_v56  ;;  %v2959_v29 = vld [vmem:[#allocation7 + $0x550] sm:$0xff]  ;;  %3551 = vmatpush.msra.mxu0 %v2961_v26 }
 0x402   :  { %v8939_v38 = vrot.slane %v10644_v59, 6  ;;  %v2632_v10 = vsel %vm10645_vm9, %v8741_v54, %v8745_v37  ;;  %v2296_v13 = vmul.f32 %v8326_v41, %v2239_v12  ;;  %v10647_v18 = vrot.slane %v8805_v34, 3  ;;  %v2927_v37 = vld [vmem:[#allocation7 + $0x450] sm:$0xff]  ;;  %3577 = vmatpush.msra.mxu1 %v2993_v49  ;;  %vm10653_vm6 = vmmov %vm10645_vm9 }
 0x403   :  { %3277 = vst [vmem:[#allocation1 + $0x1] ss:$9 sm:$0xff] %v10646_v27  ;;  %vm10648_vm5 = vcmask 1046528   ;;  %v10649_v54 = vrot.slane %v8621_v32, 2  ;;  %v8964_v40 = vadd.f32 %v2243_v28, %v8896_v5  ;;  %v2252_v55 = vrot.slane %v8926_v31, 1  ;;  %v2991_v32 = vld [vmem:[#allocation7 + $0x650] sm:$0xff]  ;;  %3603 = vmatpush.msra.mxu2 %v3025_v8  ;;  %3526 = vmatpush.msra.mxu3 %v2927_v37 }
 0x404   :  { %v8956_v62 = vrot.slane %v10647_v18, 5  ;;  %v2624_v6 = vsel %vm10648_vm5, %v8765_v14, %v8763_v42  ;;  %v2270_v30 = vadd.f32 %v2269_v36, %v2268_v25  ;;  %v2590_v63 = vrot.slane %v8860_v39, 1  ;;  %v2925_v39 = vld [vmem:[#allocation7 + $0x440] sm:$0xff]  ;;  %3552 = vmatpush.msra.mxu0 %v2959_v29  ;;  %3578 = vmatpush.msra.mxu1 %v2991_v32  ;;  %v2923_v59 = vld [vmem:[#allocation7 + $0x430] sm:$0xff]  ;;  %vm10658_vm5 = vmmov %vm10653_vm6 }
 0x405   :  { %3279 = vst [vmem:[#allocation1 + $0x2] ss:$9 sm:$0xff] %v10649_v54  ;;  %v10650_v12 = vrot.slane %v8655_v20, 3  ;;  %v2328_v35 = vsel %vm1187_vm1, %v2294_v11, %v8856_v45  ;;  %v2633_v47 = vsel %vm530_vm7, %v2631_v1, %v2632_v10  ;;  %vm10651_vm14 = vcmask 1044484   ;;  %v3023_v20 = vld [vmem:[#allocation7 + $0x750] sm:$0xff]  ;;  %v2957_v25 = vld [vmem:[#allocation7 + $0x540] sm:$0xff]  ;;  %3527 = vmatpush.msra.mxu3 %v2925_v39 }
 0x406   :  { %v2636_v5 = vsel %vm10651_vm14, %v8635_v53, %v8747_v7  ;;  %v10652_v51 = vrot.slane %v8666_v48, 4  ;;  %v2260_v28 = vadd.f32 %v2259_v60, %v8907_v50  ;;  %v2271_v2 = vrot.slane %v2270_v30, 2  ;;  %v2989_v53 = vld [vmem:[#allocation7 + $0x640] sm:$0xff]  ;;  %3287 = vst [vmem:[#allocation1 + $0x6] ss:$9 sm:$0xff] %v2590_v63  ;;  %3604 = vmatpush.msra.mxu2 %v3023_v20  ;;  %v2987_v46 = vld [vmem:[#allocation7 + $0x630] sm:$0xff]  ;;  %3553 = vmatpush.msra.mxu0 %v2957_v25  ;;  %vm10659_vm14 = vmmov %vm10639_vm0 }
 0x407   :  { %3281 = vst [vmem:[#allocation1 + $0x3] ss:$9 sm:$0xff] %v10650_v12  ;;  %v2329_v17 = vsel %vm10653_vm6, %v2295_v57, %v2328_v35  ;;  %v2605_v45 = vrot.slane %v8914_v4, 2  ;;  %v2267_v48 = vadd.f32 %v2266_v22, %v8916_v0  ;;  %vm10654_vm2 = vcmask 1046534   ;;  %v3021_v50 = vld [vmem:[#allocation7 + $0x740] sm:$0xff]  ;;  %v2955_v0 = vld [vmem:[#allocation7 + $0x530] sm:$0xff]  ;;  %3579 = vmatpush.msra.mxu1 %v2989_v53  ;;  %3528 = vmatpush.msra.mxu3 %v2923_v59  ;;  %vm10660_vm6 = vmmov %vm10658_vm5 }
 0x408   :  { %3283 = vst [vmem:[#allocation1 + $0x4] ss:$9 sm:$0xff] %v10652_v51  ;;  %v2330_v7 = vsel %vm10639_vm0, %v2296_v13, %v2329_v17  ;;  %v2637_v11 = vsel %vm10654_vm2, %v8758_v23, %v8760_v19  ;;  %v2245_v4 = vrot.slane %v8964_v40, 1  ;;  %v2253_v15 = vadd.f32 %v2252_v55, %v8926_v31  ;;  %v3019_v36 = vld [vmem:[#allocation7 + $0x730] sm:$0xff]  ;;  %v2921_v57 = vld [vmem:[#allocation7 + $0x420] sm:$0xff]  ;;  %3605 = vmatpush.msra.mxu2 %v3021_v50  ;;  %vm10661_vm0 = vmmov %vm10658_vm5 }
 0x409   :  { %v2272_v1 = vadd.f32 %v2271_v2, %v2270_v30  ;;  %v2376_v56 = vrot.slane %v8805_v34, 4  ;;  %3289 = vst [vmem:[#allocation1 + $0x7] ss:$9 sm:$0xff] %v2605_v45  ;;  %v2388_v60 = vrot.slane %v8805_v34, 5  ;;  %vm10655_vm10 = vcmask 1046529   ;;  %v2985_v22 = vld [vmem:[#allocation7 + $0x620] sm:$0xff]  ;;  %3554 = vmatpush.msra.mxu0 %v2955_v0  ;;  %3580 = vmatpush.msra.mxu1 %v2987_v46  ;;  %vm10662_vm2 = vmmov %vm10659_vm14 }
 0x40a   :  { %v8993_v23 = vsel %vm10655_vm10, %v8783_v61, %v2624_v6  ;;  %vm10656_vm4 = vcmask 1043456   ;;  %v2639_v31 = vsel %vm572_vm8, %v8763_v42, %v8765_v14  ;;  %v2299_v27 = vmul.f32 %v8326_v41, %v2260_v28  ;;  %v3017_v6 = vld [vmem:[#allocation7 + $0x720] sm:$0xff]  ;;  %v2919_v54 = vld [vmem:[#allocation7 + $0x410] sm:$0xff]  ;;  %3606 = vmatpush.msra.mxu2 %v3019_v36  ;;  %3529 = vmatpush.msra.mxu3 %v2921_v57 }
 0x40b   :  { %v8997_v19 = vsel %vm10656_vm4, %v2633_v47, %v8832_v33  ;;  %v2273_v10 = vrot.slane %v2272_v1, 1  ;;  %vm10657_vm9 = vmmov %vm10656_vm4  ;;  %v2643_v49 = vsel %vm572_vm8, %v8805_v34, %v8920_v44  ;;  %v2953_v33 = vld [vmem:[#allocation7 + $0x520] sm:$0xff]  ;;  %v2300_v42 = vmul.f32 %v8326_v41, %v2267_v48  ;;  %v2951_v63 = vld [vmem:[#allocation7 + $0x510] sm:$0xff]  ;;  %3581 = vmatpush.msra.mxu1 %v2985_v22 }
 0x40c   :  { %v9004_v26 = vsel %vm10657_vm9, %v2330_v7, 0.0  ;;  %v2400_v14 = vrot.slane %v8805_v34, 6  ;;  %v9012_v13 = vsel %vm1209_vm11, %v2636_v5, %v2637_v11  ;;  %v2644_v18 = vsel %vm10658_vm5, %v8939_v38, %v8956_v62  ;;  %v2983_v12 = vld [vmem:[#allocation7 + $0x610] sm:$0xff]  ;;  %3555 = vmatpush.msra.mxu0 %v2953_v33  ;;  %3607 = vmatpush.msra.mxu2 %v3017_v6  ;;  %v2917_v28 = vld [vmem:[#allocation7 + $0x400] sm:$0xff] }
 0x40d   :  { %v2246_v8 = vadd.f32 %v2245_v4, %v8964_v40  ;;  %v2274_v37 = vadd.f32 %v2273_v10, %v2272_v1  ;;  %v2298_v55 = vmul.f32 %v8326_v41, %v2253_v15  ;;  %v2412_v30 = vrot.slane %v8805_v34, 7  ;;  %v3015_v47 = vld [vmem:[#allocation7 + $0x710] sm:$0xff]  ;;  %3530 = vmatpush.msra.mxu3 %v2919_v54  ;;  %v2949_v2 = vld [vmem:[#allocation7 + $0x500] sm:$0xff]  ;;  %3582 = vmatpush.msra.mxu1 %v2983_v12 }
 0x40e   :  { %v2377_v29 = vrot.slane %v9004_v26, 4  ;;  %v2389_v32 = vrot.slane %v9004_v26, 5  ;;  %v2656_v35 = vsel %vm1187_vm1, %v8805_v34, %v8920_v44  ;;  %v2657_v40 = vsel %vm10659_vm14, %v8939_v38, %v8956_v62  ;;  %v2981_v17 = vld [vmem:[#allocation7 + $0x600] sm:$0xff]  ;;  %3556 = vmatpush.msra.mxu0 %v2951_v63  ;;  %3608 = vmatpush.msra.mxu2 %v3015_v47  ;;  %vm10668_vm14 = vmmov %vm10656_vm4  ;;  %v3075_v54 = vld [vmem:[#allocation7 + $0x8f0] sm:$0xff] }
 0x40f   :  { %v2301_v5 = vmul.f32 %v8326_v41, %v2274_v37  ;;  %v2331_v51 = vsel %vm1187_vm1, %v2299_v27, %v2298_v55  ;;  %v2401_v20 = vrot.slane %v9004_v26, 6  ;;  %v2413_v39 = vrot.slane %v9004_v26, 7  ;;  %3531 = vmatpush.msra.mxu3 %v2917_v28  ;;  %v3013_v22 = vld [vmem:[#allocation7 + $0x700] sm:$0xff]  ;;  %3583 = vmatpush.msra.mxu1 %v2981_v17  ;;  %v3139_v63 = vld [vmem:[#allocation7 + $0xaf0] sm:$0xff] }
 0x410   :  { %v2332_v45 = vsel %vm10660_vm6, %v2300_v42, %v2331_v51  ;;  %v2597_v25 = vrot.slane %v8910_v52, 1  ;;  %v9036_v53 = vsel %vm530_vm7, %v2639_v31, %v8783_v61  ;;  %v2671_v48 = vsel %vm10661_vm0, %v8805_v34, %v8920_v44  ;;  %v9041_v7 = vld [vmem:[#allocation1] sm:$0xff]  ;;  %v9045_v50 = vld [vmem:[#allocation1 + $0x2d] sm:$0xff]  ;;  %v9053_v1 = vld [vmem:[#allocation1 + $0x36] sm:$0xff]  ;;  %3557 = vmatpush.msra.mxu0 %v2949_v2  ;;  %3609 = vmatpush.msra.mxu2 %v3013_v22 }
 0x411   :  { %v9043_v11 = vld [vmem:[#allocation1 + $0x24] sm:$0xff]  ;;  %v2297_v59 = vmul.f32 %v8326_v41, %v2246_v8  ;;  %v2333_v4 = vsel %vm10662_vm2, %v2301_v5, %v2332_v45  ;;  %v2612_v15 = vrot.slane %v8923_v58, 2  ;;  %vm10663_vm10 = vcmask 1044484   ;;  %3428 = vmatmul.f32.vlgmr.msrb.gmra.mxu3 %v9041_v7  ;;  %v9073_v10 = vld [vmem:[#allocation1 + $0x12] sm:$0xff]  ;;  %v9075_v27 = vld [vmem:[#allocation1 + $0x1b] sm:$0xff] }
 0x412   :  { %v2672_v61 = vsel %vm10663_vm10, %v8939_v38, %v8956_v62  ;;  %v9055_v0 = vld [vmem:[#allocation1 + $0x3f] sm:$0xff]  ;;  %v9058_v46 = vld [vmem:[#allocation1 + $0x9] sm:$0xff]  ;;  %v2378_v41 = vsel %vm10656_vm4, %v2376_v56, %v2377_v29  ;;  %v2620_v31 = vrot.slane %v8930_v3, 3  ;;  %v9067_v36 = vsel %vm530_vm7, %v2643_v49, %v2644_v18  ;;  %10665 = vst [vmem:[#allocation27_spill] sm:$0xff] %v9073_v10  ;;  %3480 = vmatmul.f32.vlgmr.msrb.gmra.mxu1 %v9073_v10  ;;  %vm10670_vm0 = vmmov %vm10662_vm2 }
 0x413   :  { %vm10664_vm9 = vcmask 1042433   ;;  %3454 = vmatmul.f32.vlgmr.msrb.gmra.mxu0 %v9058_v46  ;;  %10666 = vst [vmem:[#allocation28_spill] sm:$0xff] %v9075_v27  ;;  %vm10667_vm5 = vcmask 1042432   ;;  %v2402_v49 = vsel %vm530_vm7, %v2400_v14, %v2401_v20  ;;  %v2414_v33 = vsel %vm572_vm8, %v2412_v30, %v2413_v39  ;;  %3506 = vmatmul.f32.vlgmr.msrb.gmra.mxu2 %v9075_v27  ;;  %v3171_v12 = vld [vmem:[#allocation7 + $0xbf0] sm:$0xff]  ;;  %v10678_v2 = vld [vmem:[#allocation25_spill] sm:$0xff] }
 0x414   :  { %v9070_v57 = vsel %vm10664_vm9, %v2656_v35, %v2657_v40  ;;  %v2390_v56 = vsel %vm10667_vm5, %v2388_v60, %v2389_v32  ;;  %3298 = vst [vmem:[#allocation1] ss:$9 sm:$0xff] %v8533_v16  ;;  %v9090_v42 = vsel %vm10668_vm14, %v2333_v4, 0.0  ;;  %v2420_v18 = vrot.slane %v9004_v26, 1  ;;  %v3107_v16 = vld [vmem:[#allocation7 + $0x9f0] sm:$0xff]  ;;  %3620 = vmatpush.msrb.mxu3 %v3075_v54  ;;  %3672 = vmatpush.msrb.mxu1 %v3139_v63  ;;  %v3169_v52 = vld [vmem:[#allocation7 + $0xbe0] sm:$0xff] }
 0x415   :  { %vm10669_vm6 = vcmask 1043458   ;;  %v2686_v14 = vsel %vm10670_vm0, %v8805_v34, %v8920_v44  ;;  %v10671_v6 = vrot.slane %v8570_v9, 1  ;;  %vm10672_vm2 = vcmask 1046528   ;;  %3646 = vmatpush.msrb.mxu0 %v3107_v16  ;;  %3698 = vmatpush.msrb.mxu2 %v3171_v12  ;;  %3304 = vst [vmem:[#allocation1 + $0x6] ss:$9 sm:$0xff] %v2597_v25  ;;  %v10682_v22 = vld [vmem:[#allocation22_spill] sm:$0xff] }
 0x416   :  { %v9094_v60 = vsel %vm10669_vm6, %v2671_v48, %v2672_v61  ;;  %v9102_v8 = vsel %vm10672_vm2, 0.0, %v2297_v59  ;;  %v9104_v37 = vrot.slane %v2378_v41, 4  ;;  %vm10673_vm10 = vcmask 1045509   ;;  %v10681_v48 = vld [vmem:[#allocation26_spill] sm:$0xff]  ;;  %v3105_v59 = vld [vmem:[#allocation7 + $0x9e0] sm:$0xff]  ;;  %vm10685_vm2 = vmmov %vm10668_vm14 }
 0x417   :  { %3299 = vst [vmem:[#allocation1 + $0x1] ss:$9 sm:$0xff] %v10671_v6  ;;  %v2687_v55 = vsel %vm10673_vm10, %v8939_v38, %v8956_v62  ;;  %vm10674_vm4 = vcmask 1044484   ;;  %v10675_v9 = vrot.slane %v8624_v24, 2  ;;  %v9114_v35 = vrot.slane %v2390_v56, 3  ;;  %3647 = vmatpush.msrb.mxu0 %v3105_v59  ;;  %3699 = vmatpush.msrb.mxu2 %v3169_v52 }
 0x418   :  { %v2701_v30 = vsel %vm10674_vm4, %v8805_v34, %v8920_v44  ;;  %v9116_v40 = vrot.slane %v2402_v49, 2  ;;  %v9118_v47 = vrot.slane %v2414_v33, 1  ;;  %vm10676_vm9 = vcmask 1046534   ;;  %v3073_v34 = vld [vmem:[#allocation7 + $0x8e0] sm:$0xff]  ;;  %3303 = vst [vmem:[#allocation1 + $0x5] ss:$9 sm:$0xff] %v10681_v48  ;;  %vm10683_vm6 = vmmov %vm10674_vm4 }
 0x419   :  { %3300 = vst [vmem:[#allocation1 + $0x2] ss:$9 sm:$0xff] %v10675_v9  ;;  %v2702_v5 = vsel %vm10676_vm9, %v8939_v38, %v8956_v62  ;;  %v10677_v51 = vrot.slane %v8662_v43, 3  ;;  %v10287_v24 = vrot.slane %v9090_v42, 4  ;;  %v10286_v44 = vrot.slane %v9090_v42, 5  ;;  %3621 = vmatpush.msrb.mxu3 %v3073_v34  ;;  %v3137_v49 = vld [vmem:[#allocation7 + $0xae0] sm:$0xff]  ;;  %vm10684_vm0 = vmmov %vm10676_vm9 }
 0x41a   :  { %v10285_v39 = vrot.slane %v9090_v42, 6  ;;  %v2416_v28 = vrot.slane %v9090_v42, 7  ;;  %v10679_v17 = vrot.slane %v10678_v2, 4  ;;  %v2379_v38 = vrot.slane %v9102_v8, 4  ;;  %3305 = vst [vmem:[#allocation1 + $0x7] ss:$9 sm:$0xff] %v2612_v15  ;;  %3673 = vmatpush.msrb.mxu1 %v3137_v49 }
 0x41b   :  { %3301 = vst [vmem:[#allocation1 + $0x3] ss:$9 sm:$0xff] %v10677_v51  ;;  %v2424_v43 = vrot.slane %v9004_v26, 2  ;;  %v2428_v62 = vrot.slane %v9004_v26, 3  ;;  %vm10680_vm5 = vcmask 1044483   ;;  %v2391_v4 = vrot.slane %v9102_v8, 5 }
 0x41c   :  { %3302 = vst [vmem:[#allocation1 + $0x4] ss:$9 sm:$0xff] %v10679_v17  ;;  %v9135_v45 = vsel %vm10680_vm5, %v2686_v14, %v2687_v55  ;;  %v2403_v61 = vrot.slane %v9102_v8, 6  ;;  %v2415_v41 = vrot.slane %v9102_v8, 7  ;;  %v9142_v56 = vsel %vm1209_vm11, %v2701_v30, %v2702_v5  ;;  %v3071_v30 = vld [vmem:[#allocation7 + $0x8d0] sm:$0xff]  ;;  %vm10689_vm5 = vmmov %vm10684_vm0  ;;  %v3133_v49 = vld [vmem:[#allocation7 + $0xac0] sm:$0xff] }
 0x41d   :  { %v2357_v33 = vrot.slane %v9102_v8, 1  ;;  %v9151_v14 = vsel %vm10668_vm14, %v2377_v29, %v10682_v22  ;;  %v2646_v6 = vsel %vm10683_vm6, %v9104_v37, %v9114_v35  ;;  %v2647_v54 = vsel %vm10684_vm0, %v9116_v40, %v9118_v47  ;;  %v3103_v9 = vld [vmem:[#allocation7 + $0x9d0] sm:$0xff]  ;;  %3622 = vmatpush.msrb.mxu3 %v3071_v30 }
 0x41e   :  { %v2381_v25 = vsel %vm10685_vm2, %v2379_v38, %v10287_v24  ;;  %vm10686_vm10 = vcmask 1042432   ;;  %v2405_v16 = vsel %vm530_vm7, %v2403_v61, %v10285_v39  ;;  %v2417_v55 = vsel %vm572_vm8, %v2415_v41, %v2416_v28  ;;  %v3135_v5 = vld [vmem:[#allocation7 + $0xad0] sm:$0xff]  ;;  %v3069_v38 = vld [vmem:[#allocation7 + $0x8c0] sm:$0xff]  ;;  %3648 = vmatpush.msrb.mxu0 %v3103_v9 }
 0x41f   :  { %v2393_v29 = vsel %vm10686_vm10, %v2391_v4, %v10286_v44  ;;  %v2361_v58 = vrot.slane %v9102_v8, 2  ;;  %v2365_v15 = vrot.slane %v9102_v8, 3  ;;  %vm10687_vm4 = vcmask 1045509   ;;  %v3167_v17 = vld [vmem:[#allocation7 + $0xbd0] sm:$0xff]  ;;  %v3101_v41 = vld [vmem:[#allocation7 + $0x9c0] sm:$0xff]  ;;  %vm10692_vm6 = vmmov %vm10686_vm10  ;;  %3674 = vmatpush.msrb.mxu1 %v3135_v5  ;;  %3623 = vmatpush.msrb.mxu3 %v3069_v38 }
 0x420   :  { %v2659_v63 = vsel %vm10687_vm4, %v9104_v37, %v9114_v35  ;;  %vm10688_vm9 = vcmask 1046528   ;;  %v2674_v51 = vsel %vm10689_vm5, %v9104_v37, %v9114_v35  ;;  %v2675_v34 = vsel %vm572_vm8, %v9116_v40, %v9118_v47  ;;  %v10691_v39 = vld [vmem:[#allocation23_spill] sm:$0xff]  ;;  %3700 = vmatpush.msrb.mxu2 %v3167_v17  ;;  %3649 = vmatpush.msrb.mxu0 %v3101_v41  ;;  %v3089_v24 = vld [vmem:[#allocation7 + $0x960] sm:$0xff] }
 0x421   :  { %v2660_v12 = vsel %vm10688_vm9, %v9118_v47, %v9116_v40  ;;  %vm10690_vm14 = vmmov %vm10688_vm9  ;;  %v2690_v2 = vsel %vm1187_vm1, %v9116_v40, %v9118_v47  ;;  %v9191_v48 = vrot.slane %v2381_v25, 4  ;;  %v9193_v59 = vrot.slane %v2393_v29, 3  ;;  %3675 = vmatpush.msrb.mxu1 %v3133_v49  ;;  %v3067_v38 = vld [vmem:[#allocation7 + $0x8b0] sm:$0xff] }
 0x422   :  { %v2689_v28 = vsel %vm10690_vm14, %v9114_v35, %v9104_v37  ;;  %v9195_v4 = vrot.slane %v2405_v16, 2  ;;  %v9197_v61 = vrot.slane %v2417_v55, 1  ;;  %v2436_v44 = vsel %vm10692_vm6, %v2389_v32, %v10691_v39  ;;  %v3165_v16 = vld [vmem:[#allocation7 + $0xbc0] sm:$0xff]  ;;  %v3099_v41 = vld [vmem:[#allocation7 + $0x9b0] sm:$0xff]  ;;  %3624 = vmatpush.msrb.mxu3 %v3067_v38 }
 0x423   :  { %vm10693_vm0 = vcmask 1046533   ;;  %v2704_v25 = vsel %vm572_vm8, %v9104_v37, %v9114_v35  ;;  %vm10694_vm2 = vcmask 1042434   ;;  %v9210_v55 = vrot.slane %v2357_v33, 7  ;;  %v9224_v33 = vld [vmem:[#allocation1] sm:$0xff]  ;;  %3701 = vmatpush.msrb.mxu2 %v3165_v16  ;;  %v9259_v17 = vld [vmem:[#allocation1 + $0x36] sm:$0xff]  ;;  %v3065_v16 = vld [vmem:[#allocation7 + $0x8a0] sm:$0xff]  ;;  %3650 = vmatpush.msrb.mxu0 %v3099_v41 }
 0x424   :  { %v2661_v52 = vsel %vm10693_vm0, %v2659_v63, %v2660_v12  ;;  %v2705_v29 = vsel %vm10694_vm2, %v9116_v40, %v9118_v47  ;;  %v9212_v30 = vrot.slane %v2361_v58, 6  ;;  %v9214_v9 = vrot.slane %v2365_v15, 5  ;;  %v10696_v63 = vld [vmem:[#allocation24_spill] sm:$0xff]  ;;  %v9228_v15 = vld [vmem:[#allocation1 + $0x12] sm:$0xff]  ;;  %vm10699_vm14 = vmmov %vm10694_vm2  ;;  %3625 = vmatpush.msrb.mxu3 %v3065_v16 }
 0x425   :  { %vm10695_vm10 = vcmask 1045504   ;;  %v2440_v37 = vsel %vm530_vm7, %v2401_v20, %v10696_v63  ;;  %v2635_v35 = vrot.slane %v8997_v19, 4  ;;  %v2648_v40 = vsel %vm1209_vm11, %v2646_v6, %v2647_v54  ;;  %v9226_v58 = vld [vmem:[#allocation1 + $0x9] sm:$0xff]  ;;  %v9239_v6 = vld [vmem:[#allocation1 + $0x1b] sm:$0xff] }
 0x426   :  { %v2676_v32 = vsel %vm10695_vm10, %v2675_v34, %v2674_v51  ;;  %vm10697_vm4 = vcmask 1046529   ;;  %v2662_v12 = vsel %vm2513_vm3, %v9070_v57, %v2661_v52  ;;  %v2706_v5 = vsel %vm530_vm7, %v2704_v25, %v2705_v29  ;;  %v9241_v54 = vld [vmem:[#allocation1 + $0x24] sm:$0xff]  ;;  %v9243_v51 = vld [vmem:[#allocation1 + $0x2d] sm:$0xff]  ;;  %v3163_v52 = vld [vmem:[#allocation7 + $0xbb0] sm:$0xff] }
 0x427   :  { %v2691_v47 = vsel %vm10697_vm4, %v2690_v2, %v2689_v28  ;;  %vm10698_vm9 = vcmask 1044484   ;;  %v2720_v20 = vsel %vm10689_vm5, %v9195_v4, %v9197_v61  ;;  %v9247_v57 = vrot.slane %v2420_v18, 7  ;;  %3313 = vst [vmem:[#allocation1] ss:$9 sm:$0xff] %v2620_v31  ;;  %3702 = vmatpush.msrb.mxu2 %v3163_v52  ;;  %vm10704_vm4 = vmmov %vm10699_vm14  ;;  %v3061_v41 = vld [vmem:[#allocation7 + $0x880] sm:$0xff]  ;;  %v3059_v16 = vld [vmem:[#allocation7 + $0x870] sm:$0xff] }
 0x428   :  { %v2719_v19 = vsel %vm10698_vm9, %v9191_v48, %v9193_v59  ;;  %v9251_v34 = vrot.slane %v2424_v43, 6  ;;  %v9255_v28 = vrot.slane %v2428_v62, 5  ;;  %v2677_v2 = vsel %vm2529_vm13, %v9094_v60, %v2676_v32  ;;  %v3131_v60 = vld [vmem:[#allocation7 + $0xab0] sm:$0xff]  ;;  %3314 = vst [vmem:[#allocation1 + $0x1] ss:$9 sm:$0xff] %v2635_v35  ;;  %v3097_v32 = vld [vmem:[#allocation7 + $0x9a0] sm:$0xff] }
 0x429   :  { %v9262_v49 = vrot.slane %v9151_v14, 4  ;;  %v2692_v18 = vsel %vm2545_vm15, %v9135_v45, %v2691_v47  ;;  %v2716_v43 = vsel %vm572_vm8, %v9102_v8, %v9210_v55  ;;  %v2717_v62 = vsel %vm10699_vm14, %v9212_v30, %v9214_v9  ;;  %3676 = vmatpush.msrb.mxu1 %v3131_v60  ;;  %3651 = vmatpush.msrb.mxu0 %v3097_v32  ;;  %vm10707_vm14 = vmmov %vm10704_vm4  ;;  %v3125_v52 = vld [vmem:[#allocation7 + $0xa80] sm:$0xff]  ;;  %v3091_v32 = vld [vmem:[#allocation7 + $0x970] sm:$0xff] }
 0x42a   :  { %vm10700_vm6 = vcmask 1043456   ;;  %v2663_v25 = vrot.slane %v2662_v12, 1  ;;  %v2721_v29 = vsel %vm1209_vm11, %v2719_v19, %v2720_v20  ;;  %v9279_v47 = vrot.slane %v2436_v44, 3  ;;  %v3063_v44 = vld [vmem:[#allocation7 + $0x890] sm:$0xff] }
 0x42b   :  { %v2649_v14 = vsel %vm10700_vm6, %v9067_v36, %v2648_v40  ;;  %vm10701_vm0 = vmmov %vm10700_vm6  ;;  %v9284_v3 = vsel %vm2545_vm15, %v8933_v21, %v8993_v23  ;;  %v2678_v31 = vrot.slane %v2677_v2, 2  ;;  %v3129_v36 = vld [vmem:[#allocation7 + $0xaa0] sm:$0xff]  ;;  %v2693_v35 = vrot.slane %v2692_v18, 3  ;;  %3626 = vmatpush.msrb.mxu3 %v3063_v44  ;;  %v3155_v44 = vld [vmem:[#allocation7 + $0xb70] sm:$0xff] }
 0x42c   :  { %v2707_v45 = vsel %vm10701_vm0, %v2706_v5, %v9142_v56  ;;  %3315 = vst [vmem:[#allocation1 + $0x2] ss:$9 sm:$0xff] %v2649_v14  ;;  %v3161_v40 = vld [vmem:[#allocation7 + $0xba0] sm:$0xff]  ;;  %vm10702_vm2 = vmmov %vm10701_vm0  ;;  %v2718_v12 = vsel %vm530_vm7, %v2716_v43, %v2717_v62  ;;  %v3095_v5 = vld [vmem:[#allocation7 + $0x990] sm:$0xff]  ;;  %v9292_v21 = vrot.slane %v2440_v37, 2  ;;  %v9297_v23 = vsel %vm572_vm8, %v9004_v26, %v9247_v57  ;;  %3677 = vmatpush.msrb.mxu1 %v3129_v36 }
 0x42d   :  { %v9289_v56 = vsel %vm10702_vm2, %v9036_v53, %v9012_v13  ;;  %3316 = vst [vmem:[#allocation1 + $0x3] ss:$9 sm:$0xff] %v2663_v25  ;;  %v2708_v19 = vrot.slane %v2707_v45, 4  ;;  %vm10703_vm10 = vmmov %vm10701_vm0  ;;  %v3127_v13 = vld [vmem:[#allocation7 + $0xa90] sm:$0xff]  ;;  %v9303_v2 = vsel %vm10704_vm4, %v9251_v34, %v9255_v28  ;;  %v2664_v37 = vsel %vm1187_vm1, %v9004_v26, %v9247_v57  ;;  %3703 = vmatpush.msrb.mxu2 %v3161_v40  ;;  %v3093_v18 = vld [vmem:[#allocation7 + $0x980] sm:$0xff] }
 0x42e   :  { %v2722_v20 = vsel %vm10703_vm10, %v2718_v12, %v2721_v29  ;;  %3317 = vst [vmem:[#allocation1 + $0x4] ss:$9 sm:$0xff] %v2678_v31  ;;  %v3159_v53 = vld [vmem:[#allocation7 + $0xb90] sm:$0xff]  ;;  %vm10705_vm9 = vcmask 1043459   ;;  %vm10706_vm5 = vcmask 1045509   ;;  %v2679_v62 = vsel %vm10707_vm14, %v9004_v26, %v9247_v57  ;;  %3652 = vmatpush.msrb.mxu0 %v3095_v5  ;;  %v3157_v14 = vld [vmem:[#allocation7 + $0xb80] sm:$0xff]  ;;  %3678 = vmatpush.msrb.mxu1 %v3127_v13 }
 0x42f   :  { %v2665_v38 = vsel %vm10705_vm9, %v9251_v34, %v9255_v28  ;;  %3318 = vst [vmem:[#allocation1 + $0x5] ss:$9 sm:$0xff] %v2693_v35  ;;  %v2667_v43 = vsel %vm10706_vm5, %v9262_v49, %v9279_v47  ;;  %vm10708_vm6 = vcmask 1044484   ;;  %vm10710_vm2 = vcmask 1046534   ;;  %vm10711_vm10 = vmmov %vm10705_vm9  ;;  %3704 = vmatpush.msrb.mxu2 %v3159_v53  ;;  %3627 = vmatpush.msrb.mxu3 %v3061_v41  ;;  %v3123_v12 = vld [vmem:[#allocation7 + $0xa70] sm:$0xff]  ;;  %v3057_v53 = vld [vmem:[#allocation7 + $0x860] sm:$0xff] }
 0x430   :  { %v2680_v60 = vsel %vm10708_vm6, %v9251_v34, %v9255_v28  ;;  %3319 = vst [vmem:[#allocation1 + $0x6] ss:$9 sm:$0xff] %v2708_v19  ;;  %vm10709_vm0 = vmmov %vm10708_vm6  ;;  %v2682_v45 = vsel %vm10710_vm2, %v9262_v49, %v9279_v47  ;;  %v2694_v29 = vsel %vm10711_vm10, %v9004_v26, %v9247_v57  ;;  %v2421_v31 = vrot.slane %v9090_v42, 1  ;;  %3653 = vmatpush.msrb.mxu0 %v3093_v18 }
 0x431   :  { %v2653_v25 = vsel %vm10709_vm0, %v9262_v49, %v9279_v47  ;;  %3320 = vst [vmem:[#allocation1 + $0x7] ss:$9 sm:$0xff] %v2722_v20  ;;  %v2425_v36 = vrot.slane %v9090_v42, 2  ;;  %vm10712_vm4 = vmmov %vm10706_vm5  ;;  %vm10713_vm9 = vcmask 1046528   ;;  %v2429_v5 = vrot.slane %v9090_v42, 3  ;;  %3679 = vmatpush.msrb.mxu1 %v3125_v52  ;;  %3705 = vmatpush.msrb.mxu2 %v3157_v14 }
 0x432   :  { %v2695_v40 = vsel %vm10712_vm4, %v9251_v34, %v9255_v28  ;;  %v2697_v35 = vsel %vm10713_vm9, %v9279_v47, %v9262_v49  ;;  %vm10714_vm5 = vcmask 1042433   ;;  %vm10715_vm14 = vcmask 1046533   ;;  %3628 = vmatpush.msrb.mxu3 %v3059_v16  ;;  %3654 = vmatpush.msrb.mxu0 %v3091_v32  ;;  %v3119_v16 = vld [vmem:[#allocation7 + $0xa50] sm:$0xff] }
 0x433   :  { %v2666_v19 = vsel %vm10714_vm5, %v2664_v37, %v2665_v38  ;;  %v2668_v20 = vsel %vm10715_vm14, %v2667_v43, %v9292_v21  ;;  %vm10716_vm6 = vcmask 1043458   ;;  %v10717_v27 = vrot.slane %v9090_v42, 4  ;;  %v3121_v38 = vld [vmem:[#allocation7 + $0xa60] sm:$0xff]  ;;  %3680 = vmatpush.msrb.mxu1 %v3123_v12  ;;  %3706 = vmatpush.msrb.mxu2 %v3155_v44 }
 0x434   :  { %v2681_v13 = vsel %vm10716_vm6, %v2679_v62, %v2680_v60  ;;  %vm10718_vm0 = vcmask 1043456   ;;  %v10719_v18 = vrot.slane %v9090_v42, 5  ;;  %vm10720_vm2 = vcmask 1042432   ;;  %v3153_v43 = vld [vmem:[#allocation7 + $0xb60] sm:$0xff]  ;;  %3629 = vmatpush.msrb.mxu3 %v3057_v53  ;;  %3655 = vmatpush.msrb.mxu0 %v3089_v24 }
 0x435   :  { %v2433_v41 = vsel %vm10718_vm0, %v10717_v27, %v10682_v22  ;;  %vm10721_vm10 = vcmask 1045504   ;;  %vm10722_vm4 = vcmask 1044483   ;;  %vm10723_vm9 = vcmask 1046529   ;;  %v3055_v22 = vld [vmem:[#allocation7 + $0x850] sm:$0xff]  ;;  %3681 = vmatpush.msrb.mxu1 %v3121_v38  ;;  %3707 = vmatpush.msrb.mxu2 %v3153_v43  ;;  %v3149_v38 = vld [vmem:[#allocation7 + $0xb40] sm:$0xff] }
 0x436   :  { %v2437_v10 = vsel %vm10720_vm2, %v10719_v18, %v10691_v39  ;;  %v2683_v37 = vsel %vm10721_vm10, %v9292_v21, %v2682_v45  ;;  %v2696_v62 = vsel %vm10722_vm4, %v2694_v29, %v2695_v40  ;;  %v2698_v60 = vsel %vm10723_vm9, %v9292_v21, %v2697_v35  ;;  %v3087_v39 = vld [vmem:[#allocation7 + $0x950] sm:$0xff]  ;;  %v3085_v40 = vld [vmem:[#allocation7 + $0x940] sm:$0xff]  ;;  %3630 = vmatpush.msrb.mxu3 %v3055_v22 }
 0x437   :  { %vm10724_vm5 = vcmask 1044484   ;;  %v9358_v52 = vrot.slane %v2421_v31, 7  ;;  %v9360_v14 = vrot.slane %v2425_v36, 6  ;;  %vm10725_vm14 = vcmask 1046534   ;;  %3656 = vmatpush.msrb.mxu0 %v3087_v39  ;;  %3682 = vmatpush.msrb.mxu1 %v3119_v16  ;;  %v3115_v39 = vld [vmem:[#allocation7 + $0xa30] sm:$0xff] }
 0x438   :  { %v2709_v27 = vsel %vm10724_vm5, %v9004_v26, %v9247_v57  ;;  %v2710_v45 = vsel %vm10725_vm14, %v9251_v34, %v9255_v28  ;;  %v2712_v29 = vsel %vm572_vm8, %v9262_v49, %v9279_v47  ;;  %v10726_v26 = vrot.slane %v9090_v42, 6  ;;  %v3151_v34 = vld [vmem:[#allocation7 + $0xb50] sm:$0xff]  ;;  %v3053_v28 = vld [vmem:[#allocation7 + $0x840] sm:$0xff]  ;;  %vm10728_vm0 = vmmov %vm10724_vm5 }
 0x439   :  { %v9372_v32 = vrot.slane %v2429_v5, 5  ;;  %v9374_v31 = vrot.slane %v2433_v41, 4  ;;  %v9376_v36 = vrot.slane %v2437_v10, 3  ;;  %v2652_v24 = vsel %vm530_vm7, %v9297_v23, %v9303_v2  ;;  %v9383_v47 = vld [vmem:[#allocation1] sm:$0xff]  ;;  %v9387_v35 = vld [vmem:[#allocation1 + $0x12] sm:$0xff]  ;;  %3708 = vmatpush.msrb.mxu2 %v3151_v34  ;;  %3631 = vmatpush.msrb.mxu3 %v3053_v28 }
 0x43a   :  { %v2441_v57 = vsel %vm530_vm7, %v10726_v26, %v10696_v63  ;;  %v2654_v49 = vsel %vm1209_vm11, %v2653_v25, %v9292_v21  ;;  %v9385_v63 = vld [vmem:[#allocation1 + $0x9] sm:$0xff]  ;;  %v2627_v12 = vrot.slane %v9284_v3, 3  ;;  %v2669_v44 = vsel %vm2513_vm3, %v2666_v19, %v2668_v20  ;;  %v9394_v2 = vld [vmem:[#allocation1 + $0x1b] sm:$0xff]  ;;  %3431 = vmatmul.f32.gmra.mxu3 %v9383_v47  ;;  %3483 = vmatmul.f32.gmra.mxu1 %v9387_v35 }
 0x43b   :  { %v3117_v10 = vld [vmem:[#allocation7 + $0xa40] sm:$0xff]  ;;  %v2711_v5 = vsel %vm1209_vm11, %v2709_v27, %v2710_v45  ;;  %v2713_v23 = vsel %vm530_vm7, %v2712_v29, %v9292_v21  ;;  %3457 = vmatmul.f32.gmra.mxu0 %v9385_v63  ;;  %v9402_v41 = vrot.slane %v2441_v57, 2  ;;  %v2642_v3 = vrot.slane %v9289_v56, 4  ;;  %v9407_v18 = vld [vmem:[#allocation1 + $0x36] sm:$0xff]  ;;  %v9409_v21 = vld [vmem:[#allocation1 + $0x3f] sm:$0xff]  ;;  %3509 = vmatmul.f32.gmra.mxu2 %v9394_v2 }
 0x43c   :  { %v9396_v25 = vld [vmem:[#allocation1 + $0x24] sm:$0xff]  ;;  %v9398_v53 = vld [vmem:[#allocation1 + $0x2d] sm:$0xff]  ;;  %v2684_v19 = vsel %vm2529_vm13, %v2681_v13, %v2683_v37  ;;  %v2699_v20 = vsel %vm2545_vm15, %v2696_v62, %v2698_v60  ;;  %v2723_v43 = vsel %vm572_vm8, %v9090_v42, %v9358_v52  ;;  %vm10727_vm6 = vcmask 1042434   ;;  %v3051_v37 = vld [vmem:[#allocation7 + $0x830] sm:$0xff]  ;;  %3657 = vmatpush.msrb.mxu0 %v3085_v40  ;;  %3683 = vmatpush.msrb.mxu1 %v3117_v10 }
 0x43d   :  { %v2724_v56 = vsel %vm10727_vm6, %v9360_v14, %v9372_v32  ;;  %v2726_v13 = vsel %vm10728_vm0, %v9374_v31, %v9376_v36  ;;  %3329 = vst [vmem:[#allocation1] ss:$9 sm:$0xff] %v2627_v12  ;;  %v3083_v62 = vld [vmem:[#allocation7 + $0x930] sm:$0xff]  ;;  %vm10729_vm2 = vcmask 1043456   ;;  %v2670_v27 = vrot.slane %v2669_v44, 1  ;;  %3709 = vmatpush.msrb.mxu2 %v3149_v38  ;;  %v3049_v26 = vld [vmem:[#allocation7 + $0x820] sm:$0xff]  ;;  %3632 = vmatpush.msrb.mxu3 %v3051_v37 }
 0x43e   :  { %v2655_v60 = vsel %vm10729_vm2, %v2652_v24, %v2654_v49  ;;  %vm10730_vm10 = vmmov %vm10729_vm2  ;;  %3330 = vst [vmem:[#allocation1 + $0x1] ss:$9 sm:$0xff] %v2642_v3  ;;  %v3147_v45 = vld [vmem:[#allocation7 + $0xb30] sm:$0xff]  ;;  %v2685_v29 = vrot.slane %v2684_v19, 2  ;;  %v3081_v57 = vld [vmem:[#allocation7 + $0x920] sm:$0xff]  ;;  %v2700_v16 = vrot.slane %v2699_v20, 3  ;;  %v2725_v34 = vsel %vm530_vm7, %v2723_v43, %v2724_v56  ;;  %3658 = vmatpush.msrb.mxu0 %v3083_v62  ;;  %3684 = vmatpush.msrb.mxu1 %v3115_v39 }
 0x43f   :  { %v2714_v22 = vsel %vm10730_vm10, %v2713_v23, %v2711_v5  ;;  %3331 = vst [vmem:[#allocation1 + $0x2] ss:$9 sm:$0xff] %v2655_v60  ;;  %v2727_v24 = vsel %vm1209_vm11, %v2726_v13, %v9402_v41  ;;  %v3113_v49 = vld [vmem:[#allocation7 + $0xa20] sm:$0xff]  ;;  %3710 = vmatpush.msrb.mxu2 %v3147_v45  ;;  %v3047_v12 = vld [vmem:[#allocation7 + $0x810] sm:$0xff]  ;;  %v2729_v44 = vsel %vm1187_vm1, %v9102_v8, %v9210_v55  ;;  %vm10731_vm4 = vcmask 1043459   ;;  %vm10732_vm9 = vmmov %vm10729_vm2 }
 0x440   :  { %3332 = vst [vmem:[#allocation1 + $0x3] ss:$9 sm:$0xff] %v2670_v27  ;;  %v3145_v28 = vld [vmem:[#allocation7 + $0xb20] sm:$0xff]  ;;  %v2715_v40 = vrot.slane %v2714_v22, 4  ;;  %v3079_v10 = vld [vmem:[#allocation7 + $0x910] sm:$0xff]  ;;  %v2730_v5 = vsel %vm10731_vm4, %v9212_v30, %v9214_v9  ;;  %3633 = vmatpush.msrb.mxu3 %v3049_v26  ;;  %3659 = vmatpush.msrb.mxu0 %v3081_v57  ;;  %v2728_v19 = vsel %vm10732_vm9, %v2725_v34, %v2727_v24  ;;  %vm10733_vm5 = vcmask 1045509   ;;  %vm10739_vm9 = vmmov %vm10727_vm6 }
 0x441   :  { %3333 = vst [vmem:[#allocation1 + $0x4] ss:$9 sm:$0xff] %v2685_v29  ;;  %v3111_v23 = vld [vmem:[#allocation7 + $0xa10] sm:$0xff]  ;;  %v2732_v20 = vsel %vm10733_vm5, %v9191_v48, %v9193_v59  ;;  %vm10734_vm14 = vcmask 1046528   ;;  %3685 = vmatpush.msrb.mxu1 %v3113_v49  ;;  %3711 = vmatpush.msrb.mxu2 %v3145_v28  ;;  %v3045_v43 = vld [vmem:[#allocation7 + $0x800] sm:$0xff]  ;;  %v2744_v13 = vsel %vm10727_vm6, %v9102_v8, %v9210_v55  ;;  %vm10735_vm0 = vcmask 1046534  }
 0x442   :  { %3334 = vst [vmem:[#allocation1 + $0x5] ss:$9 sm:$0xff] %v2700_v16  ;;  %v3143_v3 = vld [vmem:[#allocation7 + $0xb10] sm:$0xff]  ;;  %v2733_v38 = vsel %vm10734_vm14, %v9197_v61, %v9195_v4  ;;  %v3077_v56 = vld [vmem:[#allocation7 + $0x900] sm:$0xff]  ;;  %v2747_v37 = vsel %vm10735_vm0, %v9191_v48, %v9193_v59  ;;  %v2748_v62 = vsel %vm572_vm8, %v9195_v4, %v9197_v61  ;;  %3634 = vmatpush.msrb.mxu3 %v3047_v12  ;;  %vm10736_vm2 = vcmask 1044484   ;;  %vm10737_vm10 = vmmov %vm10734_vm14 }
 0x443   :  { %3335 = vst [vmem:[#allocation1 + $0x6] ss:$9 sm:$0xff] %v2715_v40  ;;  %3660 = vmatpush.msrb.mxu0 %v3079_v10  ;;  %v3109_v60 = vld [vmem:[#allocation7 + $0xa00] sm:$0xff]  ;;  %v2745_v22 = vsel %vm10736_vm2, %v9212_v30, %v9214_v9  ;;  %v2762_v39 = vsel %vm10737_vm10, %v9193_v59, %v9191_v48  ;;  %v2763_v45 = vsel %vm1187_vm1, %v9195_v4, %v9197_v61  ;;  %vm10738_vm4 = vcmask 1046533  }
 0x444   :  { %3336 = vst [vmem:[#allocation1 + $0x7] ss:$9 sm:$0xff] %v2728_v19  ;;  %v3141_v27 = vld [vmem:[#allocation7 + $0xb00] sm:$0xff]  ;;  %3686 = vmatpush.msrb.mxu1 %v3111_v23  ;;  %3712 = vmatpush.msrb.mxu2 %v3143_v3  ;;  %v2734_v29 = vsel %vm10738_vm4, %v2732_v20, %v2733_v38  ;;  %v2777_v26 = vsel %vm572_vm8, %v9191_v48, %v9193_v59  ;;  %vm10740_vm5 = vcmask 1045504   ;;  %vm10741_vm14 = vcmask 1043459  }
 0x445   :  { %v2778_v57 = vsel %vm10739_vm9, %v9195_v4, %v9197_v61  ;;  %3635 = vmatpush.msrb.mxu3 %v3045_v43  ;;  %3661 = vmatpush.msrb.mxu0 %v3077_v56  ;;  %v2749_v16 = vsel %vm10740_vm5, %v2748_v62, %v2747_v37  ;;  %v2759_v34 = vsel %vm10741_vm14, %v9102_v8, %v9210_v55  ;;  %vm10742_vm6 = vcmask 1045509  }
 0x446   :  { %v2760_v24 = vsel %vm10742_vm6, %v9212_v30, %v9214_v9  ;;  %3687 = vmatpush.msrb.mxu1 %v3109_v60  ;;  %3713 = vmatpush.msrb.mxu2 %v3141_v27  ;;  %vm10743_vm0 = vcmask 1042433   ;;  %vm10744_vm2 = vcmask 1046529   ;;  %vm10745_vm10 = vcmask 1044484  }
 0x447   :  { %v2731_v48 = vsel %vm10743_vm0, %v2729_v44, %v2730_v5  ;;  %v2764_v59 = vsel %vm10744_vm2, %v2763_v45, %v2762_v39  ;;  %v2774_v4 = vsel %vm10745_vm10, %v9102_v8, %v9210_v55  ;;  %vm10746_vm4 = vcmask 1046534  }
 0x448   :  { %v2775_v61 = vsel %vm10746_vm4, %v9212_v30, %v9214_v9  ;;  %v2735_v49 = vsel %vm2513_vm3, %v2731_v48, %v2734_v29  ;;  %vm10747_vm9 = vcmask 1043458   ;;  %v2779_v40 = vsel %vm530_vm7, %v2777_v26, %v2778_v57 }
 0x449   :  { %v2746_v28 = vsel %vm10747_vm9, %v2744_v13, %v2745_v22  ;;  %vm10748_vm5 = vcmask 1044483   ;;  %v2776_v5 = vsel %vm1209_vm11, %v2774_v4, %v2775_v61  ;;  %v2736_v30 = vrot.slane %v2735_v49, 1 }
 0x44a   :  { %v2750_v12 = vsel %vm2529_vm13, %v2746_v28, %v2749_v16  ;;  %v2761_v10 = vsel %vm10748_vm5, %v2759_v34, %v2760_v24  ;;  %vm10749_vm14 = vcmask 1043456   ;;  %v2737_v13 = vsel %vm1187_vm1, %v9090_v42, %v9358_v52 }
 0x44b   :  { %v2765_v44 = vsel %vm2545_vm15, %v2761_v10, %v2764_v59  ;;  %v9487_v23 = vld [vmem:[#allocation1] sm:$0xff]  ;;  %v9489_v8 = vld [vmem:[#allocation1 + $0x9] sm:$0xff]  ;;  %v9491_v55 = vld [vmem:[#allocation1 + $0x12] sm:$0xff]  ;;  %v2780_v9 = vsel %vm10749_vm14, %v2779_v40, %v2776_v5  ;;  %v2751_v38 = vrot.slane %v2750_v12, 2  ;;  %vm10750_vm6 = vcmask 1043459  }
 0x44c   :  { %v9494_v3 = vld [vmem:[#allocation1 + $0x1b] sm:$0xff]  ;;  %v9496_v19 = vld [vmem:[#allocation1 + $0x24] sm:$0xff]  ;;  %v9498_v20 = vld [vmem:[#allocation1 + $0x2d] sm:$0xff]  ;;  %v2766_v56 = vrot.slane %v2765_v44, 3  ;;  %v2738_v37 = vsel %vm10750_vm6, %v9360_v14, %v9372_v32  ;;  %v2781_v62 = vrot.slane %v2780_v9, 4  ;;  %vm10751_vm0 = vcmask 1045509  }
 0x44d   :  { %v9500_v43 = vld [vmem:[#allocation1 + $0x36] sm:$0xff]  ;;  %v2740_v60 = vsel %vm10751_vm0, %v9374_v31, %v9376_v36  ;;  %vm10752_vm2 = vcmask 1042434   ;;  %v2753_v22 = vsel %vm10745_vm10, %v9360_v14, %v9372_v32  ;;  %v2755_v39 = vsel %vm10746_vm4, %v9374_v31, %v9376_v36  ;;  %vm10754_vm5 = vmmov %vm10750_vm6 }
 0x44e   :  { %3344 = vst [vmem:[#allocation1] ss:$9 sm:$0xff] %v2736_v30  ;;  %v2752_v27 = vsel %vm10752_vm2, %v9090_v42, %v9358_v52  ;;  %vm10753_vm9 = vcmask 1042433   ;;  %v2767_v29 = vsel %vm10754_vm5, %v9090_v42, %v9358_v52  ;;  %vm10755_vm14 = vmmov %vm10751_vm0  ;;  %vm10756_vm6 = vcmask 1046528  }
 0x44f   :  { %3345 = vst [vmem:[#allocation1 + $0x1] ss:$9 sm:$0xff] %v2751_v38  ;;  %v2739_v45 = vsel %vm10753_vm9, %v2737_v13, %v2738_v37  ;;  %v2768_v26 = vsel %vm10755_vm14, %v9360_v14, %v9372_v32  ;;  %v2770_v57 = vsel %vm10756_vm6, %v9376_v36, %v9374_v31  ;;  %vm10757_vm0 = vcmask 1046533   ;;  %vm10758_vm2 = vmmov %vm10745_vm10  ;;  %v3203_v37 = vld [vmem:[#allocation7 + $0xcf0] sm:$0xff] }
 0x450   :  { %3346 = vst [vmem:[#allocation1 + $0x2] ss:$9 sm:$0xff] %v2766_v56  ;;  %v2741_v16 = vsel %vm10757_vm0, %v2740_v60, %v9402_v41  ;;  %v2782_v34 = vsel %vm10758_vm2, %v9090_v42, %v9358_v52  ;;  %vm10759_vm10 = vmmov %vm10746_vm4  ;;  %v2785_v48 = vsel %vm572_vm8, %v9374_v31, %v9376_v36  ;;  %vm10760_vm4 = vcmask 1043458   ;;  %v3267_v60 = vld [vmem:[#allocation7 + $0xef0] sm:$0xff] }
 0x451   :  { %3347 = vst [vmem:[#allocation1 + $0x3] ss:$9 sm:$0xff] %v2781_v62  ;;  %v2783_v24 = vsel %vm10759_vm10, %v9360_v14, %v9372_v32  ;;  %v2754_v59 = vsel %vm10760_vm4, %v2752_v27, %v2753_v22  ;;  %vm10761_vm9 = vcmask 1045504   ;;  %vm10762_vm5 = vcmask 1044483   ;;  %v3235_v62 = vld [vmem:[#allocation7 + $0xdf0] sm:$0xff]  ;;  %v2820_v27 = vld [vmem:[#allocation7 + $0xf8] sm:$0xff] }
 0x452   :  { %v2756_v4 = vsel %vm10761_vm9, %v9402_v41, %v2755_v39  ;;  %v2769_v61 = vsel %vm10762_vm5, %v2767_v29, %v2768_v26  ;;  %vm10763_vm14 = vcmask 1046529   ;;  %v2742_v42 = vsel %vm2513_vm3, %v2739_v45, %v2741_v16  ;;  %v3201_v22 = vld [vmem:[#allocation7 + $0xce0] sm:$0xff]  ;;  %v2818_v29 = vld [vmem:[#allocation7 + $0xe8] sm:$0xff]  ;;  %v3199_v26 = vld [vmem:[#allocation7 + $0xcd0] sm:$0xff] }
 0x453   :  { %v2771_v49 = vsel %vm10763_vm14, %v9402_v41, %v2770_v57  ;;  %v2784_v52 = vsel %vm1209_vm11, %v2782_v34, %v2783_v24  ;;  %v2786_v14 = vsel %vm530_vm7, %v2785_v48, %v9402_v41  ;;  %v2757_v32 = vsel %vm2529_vm13, %v2754_v59, %v2756_v4  ;;  %v3233_v39 = vld [vmem:[#allocation7 + $0xde0] sm:$0xff]  ;;  %v3231_v57 = vld [vmem:[#allocation7 + $0xdd0] sm:$0xff]  ;;  %v2816_v34 = vld [vmem:[#allocation7 + $0xd8] sm:$0xff] }
 0x454   :  { %v2772_v31 = vsel %vm2545_vm15, %v2769_v61, %v2771_v49  ;;  %v2743_v12 = vrot.slane %v2742_v42, 1  ;;  %vm10764_vm6 = vcmask 1043456   ;;  %v2758_v30 = vrot.slane %v2757_v32, 2  ;;  %v3265_v45 = vld [vmem:[#allocation7 + $0xee0] sm:$0xff]  ;;  %v3263_v16 = vld [vmem:[#allocation7 + $0xed0] sm:$0xff]  ;;  %v2814_v4 = vld [vmem:[#allocation7 + $0xc8] sm:$0xff] }
 0x455   :  { %v2787_v10 = vsel %vm10764_vm6, %v2786_v14, %v2784_v52  ;;  %v2773_v56 = vrot.slane %v2772_v31, 3  ;;  %v3197_v24 = vld [vmem:[#allocation7 + $0xcc0] sm:$0xff]  ;;  %v3195_v61 = vld [vmem:[#allocation7 + $0xcb0] sm:$0xff]  ;;  %v2812_v52 = vld [vmem:[#allocation7 + $0xb8] sm:$0xff]  ;;  %vm10793_vm3 = vcmask 1045509   ;;  %vm10794_vm0 = vcmask 1042434  }
 0x456   :  { %v2788_v13 = vrot.slane %v2787_v10, 4  ;;  %v3229_v48 = vld [vmem:[#allocation7 + $0xdc0] sm:$0xff]  ;;  %v3227_v49 = vld [vmem:[#allocation7 + $0xdb0] sm:$0xff]  ;;  %vm10795_vm2 = vcmask 1046528   ;;  %vm10796_vm4 = vcmask 1043459   ;;  %vm10797_vm14 = vmmov %vm10794_vm0 }
 0x457   :  { %v3261_v59 = vld [vmem:[#allocation7 + $0xec0] sm:$0xff]  ;;  %v3259_v42 = vld [vmem:[#allocation7 + $0xeb0] sm:$0xff]  ;;  %vm10798_vm6 = vmmov %vm10795_vm2 }
 0x458   :  { %v9553_v36 = vld [vmem:[#allocation1] sm:$0xff]  ;;  %v9555_v28 = vld [vmem:[#allocation1 + $0x9] sm:$0xff]  ;;  %v9557_v40 = vld [vmem:[#allocation1 + $0x12] sm:$0xff] }
 0x459   :  { %3434 = vmatmul.f32.gmra.mxu3 %v9553_v36  ;;  %3460 = vmatmul.f32.gmra.mxu0 %v9555_v28  ;;  %v9562_v44 = vld [vmem:[#allocation1 + $0x1b] sm:$0xff]  ;;  %v9564_v41 = vld [vmem:[#allocation1 + $0x24] sm:$0xff]  ;;  %v9566_v5 = vld [vmem:[#allocation1 + $0x2d] sm:$0xff] }
 0x45a   :  { %3486 = vmatmul.f32.gmra.mxu1 %v9557_v40  ;;  %3512 = vmatmul.f32.gmra.mxu2 %v9562_v44  ;;  %v9570_v9 = vld [vmem:[#allocation1 + $0x36] sm:$0xff]  ;;  %v9572_v38 = vld [vmem:[#allocation1 + $0x3f] sm:$0xff]  ;;  %v3193_v14 = vld [vmem:[#allocation7 + $0xca0] sm:$0xff] }
 0x45b   :  { %3356 = vst [vmem:[#allocation1] ss:$9 sm:$0xff] %v2743_v12  ;;  %v3225_v32 = vld [vmem:[#allocation7 + $0xda0] sm:$0xff]  ;;  %v2810_v12 = vld [vmem:[#allocation7 + $0xa8] sm:$0xff]  ;;  %v3191_v10 = vld [vmem:[#allocation7 + $0xc90] sm:$0xff] }
 0x45c   :  { %3357 = vst [vmem:[#allocation1 + $0x1] ss:$9 sm:$0xff] %v2758_v30  ;;  %v3257_v31 = vld [vmem:[#allocation7 + $0xea0] sm:$0xff]  ;;  %v3223_v30 = vld [vmem:[#allocation7 + $0xd90] sm:$0xff] }
 0x45d   :  { %3358 = vst [vmem:[#allocation1 + $0x2] ss:$9 sm:$0xff] %v2773_v56  ;;  %v3255_v56 = vld [vmem:[#allocation7 + $0xe90] sm:$0xff] }
 0x45e   :  { %3359 = vst [vmem:[#allocation1 + $0x3] ss:$9 sm:$0xff] %v2788_v13  ;;  %v2808_v13 = vld [vmem:[#allocation7 + $0x98] sm:$0xff] }
 0x461   :  { %3532 = vmatmul.f32.vlgmr.msra.gmra.mxu3 %v9043_v11  ;;  %3558 = vmatmul.f32.vlgmr.msra.gmra.mxu0 %v9045_v50 }
 0x462   :  { %3584 = vmatmul.f32.vlgmr.msra.gmra.mxu1 %v9053_v1  ;;  %3610 = vmatmul.f32.vlgmr.msra.gmra.mxu2 %v9055_v0 }
 0x463   :  { %3724 = vmatpush.msra.mxu3 %v3203_v37  ;;  %3750 = vmatpush.msra.mxu0 %v3235_v62  ;;  %v3189_v37 = vld [vmem:[#allocation7 + $0xc80] sm:$0xff] }
 0x464   :  { %3776 = vmatpush.msra.mxu1 %v3267_v60  ;;  %3802 = vmatpush.msra.mxu2 %v2820_v27  ;;  %v3221_v62 = vld [vmem:[#allocation7 + $0xd80] sm:$0xff]  ;;  %v2806_v27 = vld [vmem:[#allocation7 + $0x88] sm:$0xff] }
 0x465   :  { %3725 = vmatpush.msra.mxu3 %v3201_v22  ;;  %3751 = vmatpush.msra.mxu0 %v3233_v39  ;;  %v3253_v60 = vld [vmem:[#allocation7 + $0xe80] sm:$0xff]  ;;  %v3187_v22 = vld [vmem:[#allocation7 + $0xc70] sm:$0xff] }
 0x466   :  { %3777 = vmatpush.msra.mxu1 %v3265_v45  ;;  %3803 = vmatpush.msra.mxu2 %v2818_v29  ;;  %v3219_v39 = vld [vmem:[#allocation7 + $0xd70] sm:$0xff]  ;;  %v2804_v29 = vld [vmem:[#allocation7 + $0x78] sm:$0xff] }
 0x467   :  { %3726 = vmatpush.msra.mxu3 %v3199_v26  ;;  %3752 = vmatpush.msra.mxu0 %v3231_v57  ;;  %v3251_v45 = vld [vmem:[#allocation7 + $0xe70] sm:$0xff]  ;;  %v3185_v26 = vld [vmem:[#allocation7 + $0xc60] sm:$0xff] }
 0x468   :  { %3778 = vmatpush.msra.mxu1 %v3263_v16  ;;  %3804 = vmatpush.msra.mxu2 %v2816_v34  ;;  %v3217_v57 = vld [vmem:[#allocation7 + $0xd60] sm:$0xff]  ;;  %v2802_v34 = vld [vmem:[#allocation7 + $0x68] sm:$0xff] }
 0x469   :  { %3727 = vmatpush.msra.mxu3 %v3197_v24  ;;  %3753 = vmatpush.msra.mxu0 %v3229_v48  ;;  %v3249_v16 = vld [vmem:[#allocation7 + $0xe60] sm:$0xff]  ;;  %v3183_v24 = vld [vmem:[#allocation7 + $0xc50] sm:$0xff] }
 0x46a   :  { %3779 = vmatpush.msra.mxu1 %v3261_v59  ;;  %3805 = vmatpush.msra.mxu2 %v2814_v4  ;;  %v3215_v48 = vld [vmem:[#allocation7 + $0xd50] sm:$0xff]  ;;  %v2800_v4 = vld [vmem:[#allocation7 + $0x58] sm:$0xff] }
 0x46b   :  { %3535 = vmatmul.f32.gmra.mxu3 %v9396_v25  ;;  %3561 = vmatmul.f32.gmra.mxu0 %v9398_v53  ;;  %v3247_v59 = vld [vmem:[#allocation7 + $0xe50] sm:$0xff] }
 0x46c   :  { %3587 = vmatmul.f32.gmra.mxu1 %v9407_v18  ;;  %3613 = vmatmul.f32.gmra.mxu2 %v9409_v21 }
 0x46d   :  { %3728 = vmatpush.msra.mxu3 %v3195_v61  ;;  %3754 = vmatpush.msra.mxu0 %v3227_v49  ;;  %v3181_v61 = vld [vmem:[#allocation7 + $0xc40] sm:$0xff] }
 0x46e   :  { %3780 = vmatpush.msra.mxu1 %v3259_v42  ;;  %3806 = vmatpush.msra.mxu2 %v2812_v52  ;;  %v3213_v49 = vld [vmem:[#allocation7 + $0xd40] sm:$0xff]  ;;  %v2798_v52 = vld [vmem:[#allocation7 + $0x48] sm:$0xff] }
 0x46f   :  { %3729 = vmatpush.msra.mxu3 %v3193_v14  ;;  %3755 = vmatpush.msra.mxu0 %v3225_v32  ;;  %v3245_v42 = vld [vmem:[#allocation7 + $0xe40] sm:$0xff]  ;;  %v3179_v14 = vld [vmem:[#allocation7 + $0xc30] sm:$0xff] }
 0x470   :  { %3781 = vmatpush.msra.mxu1 %v3257_v31  ;;  %3807 = vmatpush.msra.mxu2 %v2810_v12  ;;  %v3211_v32 = vld [vmem:[#allocation7 + $0xd30] sm:$0xff]  ;;  %v2796_v12 = vld [vmem:[#allocation7 + $0x38] sm:$0xff] }
 0x471   :  { %3730 = vmatpush.msra.mxu3 %v3191_v10  ;;  %3756 = vmatpush.msra.mxu0 %v3223_v30  ;;  %v3243_v31 = vld [vmem:[#allocation7 + $0xe30] sm:$0xff]  ;;  %v3177_v10 = vld [vmem:[#allocation7 + $0xc20] sm:$0xff] }
 0x472   :  { %3782 = vmatpush.msra.mxu1 %v3255_v56  ;;  %3808 = vmatpush.msra.mxu2 %v2808_v13  ;;  %v3209_v30 = vld [vmem:[#allocation7 + $0xd20] sm:$0xff]  ;;  %v2794_v13 = vld [vmem:[#allocation7 + $0x28] sm:$0xff] }
 0x473   :  { %3731 = vmatpush.msra.mxu3 %v3189_v37  ;;  %3757 = vmatpush.msra.mxu0 %v3221_v62  ;;  %v3241_v56 = vld [vmem:[#allocation7 + $0xe20] sm:$0xff]  ;;  %v3175_v37 = vld [vmem:[#allocation7 + $0xc10] sm:$0xff] }
 0x474   :  { %3783 = vmatpush.msra.mxu1 %v3253_v60  ;;  %3809 = vmatpush.msra.mxu2 %v2806_v27  ;;  %v3207_v62 = vld [vmem:[#allocation7 + $0xd10] sm:$0xff]  ;;  %v2792_v27 = vld [vmem:[#allocation7 + $0x18] sm:$0xff] }
 0x475   :  { %3538 = vmatmul.f32.gmra.mxu3 %v9564_v41  ;;  %3564 = vmatmul.f32.gmra.mxu0 %v9566_v5  ;;  %v3239_v60 = vld [vmem:[#allocation7 + $0xe10] sm:$0xff] }
 0x476   :  { %3590 = vmatmul.f32.gmra.mxu1 %v9570_v9  ;;  %3616 = vmatmul.f32.gmra.mxu2 %v9572_v38 }
 0x477   :  { %3732 = vmatpush.msra.mxu3 %v3187_v22  ;;  %3758 = vmatpush.msra.mxu0 %v3219_v39  ;;  %v3173_v22 = vld [vmem:[#allocation7 + $0xc00] sm:$0xff] }
 0x478   :  { %3784 = vmatpush.msra.mxu1 %v3251_v45  ;;  %3810 = vmatpush.msra.mxu2 %v2804_v29  ;;  %v3205_v39 = vld [vmem:[#allocation7 + $0xd00] sm:$0xff]  ;;  %v2790_v29 = vld [vmem:[#allocation7 + $0x8] sm:$0xff] }
 0x479   :  { %3733 = vmatpush.msra.mxu3 %v3185_v26  ;;  %3759 = vmatpush.msra.mxu0 %v3217_v57  ;;  %v3237_v45 = vld [vmem:[#allocation7 + $0xe00] sm:$0xff]  ;;  %v2852_v26 = vld [vmem:[#allocation7 + $0x1f8] sm:$0xff] }
 0x47a   :  { %3785 = vmatpush.msra.mxu1 %v3249_v16  ;;  %3811 = vmatpush.msra.mxu2 %v2802_v34  ;;  %v2884_v57 = vld [vmem:[#allocation7 + $0x2f8] sm:$0xff] }
 0x47b   :  { %3734 = vmatpush.msra.mxu3 %v3183_v24  ;;  %3760 = vmatpush.msra.mxu0 %v3215_v48  ;;  %v2916_v16 = vld [vmem:[#allocation7 + $0x3f8] sm:$0xff]  ;;  %v2850_v24 = vld [vmem:[#allocation7 + $0x1e8] sm:$0xff] }
 0x47c   :  { %3786 = vmatpush.msra.mxu1 %v3247_v59  ;;  %3812 = vmatpush.msra.mxu2 %v2800_v4  ;;  %v2948_v34 = vld [vmem:[#allocation7 + $0x4f8] sm:$0xff]  ;;  %v2882_v48 = vld [vmem:[#allocation7 + $0x2e8] sm:$0xff] }
 0x47d   :  { %3735 = vmatpush.msra.mxu3 %v3181_v61  ;;  %3761 = vmatpush.msra.mxu0 %v3213_v49  ;;  %v2914_v59 = vld [vmem:[#allocation7 + $0x3e8] sm:$0xff]  ;;  %v2848_v61 = vld [vmem:[#allocation7 + $0x1d8] sm:$0xff] }
 0x47e   :  { %3787 = vmatpush.msra.mxu1 %v3245_v42  ;;  %3813 = vmatpush.msra.mxu2 %v2798_v52  ;;  %v2946_v4 = vld [vmem:[#allocation7 + $0x4e8] sm:$0xff]  ;;  %v2880_v49 = vld [vmem:[#allocation7 + $0x2d8] sm:$0xff] }
 0x47f   :  { %3636 = vmatmul.f32.vlgmr.msrb.gmra.mxu3 %v9224_v33  ;;  %3662 = vmatmul.f32.vlgmr.msrb.gmra.mxu0 %v9226_v58  ;;  %v2912_v42 = vld [vmem:[#allocation7 + $0x3d8] sm:$0xff] }
 0x480   :  { %3688 = vmatmul.f32.vlgmr.msrb.gmra.mxu1 %v9228_v15  ;;  %3714 = vmatmul.f32.vlgmr.msrb.gmra.mxu2 %v9239_v6  ;;  %v2944_v52 = vld [vmem:[#allocation7 + $0x4d8] sm:$0xff] }
 0x481   :  { %3736 = vmatpush.msra.mxu3 %v3179_v14  ;;  %3762 = vmatpush.msra.mxu0 %v3211_v32  ;;  %v2846_v14 = vld [vmem:[#allocation7 + $0x1c8] sm:$0xff] }
 0x482   :  { %3788 = vmatpush.msra.mxu1 %v3243_v31  ;;  %3814 = vmatpush.msra.mxu2 %v2796_v12  ;;  %v2878_v32 = vld [vmem:[#allocation7 + $0x2c8] sm:$0xff] }
 0x483   :  { %3737 = vmatpush.msra.mxu3 %v3177_v10  ;;  %3763 = vmatpush.msra.mxu0 %v3209_v30  ;;  %v2910_v31 = vld [vmem:[#allocation7 + $0x3c8] sm:$0xff]  ;;  %v2844_v10 = vld [vmem:[#allocation7 + $0x1b8] sm:$0xff] }
 0x484   :  { %3789 = vmatpush.msra.mxu1 %v3241_v56  ;;  %3815 = vmatpush.msra.mxu2 %v2794_v13  ;;  %v2942_v12 = vld [vmem:[#allocation7 + $0x4c8] sm:$0xff]  ;;  %v2876_v30 = vld [vmem:[#allocation7 + $0x2b8] sm:$0xff] }
 0x485   :  { %3738 = vmatpush.msra.mxu3 %v3175_v37  ;;  %3764 = vmatpush.msra.mxu0 %v3207_v62  ;;  %v2908_v56 = vld [vmem:[#allocation7 + $0x3b8] sm:$0xff] }
 0x486   :  { %3790 = vmatpush.msra.mxu1 %v3239_v60  ;;  %3816 = vmatpush.msra.mxu2 %v2792_v27  ;;  %v2940_v13 = vld [vmem:[#allocation7 + $0x4b8] sm:$0xff]  ;;  %v9598_v60 = vld [vmem:[#allocation1 + $0x12] sm:$0xff] }
 0x487   :  { %3739 = vmatpush.msra.mxu3 %v3173_v22  ;;  %3765 = vmatpush.msra.mxu0 %v3205_v39  ;;  %v9594_v37 = vld [vmem:[#allocation1] sm:$0xff]  ;;  %v9596_v62 = vld [vmem:[#allocation1 + $0x9] sm:$0xff]  ;;  %v2842_v27 = vld [vmem:[#allocation7 + $0x1a8] sm:$0xff] }
 0x488   :  { %3791 = vmatpush.msra.mxu1 %v3237_v45  ;;  %3817 = vmatpush.msra.mxu2 %v2790_v29  ;;  %v2874_v22 = vld [vmem:[#allocation7 + $0x2a8] sm:$0xff]  ;;  %v9602_v39 = vld [vmem:[#allocation1 + $0x1b] sm:$0xff] }
 0x489   :  { %3828 = vmatpush.msrb.mxu3 %v2852_v26  ;;  %3854 = vmatpush.msrb.mxu0 %v2884_v57  ;;  %v2906_v45 = vld [vmem:[#allocation7 + $0x3a8] sm:$0xff]  ;;  %v2840_v26 = vld [vmem:[#allocation7 + $0x198] sm:$0xff] }
 0x48a   :  { %3880 = vmatpush.msrb.mxu1 %v2916_v16  ;;  %3906 = vmatpush.msrb.mxu2 %v2948_v34  ;;  %v2938_v29 = vld [vmem:[#allocation7 + $0x4a8] sm:$0xff]  ;;  %v2872_v57 = vld [vmem:[#allocation7 + $0x298] sm:$0xff] }
 0x48b   :  { %3639 = vmatmul.f32.gmra.mxu3 %v9487_v23  ;;  %3665 = vmatmul.f32.gmra.mxu0 %v9489_v8  ;;  %v2904_v16 = vld [vmem:[#allocation7 + $0x398] sm:$0xff] }
 0x48c   :  { %3691 = vmatmul.f32.gmra.mxu1 %v9491_v55  ;;  %3717 = vmatmul.f32.gmra.mxu2 %v9494_v3  ;;  %v2936_v34 = vld [vmem:[#allocation7 + $0x498] sm:$0xff] }
 0x48d   :  { %3829 = vmatpush.msrb.mxu3 %v2850_v24  ;;  %3855 = vmatpush.msrb.mxu0 %v2882_v48  ;;  %v2838_v24 = vld [vmem:[#allocation7 + $0x188] sm:$0xff] }
 0x48e   :  { %3881 = vmatpush.msrb.mxu1 %v2914_v59  ;;  %3907 = vmatpush.msrb.mxu2 %v2946_v4  ;;  %v2870_v48 = vld [vmem:[#allocation7 + $0x288] sm:$0xff] }
 0x48f   :  { %3830 = vmatpush.msrb.mxu3 %v2848_v61  ;;  %3856 = vmatpush.msrb.mxu0 %v2880_v49  ;;  %v2902_v59 = vld [vmem:[#allocation7 + $0x388] sm:$0xff]  ;;  %v2836_v61 = vld [vmem:[#allocation7 + $0x178] sm:$0xff] }
 0x490   :  { %3882 = vmatpush.msrb.mxu1 %v2912_v42  ;;  %3908 = vmatpush.msrb.mxu2 %v2944_v52  ;;  %v2934_v4 = vld [vmem:[#allocation7 + $0x488] sm:$0xff]  ;;  %v2868_v49 = vld [vmem:[#allocation7 + $0x278] sm:$0xff] }
 0x491   :  { %3831 = vmatpush.msrb.mxu3 %v2846_v14  ;;  %3857 = vmatpush.msrb.mxu0 %v2878_v32  ;;  %v2900_v42 = vld [vmem:[#allocation7 + $0x378] sm:$0xff]  ;;  %v2834_v14 = vld [vmem:[#allocation7 + $0x168] sm:$0xff] }
 0x492   :  { %3883 = vmatpush.msrb.mxu1 %v2910_v31  ;;  %3909 = vmatpush.msrb.mxu2 %v2942_v12  ;;  %v2932_v52 = vld [vmem:[#allocation7 + $0x478] sm:$0xff]  ;;  %v2866_v32 = vld [vmem:[#allocation7 + $0x268] sm:$0xff] }
 0x493   :  { %3832 = vmatpush.msrb.mxu3 %v2844_v10  ;;  %3858 = vmatpush.msrb.mxu0 %v2876_v30  ;;  %v2898_v31 = vld [vmem:[#allocation7 + $0x368] sm:$0xff]  ;;  %v2832_v10 = vld [vmem:[#allocation7 + $0x158] sm:$0xff] }
 0x494   :  { %3884 = vmatpush.msrb.mxu1 %v2908_v56  ;;  %3910 = vmatpush.msrb.mxu2 %v2940_v13  ;;  %v2930_v12 = vld [vmem:[#allocation7 + $0x468] sm:$0xff]  ;;  %v2864_v30 = vld [vmem:[#allocation7 + $0x258] sm:$0xff] }
 0x495   :  { %3642 = vmatmul.f32.gmra.mxu3 %v9594_v37  ;;  %3668 = vmatmul.f32.gmra.mxu0 %v9596_v62  ;;  %v2896_v56 = vld [vmem:[#allocation7 + $0x358] sm:$0xff] }
 0x496   :  { %3694 = vmatmul.f32.gmra.mxu1 %v9598_v60  ;;  %3720 = vmatmul.f32.gmra.mxu2 %v9602_v39  ;;  %v2928_v13 = vld [vmem:[#allocation7 + $0x458] sm:$0xff] }
 0x497   :  { %3833 = vmatpush.msrb.mxu3 %v2842_v27  ;;  %3859 = vmatpush.msrb.mxu0 %v2874_v22  ;;  %v2830_v27 = vld [vmem:[#allocation7 + $0x148] sm:$0xff] }
 0x498   :  { %3885 = vmatpush.msrb.mxu1 %v2906_v45  ;;  %3911 = vmatpush.msrb.mxu2 %v2938_v29  ;;  %v2862_v22 = vld [vmem:[#allocation7 + $0x248] sm:$0xff] }
 0x499   :  { %3834 = vmatpush.msrb.mxu3 %v2840_v26  ;;  %3860 = vmatpush.msrb.mxu0 %v2872_v57  ;;  %v2894_v45 = vld [vmem:[#allocation7 + $0x348] sm:$0xff]  ;;  %v2828_v26 = vld [vmem:[#allocation7 + $0x138] sm:$0xff] }
 0x49a   :  { %3886 = vmatpush.msrb.mxu1 %v2904_v16  ;;  %3912 = vmatpush.msrb.mxu2 %v2936_v34  ;;  %v2926_v29 = vld [vmem:[#allocation7 + $0x448] sm:$0xff]  ;;  %v2860_v57 = vld [vmem:[#allocation7 + $0x238] sm:$0xff] }
 0x49b   :  { %3835 = vmatpush.msrb.mxu3 %v2838_v24  ;;  %3861 = vmatpush.msrb.mxu0 %v2870_v48  ;;  %v2924_v16 = vld [vmem:[#allocation7 + $0x438] sm:$0xff]  ;;  %v2826_v34 = vld [vmem:[#allocation7 + $0x128] sm:$0xff] }
 0x49c   :  { %3887 = vmatpush.msrb.mxu1 %v2902_v59  ;;  %3913 = vmatpush.msrb.mxu2 %v2934_v4  ;;  %v2858_v24 = vld [vmem:[#allocation7 + $0x228] sm:$0xff]  ;;  %v2824_v4 = vld [vmem:[#allocation7 + $0x118] sm:$0xff] }
 0x49d   :  { %3836 = vmatpush.msrb.mxu3 %v2836_v61  ;;  %3862 = vmatpush.msrb.mxu0 %v2868_v49  ;;  %v2890_v48 = vld [vmem:[#allocation7 + $0x328] sm:$0xff]  ;;  %v2856_v61 = vld [vmem:[#allocation7 + $0x218] sm:$0xff] }
 0x49e   :  { %3888 = vmatpush.msrb.mxu1 %v2900_v42  ;;  %3914 = vmatpush.msrb.mxu2 %v2932_v52  ;;  %v2922_v59 = vld [vmem:[#allocation7 + $0x428] sm:$0xff]  ;;  %v2888_v49 = vld [vmem:[#allocation7 + $0x318] sm:$0xff] }
 0x49f   :  { %3740 = vmatmul.f32.vlgmr.msra.gmra.mxu3 %v9241_v54  ;;  %3766 = vmatmul.f32.vlgmr.msra.gmra.mxu0 %v9243_v51  ;;  %v2920_v42 = vld [vmem:[#allocation7 + $0x418] sm:$0xff]  ;;  %v2822_v52 = vld [vmem:[#allocation7 + $0x108] sm:$0xff] }
 0x4a0   :  { %3792 = vmatmul.f32.vlgmr.msra.gmra.mxu1 %v9259_v17  ;;  %3818 = vmatmul.f32.vlgmr.msra.gmra.mxu2 %v9041_v7  ;;  %v2892_v7 = vld [vmem:[#allocation7 + $0x338] sm:$0xff] }
 0x4a1   :  { %3837 = vmatpush.msrb.mxu3 %v2834_v14  ;;  %3863 = vmatpush.msrb.mxu0 %v2866_v32  ;;  %v2854_v14 = vld [vmem:[#allocation7 + $0x208] sm:$0xff] }
 0x4a2   :  { %3889 = vmatpush.msrb.mxu1 %v2898_v31  ;;  %3915 = vmatpush.msrb.mxu2 %v2930_v12  ;;  %v2886_v32 = vld [vmem:[#allocation7 + $0x308] sm:$0xff]  ;;  %v2980_v12 = vld [vmem:[#allocation7 + $0x5f8] sm:$0xff] }
 0x4a3   :  { %3838 = vmatpush.msrb.mxu3 %v2832_v10  ;;  %3864 = vmatpush.msrb.mxu0 %v2864_v30  ;;  %v2918_v31 = vld [vmem:[#allocation7 + $0x408] sm:$0xff]  ;;  %v3012_v10 = vld [vmem:[#allocation7 + $0x6f8] sm:$0xff] }
 0x4a4   :  { %3890 = vmatpush.msrb.mxu1 %v2896_v56  ;;  %3916 = vmatpush.msrb.mxu2 %v2928_v13  ;;  %v3076_v30 = vld [vmem:[#allocation7 + $0x8f8] sm:$0xff]  ;;  %v9616_v13 = vld [vmem:[#allocation1 + $0x2d] sm:$0xff] }
 0x4a5   :  { %3839 = vmatpush.msrb.mxu3 %v2830_v27  ;;  %3865 = vmatpush.msrb.mxu0 %v2862_v22  ;;  %v9614_v56 = vld [vmem:[#allocation1 + $0x24] sm:$0xff]  ;;  %v2978_v27 = vld [vmem:[#allocation7 + $0x5e8] sm:$0xff] }
 0x4a6   :  { %3891 = vmatpush.msrb.mxu1 %v2894_v45  ;;  %3917 = vmatpush.msrb.mxu2 %v2926_v29  ;;  %v3010_v22 = vld [vmem:[#allocation7 + $0x6e8] sm:$0xff] }
 0x4a7   :  { %3840 = vmatpush.msrb.mxu3 %v2828_v26  ;;  %3866 = vmatpush.msrb.mxu0 %v2860_v57  ;;  %v9620_v45 = vld [vmem:[#allocation1 + $0x36] sm:$0xff]  ;;  %v2976_v57 = vld [vmem:[#allocation7 + $0x5d8] sm:$0xff] }
 0x4a8   :  { %3892 = vmatpush.msrb.mxu1 %v2892_v7  ;;  %3918 = vmatpush.msrb.mxu2 %v2924_v16  ;;  %v3042_v29 = vld [vmem:[#allocation7 + $0x7e8] sm:$0xff]  ;;  %v3008_v7 = vld [vmem:[#allocation7 + $0x6d8] sm:$0xff] }
 0x4a9   :  { %3743 = vmatmul.f32.gmra.mxu3 %v9496_v19  ;;  %3769 = vmatmul.f32.gmra.mxu0 %v9498_v20  ;;  %v3074_v26 = vld [vmem:[#allocation7 + $0x8e8] sm:$0xff]  ;;  %v3040_v16 = vld [vmem:[#allocation7 + $0x7d8] sm:$0xff] }
 0x4aa   :  { %3795 = vmatmul.f32.gmra.mxu1 %v9500_v43  ;;  %3821 = vmatmul.f32.gmra.mxu2 %v9383_v47  ;;  %v3044_v47 = vld [vmem:[#allocation7 + $0x7f8] sm:$0xff] }
 0x4ab   :  { %3841 = vmatpush.msrb.mxu3 %v2826_v34  ;;  %3867 = vmatpush.msrb.mxu0 %v2858_v24  ;;  %v3072_v34 = vld [vmem:[#allocation7 + $0x8d8] sm:$0xff]  ;;  %v2974_v24 = vld [vmem:[#allocation7 + $0x5c8] sm:$0xff] }
 0x4ac   :  { %3893 = vmatpush.msrb.mxu1 %v2890_v48  ;;  %3919 = vmatpush.msrb.mxu2 %v2922_v59  ;;  %v3006_v48 = vld [vmem:[#allocation7 + $0x6c8] sm:$0xff] }
 0x4ad   :  { %3842 = vmatpush.msrb.mxu3 %v2824_v4  ;;  %3868 = vmatpush.msrb.mxu0 %v2856_v61  ;;  %v3038_v59 = vld [vmem:[#allocation7 + $0x7c8] sm:$0xff]  ;;  %v2972_v61 = vld [vmem:[#allocation7 + $0x5b8] sm:$0xff] }
 0x4ae   :  { %3894 = vmatpush.msrb.mxu1 %v2888_v49  ;;  %3920 = vmatpush.msrb.mxu2 %v2920_v42  ;;  %v3070_v4 = vld [vmem:[#allocation7 + $0x8c8] sm:$0xff]  ;;  %v3004_v49 = vld [vmem:[#allocation7 + $0x6b8] sm:$0xff] }
 0x4af   :  { %3843 = vmatpush.msrb.mxu3 %v2822_v52  ;;  %3869 = vmatpush.msrb.mxu0 %v2854_v14  ;;  %v3068_v42 = vld [vmem:[#allocation7 + $0x8b8] sm:$0xff]  ;;  %v2970_v52 = vld [vmem:[#allocation7 + $0x5a8] sm:$0xff] }
 0x4b0   :  { %3895 = vmatpush.msrb.mxu1 %v2886_v32  ;;  %3921 = vmatpush.msrb.mxu2 %v2918_v31  ;;  %v3002_v14 = vld [vmem:[#allocation7 + $0x6a8] sm:$0xff]  ;;  %v10765_v32 = vld [vmem:[#allocation27_spill] sm:$0xff] }
 0x4b1   :  { %3932 = vmatpush.msra.mxu3 %v2980_v12  ;;  %3958 = vmatpush.msra.mxu0 %v3012_v10  ;;  %v3034_v31 = vld [vmem:[#allocation7 + $0x7a8] sm:$0xff]  ;;  %v10766_v10 = vld [vmem:[#allocation28_spill] sm:$0xff] }
 0x4b2   :  { %3984 = vmatpush.msra.mxu1 %v3044_v47  ;;  %4010 = vmatpush.msra.mxu2 %v3076_v30  ;;  %v3066_v12 = vld [vmem:[#allocation7 + $0x8a8] sm:$0xff]  ;;  %v2968_v47 = vld [vmem:[#allocation7 + $0x598] sm:$0xff] }
 0x4b3   :  { %3746 = vmatmul.f32.gmra.mxu3 %v9614_v56  ;;  %3772 = vmatmul.f32.gmra.mxu0 %v9616_v13  ;;  %v3000_v30 = vld [vmem:[#allocation7 + $0x698] sm:$0xff] }
 0x4b4   :  { %3798 = vmatmul.f32.gmra.mxu1 %v9620_v45  ;;  %3824 = vmatmul.f32.gmra.mxu2 %v9553_v36  ;;  %v3036_v36 = vld [vmem:[#allocation7 + $0x7b8] sm:$0xff] }
 0x4b5   :  { %3933 = vmatpush.msra.mxu3 %v2978_v27  ;;  %3959 = vmatpush.msra.mxu0 %v3010_v22  ;;  %v3032_v27 = vld [vmem:[#allocation7 + $0x798] sm:$0xff] }
 0x4b6   :  { %3985 = vmatpush.msra.mxu1 %v3042_v29  ;;  %4011 = vmatpush.msra.mxu2 %v3074_v26  ;;  %v3064_v22 = vld [vmem:[#allocation7 + $0x898] sm:$0xff]  ;;  %v2966_v29 = vld [vmem:[#allocation7 + $0x588] sm:$0xff] }
 0x4b7   :  { %3934 = vmatpush.msra.mxu3 %v2976_v57  ;;  %3960 = vmatpush.msra.mxu0 %v3008_v7  ;;  %v2998_v26 = vld [vmem:[#allocation7 + $0x688] sm:$0xff]  ;;  %v2964_v7 = vld [vmem:[#allocation7 + $0x578] sm:$0xff] }
 0x4b8   :  { %3986 = vmatpush.msra.mxu1 %v3040_v16  ;;  %4012 = vmatpush.msra.mxu2 %v3072_v34  ;;  %v3062_v57 = vld [vmem:[#allocation7 + $0x888] sm:$0xff]  ;;  %v2996_v16 = vld [vmem:[#allocation7 + $0x678] sm:$0xff] }
 0x4b9   :  { %3935 = vmatpush.msra.mxu3 %v2974_v24  ;;  %3961 = vmatpush.msra.mxu0 %v3006_v48  ;;  %v3060_v34 = vld [vmem:[#allocation7 + $0x878] sm:$0xff]  ;;  %v2962_v24 = vld [vmem:[#allocation7 + $0x568] sm:$0xff] }
 0x4ba   :  { %3987 = vmatpush.msra.mxu1 %v3038_v59  ;;  %4013 = vmatpush.msra.mxu2 %v3070_v4  ;;  %v2994_v48 = vld [vmem:[#allocation7 + $0x668] sm:$0xff] }
 0x4bb   :  { %3936 = vmatpush.msra.mxu3 %v2972_v61  ;;  %3962 = vmatpush.msra.mxu0 %v3004_v49  ;;  %v3026_v59 = vld [vmem:[#allocation7 + $0x768] sm:$0xff]  ;;  %v2960_v61 = vld [vmem:[#allocation7 + $0x558] sm:$0xff] }
 0x4bc   :  { %3988 = vmatpush.msra.mxu1 %v3036_v36  ;;  %4014 = vmatpush.msra.mxu2 %v3068_v42  ;;  %v3058_v4 = vld [vmem:[#allocation7 + $0x868] sm:$0xff]  ;;  %v2992_v49 = vld [vmem:[#allocation7 + $0x658] sm:$0xff] }
 0x4bd   :  { %3844 = vmatmul.f32.vlgmr.msrb.gmra.mxu3 %v9058_v46  ;;  %3870 = vmatmul.f32.vlgmr.msrb.gmra.mxu0 %v10765_v32  ;;  %v3030_v46 = vld [vmem:[#allocation7 + $0x788] sm:$0xff]  ;;  %v3024_v36 = vld [vmem:[#allocation7 + $0x758] sm:$0xff] }
 0x4be   :  { %3896 = vmatmul.f32.vlgmr.msrb.gmra.mxu1 %v10766_v10  ;;  %3922 = vmatmul.f32.vlgmr.msrb.gmra.mxu2 %v9043_v11  ;;  %v3028_v11 = vld [vmem:[#allocation7 + $0x778] sm:$0xff]  ;;  %v2986_v10 = vld [vmem:[#allocation7 + $0x628] sm:$0xff] }
 0x4bf   :  { %3937 = vmatpush.msra.mxu3 %v2970_v52  ;;  %3963 = vmatpush.msra.mxu0 %v3002_v14  ;;  %v3056_v42 = vld [vmem:[#allocation7 + $0x858] sm:$0xff]  ;;  %v2958_v52 = vld [vmem:[#allocation7 + $0x548] sm:$0xff] }
 0x4c0   :  { %3989 = vmatpush.msra.mxu1 %v3034_v31  ;;  %4015 = vmatpush.msra.mxu2 %v3066_v12  ;;  %v2990_v14 = vld [vmem:[#allocation7 + $0x648] sm:$0xff]  ;;  %v2956_v32 = vld [vmem:[#allocation7 + $0x538] sm:$0xff] }
 0x4c1   :  { %3938 = vmatpush.msra.mxu3 %v2968_v47  ;;  %3964 = vmatpush.msra.mxu0 %v3000_v30  ;;  %v3052_v31 = vld [vmem:[#allocation7 + $0x838] sm:$0xff]  ;;  %v2954_v12 = vld [vmem:[#allocation7 + $0x528] sm:$0xff] }
 0x4c2   :  { %3990 = vmatpush.msra.mxu1 %v3032_v27  ;;  %4016 = vmatpush.msra.mxu2 %v3064_v22  ;;  %v3018_v47 = vld [vmem:[#allocation7 + $0x728] sm:$0xff]  ;;  %v2952_v27 = vld [vmem:[#allocation7 + $0x518] sm:$0xff] }
 0x4c3   :  { %3939 = vmatpush.msra.mxu3 %v2966_v29  ;;  %3965 = vmatpush.msra.mxu0 %v2998_v26  ;;  %v3050_v30 = vld [vmem:[#allocation7 + $0x828] sm:$0xff]  ;;  %v2984_v22 = vld [vmem:[#allocation7 + $0x618] sm:$0xff] }
 0x4c4   :  { %3991 = vmatpush.msra.mxu1 %v3030_v46  ;;  %4017 = vmatpush.msra.mxu2 %v3062_v57  ;;  %v3016_v29 = vld [vmem:[#allocation7 + $0x718] sm:$0xff]  ;;  %v2950_v46 = vld [vmem:[#allocation7 + $0x508] sm:$0xff] }
 0x4c5   :  { %3940 = vmatpush.msra.mxu3 %v2964_v7  ;;  %3966 = vmatpush.msra.mxu0 %v2996_v16  ;;  %v3048_v26 = vld [vmem:[#allocation7 + $0x818] sm:$0xff]  ;;  %v2982_v57 = vld [vmem:[#allocation7 + $0x608] sm:$0xff] }
 0x4c6   :  { %3992 = vmatpush.msra.mxu1 %v3028_v11  ;;  %4018 = vmatpush.msra.mxu2 %v3060_v34  ;;  %v3108_v7 = vld [vmem:[#allocation7 + $0x9f8] sm:$0xff]  ;;  %v3106_v11 = vld [vmem:[#allocation7 + $0x9e8] sm:$0xff] }
 0x4c7   :  { %3847 = vmatmul.f32.gmra.mxu3 %v9385_v63  ;;  %3873 = vmatmul.f32.gmra.mxu0 %v9387_v35  ;;  %v3022_v63 = vld [vmem:[#allocation7 + $0x748] sm:$0xff]  ;;  %v3204_v16 = vld [vmem:[#allocation7 + $0xcf8] sm:$0xff] }
 0x4c8   :  { %3899 = vmatmul.f32.gmra.mxu1 %v9394_v2  ;;  %3925 = vmatmul.f32.gmra.mxu2 %v9396_v25  ;;  %v3054_v35 = vld [vmem:[#allocation7 + $0x848] sm:$0xff]  ;;  %v2988_v2 = vld [vmem:[#allocation7 + $0x638] sm:$0xff] }
 0x4c9   :  { %3941 = vmatpush.msra.mxu3 %v2962_v24  ;;  %3967 = vmatpush.msra.mxu0 %v2994_v48  ;;  %v3020_v25 = vld [vmem:[#allocation7 + $0x738] sm:$0xff]  ;;  %v3138_v34 = vld [vmem:[#allocation7 + $0xae8] sm:$0xff] }
 0x4ca   :  { %3993 = vmatpush.msra.mxu1 %v3026_v59  ;;  %4019 = vmatpush.msra.mxu2 %v3058_v4  ;;  %v3170_v24 = vld [vmem:[#allocation7 + $0xbe8] sm:$0xff]  ;;  %v9636_v59 = vpop.f32.mrf.mxu0  ;;  %v9638_v4 = vpop.f32.mrf.mxu3 }
 0x4cb   :  { %3942 = vmatpush.msra.mxu3 %v2960_v61  ;;  %3968 = vmatpush.msra.mxu0 %v2992_v49  ;;  %v3202_v48 = vld [vmem:[#allocation7 + $0xce8] sm:$0xff]  ;;  %v3104_v61 = vld [vmem:[#allocation7 + $0x9d8] sm:$0xff] }
 0x4cc   :  { %3994 = vmatpush.msra.mxu1 %v3024_v36  ;;  %4020 = vmatpush.msra.mxu2 %v3056_v42  ;;  %v3136_v49 = vld [vmem:[#allocation7 + $0xad8] sm:$0xff] }
 0x4cd   :  { %3943 = vmatpush.msra.mxu3 %v2958_v52  ;;  %3969 = vmatpush.msra.mxu0 %v2990_v14  ;;  %v3168_v36 = vld [vmem:[#allocation7 + $0xbd8] sm:$0xff]  ;;  %v3102_v52 = vld [vmem:[#allocation7 + $0x9c8] sm:$0xff] }
 0x4ce   :  { %3995 = vmatpush.msra.mxu1 %v3022_v63  ;;  %4021 = vmatpush.msra.mxu2 %v3054_v35  ;;  %v3200_v42 = vld [vmem:[#allocation7 + $0xcd8] sm:$0xff]  ;;  %v3134_v14 = vld [vmem:[#allocation7 + $0xac8] sm:$0xff] }
 0x4cf   :  { %3944 = vmatpush.msra.mxu3 %v2956_v32  ;;  %3970 = vmatpush.msra.mxu0 %v2988_v2  ;;  %v3166_v63 = vld [vmem:[#allocation7 + $0xbc8] sm:$0xff]  ;;  %v3100_v32 = vld [vmem:[#allocation7 + $0x9b8] sm:$0xff] }
 0x4d0   :  { %3996 = vmatpush.msra.mxu1 %v3020_v25  ;;  %4022 = vmatpush.msra.mxu2 %v3052_v31  ;;  %v3198_v35 = vld [vmem:[#allocation7 + $0xcc8] sm:$0xff]  ;;  %v3132_v2 = vld [vmem:[#allocation7 + $0xab8] sm:$0xff] }
 0x4d1   :  { %3850 = vmatmul.f32.gmra.mxu3 %v9555_v28  ;;  %3876 = vmatmul.f32.gmra.mxu0 %v9557_v40  ;;  %v3014_v28 = vld [vmem:[#allocation7 + $0x708] sm:$0xff] }
 0x4d2   :  { %3902 = vmatmul.f32.gmra.mxu1 %v9562_v44  ;;  %3928 = vmatmul.f32.gmra.mxu2 %v9564_v41  ;;  %v3046_v40 = vld [vmem:[#allocation7 + $0x808] sm:$0xff]  ;;  %v3140_v44 = vld [vmem:[#allocation7 + $0xaf8] sm:$0xff]  ;;  %v9644_v31 = vpop.f32.mrf.mxu0 }
 0x4d3   :  { %3945 = vmatpush.msra.mxu3 %v2954_v12  ;;  %3971 = vmatpush.msra.mxu0 %v2986_v10  ;;  %v3172_v41 = vld [vmem:[#allocation7 + $0xbf8] sm:$0xff]  ;;  %v3098_v25 = vld [vmem:[#allocation7 + $0x9a8] sm:$0xff]  ;;  %v9646_v10 = vpop.f32.mrf.mxu3 }
 0x4d4   :  { %3997 = vmatpush.msra.mxu1 %v3018_v47  ;;  %4023 = vmatpush.msra.mxu2 %v3050_v30  ;;  %v3194_v12 = vld [vmem:[#allocation7 + $0xca8] sm:$0xff]  ;;  %v3096_v47 = vld [vmem:[#allocation7 + $0x998] sm:$0xff] }
 0x4d5   :  { %3946 = vmatpush.msra.mxu3 %v2952_v27  ;;  %3972 = vmatpush.msra.mxu0 %v2984_v22  ;;  %v3128_v30 = vld [vmem:[#allocation7 + $0xa98] sm:$0xff] }
 0x4d6   :  { %3998 = vmatpush.msra.mxu1 %v3016_v29  ;;  %4024 = vmatpush.msra.mxu2 %v3048_v26  ;;  %v3160_v27 = vld [vmem:[#allocation7 + $0xb98] sm:$0xff]  ;;  %v3094_v29 = vld [vmem:[#allocation7 + $0x988] sm:$0xff] }
 0x4d7   :  { %3947 = vmatpush.msra.mxu3 %v2950_v46  ;;  %3973 = vmatpush.msra.mxu0 %v2982_v57  ;;  %v3192_v22 = vld [vmem:[#allocation7 + $0xc98] sm:$0xff]  ;;  %v3126_v26 = vld [vmem:[#allocation7 + $0xa88] sm:$0xff] }
 0x4d8   :  { %3999 = vmatpush.msra.mxu1 %v3014_v28  ;;  %4025 = vmatpush.msra.mxu2 %v3046_v40  ;;  %v3158_v46 = vld [vmem:[#allocation7 + $0xb88] sm:$0xff]  ;;  %v3092_v28 = vld [vmem:[#allocation7 + $0x978] sm:$0xff] }
 0x4d9   :  { %4036 = vmatpush.msrb.mxu3 %v3108_v7  ;;  %4062 = vmatpush.msrb.mxu0 %v3140_v44  ;;  %v3190_v57 = vld [vmem:[#allocation7 + $0xc88] sm:$0xff]  ;;  %v3124_v40 = vld [vmem:[#allocation7 + $0xa78] sm:$0xff] }
 0x4da   :  { %4088 = vmatpush.msrb.mxu1 %v3172_v41  ;;  %4114 = vmatpush.msrb.mxu2 %v3204_v16  ;;  %v9652_v7 = vpop.f32.mrf.mxu0  ;;  %v3154_v41 = vld [vmem:[#allocation7 + $0xb68] sm:$0xff] }
 0x4db   :  { %4037 = vmatpush.msrb.mxu3 %v3106_v11  ;;  %4063 = vmatpush.msrb.mxu0 %v3138_v34  ;;  %v3186_v16 = vld [vmem:[#allocation7 + $0xc68] sm:$0xff]  ;;  %v9656_v11 = vpop.f32.mrf.mxu1  ;;  %v3088_v34 = vld [vmem:[#allocation7 + $0x958] sm:$0xff] }
 0x4dc   :  { %4089 = vmatpush.msrb.mxu1 %v3170_v24  ;;  %4115 = vmatpush.msrb.mxu2 %v3202_v48  ;;  %v9654_v44 = vpop.f32.mrf.mxu3  ;;  %v3120_v24 = vld [vmem:[#allocation7 + $0xa58] sm:$0xff] }
 0x4dd   :  { %3948 = vmatmul.f32.vlgmr.msra.gmra.mxu3 %v9045_v50  ;;  %3974 = vmatmul.f32.vlgmr.msra.gmra.mxu0 %v9053_v1  ;;  %v3164_v50 = vld [vmem:[#allocation7 + $0xbb8] sm:$0xff] }
 0x4de   :  { %4000 = vmatmul.f32.vlgmr.msra.gmra.mxu1 %v9055_v0  ;;  %4026 = vmatmul.f32.vlgmr.msra.gmra.mxu2 %v9224_v33  ;;  %v3196_v1 = vld [vmem:[#allocation7 + $0xcb8] sm:$0xff]  ;;  %v3130_v0 = vld [vmem:[#allocation7 + $0xaa8] sm:$0xff] }
 0x4df   :  { %4038 = vmatpush.msrb.mxu3 %v3104_v61  ;;  %4064 = vmatpush.msrb.mxu0 %v3136_v49  ;;  %v3162_v33 = vld [vmem:[#allocation7 + $0xba8] sm:$0xff]  ;;  %v3152_v48 = vld [vmem:[#allocation7 + $0xb58] sm:$0xff] }
 0x4e0   :  { %4090 = vmatpush.msrb.mxu1 %v3168_v36  ;;  %4116 = vmatpush.msrb.mxu2 %v3200_v42  ;;  %v3184_v61 = vld [vmem:[#allocation7 + $0xc58] sm:$0xff]  ;;  %v3086_v49 = vld [vmem:[#allocation7 + $0x948] sm:$0xff]  ;;  %v9662_v42 = vpop.f32.mrf.mxu2 }
 0x4e1   :  { %4039 = vmatpush.msrb.mxu3 %v3102_v52  ;;  %4065 = vmatpush.msrb.mxu0 %v3134_v14  ;;  %v3118_v36 = vld [vmem:[#allocation7 + $0xa48] sm:$0xff] }
 0x4e2   :  { %4091 = vmatpush.msrb.mxu1 %v3166_v63  ;;  %4117 = vmatpush.msrb.mxu2 %v3198_v35  ;;  %v3150_v52 = vld [vmem:[#allocation7 + $0xb48] sm:$0xff]  ;;  %v3084_v63 = vld [vmem:[#allocation7 + $0x938] sm:$0xff] }
 0x4e3   :  { %4040 = vmatpush.msrb.mxu3 %v3100_v32  ;;  %4066 = vmatpush.msrb.mxu0 %v3132_v2  ;;  %v3182_v14 = vld [vmem:[#allocation7 + $0xc48] sm:$0xff]  ;;  %v3180_v35 = vld [vmem:[#allocation7 + $0xc38] sm:$0xff]  ;;  %v9664_v32 = vpop.f32.mrf.mxu0 }
 0x4e4   :  { %4092 = vmatpush.msrb.mxu1 %v3164_v50  ;;  %4118 = vmatpush.msrb.mxu2 %v3196_v1  ;;  %v3082_v2 = vld [vmem:[#allocation7 + $0x928] sm:$0xff] }
 0x4e5   :  { %4041 = vmatpush.msrb.mxu3 %v3098_v25  ;;  %4067 = vmatpush.msrb.mxu0 %v3130_v0  ;;  %v3114_v50 = vld [vmem:[#allocation7 + $0xa28] sm:$0xff]  ;;  %v3080_v0 = vld [vmem:[#allocation7 + $0x918] sm:$0xff] }
 0x4e6   :  { %4093 = vmatpush.msrb.mxu1 %v3162_v33  ;;  %4119 = vmatpush.msrb.mxu2 %v3194_v12  ;;  %v3146_v1 = vld [vmem:[#allocation7 + $0xb28] sm:$0xff]  ;;  %v3112_v33 = vld [vmem:[#allocation7 + $0xa18] sm:$0xff] }
 0x4e7   :  { %3951 = vmatmul.f32.gmra.mxu3 %v9398_v53  ;;  %3977 = vmatmul.f32.gmra.mxu0 %v9407_v18  ;;  %v3156_v53 = vld [vmem:[#allocation7 + $0xb78] sm:$0xff]  ;;  %v3178_v25 = vld [vmem:[#allocation7 + $0xc28] sm:$0xff] }
 0x4e8   :  { %4003 = vmatmul.f32.gmra.mxu1 %v9409_v21  ;;  %4029 = vmatmul.f32.gmra.mxu2 %v9487_v23  ;;  %v3188_v18 = vld [vmem:[#allocation7 + $0xc78] sm:$0xff]  ;;  %v3090_v21 = vld [vmem:[#allocation7 + $0x968] sm:$0xff] }
 0x4e9   :  { %4042 = vmatpush.msrb.mxu3 %v3096_v47  ;;  %4068 = vmatpush.msrb.mxu0 %v3128_v30  ;;  %v3122_v23 = vld [vmem:[#allocation7 + $0xa68] sm:$0xff]  ;;  %v3144_v12 = vld [vmem:[#allocation7 + $0xb18] sm:$0xff] }
 0x4ea   :  { %4094 = vmatpush.msrb.mxu1 %v3160_v27  ;;  %4120 = vmatpush.msrb.mxu2 %v3192_v22  ;;  %v3176_v47 = vld [vmem:[#allocation7 + $0xc18] sm:$0xff]  ;;  %v3078_v30 = vld [vmem:[#allocation7 + $0x908] sm:$0xff]  ;;  %v9670_v22 = vpop.f32.mrf.mxu2 }
 0x4eb   :  { %4043 = vmatpush.msrb.mxu3 %v3094_v29  ;;  %4069 = vmatpush.msrb.mxu0 %v3126_v26  ;;  %v3110_v27 = vld [vmem:[#allocation7 + $0xa08] sm:$0xff] }
 0x4ec   :  { %4095 = vmatpush.msrb.mxu1 %v3158_v46  ;;  %4121 = vmatpush.msrb.mxu2 %v3190_v57  ;;  %v3142_v29 = vld [vmem:[#allocation7 + $0xb08] sm:$0xff]  ;;  %v3236_v57 = vld [vmem:[#allocation7 + $0xdf8] sm:$0xff] }
 0x4ed   :  { %4044 = vmatpush.msrb.mxu3 %v3092_v28  ;;  %4070 = vmatpush.msrb.mxu0 %v3124_v40  ;;  %v3174_v26 = vld [vmem:[#allocation7 + $0xc08] sm:$0xff]  ;;  %v3268_v28 = vld [vmem:[#allocation7 + $0xef8] sm:$0xff]  ;;  %v9676_v40 = vpop.f32.mrf.mxu0 }
 0x4ee   :  { %4096 = vmatpush.msrb.mxu1 %v3156_v53  ;;  %4122 = vmatpush.msrb.mxu2 %v3188_v18  ;;  %v3234_v18 = vld [vmem:[#allocation7 + $0xde8] sm:$0xff] }
 0x4ef   :  { %4045 = vmatpush.msrb.mxu3 %v3090_v21  ;;  %4071 = vmatpush.msrb.mxu0 %v3122_v23  ;;  %v3266_v21 = vld [vmem:[#allocation7 + $0xee8] sm:$0xff]  ;;  %v3232_v23 = vld [vmem:[#allocation7 + $0xdd8] sm:$0xff] }
 0x4f0   :  { %4097 = vmatpush.msrb.mxu1 %v3154_v41  ;;  %4123 = vmatpush.msrb.mxu2 %v3186_v16  ;;  %v3264_v41 = vld [vmem:[#allocation7 + $0xed8] sm:$0xff] }
 0x4f1   :  { %3954 = vmatmul.f32.gmra.mxu3 %v9566_v5  ;;  %3980 = vmatmul.f32.gmra.mxu0 %v9570_v9  ;;  %v3116_v5 = vld [vmem:[#allocation7 + $0xa38] sm:$0xff] }
 0x4f2   :  { %4006 = vmatmul.f32.gmra.mxu1 %v9572_v38  ;;  %4032 = vmatmul.f32.gmra.mxu2 %v9594_v37  ;;  %v3148_v9 = vld [vmem:[#allocation7 + $0xb38] sm:$0xff]  ;;  %v9666_v38 = vpop.f32.mrf.mxu3  ;;  %v9668_v37 = vpop.f32.mrf.mxu1 }
 0x4f3   :  { %4046 = vmatpush.msrb.mxu3 %v3088_v34  ;;  %4072 = vmatpush.msrb.mxu0 %v3120_v24  ;;  %v9682_v16 = vpop.f32.mrf.mxu2  ;;  %v3228_v34 = vld [vmem:[#allocation7 + $0xdb8] sm:$0xff] }
 0x4f4   :  { %4098 = vmatpush.msrb.mxu1 %v3152_v48  ;;  %4124 = vmatpush.msrb.mxu2 %v3184_v61  ;;  %v3258_v48 = vld [vmem:[#allocation7 + $0xea8] sm:$0xff] }
 0x4f5   :  { %4047 = vmatpush.msrb.mxu3 %v3086_v49  ;;  %4073 = vmatpush.msrb.mxu0 %v3118_v36  ;;  %v9690_v61 = vpop.f32.mrf.mxu0  ;;  %v3224_v36 = vld [vmem:[#allocation7 + $0xd98] sm:$0xff] }
 0x4f6   :  { %4099 = vmatpush.msrb.mxu1 %v3150_v52  ;;  %4125 = vmatpush.msrb.mxu2 %v3182_v14  ;;  %v3256_v52 = vld [vmem:[#allocation7 + $0xe98] sm:$0xff] }
 0x4f7   :  { %4048 = vmatpush.msrb.mxu3 %v3084_v63  ;;  %4074 = vmatpush.msrb.mxu0 %v3116_v5  ;;  %v3218_v5 = vld [vmem:[#allocation7 + $0xd68] sm:$0xff] }
 0x4f8   :  { %4100 = vmatpush.msrb.mxu1 %v3148_v9  ;;  %4126 = vmatpush.msrb.mxu2 %v3180_v35  ;;  %v3250_v9 = vld [vmem:[#allocation7 + $0xe68] sm:$0xff] }
 0x4f9   :  { %4049 = vmatpush.msrb.mxu3 %v3082_v2  ;;  %4075 = vmatpush.msrb.mxu0 %v3114_v50  ;;  %v3216_v50 = vld [vmem:[#allocation7 + $0xd58] sm:$0xff] }
 0x4fa   :  { %4101 = vmatpush.msrb.mxu1 %v3146_v1  ;;  %4127 = vmatpush.msrb.mxu2 %v3178_v25  ;;  %v9672_v46 = vpop.f32.mrf.mxu1  ;;  %v9678_v53 = vpop.f32.mrf.mxu3  ;;  %v3248_v1 = vld [vmem:[#allocation7 + $0xe58] sm:$0xff] }
 0x4fb   :  { %4050 = vmatpush.msrb.mxu3 %v3080_v0  ;;  %4076 = vmatpush.msrb.mxu0 %v3112_v33  ;;  %v9694_v14 = vpop.f32.mrf.mxu2  ;;  %v3210_v0 = vld [vmem:[#allocation7 + $0xd28] sm:$0xff] }
 0x4fc   :  { %4102 = vmatpush.msrb.mxu1 %v3144_v12  ;;  %4128 = vmatpush.msrb.mxu2 %v3176_v47  ;;  %v3242_v33 = vld [vmem:[#allocation7 + $0xe28] sm:$0xff]  ;;  %v3208_v47 = vld [vmem:[#allocation7 + $0xd18] sm:$0xff] }
 0x4fd   :  { %4051 = vmatpush.msrb.mxu3 %v3078_v30  ;;  %4077 = vmatpush.msrb.mxu0 %v3110_v27  ;;  %v9702_v35 = vpop.f32.mrf.mxu0  ;;  %v3240_v30 = vld [vmem:[#allocation7 + $0xe18] sm:$0xff] }
 0x4fe   :  { %4103 = vmatpush.msrb.mxu1 %v3142_v29  ;;  %4129 = vmatpush.msrb.mxu2 %v3174_v26  ;;  %v3206_v26 = vld [vmem:[#allocation7 + $0xd08] sm:$0xff] }
 0x4ff   :  { %4052 = vmatmul.f32.vlgmr.msrb.gmra.mxu3 %v9226_v58  ;;  %4078 = vmatmul.f32.vlgmr.msrb.gmra.mxu0 %v9228_v15  ;;  %v3230_v58 = vld [vmem:[#allocation7 + $0xdc8] sm:$0xff] }
 0x500   :  { %4104 = vmatmul.f32.vlgmr.msrb.gmra.mxu1 %v9239_v6  ;;  %4130 = vmatmul.f32.vlgmr.msrb.gmra.mxu2 %v9241_v54  ;;  %v3262_v15 = vld [vmem:[#allocation7 + $0xec8] sm:$0xff]  ;;  %v3260_v6 = vld [vmem:[#allocation7 + $0xeb8] sm:$0xff] }
 0x501   :  { %4140 = vmatpush.msra.mxu3 %v3236_v57  ;;  %4166 = vmatpush.msra.mxu0 %v3268_v28  ;;  %v3226_v54 = vld [vmem:[#allocation7 + $0xda8] sm:$0xff] }
 0x502   :  { %v9684_v24 = vpop.f32.mrf.mxu1  ;;  %v9692_v49 = vpop.f32.mrf.mxu3  ;;  %v3238_v57 = vld [vmem:[#allocation7 + $0xe08] sm:$0xff] }
 0x503   :  { %4141 = vmatpush.msra.mxu3 %v3234_v18  ;;  %4167 = vmatpush.msra.mxu0 %v3266_v21  ;;  %v9706_v25 = vpop.f32.mrf.mxu2 }
 0x505   :  { %4142 = vmatpush.msra.mxu3 %v3232_v23  ;;  %4168 = vmatpush.msra.mxu0 %v3264_v41 }
 0x507   :  { %4143 = vmatpush.msra.mxu3 %v3230_v58  ;;  %4169 = vmatpush.msra.mxu0 %v3262_v15 }
 0x508   :  { %4055 = vmatmul.f32.gmra.mxu3 %v9489_v8  ;;  %4081 = vmatmul.f32.gmra.mxu0 %v9491_v55  ;;  %v3222_v8 = vld [vmem:[#allocation7 + $0xd88] sm:$0xff]  ;;  %v9710_v27 = vpop.f32.mrf.mxu0 }
 0x509   :  { %4107 = vmatmul.f32.gmra.mxu1 %v9494_v3  ;;  %4133 = vmatmul.f32.gmra.mxu2 %v9496_v19  ;;  %v3254_v55 = vld [vmem:[#allocation7 + $0xe88] sm:$0xff]  ;;  %v3220_v3 = vld [vmem:[#allocation7 + $0xd78] sm:$0xff] }
 0x50a   :  { %4144 = vmatpush.msra.mxu3 %v3228_v34  ;;  %4170 = vmatpush.msra.mxu0 %v3260_v6  ;;  %v3252_v19 = vld [vmem:[#allocation7 + $0xe78] sm:$0xff]  ;;  %v9698_v63 = vpop.f32.mrf.mxu1  ;;  %v9704_v2 = vpop.f32.mrf.mxu3 }
 0x50b   :  { %v9714_v28 = vpop.f32.mrf.mxu2 }
 0x50c   :  { %4145 = vmatpush.msra.mxu3 %v3226_v54  ;;  %4171 = vmatpush.msra.mxu0 %v3258_v48  ;;  %10767 = vst [vmem:[#allocation25_spill] sm:$0xff] %v9714_v28  ;;  %v4419_v28 = vld [vmem:[#allocation10 + $0x300] sm:$0xff] }
 0x50e   :  { %4146 = vmatpush.msra.mxu3 %v3224_v36  ;;  %4172 = vmatpush.msra.mxu0 %v3256_v52 }
 0x510   :  { %4147 = vmatpush.msra.mxu3 %v3222_v8  ;;  %4173 = vmatpush.msra.mxu0 %v3254_v55 }
 0x511   :  { %4058 = vmatmul.f32.gmra.mxu3 %v9596_v62  ;;  %4084 = vmatmul.f32.gmra.mxu0 %v9598_v60  ;;  %v3214_v62 = vld [vmem:[#allocation7 + $0xd48] sm:$0xff] }
 0x512   :  { %4110 = vmatmul.f32.gmra.mxu1 %v9602_v39  ;;  %4136 = vmatmul.f32.gmra.mxu2 %v9614_v56  ;;  %v3246_v60 = vld [vmem:[#allocation7 + $0xe48] sm:$0xff]  ;;  %v3212_v39 = vld [vmem:[#allocation7 + $0xd38] sm:$0xff]  ;;  %v9708_v12 = vpop.f32.mrf.mxu1  ;;  %v9712_v29 = vpop.f32.mrf.mxu3 }
 0x513   :  { %4148 = vmatpush.msra.mxu3 %v3220_v3  ;;  %4174 = vmatpush.msra.mxu0 %v3252_v19  ;;  %v3244_v56 = vld [vmem:[#allocation7 + $0xe38] sm:$0xff]  ;;  %v9720_v21 = vpop.f32.mrf.mxu0  ;;  %v9726_v41 = vpop.f32.mrf.mxu2 }
 0x514   :  { %10768 = vst [vmem:[#allocation26_spill] sm:$0xff] %v9720_v21  ;;  %v4431_v21 = vld [vmem:[#allocation10 + $0x360] sm:$0xff] }
 0x515   :  { %4149 = vmatpush.msra.mxu3 %v3218_v5  ;;  %4175 = vmatpush.msra.mxu0 %v3250_v9 }
 0x517   :  { %4150 = vmatpush.msra.mxu3 %v3216_v50  ;;  %4176 = vmatpush.msra.mxu0 %v3248_v1 }
 0x519   :  { %4151 = vmatpush.msra.mxu3 %v3214_v62  ;;  %4177 = vmatpush.msra.mxu0 %v3246_v60 }
 0x51a   :  { %v9718_v18 = vpop.f32.mrf.mxu1  ;;  %v9722_v23 = vpop.f32.mrf.mxu3 }
 0x51b   :  { %4152 = vmatpush.msra.mxu3 %v3212_v39  ;;  %4178 = vmatpush.msra.mxu0 %v3244_v56  ;;  %10769 = vst [vmem:[#allocation22_spill] sm:$0xff] %v9722_v23  ;;  %v3269_v39 = vld [vmem:[#allocation8] sm:$0x3]  ;;  %v4383_v56 = vld [vmem:[#allocation10 + $0x1e0] sm:$0xff] }
 0x51c   :  { %v9730_v15 = vpop.f32.mrf.mxu0  ;;  %4973 = vmatpush.msra.mxu1 %v4383_v56  ;;  %v4371_v56 = vld [vmem:[#allocation10 + $0x180] sm:$0xff] }
 0x51d   :  { %4153 = vmatpush.msra.mxu3 %v3210_v0  ;;  %4179 = vmatpush.msra.mxu0 %v3242_v33  ;;  %v4447_v0 = vld [vmem:[#allocation10 + $0x3e0] sm:$0xff]  ;;  %v9778_v33 = vperm.slane %v3269_v39, 0 }
 0x51e   :  { %4993 = vmatpush.msra.mxu2 %v4447_v0  ;;  %v4435_v0 = vld [vmem:[#allocation10 + $0x380] sm:$0xff] }
 0x51f   :  { %4154 = vmatpush.msra.mxu3 %v3208_v47  ;;  %4180 = vmatpush.msra.mxu0 %v3240_v30  ;;  %v4575_v23 = vld [vmem:[#allocation10 + $0x7e0] sm:$0xff] }
 0x521   :  { %4155 = vmatpush.msra.mxu3 %v3206_v26  ;;  %4181 = vmatpush.msra.mxu0 %v3238_v57  ;;  %v4379_v57 = vld [vmem:[#allocation10 + $0x1c0] sm:$0xff] }
 0x522   :  { %4156 = vmatmul.f32.vlgmr.msra.gmra.mxu3 %v9243_v51  ;;  %4182 = vmatmul.f32.vlgmr.msra.gmra.mxu0 %v9259_v17  ;;  %v9728_v58 = vpop.f32.mrf.mxu1  ;;  %v9732_v34 = vpop.f32.mrf.mxu3 }
 0x523   :  { %v9736_v51 = vpop.f32.mrf.mxu2  ;;  %4974 = vmatpush.msra.mxu1 %v4379_v57  ;;  %5033 = vmatpush.msrb.mxu0 %v4575_v23 }
 0x524   :  { %10770 = vst [vmem:[#allocation23_spill] sm:$0xff] %v9736_v51 }
 0x526   :  { %v9740_v6 = vpop.f32.mrf.mxu0 }
 0x527   :  { %10772 = vst [vmem:[#allocation27_spill] sm:$0xff] %v9740_v6  ;;  %v4511_v6 = vld [vmem:[#allocation10 + $0x5e0] sm:$0xff] }
 0x528   :  { %5013 = vmatpush.msrb.mxu3 %v4511_v6  ;;  %v4423_v6 = vld [vmem:[#allocation10 + $0x320] sm:$0xff] }
 0x52a   :  { %4159 = vmatmul.f32.gmra.mxu3 %v9498_v20  ;;  %4185 = vmatmul.f32.gmra.mxu0 %v9500_v43  ;;  %v9738_v17 = vpop.f32.mrf.mxu1 }
 0x52b   :  { %10771 = vst [vmem:[#allocation24_spill] sm:$0xff] %v9738_v17  ;;  %v9744_v43 = vpop.f32.mrf.mxu2 }
 0x52c   :  { %v9742_v20 = vpop.f32.mrf.mxu3  ;;  %10774 = vst [vmem:[#allocation29_spill] sm:$0xff] %v9744_v43  ;;  %v4439_v43 = vld [vmem:[#allocation10 + $0x3a0] sm:$0xff] }
 0x52d   :  { %10773 = vst [vmem:[#allocation28_spill] sm:$0xff] %v9742_v20  ;;  %v4507_v20 = vld [vmem:[#allocation10 + $0x5c0] sm:$0xff] }
 0x52e   :  { %5014 = vmatpush.msrb.mxu3 %v4507_v20  ;;  %v4351_v20 = vld [vmem:[#allocation10 + $0xe0] sm:$0xff] }
 0x530   :  { %v9748_v48 = vpop.f32.mrf.mxu0 }
 0x531   :  { %10776 = vst [vmem:[#allocation31_spill] sm:$0xff] %v9748_v48  ;;  %v3430_v48 = vadd.f32 %v9638_v4, %v9778_v33  ;;  %v9791_v4 = vperm.slane %v3269_v39, 1  ;;  %v4355_v39 = vld [vmem:[#allocation10 + $0x100] sm:$0xff] }
 0x532   :  { %4162 = vmatmul.f32.gmra.mxu3 %v9616_v13  ;;  %4188 = vmatmul.f32.gmra.mxu0 %v9620_v45  ;;  %v9746_v54 = vpop.f32.mrf.mxu1 }
 0x533   :  { %10775 = vst [vmem:[#allocation30_spill] sm:$0xff] %v9746_v54  ;;  %v9752_v52 = vpop.f32.mrf.mxu2  ;;  %v3456_v57 = vadd.f32 %v9636_v59, %v3430_v48  ;;  %v4571_v59 = vld [vmem:[#allocation10 + $0x7c0] sm:$0xff] }
 0x534   :  { %5034 = vmatpush.msrb.mxu0 %v4571_v59  ;;  %v4503_v48 = vld [vmem:[#allocation10 + $0x5a0] sm:$0xff] }
 0x535   :  { %v3482_v23 = vadd.f32 %v9656_v11, %v3456_v57  ;;  %5015 = vmatpush.msrb.mxu3 %v4503_v48  ;;  %v4563_v11 = vld [vmem:[#allocation10 + $0x780] sm:$0xff] }
 0x536   :  { %v9750_v36 = vpop.f32.mrf.mxu3  ;;  %v4415_v57 = vld [vmem:[#allocation10 + $0x2e0] sm:$0xff] }
 0x537   :  { %10777 = vst [vmem:[#allocation32_spill] sm:$0xff] %v9750_v36  ;;  %v4375_v36 = vld [vmem:[#allocation10 + $0x1a0] sm:$0xff]  ;;  %v3508_v59 = vadd.f32 %v9662_v42, %v3482_v23 }
 0x538   :  { %4975 = vmatpush.msra.mxu1 %v4375_v36  ;;  %v4363_v36 = vld [vmem:[#allocation10 + $0x140] sm:$0xff] }
 0x539   :  { %v3534_v48 = vadd.f32 %v9666_v38, %v3508_v59  ;;  %v4555_v42 = vld [vmem:[#allocation10 + $0x740] sm:$0xff] }
 0x53a   :  { %v9754_v13 = vpop.f32.mrf.mxu1  ;;  %v9756_v45 = vpop.f32.mrf.mxu0  ;;  %4976 = vmatpush.msra.mxu1 %v4371_v56  ;;  %v3433_v56 = vadd.f32 %v9646_v10, %v9778_v33  ;;  %v3820_v10 = vadd.f32 %v9752_v52, %v9791_v4  ;;  %v4495_v52 = vld [vmem:[#allocation10 + $0x560] sm:$0xff] }
 0x53b   :  { %10778 = vst [vmem:[#allocation33_spill] sm:$0xff] %v9754_v13  ;;  %v9760_v55 = vpop.f32.mrf.mxu2  ;;  %v4367_v13 = vld [vmem:[#allocation10 + $0x160] sm:$0xff] }
 0x53c   :  { %4977 = vmatpush.msra.mxu1 %v4367_v13  ;;  %v4567_v13 = vld [vmem:[#allocation10 + $0x7a0] sm:$0xff] }
 0x53d   :  { %5035 = vmatpush.msrb.mxu0 %v4567_v13  ;;  %v4343_v23 = vld [vmem:[#allocation10 + $0xa0] sm:$0xff] }
 0x53e   :  { %4978 = vmatpush.msra.mxu1 %v4363_v36  ;;  %v4499_v36 = vld [vmem:[#allocation10 + $0x580] sm:$0xff] }
 0x53f   :  { %5016 = vmatpush.msrb.mxu3 %v4499_v36  ;;  %5036 = vmatpush.msrb.mxu0 %v4563_v11  ;;  %v4487_v36 = vld [vmem:[#allocation10 + $0x520] sm:$0xff] }
 0x540   :  { %v9758_v8 = vpop.f32.mrf.mxu3  ;;  %v4551_v38 = vld [vmem:[#allocation10 + $0x720] sm:$0xff] }
 0x541   :  { %5017 = vmatpush.msrb.mxu3 %v4495_v52  ;;  %v4339_v11 = vld [vmem:[#allocation10 + $0x80] sm:$0xff]  ;;  %v3560_v52 = vadd.f32 %v9664_v32, %v3534_v48 }
 0x542   :  { %v9762_v3 = vpop.f32.mrf.mxu1  ;;  %v4547_v59 = vld [vmem:[#allocation10 + $0x700] sm:$0xff] }
 0x543   :  { %10779 = vst [vmem:[#allocation34_spill] sm:$0xff] %v9762_v3  ;;  %v9768_v9 = vpop.f32.mrf.mxu2  ;;  %v4443_v3 = vld [vmem:[#allocation10 + $0x3c0] sm:$0xff]  ;;  %v3586_v32 = vadd.f32 %v9684_v24, %v3560_v52 }
 0x544   :  { %v9764_v19 = vpop.f32.mrf.mxu0  ;;  %4994 = vmatpush.msra.mxu2 %v4443_v3  ;;  %v4335_v48 = vld [vmem:[#allocation10 + $0x60] sm:$0xff]  ;;  %v3826_v52 = vadd.f32 %v9768_v9, %v9791_v4 }
 0x545   :  { %v4463_v9 = vld [vmem:[#allocation10 + $0x460] sm:$0xff] }
 0x546   :  { %4995 = vmatpush.msra.mxu2 %v4439_v43  ;;  %v4427_v43 = vld [vmem:[#allocation10 + $0x340] sm:$0xff] }
 0x548   :  { %4996 = vmatpush.msra.mxu2 %v4435_v0 }
 0x54a   :  { %v9766_v5 = vpop.f32.mrf.mxu3  ;;  %v9770_v50 = vpop.f32.mrf.mxu1  ;;  %4997 = vmatpush.msra.mxu2 %v4431_v21  ;;  %v4359_v21 = vld [vmem:[#allocation10 + $0x120] sm:$0xff] }
 0x54b   :  { %v9776_v60 = vpop.f32.mrf.mxu2  ;;  %4979 = vmatpush.msra.mxu1 %v4359_v21  ;;  %v3846_v21 = vadd.f32 %v9758_v8, %v3820_v10  ;;  %v4407_v8 = vld [vmem:[#allocation10 + $0x2a0] sm:$0xff] }
 0x54c   :  { %4998 = vmatpush.msra.mxu2 %v4427_v43  ;;  %v3459_v43 = vadd.f32 %v9644_v31, %v3433_v56  ;;  %v4347_v31 = vld [vmem:[#allocation10 + $0xc0] sm:$0xff] }
 0x54d   :  { %4980 = vmatpush.msra.mxu1 %v4355_v39  ;;  %v4411_v56 = vld [vmem:[#allocation10 + $0x2c0] sm:$0xff]  ;;  %v3872_v10 = vadd.f32 %v9756_v45, %v3846_v21  ;;  %v3823_v45 = vadd.f32 %v9760_v55, %v9791_v4 }
 0x54e   :  { %v9772_v1 = vpop.f32.mrf.mxu0  ;;  %4999 = vmatpush.msra.mxu2 %v4423_v6  ;;  %v4559_v6 = vld [vmem:[#allocation10 + $0x760] sm:$0xff]  ;;  %v3485_v13 = vadd.f32 %v9668_v37, %v3459_v43 }
 0x54f   :  { %4981 = vmatpush.msra.mxu1 %v4351_v20  ;;  %5037 = vmatpush.msrb.mxu0 %v4559_v6  ;;  %v4403_v37 = vld [vmem:[#allocation10 + $0x280] sm:$0xff]  ;;  %v3898_v6 = vadd.f32 %v9770_v50, %v3872_v10 }
 0x550   :  { %5000 = vmatpush.msra.mxu2 %v4419_v28  ;;  %v4491_v28 = vld [vmem:[#allocation10 + $0x540] sm:$0xff]  ;;  %v3511_v21 = vadd.f32 %v9670_v22, %v3485_v13  ;;  %v3436_v22 = vadd.f32 %v9654_v44, %v9778_v33  ;;  %v3612_v33 = vadd.f32 %v9694_v14, %v3586_v32 }
 0x551   :  { %4982 = vmatpush.msra.mxu1 %v4347_v31  ;;  %5018 = vmatpush.msrb.mxu3 %v4491_v28  ;;  %v4483_v43 = vld [vmem:[#allocation10 + $0x500] sm:$0xff]  ;;  %v3849_v31 = vadd.f32 %v9766_v5, %v3823_v45  ;;  %v3924_v50 = vadd.f32 %v9776_v60, %v3898_v6 }
 0x552   :  { %v9780_v47 = vpop.f32.mrf.mxu1  ;;  %5001 = vmatpush.msra.mxu2 %v4415_v57  ;;  %5038 = vmatpush.msrb.mxu0 %v4555_v42  ;;  %v4399_v55 = vld [vmem:[#allocation10 + $0x260] sm:$0xff] }
 0x553   :  { %v9788_v17 = vpop.f32.mrf.mxu2  ;;  %4983 = vmatpush.msra.mxu1 %v4343_v23  ;;  %5019 = vmatpush.msrb.mxu3 %v4487_v36  ;;  %v4479_v42 = vld [vmem:[#allocation10 + $0x4e0] sm:$0xff]  ;;  %v3875_v5 = vadd.f32 %v9764_v19, %v3849_v31 }
 0x554   :  { %v9774_v62 = vpop.f32.mrf.mxu3  ;;  %5002 = vmatpush.msra.mxu2 %v4411_v56  ;;  %5039 = vmatpush.msrb.mxu0 %v4551_v38  ;;  %v3537_v56 = vadd.f32 %v9678_v53, %v3511_v21  ;;  %v4543_v13 = vld [vmem:[#allocation10 + $0x6e0] sm:$0xff] }
 0x555   :  { %4984 = vmatpush.msra.mxu1 %v4339_v11  ;;  %5020 = vmatpush.msrb.mxu3 %v4483_v43  ;;  %v4331_v53 = vld [vmem:[#allocation10 + $0x40] sm:$0xff]  ;;  %v3901_v14 = vadd.f32 %v9780_v47, %v3875_v5  ;;  %v3852_v32 = vadd.f32 %v9774_v62, %v3826_v52 }
 0x556   :  { %5003 = vmatpush.msra.mxu2 %v4407_v8  ;;  %5040 = vmatpush.msrb.mxu0 %v4547_v59  ;;  %v4395_v23 = vld [vmem:[#allocation10 + $0x240] sm:$0xff]  ;;  %v3563_v24 = vadd.f32 %v9676_v40, %v3537_v56  ;;  %v3462_v40 = vadd.f32 %v9652_v7, %v3436_v22  ;;  %v3638_v59 = vadd.f32 %v9704_v2, %v3612_v33 }
 0x557   :  { %4985 = vmatpush.msra.mxu1 %v4335_v48  ;;  %5021 = vmatpush.msrb.mxu3 %v4479_v42  ;;  %v4475_v8 = vld [vmem:[#allocation10 + $0x4c0] sm:$0xff]  ;;  %v3927_v22 = vadd.f32 %v9788_v17, %v3901_v14  ;;  %v3878_v5 = vadd.f32 %v9772_v1, %v3852_v32 }
 0x558   :  { %5004 = vmatpush.msra.mxu2 %v4403_v37  ;;  %5041 = vmatpush.msrb.mxu0 %v4543_v13  ;;  %v4539_v44 = vld [vmem:[#allocation10 + $0x6c0] sm:$0xff]  ;;  %v3589_v6 = vadd.f32 %v9698_v63, %v3563_v24  ;;  %v3488_v4 = vadd.f32 %v9672_v46, %v3462_v40  ;;  %v3664_v42 = vadd.f32 %v9702_v35, %v3638_v59 }
 0x559   :  { %4986 = vmatpush.msra.mxu1 %v4331_v53  ;;  %5022 = vmatpush.msrb.mxu3 %v4475_v8  ;;  %v4327_v19 = vld [vmem:[#allocation10 + $0x20] sm:$0xff] }
 0x55a   :  { %v9782_v30 = vpop.f32.mrf.mxu0  ;;  %v9793_v3 = vpop.f32.mrf.mxu1  ;;  %5005 = vmatpush.msra.mxu2 %v4399_v55  ;;  %5042 = vmatpush.msrb.mxu0 %v4539_v44  ;;  %v4391_v11 = vld [vmem:[#allocation10 + $0x220] sm:$0xff]  ;;  %v3615_v13 = vadd.f32 %v9706_v25, %v3589_v6  ;;  %v3514_v8 = vadd.f32 %v9682_v16, %v3488_v4  ;;  %v3690_v1 = vadd.f32 %v9718_v18, %v3664_v42 }
 0x55b   :  { %v9805_v51 = vpop.f32.mrf.mxu2  ;;  %v4471_v37 = vld [vmem:[#allocation10 + $0x4a0] sm:$0xff]  ;;  %4987 = vmatpush.msra.mxu1 %v4327_v19  ;;  %v3904_v40 = vadd.f32 %v9793_v3, %v3878_v5 }
 0x55c   :  { %5006 = vmatpush.msra.mxu2 %v4395_v23  ;;  %v4535_v43 = vld [vmem:[#allocation10 + $0x6a0] sm:$0xff]  ;;  %5023 = vmatpush.msrb.mxu3 %v4471_v37  ;;  %v3641_v24 = vadd.f32 %v9712_v29, %v3615_v13  ;;  %v10782_v13 = vld [vmem:[#allocation30_spill] sm:$0xff] }
 0x55d   :  { %5043 = vmatpush.msrb.mxu0 %v4535_v43  ;;  %v4387_v45 = vld [vmem:[#allocation10 + $0x200] sm:$0xff] }
 0x55e   :  { %5007 = vmatpush.msra.mxu2 %v4391_v11  ;;  %v4467_v21 = vld [vmem:[#allocation10 + $0x480] sm:$0xff]  ;;  %v3540_v11 = vadd.f32 %v9692_v49, %v3514_v8  ;;  %v3667_v52 = vadd.f32 %v9710_v27, %v3641_v24  ;;  %v3716_v49 = vadd.f32 %v9726_v41, %v3690_v1 }
 0x55f   :  { %v4531_v7 = vld [vmem:[#allocation10 + $0x680] sm:$0xff]  ;;  %5024 = vmatpush.msrb.mxu3 %v4467_v21 }
 0x560   :  { %v9784_v26 = vpop.f32.mrf.mxu3  ;;  %5008 = vmatpush.msra.mxu2 %v4387_v45  ;;  %v4639_v31 = vld [vmem:[#allocation10 + $0x9e0] sm:$0xff]  ;;  %5044 = vmatpush.msrb.mxu0 %v4531_v7  ;;  %v3693_v27 = vadd.f32 %v9728_v58, %v3667_v52 }
 0x561   :  { %v3950_v60 = vadd.f32 %v9784_v26, %v3924_v50  ;;  %v4323_v26 = vld [vmem:[#allocation10] sm:$0xff]  ;;  %5025 = vmatpush.msrb.mxu3 %v4463_v9 }
 0x562   :  { %v9812_v39 = vpop.f32.mrf.mxu1  ;;  %4988 = vmatpush.msra.mxu1 %v4323_v26  ;;  %v4703_v56 = vld [vmem:[#allocation10 + $0xbe0] sm:$0xff]  ;;  %v3566_v26 = vadd.f32 %v9690_v61, %v3540_v11 }
 0x563   :  { %v9825_v28 = vpop.f32.mrf.mxu2  ;;  %v3976_v2 = vadd.f32 %v9782_v30, %v3950_v60  ;;  %v4527_v47 = vld [vmem:[#allocation10 + $0x660] sm:$0xff]  ;;  %5073 = vmatpush.msrb.mxu2 %v4703_v56 }
 0x564   :  { %v9797_v0 = vpop.f32.mrf.mxu0  ;;  %5053 = vmatpush.msrb.mxu1 %v4639_v31  ;;  %v4635_v63 = vld [vmem:[#allocation10 + $0x9c0] sm:$0xff]  ;;  %5045 = vmatpush.msrb.mxu0 %v4527_v47  ;;  %v3592_v61 = vadd.f32 %v9708_v12, %v3566_v26 }
 0x565   :  { %v4699_v55 = vld [vmem:[#allocation10 + $0xbc0] sm:$0xff]  ;;  %v4002_v53 = vadd.f32 %v9812_v39, %v3976_v2  ;;  %v10780_v2 = vld [vmem:[#allocation23_spill] sm:$0xff] }
 0x566   :  { %v4459_v62 = vld [vmem:[#allocation10 + $0x440] sm:$0xff]  ;;  %5054 = vmatpush.msrb.mxu1 %v4635_v63  ;;  %5074 = vmatpush.msrb.mxu2 %v4699_v55  ;;  %v3719_v9 = vadd.f32 %v10780_v2, %v3693_v27 }
 0x567   :  { %v4523_v30 = vld [vmem:[#allocation10 + $0x640] sm:$0xff]  ;;  %5026 = vmatpush.msrb.mxu3 %v4459_v62  ;;  %v4028_v43 = vadd.f32 %v9825_v28, %v4002_v53  ;;  %v3742_v28 = vadd.f32 %v9732_v34, %v3716_v49 }
 0x568   :  { %v4631_v50 = vld [vmem:[#allocation10 + $0x9a0] sm:$0xff]  ;;  %5046 = vmatpush.msrb.mxu0 %v4523_v30 }
 0x569   :  { %v4695_v46 = vld [vmem:[#allocation10 + $0xba0] sm:$0xff]  ;;  %5055 = vmatpush.msrb.mxu1 %v4631_v50 }
 0x56a   :  { %v9799_v54 = vpop.f32.mrf.mxu3  ;;  %v9839_v38 = vpop.f32.mrf.mxu1  ;;  %v4455_v35 = vld [vmem:[#allocation10 + $0x420] sm:$0xff]  ;;  %5075 = vmatpush.msrb.mxu2 %v4695_v46  ;;  %v10783_v46 = vld [vmem:[#allocation28_spill] sm:$0xff] }
 0x56b   :  { %v9850_v48 = vpop.f32.mrf.mxu2  ;;  %v3953_v23 = vadd.f32 %v9799_v54, %v3927_v22  ;;  %v4519_v17 = vld [vmem:[#allocation10 + $0x620] sm:$0xff]  ;;  %5027 = vmatpush.msrb.mxu3 %v4455_v35  ;;  %v3745_v5 = vadd.f32 %v10783_v46, %v3719_v9  ;;  %v10784_v35 = vld [vmem:[#allocation22_spill] sm:$0xff] }
 0x56c   :  { %v4627_v33 = vld [vmem:[#allocation10 + $0x980] sm:$0xff]  ;;  %5047 = vmatpush.msrb.mxu0 %v4519_v17 }
 0x56d   :  { %v4691_v60 = vld [vmem:[#allocation10 + $0xb80] sm:$0xff]  ;;  %5056 = vmatpush.msrb.mxu1 %v4627_v33  ;;  %v3979_v59 = vadd.f32 %v9797_v0, %v3953_v23  ;;  %v3930_v0 = vadd.f32 %v9805_v51, %v3904_v40  ;;  %v3768_v51 = vadd.f32 %v9730_v15, %v3742_v28 }
 0x56e   :  { %v9814_v20 = vpop.f32.mrf.mxu0  ;;  %v4451_v54 = vld [vmem:[#allocation10 + $0x400] sm:$0xff]  ;;  %5076 = vmatpush.msrb.mxu2 %v4691_v60 }
 0x56f   :  { %v4515_v19 = vld [vmem:[#allocation10 + $0x600] sm:$0xff]  ;;  %5028 = vmatpush.msrb.mxu3 %v4451_v54  ;;  %v4005_v45 = vadd.f32 %v9839_v38, %v3979_v59  ;;  %v9892_v50 = vadd.f32 %v10782_v13, %v3768_v51  ;;  %v10788_v51 = vld [vmem:[#allocation24_spill] sm:$0xff] }
 0x570   :  { %v4623_v16 = vld [vmem:[#allocation10 + $0x960] sm:$0xff]  ;;  %5048 = vmatpush.msrb.mxu0 %v4515_v19 }
 0x571   :  { %v4687_v29 = vld [vmem:[#allocation10 + $0xb60] sm:$0xff]  ;;  %5057 = vmatpush.msrb.mxu1 %v4623_v16  ;;  %v4031_v58 = vadd.f32 %v9850_v48, %v4005_v45  ;;  %vm4192_vm11 = vcmp.gt.f32.partialorder %v9892_v50, 0.0 }
 0x572   :  { %v9863_v39 = vpop.f32.mrf.mxu1  ;;  %v4767_v37 = vld [vmem:[#allocation10 + $0xde0] sm:$0xff]  ;;  %5077 = vmatpush.msrb.mxu2 %v4687_v29  ;;  %v4198_v29 = vmul.f32 1.442695, %v9892_v50 }
 0x573   :  { %v4831_v18 = vld [vmem:[#allocation10 + $0xfe0] sm:$0xff]  ;;  %5093 = vmatpush.msra.mxu3 %v4767_v37  ;;  %v10785_v37 = vld [vmem:[#allocation27_spill] sm:$0xff] }
 0x574   :  { %v9816_v57 = vpop.f32.mrf.mxu3  ;;  %5113 = vmatpush.msra.mxu0 %v4831_v18  ;;  %v4683_v7 = vld [vmem:[#allocation10 + $0xb40] sm:$0xff]  ;;  %v3771_v40 = vadd.f32 %v10785_v37, %v3745_v5  ;;  %v10786_v18 = vld [vmem:[#allocation26_spill] sm:$0xff]  ;;  %6300 = vpow2.f32 %v4198_v29  ;;  %v10791_v29 = vld [vmem:[#allocation31_spill] sm:$0xff] }
 0x575   :  { %v9873_v3 = vpop.f32.mrf.mxu2  ;;  %v3956_v21 = vadd.f32 %v9816_v57, %v3930_v0  ;;  %v4763_v31 = vld [vmem:[#allocation10 + $0xdc0] sm:$0xff]  ;;  %5078 = vmatpush.msrb.mxu2 %v4683_v7 }
 0x576   :  { %v4827_v34 = vld [vmem:[#allocation10 + $0xfc0] sm:$0xff]  ;;  %5094 = vmatpush.msra.mxu3 %v4763_v31 }
 0x577   :  { %5114 = vmatpush.msra.mxu0 %v4827_v34  ;;  %v4615_v57 = vld [vmem:[#allocation10 + $0x920] sm:$0xff]  ;;  %v3982_v47 = vadd.f32 %v9814_v20, %v3956_v21 }
 0x578   :  { %v4759_v38 = vld [vmem:[#allocation10 + $0xda0] sm:$0xff] }
 0x579   :  { %v4823_v12 = vld [vmem:[#allocation10 + $0xfa0] sm:$0xff]  ;;  %5095 = vmatpush.msra.mxu3 %v4759_v38  ;;  %v4008_v24 = vadd.f32 %v9863_v39, %v3982_v47 }
 0x57a   :  { %5115 = vmatpush.msra.mxu0 %v4823_v12  ;;  %v4611_v55 = vld [vmem:[#allocation10 + $0x900] sm:$0xff]  ;;  %v6301_v46 = vpop.eup %6300 }
 0x57b   :  { %v4675_v15 = vld [vmem:[#allocation10 + $0xb00] sm:$0xff]  ;;  %v4034_v26 = vadd.f32 %v9873_v3, %v4008_v24 }
 0x57c   :  { %v9833_v10 = vpop.f32.mrf.mxu0  ;;  %v4755_v42 = vld [vmem:[#allocation10 + $0xd80] sm:$0xff] }
 0x57d   :  { %v4105_v6 = vpop.f32.mrf.mxu1  ;;  %v10781_v48 = vld [vmem:[#allocation25_spill] sm:$0xff]  ;;  %5096 = vmatpush.msra.mxu3 %v4755_v42 }
 0x57e   :  { %v3618_v22 = vadd.f32 %v10781_v48, %v3592_v61  ;;  %v4819_v30 = vld [vmem:[#allocation10 + $0xf80] sm:$0xff] }
 0x57f   :  { %5116 = vmatpush.msra.mxu0 %v4819_v30  ;;  %v4607_v20 = vld [vmem:[#allocation10 + $0x8e0] sm:$0xff] }
 0x580   :  { %v4671_v53 = vld [vmem:[#allocation10 + $0xae0] sm:$0xff]  ;;  %v3644_v17 = vadd.f32 %v10784_v35, %v3618_v22 }
 0x581   :  { %v4751_v23 = vld [vmem:[#allocation10 + $0xd60] sm:$0xff] }
 0x582   :  { %v9835_v36 = vpop.f32.mrf.mxu3  ;;  %v4815_v8 = vld [vmem:[#allocation10 + $0xf60] sm:$0xff]  ;;  %5097 = vmatpush.msra.mxu3 %v4751_v23  ;;  %v3670_v52 = vadd.f32 %v10786_v18, %v3644_v17 }
 0x583   :  { %v4054_v14 = vadd.f32 %v9835_v36, %v4028_v43  ;;  %v4619_v36 = vld [vmem:[#allocation10 + $0x940] sm:$0xff]  ;;  %v4131_v62 = vpop.f32.mrf.mxu2  ;;  %5117 = vmatpush.msra.mxu0 %v4815_v8 }
 0x584   :  { %5058 = vmatpush.msrb.mxu1 %v4619_v36  ;;  %v4603_v60 = vld [vmem:[#allocation10 + $0x8c0] sm:$0xff] }
 0x585   :  { %v9860_v44 = vpop.f32.mrf.mxu0  ;;  %v4080_v41 = vadd.f32 %v9833_v10, %v4054_v14  ;;  %v4679_v10 = vld [vmem:[#allocation10 + $0xb20] sm:$0xff] }
 0x586   :  { %5059 = vmatpush.msrb.mxu1 %v4615_v57  ;;  %5079 = vmatpush.msrb.mxu2 %v4679_v10  ;;  %v4667_v1 = vld [vmem:[#allocation10 + $0xac0] sm:$0xff]  ;;  %v4108_v49 = vpop.f32.mrf.mxu1 }
 0x587   :  { %v4106_v4 = vadd.f32 %v4105_v6, %v4080_v41  ;;  %v4747_v54 = vld [vmem:[#allocation10 + $0xd40] sm:$0xff] }
 0x588   :  { %5060 = vmatpush.msrb.mxu1 %v4611_v55  ;;  %5080 = vmatpush.msrb.mxu2 %v4675_v15  ;;  %v4811_v16 = vld [vmem:[#allocation10 + $0xf40] sm:$0xff] }
 0x589   :  { %5098 = vmatpush.msra.mxu3 %v4747_v54  ;;  %5118 = vmatpush.msra.mxu0 %v4811_v16  ;;  %v4599_v39 = vld [vmem:[#allocation10 + $0x8a0] sm:$0xff]  ;;  %v6240_v54 = vadd.f32 -1.0, %v6301_v46 }
 0x58a   :  { %5061 = vmatpush.msrb.mxu1 %v4607_v20  ;;  %5081 = vmatpush.msrb.mxu2 %v4671_v53  ;;  %v4663_v59 = vld [vmem:[#allocation10 + $0xaa0] sm:$0xff] }
 0x58b   :  { %v4056_v25 = vpop.f32.mrf.mxu3  ;;  %v4807_v14 = vld [vmem:[#allocation10 + $0xf20] sm:$0xff] }
 0x58c   :  { %v4057_v63 = vadd.f32 %v4056_v25, %v4031_v58  ;;  %v4132_v25 = vadd.f32 %v4131_v62, %v4106_v4  ;;  %5062 = vmatpush.msrb.mxu1 %v4603_v60  ;;  %5082 = vmatpush.msrb.mxu2 %v4667_v1  ;;  %v4595_v45 = vld [vmem:[#allocation10 + $0x880] sm:$0xff]  ;;  %v3696_v58 = vadd.f32 %v10788_v51, %v3670_v52  ;;  %v4134_v57 = vpop.f32.mrf.mxu2 }
 0x58d   :  { %5119 = vmatpush.msra.mxu0 %v4807_v14  ;;  %v4659_v27 = vld [vmem:[#allocation10 + $0xa80] sm:$0xff] }
 0x58e   :  { %v9882_v56 = vpop.f32.mrf.mxu0  ;;  %v4083_v33 = vadd.f32 %v9860_v44, %v4057_v63  ;;  %v4743_v44 = vld [vmem:[#allocation10 + $0xd20] sm:$0xff]  ;;  %5063 = vmatpush.msrb.mxu1 %v4599_v39  ;;  %5083 = vmatpush.msrb.mxu2 %v4663_v59 }
 0x58f   :  { %5099 = vmatpush.msra.mxu3 %v4743_v44  ;;  %v4739_v21 = vld [vmem:[#allocation10 + $0xd00] sm:$0xff]  ;;  %v4111_v17 = vpop.f32.mrf.mxu1 }
 0x590   :  { %v4109_v28 = vadd.f32 %v4108_v49, %v4083_v33  ;;  %5064 = vmatpush.msrb.mxu1 %v4595_v45  ;;  %5084 = vmatpush.msrb.mxu2 %v4659_v27  ;;  %v4803_v6 = vld [vmem:[#allocation10 + $0xf00] sm:$0xff]  ;;  %v9921_v49 = vsel %vm4192_vm11, %v9892_v50, %v6240_v54  ;;  %v10792_v27 = vld [vmem:[#allocation34_spill] sm:$0xff]  ;;  %vm10800_vm11 = vmmov %vm10796_vm4 }
 0x591   :  { %v10787_v41 = vld [vmem:[#allocation33_spill] sm:$0xff]  ;;  %5100 = vmatpush.msra.mxu3 %v4739_v21  ;;  %5120 = vmatpush.msra.mxu0 %v4803_v6 }
 0x592   :  { %v9905_v36 = vadd.f32 %v10787_v41, %v3771_v40  ;;  %v4591_v3 = vld [vmem:[#allocation10 + $0x860] sm:$0xff]  ;;  %v4135_v38 = vadd.f32 %v4134_v57, %v4109_v28 }
 0x593   :  { %v4655_v61 = vld [vmem:[#allocation10 + $0xa60] sm:$0xff]  ;;  %5065 = vmatpush.msrb.mxu1 %v4591_v3 }
 0x594   :  { %v9884_v32 = vpop.f32.mrf.mxu3  ;;  %v4735_v34 = vld [vmem:[#allocation10 + $0xce0] sm:$0xff]  ;;  %5085 = vmatpush.msrb.mxu2 %v4655_v61  ;;  %v4202_v4 = vmul.f32 1.442695, %v9905_v36  ;;  %vm4194_vm15 = vcmp.gt.f32.partialorder %v9905_v36, 0.0 }
 0x595   :  { %v4060_v7 = vadd.f32 %v9884_v32, %v4034_v26  ;;  %v4799_v10 = vld [vmem:[#allocation10 + $0xee0] sm:$0xff]  ;;  %5101 = vmatpush.msra.mxu3 %v4735_v34  ;;  %v4137_v40 = vpop.f32.mrf.mxu2 }
 0x596   :  { %5121 = vmatpush.msra.mxu0 %v4799_v10  ;;  %v4587_v2 = vld [vmem:[#allocation10 + $0x840] sm:$0xff] }
 0x597   :  { %v4651_v9 = vld [vmem:[#allocation10 + $0xa40] sm:$0xff]  ;;  %5066 = vmatpush.msrb.mxu1 %v4587_v2  ;;  %v4086_v63 = vadd.f32 %v9882_v56, %v4060_v7  ;;  %v10790_v56 = vld [vmem:[#allocation32_spill] sm:$0xff] }
 0x598   :  { %v4731_v32 = vld [vmem:[#allocation10 + $0xcc0] sm:$0xff]  ;;  %5086 = vmatpush.msrb.mxu2 %v4651_v9 }
 0x599   :  { %v4795_v47 = vld [vmem:[#allocation10 + $0xec0] sm:$0xff]  ;;  %5102 = vmatpush.msra.mxu3 %v4731_v32 }
 0x59a   :  { %5122 = vmatpush.msra.mxu0 %v4795_v47  ;;  %v4583_v15 = vld [vmem:[#allocation10 + $0x820] sm:$0xff] }
 0x59b   :  { %v4647_v42 = vld [vmem:[#allocation10 + $0xa20] sm:$0xff]  ;;  %5067 = vmatpush.msrb.mxu1 %v4583_v15 }
 0x59c   :  { %v4727_v48 = vld [vmem:[#allocation10 + $0xca0] sm:$0xff]  ;;  %5087 = vmatpush.msrb.mxu2 %v4647_v42 }
 0x59d   :  { %v10789_v22 = vld [vmem:[#allocation29_spill] sm:$0xff]  ;;  %5103 = vmatpush.msra.mxu3 %v4727_v48 }
 0x59e   :  { %v3722_v62 = vadd.f32 %v10789_v22, %v3696_v58  ;;  %v4791_v13 = vld [vmem:[#allocation10 + $0xea0] sm:$0xff] }
 0x59f   :  { %v4183_v19 = vpop.f32.mrf.mxu0  ;;  %5123 = vmatpush.msra.mxu0 %v4791_v13  ;;  %v4579_v20 = vld [vmem:[#allocation10 + $0x800] sm:$0xff] }
 0x5a0   :  { %v4643_v53 = vld [vmem:[#allocation10 + $0xa00] sm:$0xff]  ;;  %v3748_v35 = vadd.f32 %v10790_v56, %v3722_v62  ;;  %5068 = vmatpush.msrb.mxu1 %v4579_v20 }
 0x5a1   :  { %v4723_v23 = vld [vmem:[#allocation10 + $0xc80] sm:$0xff]  ;;  %5088 = vmatpush.msrb.mxu2 %v4643_v53 }
 0x5a2   :  { %v4787_v8 = vld [vmem:[#allocation10 + $0xe80] sm:$0xff]  ;;  %5104 = vmatpush.msra.mxu3 %v4723_v23  ;;  %v3774_v37 = vadd.f32 %v10791_v29, %v3748_v35  ;;  %v4384_v29 = vld [vmem:[#allocation10 + $0x1e8] sm:$0xff] }
 0x5a3   :  { %5124 = vmatpush.msra.mxu0 %v4787_v8  ;;  %v4719_v60 = vld [vmem:[#allocation10 + $0xc60] sm:$0xff] }
 0x5a4   :  { %v4783_v1 = vld [vmem:[#allocation10 + $0xe60] sm:$0xff]  ;;  %5105 = vmatpush.msra.mxu3 %v4719_v60  ;;  %v3800_v21 = vadd.f32 %v10792_v27, %v3774_v37  ;;  %v4448_v37 = vld [vmem:[#allocation10 + $0x3e8] sm:$0xff] }
 0x5a5   :  { %v4157_v11 = vpop.f32.mrf.mxu3  ;;  %v4779_v16 = vld [vmem:[#allocation10 + $0xe40] sm:$0xff]  ;;  %5125 = vmatpush.msra.mxu0 %v4783_v1  ;;  %v4376_v27 = vld [vmem:[#allocation10 + $0x1a8] sm:$0xff] }
 0x5a6   :  { %v4158_v43 = vadd.f32 %v4157_v11, %v4132_v25  ;;  %v4112_v25 = vadd.f32 %v4111_v17, %v4086_v63  ;;  %v4715_v11 = vld [vmem:[#allocation10 + $0xc40] sm:$0xff]  ;;  %v4206_v34 = vmul.f32 1.442695, %v3800_v21  ;;  %vm4196_vm5 = vcmp.gt.f32.partialorder %v3800_v21, 0.0 }
 0x5a7   :  { %v4186_v30 = vpop.f32.mrf.mxu0  ;;  %v4711_v59 = vld [vmem:[#allocation10 + $0xc20] sm:$0xff]  ;;  %5106 = vmatpush.msra.mxu3 %v4715_v11  ;;  %5126 = vmatpush.msra.mxu0 %v4779_v16 }
 0x5a8   :  { %v9902_v0 = vadd.f32 %v4183_v19, %v4158_v43  ;;  %v4138_v44 = vadd.f32 %v4137_v40, %v4112_v25  ;;  %v4775_v52 = vld [vmem:[#allocation10 + $0xe20] sm:$0xff] }
 0x5a9   :  { %v4707_v14 = vld [vmem:[#allocation10 + $0xc00] sm:$0xff]  ;;  %5107 = vmatpush.msra.mxu3 %v4711_v59  ;;  %5127 = vmatpush.msra.mxu0 %v4775_v52 }
 0x5aa   :  { %v4200_v31 = vmul.f32 1.442695, %v9902_v0  ;;  %vm4193_vm7 = vcmp.gt.f32.partialorder %v9902_v0, 0.0  ;;  %v4771_v45 = vld [vmem:[#allocation10 + $0xe00] sm:$0xff] }
 0x5ab   :  { %5108 = vmatpush.msra.mxu3 %v4707_v14  ;;  %5128 = vmatpush.msra.mxu0 %v4771_v45  ;;  %v4895_v48 = vld [vmem:[#allocation10 + $0x11e0] sm:$0xff]  ;;  %v4380_v14 = vld [vmem:[#allocation10 + $0x1c8] sm:$0xff] }
 0x5ac   :  { %6302 = vpow2.f32 %v4200_v31  ;;  %v4959_v22 = vld [vmem:[#allocation10 + $0x13e0] sm:$0xff] }
 0x5ad   :  { %v4160_v12 = vpop.f32.mrf.mxu3  ;;  %6304 = vpow2.f32 %v4202_v4  ;;  %v4891_v53 = vld [vmem:[#allocation10 + $0x11c0] sm:$0xff] }
 0x5ae   :  { %v4161_v55 = vadd.f32 %v4160_v12, %v4135_v38  ;;  %v4955_v23 = vld [vmem:[#allocation10 + $0x13c0] sm:$0xff] }
 0x5af   :  { %v4189_v3 = vpop.f32.mrf.mxu0  ;;  %v4887_v17 = vld [vmem:[#allocation10 + $0x11a0] sm:$0xff] }
 0x5b0   :  { %v4187_v5 = vadd.f32 %v4186_v30, %v4161_v55  ;;  %v4951_v8 = vld [vmem:[#allocation10 + $0x13a0] sm:$0xff] }
 0x5b1   :  { %v4947_v25 = vld [vmem:[#allocation10 + $0x1380] sm:$0xff] }
 0x5b2   :  { %v6303_v24 = vpop.eup %6302  ;;  %v4204_v33 = vmul.f32 1.442695, %v4187_v5  ;;  %vm4195_vm13 = vcmp.gt.f32.partialorder %v4187_v5, 0.0  ;;  %v4879_v60 = vld [vmem:[#allocation10 + $0x1160] sm:$0xff] }
 0x5b3   :  { %v6241_v19 = vadd.f32 -1.0, %v6303_v24  ;;  %v6305_v26 = vpop.eup %6304  ;;  %v4883_v24 = vld [vmem:[#allocation10 + $0x1180] sm:$0xff] }
 0x5b4   :  { %6306 = vpow2.f32 %v4204_v33  ;;  %v6242_v50 = vadd.f32 -1.0, %v6305_v26  ;;  %v4943_v1 = vld [vmem:[#allocation10 + $0x1360] sm:$0xff]  ;;  %v4444_v26 = vld [vmem:[#allocation10 + $0x3c8] sm:$0xff] }
 0x5b5   :  { %v4217_v43 = vsel %vm4193_vm7, %v9902_v0, %v6241_v19  ;;  %v4163_v39 = vpop.f32.mrf.mxu3  ;;  %6308 = vpow2.f32 %v4206_v34  ;;  %vm10799_vm7 = vcmask 1044484   ;;  %v4875_v40 = vld [vmem:[#allocation10 + $0x1140] sm:$0xff]  ;;  %v4368_v34 = vld [vmem:[#allocation10 + $0x168] sm:$0xff] }
 0x5b6   :  { %v9918_v18 = vrot.slane %v4217_v43, 7  ;;  %v4164_v0 = vadd.f32 %v4163_v39, %v4138_v44  ;;  %v9934_v57 = vsel %vm4194_vm15, %v9905_v36, %v6242_v50  ;;  %v4939_v44 = vld [vmem:[#allocation10 + $0x1340] sm:$0xff]  ;;  %v4372_v50 = vld [vmem:[#allocation10 + $0x188] sm:$0xff]  ;;  %vm10803_vm15 = vmmov %vm10759_vm10 }
 0x5b7   :  { %v4935_v45 = vld [vmem:[#allocation10 + $0x1320] sm:$0xff] }
 0x5b8   :  { %v4231_v28 = vsel %vm572_vm8, %v9921_v49, %v9918_v18  ;;  %v4240_v41 = vsel %vm10793_vm3, %v9921_v49, %v9918_v18  ;;  %v4190_v61 = vadd.f32 %v4189_v3, %v4164_v0  ;;  %v4232_v36 = vsel %vm1187_vm1, %v9921_v49, %v9918_v18  ;;  %v4871_v0 = vld [vmem:[#allocation10 + $0x1120] sm:$0xff] }
 0x5b9   :  { %4268 = vst [vmem:[#allocation1] ss:$9 sm:$0xff] %v4231_v28  ;;  %v4241_v7 = vrot.slane %v4240_v41, 5  ;;  %v4242_v4 = vsel %vm10759_vm10, %v9921_v49, %v9918_v18  ;;  %v4233_v42 = vrot.slane %v4232_v36, 1  ;;  %v4234_v33 = vsel %vm10797_vm14, %v9921_v49, %v9918_v18  ;;  %v4931_v41 = vld [vmem:[#allocation10 + $0x1300] sm:$0xff]  ;;  %v4428_v36 = vld [vmem:[#allocation10 + $0x348] sm:$0xff] }
 0x5ba   :  { %v6307_v6 = vpop.eup %6306  ;;  %v4208_v10 = vmul.f32 1.442695, %v4190_v61  ;;  %vm4197_vm9 = vcmp.gt.f32.partialorder %v4190_v61, 0.0  ;;  %v4243_v62 = vrot.slane %v4242_v4, 6  ;;  %v4244_v54 = vsel %vm10798_vm6, %v9918_v18, %v9921_v49  ;;  %v4927_v3 = vld [vmem:[#allocation10 + $0x12e0] sm:$0xff] }
 0x5bb   :  { %v6243_v31 = vadd.f32 -1.0, %v6307_v6  ;;  %4270 = vst [vmem:[#allocation1 + $0x1] ss:$9 sm:$0xff] %v4241_v7  ;;  %v6309_v12 = vpop.eup %6308  ;;  %v4235_v11 = vrot.slane %v4234_v33, 2  ;;  %v4245_v43 = vrot.slane %v4244_v54, 7  ;;  %v4867_v6 = vld [vmem:[#allocation10 + $0x1100] sm:$0xff] }
 0x5bc   :  { %6310 = vpow2.f32 %v4208_v10  ;;  %v6244_v63 = vadd.f32 -1.0, %v6309_v12  ;;  %v4436_v7 = vld [vmem:[#allocation10 + $0x388] sm:$0xff]  ;;  %v4859_v10 = vld [vmem:[#allocation10 + $0x10c0] sm:$0xff]  ;;  %vm6213_vm6 = vcmask 3072  }
 0x5bd   :  { %v4219_v51 = vsel %vm4195_vm13, %v4187_v5, %v6243_v31  ;;  %v4863_v31 = vld [vmem:[#allocation10 + $0x10e0] sm:$0xff]  ;;  %vm10801_vm13 = vmmov %vm10794_vm0  ;;  %v4364_v12 = vld [vmem:[#allocation10 + $0x148] sm:$0xff] }
 0x5be   :  { %v9931_v58 = vrot.slane %v4219_v51, 7  ;;  %v9959_v56 = vsel %vm4196_vm5, %v3800_v21, %v6244_v63  ;;  %v4440_v21 = vld [vmem:[#allocation10 + $0x3a8] sm:$0xff]  ;;  %v4907_v33 = vld [vmem:[#allocation10 + $0x1240] sm:$0xff] }
 0x5bf   :  { %v4432_v51 = vld [vmem:[#allocation10 + $0x368] sm:$0xff] }
 0x5c0   :  { %v4249_v38 = vsel %vm10794_vm0, %v9934_v57, %v9931_v58  ;;  %v4259_v9 = vsel %vm10795_vm2, %v9931_v58, %v9934_v57  ;;  %v4251_v55 = vsel %vm10796_vm4, %v9934_v57, %v9931_v58  ;;  %v4253_v19 = vsel %vm10799_vm7, %v9934_v57, %v9931_v58  ;;  %v4412_v54 = vld [vmem:[#allocation10 + $0x2c8] sm:$0xff]  ;;  %vm10804_vm0 = vmmov %vm10796_vm4 }
 0x5c1   :  { %v4250_v2 = vrot.slane %v4249_v38, 2  ;;  %v4260_v32 = vrot.slane %v4259_v9, 7  ;;  %v4252_v5 = vrot.slane %v4251_v55, 3  ;;  %v4254_v52 = vrot.slane %v4253_v19, 4  ;;  %v4923_v38 = vld [vmem:[#allocation10 + $0x12c0] sm:$0xff] }
 0x5c2   :  { %v6311_v47 = vpop.eup %6310  ;;  %v4919_v55 = vld [vmem:[#allocation10 + $0x12a0] sm:$0xff]  ;;  %v4247_v19 = vsel %vm1187_vm1, %v9934_v57, %v9931_v58 }
 0x5c3   :  { %4272 = vst [vmem:[#allocation1 + $0x2] ss:$9 sm:$0xff] %v4250_v2  ;;  %v6245_v15 = vadd.f32 -1.0, %v6311_v47  ;;  %v4255_v2 = vsel %vm10793_vm3, %v9934_v57, %v9931_v58  ;;  %v4855_v47 = vld [vmem:[#allocation10 + $0x10a0] sm:$0xff] }
 0x5c4   :  { %4274 = vst [vmem:[#allocation1 + $0x3] ss:$9 sm:$0xff] %v4260_v32 }
 0x5c5   :  { %v4221_v30 = vsel %vm4197_vm9, %v4190_v61, %v6245_v15  ;;  %v4236_v61 = vsel %vm10800_vm11, %v9921_v49, %v9918_v18  ;;  %v4246_v15 = vsel %vm572_vm8, %v9934_v57, %v9931_v58 }
 0x5c6   :  { %v9955_v20 = vrot.slane %v4221_v30, 7  ;;  %v4237_v9 = vrot.slane %v4236_v61, 3  ;;  %v4851_v30 = vld [vmem:[#allocation10 + $0x1080] sm:$0xff]  ;;  %v4392_v61 = vld [vmem:[#allocation10 + $0x228] sm:$0xff] }
 0x5c8   :  { %v4261_v35 = vsel %vm572_vm8, %v9959_v56, %v9955_v20  ;;  %v4262_v16 = vsel %vm1187_vm1, %v9959_v56, %v9955_v20  ;;  %v4264_v32 = vsel %vm10801_vm13, %v9959_v56, %v9955_v20  ;;  %vm10802_vm8 = vmmov %vm10799_vm7 }
 0x5c9   :  { %v4263_v28 = vrot.slane %v4262_v16, 1  ;;  %v4903_v16 = vld [vmem:[#allocation10 + $0x1220] sm:$0xff] }
 0x5cb   :  { %v9951_v13 = vld [vmem:[#allocation1] sm:$0xff]  ;;  %v9953_v46 = vld [vmem:[#allocation1 + $0x9] sm:$0xff] }
 0x5cc   :  { %4989 = vmatmul.f32.vlgmr.msra.gmra.mxu1 %v9951_v13  ;;  %5009 = vmatmul.f32.vlgmr.msra.gmra.mxu2 %v9953_v46  ;;  %4279 = vst [vmem:[#allocation1] ss:$9 sm:$0xff] %v4233_v42  ;;  %v4256_v42 = vrot.slane %v4255_v2, 5 }
 0x5cd   :  { %4281 = vst [vmem:[#allocation1 + $0x1] ss:$9 sm:$0xff] %v4243_v62  ;;  %5133 = vmatpush.msra.mxu1 %v4895_v48  ;;  %5153 = vmatpush.msra.mxu2 %v4959_v22  ;;  %v4360_v48 = vld [vmem:[#allocation10 + $0x128] sm:$0xff]  ;;  %v4265_v62 = vrot.slane %v4264_v32, 2 }
 0x5ce   :  { %4283 = vst [vmem:[#allocation1 + $0x2] ss:$9 sm:$0xff] %v4252_v5  ;;  %v4424_v22 = vld [vmem:[#allocation10 + $0x328] sm:$0xff]  ;;  %v4915_v5 = vld [vmem:[#allocation10 + $0x1280] sm:$0xff] }
 0x5cf   :  { %4285 = vst [vmem:[#allocation1 + $0x3] ss:$9 sm:$0xff] %v4261_v35  ;;  %5134 = vmatpush.msra.mxu1 %v4891_v53  ;;  %5154 = vmatpush.msra.mxu2 %v4955_v23  ;;  %v4356_v53 = vld [vmem:[#allocation10 + $0x108] sm:$0xff]  ;;  %v4847_v35 = vld [vmem:[#allocation10 + $0x1060] sm:$0xff] }
 0x5d0   :  { %v4420_v23 = vld [vmem:[#allocation10 + $0x308] sm:$0xff] }
 0x5d1   :  { %5135 = vmatpush.msra.mxu1 %v4887_v17  ;;  %5155 = vmatpush.msra.mxu2 %v4951_v8  ;;  %v4911_v17 = vld [vmem:[#allocation10 + $0x1260] sm:$0xff]  ;;  %v4352_v8 = vld [vmem:[#allocation10 + $0xe8] sm:$0xff] }
 0x5d2   :  { %v4496_v32 = vld [vmem:[#allocation10 + $0x568] sm:$0xff] }
 0x5d3   :  { %5136 = vmatpush.msra.mxu1 %v4883_v24  ;;  %5156 = vmatpush.msra.mxu2 %v4947_v25  ;;  %v4416_v24 = vld [vmem:[#allocation10 + $0x2e8] sm:$0xff]  ;;  %v4843_v25 = vld [vmem:[#allocation10 + $0x1040] sm:$0xff] }
 0x5d5   :  { %5137 = vmatpush.msra.mxu1 %v4879_v60  ;;  %5157 = vmatpush.msra.mxu2 %v4943_v1  ;;  %v4238_v60 = vsel %vm10802_vm8, %v9921_v49, %v9918_v18  ;;  %v4348_v1 = vld [vmem:[#allocation10 + $0xc8] sm:$0xff]  ;;  %v4266_v18 = vsel %vm10804_vm0, %v9959_v56, %v9955_v20 }
 0x5d6   :  { %v9976_v39 = vld [vmem:[#allocation1] sm:$0xff]  ;;  %v9978_v59 = vld [vmem:[#allocation1 + $0x9] sm:$0xff]  ;;  %v4344_v49 = vld [vmem:[#allocation10 + $0xa8] sm:$0xff] }
 0x5d7   :  { %5029 = vmatmul.f32.vlgmr.msrb.gmra.mxu3 %v9976_v39  ;;  %5049 = vmatmul.f32.vlgmr.msrb.gmra.mxu0 %v9978_v59  ;;  %4290 = vst [vmem:[#allocation1] ss:$9 sm:$0xff] %v4235_v11  ;;  %v4839_v11 = vld [vmem:[#allocation10 + $0x1020] sm:$0xff]  ;;  %v4340_v20 = vld [vmem:[#allocation10 + $0x88] sm:$0xff] }
 0x5d8   :  { %4292 = vst [vmem:[#allocation1 + $0x1] ss:$9 sm:$0xff] %v4245_v43  ;;  %5173 = vmatpush.msrb.mxu3 %v4384_v29  ;;  %5193 = vmatpush.msrb.mxu0 %v4448_v37  ;;  %v4257_v29 = vsel %vm10803_vm15, %v9934_v57, %v9931_v58  ;;  %v4239_v37 = vrot.slane %v4238_v60, 4  ;;  %v4835_v43 = vld [vmem:[#allocation10 + $0x1000] sm:$0xff]  ;;  %v4404_v56 = vld [vmem:[#allocation10 + $0x288] sm:$0xff] }
 0x5d9   :  { %4294 = vst [vmem:[#allocation1 + $0x2] ss:$9 sm:$0xff] %v4254_v52  ;;  %5138 = vmatpush.msra.mxu1 %v4875_v40  ;;  %5158 = vmatpush.msra.mxu2 %v4939_v44  ;;  %v4408_v40 = vld [vmem:[#allocation10 + $0x2a8] sm:$0xff]  ;;  %v4248_v44 = vrot.slane %v4247_v19, 1  ;;  %v4899_v58 = vld [vmem:[#allocation10 + $0x1200] sm:$0xff]  ;;  %v4258_v57 = vrot.slane %v4257_v29, 6 }
 0x5da   :  { %4296 = vst [vmem:[#allocation1 + $0x3] ss:$9 sm:$0xff] %v4263_v28  ;;  %5174 = vmatpush.msrb.mxu3 %v4380_v14  ;;  %5194 = vmatpush.msrb.mxu0 %v4444_v26  ;;  %v4267_v26 = vrot.slane %v4266_v18, 3  ;;  %v4512_v28 = vld [vmem:[#allocation10 + $0x5e8] sm:$0xff] }
 0x5db   :  { %5139 = vmatpush.msra.mxu1 %v4871_v0  ;;  %5159 = vmatpush.msra.mxu2 %v4935_v45  ;;  %v4576_v0 = vld [vmem:[#allocation10 + $0x7e8] sm:$0xff] }
 0x5dc   :  { %5175 = vmatpush.msrb.mxu3 %v4376_v27  ;;  %5195 = vmatpush.msrb.mxu0 %v4440_v21  ;;  %v4336_v45 = vld [vmem:[#allocation10 + $0x68] sm:$0xff] }
 0x5dd   :  { %5140 = vmatpush.msra.mxu1 %v4867_v6  ;;  %5160 = vmatpush.msra.mxu2 %v4931_v41  ;;  %v4400_v27 = vld [vmem:[#allocation10 + $0x268] sm:$0xff] }
 0x5de   :  { %5176 = vmatpush.msrb.mxu3 %v4372_v50  ;;  %5196 = vmatpush.msrb.mxu0 %v4436_v7  ;;  %v4508_v21 = vld [vmem:[#allocation10 + $0x5c8] sm:$0xff] }
 0x5df   :  { %5141 = vmatpush.msra.mxu1 %v4863_v31  ;;  %5161 = vmatpush.msra.mxu2 %v4927_v3  ;;  %v4572_v6 = vld [vmem:[#allocation10 + $0x7c8] sm:$0xff] }
 0x5e0   :  { %5177 = vmatpush.msrb.mxu3 %v4368_v34  ;;  %5197 = vmatpush.msrb.mxu0 %v4432_v51  ;;  %v4332_v41 = vld [vmem:[#allocation10 + $0x48] sm:$0xff] }
 0x5e1   :  { %v9991_v4 = vld [vmem:[#allocation1] sm:$0xff]  ;;  %v9993_v63 = vld [vmem:[#allocation1 + $0x9] sm:$0xff]  ;;  %5142 = vmatpush.msra.mxu1 %v4859_v10  ;;  %5162 = vmatpush.msra.mxu2 %v4923_v38  ;;  %v4396_v50 = vld [vmem:[#allocation10 + $0x248] sm:$0xff] }
 0x5e2   :  { %5069 = vmatmul.f32.vlgmr.msrb.gmra.mxu1 %v9991_v4  ;;  %5089 = vmatmul.f32.vlgmr.msrb.gmra.mxu2 %v9993_v63  ;;  %4301 = vst [vmem:[#allocation1] ss:$9 sm:$0xff] %v4237_v9  ;;  %v4504_v7 = vld [vmem:[#allocation10 + $0x5a8] sm:$0xff] }
 0x5e3   :  { %4303 = vst [vmem:[#allocation1 + $0x1] ss:$9 sm:$0xff] %v4246_v15  ;;  %5178 = vmatpush.msrb.mxu3 %v4364_v12  ;;  %5198 = vmatpush.msrb.mxu0 %v4428_v36  ;;  %v4568_v31 = vld [vmem:[#allocation10 + $0x7a8] sm:$0xff] }
 0x5e4   :  { %4305 = vst [vmem:[#allocation1 + $0x2] ss:$9 sm:$0xff] %v4256_v42  ;;  %5143 = vmatpush.msra.mxu1 %v4855_v47  ;;  %5163 = vmatpush.msra.mxu2 %v4919_v55  ;;  %v4328_v3 = vld [vmem:[#allocation10 + $0x28] sm:$0xff] }
 0x5e5   :  { %4307 = vst [vmem:[#allocation1 + $0x3] ss:$9 sm:$0xff] %v4265_v62  ;;  %5179 = vmatpush.msrb.mxu3 %v4360_v48  ;;  %5199 = vmatpush.msrb.mxu0 %v4424_v22  ;;  %v4500_v34 = vld [vmem:[#allocation10 + $0x588] sm:$0xff] }
 0x5e6   :  { %5144 = vmatpush.msra.mxu1 %v4851_v30  ;;  %5164 = vmatpush.msra.mxu2 %v4915_v5  ;;  %v4564_v51 = vld [vmem:[#allocation10 + $0x788] sm:$0xff] }
 0x5e7   :  { %5180 = vmatpush.msrb.mxu3 %v4356_v53  ;;  %5200 = vmatpush.msrb.mxu0 %v4420_v23  ;;  %v4324_v10 = vld [vmem:[#allocation10 + $0x8] sm:$0xff] }
 0x5e8   :  { %5145 = vmatpush.msra.mxu1 %v4847_v35  ;;  %5165 = vmatpush.msra.mxu2 %v4911_v17  ;;  %v4388_v38 = vld [vmem:[#allocation10 + $0x208] sm:$0xff] }
 0x5e9   :  { %5181 = vmatpush.msrb.mxu3 %v4352_v8  ;;  %5201 = vmatpush.msrb.mxu0 %v4416_v24  ;;  %v4560_v12 = vld [vmem:[#allocation10 + $0x768] sm:$0xff] }
 0x5ea   :  { %5146 = vmatpush.msra.mxu1 %v4843_v25  ;;  %5166 = vmatpush.msra.mxu2 %v4907_v33  ;;  %v4640_v36 = vld [vmem:[#allocation10 + $0x9e8] sm:$0xff] }
 0x5eb   :  { %5182 = vmatpush.msrb.mxu3 %v4348_v1  ;;  %5202 = vmatpush.msrb.mxu0 %v4412_v54  ;;  %v4704_v47 = vld [vmem:[#allocation10 + $0xbe8] sm:$0xff] }
 0x5ec   :  { %v10012_v52 = vld [vmem:[#allocation1] sm:$0xff]  ;;  %v10014_v14 = vld [vmem:[#allocation1 + $0x9] sm:$0xff]  ;;  %5147 = vmatpush.msra.mxu1 %v4839_v11  ;;  %5167 = vmatpush.msra.mxu2 %v4903_v16  ;;  %v4492_v55 = vld [vmem:[#allocation10 + $0x548] sm:$0xff] }
 0x5ed   :  { %5109 = vmatmul.f32.vlgmr.msra.gmra.mxu3 %v10012_v52  ;;  %5129 = vmatmul.f32.vlgmr.msra.gmra.mxu0 %v10014_v14  ;;  %4312 = vst [vmem:[#allocation1] ss:$9 sm:$0xff] %v4239_v37  ;;  %v4556_v15 = vld [vmem:[#allocation10 + $0x748] sm:$0xff] }
 0x5ee   :  { %4314 = vst [vmem:[#allocation1 + $0x1] ss:$9 sm:$0xff] %v4248_v44  ;;  %5183 = vmatpush.msrb.mxu3 %v4344_v49  ;;  %5203 = vmatpush.msrb.mxu0 %v4408_v40  ;;  %v4636_v42 = vld [vmem:[#allocation10 + $0x9c8] sm:$0xff] }
 0x5ef   :  { %4316 = vst [vmem:[#allocation1 + $0x2] ss:$9 sm:$0xff] %v4258_v57  ;;  %5148 = vmatpush.msra.mxu1 %v4835_v43  ;;  %5168 = vmatpush.msra.mxu2 %v4899_v58  ;;  %v4700_v48 = vld [vmem:[#allocation10 + $0xbc8] sm:$0xff] }
 0x5f0   :  { %4318 = vst [vmem:[#allocation1 + $0x3] ss:$9 sm:$0xff] %v4267_v26  ;;  %5184 = vmatpush.msrb.mxu3 %v4340_v20  ;;  %5204 = vmatpush.msrb.mxu0 %v4404_v56  ;;  %v4488_v22 = vld [vmem:[#allocation10 + $0x528] sm:$0xff] }
 0x5f1   :  { %5213 = vmatpush.msrb.mxu1 %v4512_v28  ;;  %5233 = vmatpush.msrb.mxu2 %v4576_v0  ;;  %v4552_v62 = vld [vmem:[#allocation10 + $0x728] sm:$0xff] }
 0x5f2   :  { %5185 = vmatpush.msrb.mxu3 %v4336_v45  ;;  %5205 = vmatpush.msrb.mxu0 %v4400_v27  ;;  %v4632_v30 = vld [vmem:[#allocation10 + $0x9a8] sm:$0xff] }
 0x5f3   :  { %5214 = vmatpush.msrb.mxu1 %v4508_v21  ;;  %5234 = vmatpush.msrb.mxu2 %v4572_v6  ;;  %v4696_v5 = vld [vmem:[#allocation10 + $0xba8] sm:$0xff] }
 0x5f4   :  { %5186 = vmatpush.msrb.mxu3 %v4332_v41  ;;  %5206 = vmatpush.msrb.mxu0 %v4396_v50  ;;  %v4484_v53 = vld [vmem:[#allocation10 + $0x508] sm:$0xff] }
 0x5f5   :  { %5215 = vmatpush.msrb.mxu1 %v4504_v7  ;;  %5235 = vmatpush.msrb.mxu2 %v4568_v31  ;;  %v4548_v23 = vld [vmem:[#allocation10 + $0x708] sm:$0xff] }
 0x5f6   :  { %5187 = vmatpush.msrb.mxu3 %v4328_v3  ;;  %5207 = vmatpush.msrb.mxu0 %v4392_v61  ;;  %v4628_v35 = vld [vmem:[#allocation10 + $0x988] sm:$0xff] }
 0x5f7   :  { %v10018_v2 = vld [vmem:[#allocation1] sm:$0xff]  ;;  %v10020_v9 = vld [vmem:[#allocation1 + $0x9] sm:$0xff]  ;;  %5216 = vmatpush.msrb.mxu1 %v4500_v34  ;;  %5236 = vmatpush.msrb.mxu2 %v4564_v51  ;;  %v4692_v17 = vld [vmem:[#allocation10 + $0xb88] sm:$0xff] }
 0x5f8   :  { %5149 = vmatmul.f32.vlgmr.msra.gmra.mxu1 %v10018_v2  ;;  %5169 = vmatmul.f32.vlgmr.msra.gmra.mxu2 %v10020_v9  ;;  %v4480_v8 = vld [vmem:[#allocation10 + $0x4e8] sm:$0xff] }
 0x5f9   :  { %5188 = vmatpush.msrb.mxu3 %v4324_v10  ;;  %5208 = vmatpush.msrb.mxu0 %v4388_v38  ;;  %v4544_v24 = vld [vmem:[#allocation10 + $0x6e8] sm:$0xff] }
 0x5fa   :  { %5189 = vmatmul.f32.vlgmr.msrb.gmra.mxu3 %v9951_v13  ;;  %5209 = vmatmul.f32.vlgmr.msrb.gmra.mxu0 %v9953_v46  ;;  %v4624_v25 = vld [vmem:[#allocation10 + $0x968] sm:$0xff] }
 0x5fb   :  { %5217 = vmatpush.msrb.mxu1 %v4496_v32  ;;  %5237 = vmatpush.msrb.mxu2 %v4560_v12  ;;  %v4688_v33 = vld [vmem:[#allocation10 + $0xb68] sm:$0xff] }
 0x5fc   :  { %5253 = vmatpush.msra.mxu3 %v4640_v36  ;;  %5273 = vmatpush.msra.mxu0 %v4704_v47  ;;  %v4476_v60 = vld [vmem:[#allocation10 + $0x4c8] sm:$0xff] }
 0x5fd   :  { %5218 = vmatpush.msrb.mxu1 %v4492_v55  ;;  %5238 = vmatpush.msrb.mxu2 %v4556_v15  ;;  %v4540_v1 = vld [vmem:[#allocation10 + $0x6c8] sm:$0xff] }
 0x5fe   :  { %5254 = vmatpush.msra.mxu3 %v4636_v42  ;;  %5274 = vmatpush.msra.mxu0 %v4700_v48  ;;  %v4620_v54 = vld [vmem:[#allocation10 + $0x948] sm:$0xff] }
 0x5ff   :  { %5219 = vmatpush.msrb.mxu1 %v4488_v22  ;;  %5239 = vmatpush.msrb.mxu2 %v4552_v62  ;;  %v4684_v19 = vld [vmem:[#allocation10 + $0xb48] sm:$0xff] }
 0x600   :  { %5255 = vmatpush.msra.mxu3 %v4632_v30  ;;  %5275 = vmatpush.msra.mxu0 %v4696_v5  ;;  %v4472_v11 = vld [vmem:[#allocation10 + $0x4a8] sm:$0xff] }
 0x601   :  { %5220 = vmatpush.msrb.mxu1 %v4484_v53  ;;  %5240 = vmatpush.msrb.mxu2 %v4548_v23  ;;  %v4536_v16 = vld [vmem:[#allocation10 + $0x6a8] sm:$0xff] }
 0x602   :  { %5256 = vmatpush.msra.mxu3 %v4628_v35  ;;  %5276 = vmatpush.msra.mxu0 %v4692_v17  ;;  %v4616_v29 = vld [vmem:[#allocation10 + $0x928] sm:$0xff] }
 0x603   :  { %5221 = vmatpush.msrb.mxu1 %v4480_v8  ;;  %5241 = vmatpush.msrb.mxu2 %v4544_v24  ;;  %v4680_v37 = vld [vmem:[#allocation10 + $0xb28] sm:$0xff] }
 0x604   :  { %5257 = vmatpush.msra.mxu3 %v4624_v25  ;;  %5277 = vmatpush.msra.mxu0 %v4688_v33  ;;  %v4468_v18 = vld [vmem:[#allocation10 + $0x488] sm:$0xff] }
 0x605   :  { %5222 = vmatpush.msrb.mxu1 %v4476_v60  ;;  %5242 = vmatpush.msrb.mxu2 %v4540_v1  ;;  %v4532_v49 = vld [vmem:[#allocation10 + $0x688] sm:$0xff] }
 0x606   :  { %5258 = vmatpush.msra.mxu3 %v4620_v54  ;;  %5278 = vmatpush.msra.mxu0 %v4684_v19  ;;  %v4612_v40 = vld [vmem:[#allocation10 + $0x908] sm:$0xff] }
 0x607   :  { %5223 = vmatpush.msrb.mxu1 %v4472_v11  ;;  %5243 = vmatpush.msrb.mxu2 %v4536_v16  ;;  %v4676_v43 = vld [vmem:[#allocation10 + $0xb08] sm:$0xff] }
 0x608   :  { %5259 = vmatpush.msra.mxu3 %v4616_v29  ;;  %5279 = vmatpush.msra.mxu0 %v4680_v37  ;;  %v4464_v44 = vld [vmem:[#allocation10 + $0x468] sm:$0xff] }
 0x609   :  { %v4528_v58 = vld [vmem:[#allocation10 + $0x668] sm:$0xff]  ;;  %5224 = vmatpush.msrb.mxu1 %v4468_v18  ;;  %5244 = vmatpush.msrb.mxu2 %v4532_v49 }
 0x60a   :  { %v4608_v57 = vld [vmem:[#allocation10 + $0x8e8] sm:$0xff]  ;;  %5260 = vmatpush.msra.mxu3 %v4612_v40  ;;  %5280 = vmatpush.msra.mxu0 %v4676_v43 }
 0x60b   :  { %v4672_v20 = vld [vmem:[#allocation10 + $0xae8] sm:$0xff]  ;;  %5225 = vmatpush.msrb.mxu1 %v4464_v44  ;;  %5245 = vmatpush.msrb.mxu2 %v4528_v58 }
 0x60c   :  { %v4460_v56 = vld [vmem:[#allocation10 + $0x448] sm:$0xff]  ;;  %5261 = vmatpush.msra.mxu3 %v4608_v57  ;;  %5281 = vmatpush.msra.mxu0 %v4672_v20 }
 0x60d   :  { %v4524_v26 = vld [vmem:[#allocation10 + $0x648] sm:$0xff]  ;;  %5226 = vmatpush.msrb.mxu1 %v4460_v56 }
 0x60e   :  { %v4604_v28 = vld [vmem:[#allocation10 + $0x8c8] sm:$0xff]  ;;  %5246 = vmatpush.msrb.mxu2 %v4524_v26 }
 0x60f   :  { %v4668_v0 = vld [vmem:[#allocation10 + $0xac8] sm:$0xff]  ;;  %5262 = vmatpush.msra.mxu3 %v4604_v28 }
 0x610   :  { %v4456_v45 = vld [vmem:[#allocation10 + $0x428] sm:$0xff]  ;;  %5282 = vmatpush.msra.mxu0 %v4668_v0 }
 0x611   :  { %v4520_v27 = vld [vmem:[#allocation10 + $0x628] sm:$0xff]  ;;  %5227 = vmatpush.msrb.mxu1 %v4456_v45 }
 0x612   :  { %v4600_v21 = vld [vmem:[#allocation10 + $0x8a8] sm:$0xff]  ;;  %5247 = vmatpush.msrb.mxu2 %v4520_v27 }
 0x613   :  { %v4664_v6 = vld [vmem:[#allocation10 + $0xaa8] sm:$0xff]  ;;  %5263 = vmatpush.msra.mxu3 %v4600_v21 }
 0x614   :  { %v4452_v41 = vld [vmem:[#allocation10 + $0x408] sm:$0xff]  ;;  %5283 = vmatpush.msra.mxu0 %v4664_v6 }
 0x615   :  { %v4516_v50 = vld [vmem:[#allocation10 + $0x608] sm:$0xff]  ;;  %5228 = vmatpush.msrb.mxu1 %v4452_v41 }
 0x616   :  { %v4596_v7 = vld [vmem:[#allocation10 + $0x888] sm:$0xff]  ;;  %5248 = vmatpush.msrb.mxu2 %v4516_v50  ;;  %5229 = vmatmul.f32.vlgmr.msrb.gmra.mxu1 %v9976_v39 }
 0x617   :  { %v4660_v31 = vld [vmem:[#allocation10 + $0xa88] sm:$0xff]  ;;  %5264 = vmatpush.msra.mxu3 %v4596_v7  ;;  %5249 = vmatmul.f32.vlgmr.msrb.gmra.mxu2 %v9978_v59 }
 0x618   :  { %v4768_v3 = vld [vmem:[#allocation10 + $0xde8] sm:$0xff]  ;;  %5284 = vmatpush.msra.mxu0 %v4660_v31 }
 0x619   :  { %v4832_v61 = vld [vmem:[#allocation10 + $0xfe8] sm:$0xff]  ;;  %5293 = vmatpush.msra.mxu1 %v4768_v3 }
 0x61a   :  { %v4592_v34 = vld [vmem:[#allocation10 + $0x868] sm:$0xff]  ;;  %5313 = vmatpush.msra.mxu2 %v4832_v61 }
 0x61b   :  { %v4656_v51 = vld [vmem:[#allocation10 + $0xa68] sm:$0xff]  ;;  %5265 = vmatpush.msra.mxu3 %v4592_v34 }
 0x61c   :  { %v4764_v10 = vld [vmem:[#allocation10 + $0xdc8] sm:$0xff]  ;;  %5285 = vmatpush.msra.mxu0 %v4656_v51 }
 0x61d   :  { %v4828_v38 = vld [vmem:[#allocation10 + $0xfc8] sm:$0xff]  ;;  %5294 = vmatpush.msra.mxu1 %v4764_v10 }
 0x61e   :  { %v4588_v32 = vld [vmem:[#allocation10 + $0x848] sm:$0xff]  ;;  %5314 = vmatpush.msra.mxu2 %v4828_v38 }
 0x61f   :  { %v4652_v12 = vld [vmem:[#allocation10 + $0xa48] sm:$0xff]  ;;  %5266 = vmatpush.msra.mxu3 %v4588_v32 }
 0x620   :  { %v4760_v36 = vld [vmem:[#allocation10 + $0xda8] sm:$0xff]  ;;  %5286 = vmatpush.msra.mxu0 %v4652_v12 }
 0x621   :  { %v4824_v47 = vld [vmem:[#allocation10 + $0xfa8] sm:$0xff]  ;;  %5295 = vmatpush.msra.mxu1 %v4760_v36 }
 0x622   :  { %v4584_v55 = vld [vmem:[#allocation10 + $0x828] sm:$0xff]  ;;  %5315 = vmatpush.msra.mxu2 %v4824_v47 }
 0x623   :  { %v4648_v15 = vld [vmem:[#allocation10 + $0xa28] sm:$0xff]  ;;  %5267 = vmatpush.msra.mxu3 %v4584_v55  ;;  %v4385_v55 = vld [vmem:[#allocation10 + $0x1f0] sm:$0xff] }
 0x624   :  { %v4756_v42 = vld [vmem:[#allocation10 + $0xd88] sm:$0xff]  ;;  %5287 = vmatpush.msra.mxu0 %v4648_v15  ;;  %v4449_v15 = vld [vmem:[#allocation10 + $0x3f0] sm:$0xff] }
 0x625   :  { %v4820_v48 = vld [vmem:[#allocation10 + $0xf88] sm:$0xff]  ;;  %5296 = vmatpush.msra.mxu1 %v4756_v42 }
 0x626   :  { %v4580_v22 = vld [vmem:[#allocation10 + $0x808] sm:$0xff]  ;;  %5316 = vmatpush.msra.mxu2 %v4820_v48 }
 0x627   :  { %v4644_v62 = vld [vmem:[#allocation10 + $0xa08] sm:$0xff]  ;;  %5268 = vmatpush.msra.mxu3 %v4580_v22  ;;  %v4381_v22 = vld [vmem:[#allocation10 + $0x1d0] sm:$0xff] }
 0x628   :  { %v4752_v30 = vld [vmem:[#allocation10 + $0xd68] sm:$0xff]  ;;  %5288 = vmatpush.msra.mxu0 %v4644_v62  ;;  %5269 = vmatmul.f32.vlgmr.msra.gmra.mxu3 %v9991_v4  ;;  %v4445_v62 = vld [vmem:[#allocation10 + $0x3d0] sm:$0xff] }
 0x629   :  { %v4816_v5 = vld [vmem:[#allocation10 + $0xf68] sm:$0xff]  ;;  %5289 = vmatmul.f32.vlgmr.msra.gmra.mxu0 %v9993_v63  ;;  %5297 = vmatpush.msra.mxu1 %v4752_v30 }
 0x62a   :  { %v4896_v53 = vld [vmem:[#allocation10 + $0x11e8] sm:$0xff]  ;;  %5317 = vmatpush.msra.mxu2 %v4816_v5 }
 0x62b   :  { %v4960_v23 = vld [vmem:[#allocation10 + $0x13e8] sm:$0xff]  ;;  %5333 = vmatpush.msrb.mxu3 %v4896_v53  ;;  %v4377_v53 = vld [vmem:[#allocation10 + $0x1b0] sm:$0xff] }
 0x62c   :  { %v4748_v35 = vld [vmem:[#allocation10 + $0xd48] sm:$0xff]  ;;  %5353 = vmatpush.msrb.mxu0 %v4960_v23  ;;  %v4441_v23 = vld [vmem:[#allocation10 + $0x3b0] sm:$0xff] }
 0x62d   :  { %v4812_v17 = vld [vmem:[#allocation10 + $0xf48] sm:$0xff]  ;;  %5298 = vmatpush.msra.mxu1 %v4748_v35 }
 0x62e   :  { %v4892_v8 = vld [vmem:[#allocation10 + $0x11c8] sm:$0xff]  ;;  %5318 = vmatpush.msra.mxu2 %v4812_v17 }
 0x62f   :  { %v4956_v24 = vld [vmem:[#allocation10 + $0x13c8] sm:$0xff]  ;;  %5334 = vmatpush.msrb.mxu3 %v4892_v8  ;;  %v4373_v8 = vld [vmem:[#allocation10 + $0x190] sm:$0xff] }
 0x630   :  { %v4744_v25 = vld [vmem:[#allocation10 + $0xd28] sm:$0xff]  ;;  %5354 = vmatpush.msrb.mxu0 %v4956_v24  ;;  %v4437_v24 = vld [vmem:[#allocation10 + $0x390] sm:$0xff] }
 0x631   :  { %v4808_v33 = vld [vmem:[#allocation10 + $0xf28] sm:$0xff]  ;;  %5299 = vmatpush.msra.mxu1 %v4744_v25 }
 0x632   :  { %v4888_v60 = vld [vmem:[#allocation10 + $0x11a8] sm:$0xff]  ;;  %5319 = vmatpush.msra.mxu2 %v4808_v33 }
 0x633   :  { %v4952_v1 = vld [vmem:[#allocation10 + $0x13a8] sm:$0xff]  ;;  %5335 = vmatpush.msrb.mxu3 %v4888_v60  ;;  %v4369_v60 = vld [vmem:[#allocation10 + $0x170] sm:$0xff] }
 0x634   :  { %v4740_v54 = vld [vmem:[#allocation10 + $0xd08] sm:$0xff]  ;;  %5355 = vmatpush.msrb.mxu0 %v4952_v1  ;;  %v4433_v1 = vld [vmem:[#allocation10 + $0x370] sm:$0xff] }
 0x635   :  { %v4804_v19 = vld [vmem:[#allocation10 + $0xf08] sm:$0xff]  ;;  %5300 = vmatpush.msra.mxu1 %v4740_v54  ;;  %v4513_v54 = vld [vmem:[#allocation10 + $0x5f0] sm:$0xff] }
 0x636   :  { %v4884_v11 = vld [vmem:[#allocation10 + $0x1188] sm:$0xff]  ;;  %5320 = vmatpush.msra.mxu2 %v4804_v19  ;;  %v4577_v19 = vld [vmem:[#allocation10 + $0x7f0] sm:$0xff] }
 0x637   :  { %v4948_v16 = vld [vmem:[#allocation10 + $0x1388] sm:$0xff]  ;;  %5336 = vmatpush.msrb.mxu3 %v4884_v11  ;;  %v4365_v11 = vld [vmem:[#allocation10 + $0x150] sm:$0xff] }
 0x638   :  { %v4736_v29 = vld [vmem:[#allocation10 + $0xce8] sm:$0xff]  ;;  %5356 = vmatpush.msrb.mxu0 %v4948_v16  ;;  %v4429_v16 = vld [vmem:[#allocation10 + $0x350] sm:$0xff] }
 0x639   :  { %v4800_v37 = vld [vmem:[#allocation10 + $0xee8] sm:$0xff]  ;;  %5301 = vmatpush.msra.mxu1 %v4736_v29  ;;  %v4509_v29 = vld [vmem:[#allocation10 + $0x5d0] sm:$0xff] }
 0x63a   :  { %v4880_v18 = vld [vmem:[#allocation10 + $0x1168] sm:$0xff]  ;;  %5321 = vmatpush.msra.mxu2 %v4800_v37  ;;  %v4573_v37 = vld [vmem:[#allocation10 + $0x7d0] sm:$0xff] }
 0x63b   :  { %v4944_v49 = vld [vmem:[#allocation10 + $0x1368] sm:$0xff]  ;;  %5337 = vmatpush.msrb.mxu3 %v4880_v18  ;;  %v4361_v18 = vld [vmem:[#allocation10 + $0x130] sm:$0xff] }
 0x63c   :  { %v4732_v40 = vld [vmem:[#allocation10 + $0xcc8] sm:$0xff]  ;;  %5357 = vmatpush.msrb.mxu0 %v4944_v49  ;;  %v4425_v49 = vld [vmem:[#allocation10 + $0x330] sm:$0xff] }
 0x63d   :  { %v4796_v43 = vld [vmem:[#allocation10 + $0xec8] sm:$0xff]  ;;  %5302 = vmatpush.msra.mxu1 %v4732_v40  ;;  %v4505_v40 = vld [vmem:[#allocation10 + $0x5b0] sm:$0xff] }
 0x63e   :  { %v4876_v44 = vld [vmem:[#allocation10 + $0x1148] sm:$0xff]  ;;  %5322 = vmatpush.msra.mxu2 %v4796_v43  ;;  %v4569_v43 = vld [vmem:[#allocation10 + $0x7b0] sm:$0xff] }
 0x63f   :  { %v4940_v58 = vld [vmem:[#allocation10 + $0x1348] sm:$0xff]  ;;  %5338 = vmatpush.msrb.mxu3 %v4876_v44  ;;  %v4357_v44 = vld [vmem:[#allocation10 + $0x110] sm:$0xff] }
 0x640   :  { %v4728_v57 = vld [vmem:[#allocation10 + $0xca8] sm:$0xff]  ;;  %5358 = vmatpush.msrb.mxu0 %v4940_v58  ;;  %v4565_v58 = vld [vmem:[#allocation10 + $0x790] sm:$0xff] }
 0x641   :  { %v4792_v20 = vld [vmem:[#allocation10 + $0xea8] sm:$0xff]  ;;  %5303 = vmatpush.msra.mxu1 %v4728_v57  ;;  %v4353_v57 = vld [vmem:[#allocation10 + $0xf0] sm:$0xff] }
 0x642   :  { %v4872_v56 = vld [vmem:[#allocation10 + $0x1128] sm:$0xff]  ;;  %5323 = vmatpush.msra.mxu2 %v4792_v20  ;;  %v4417_v20 = vld [vmem:[#allocation10 + $0x2f0] sm:$0xff] }
 0x643   :  { %v4936_v26 = vld [vmem:[#allocation10 + $0x1328] sm:$0xff]  ;;  %5339 = vmatpush.msrb.mxu3 %v4872_v56  ;;  %v4497_v56 = vld [vmem:[#allocation10 + $0x570] sm:$0xff] }
 0x644   :  { %v4724_v28 = vld [vmem:[#allocation10 + $0xc88] sm:$0xff]  ;;  %5359 = vmatpush.msrb.mxu0 %v4936_v26  ;;  %v4561_v26 = vld [vmem:[#allocation10 + $0x770] sm:$0xff] }
 0x645   :  { %v4788_v0 = vld [vmem:[#allocation10 + $0xe88] sm:$0xff]  ;;  %5304 = vmatpush.msra.mxu1 %v4724_v28  ;;  %v4349_v28 = vld [vmem:[#allocation10 + $0xd0] sm:$0xff] }
 0x646   :  { %v4868_v45 = vld [vmem:[#allocation10 + $0x1108] sm:$0xff]  ;;  %5324 = vmatpush.msra.mxu2 %v4788_v0  ;;  %v4413_v0 = vld [vmem:[#allocation10 + $0x2d0] sm:$0xff] }
 0x647   :  { %v4932_v27 = vld [vmem:[#allocation10 + $0x1308] sm:$0xff]  ;;  %5340 = vmatpush.msrb.mxu3 %v4868_v45  ;;  %v4493_v45 = vld [vmem:[#allocation10 + $0x550] sm:$0xff] }
 0x648   :  { %v4720_v21 = vld [vmem:[#allocation10 + $0xc68] sm:$0xff]  ;;  %5360 = vmatpush.msrb.mxu0 %v4932_v27  ;;  %v4557_v27 = vld [vmem:[#allocation10 + $0x750] sm:$0xff] }
 0x649   :  { %v4784_v6 = vld [vmem:[#allocation10 + $0xe68] sm:$0xff]  ;;  %5305 = vmatpush.msra.mxu1 %v4720_v21  ;;  %v4345_v21 = vld [vmem:[#allocation10 + $0xb0] sm:$0xff] }
 0x64a   :  { %v4864_v41 = vld [vmem:[#allocation10 + $0x10e8] sm:$0xff]  ;;  %5325 = vmatpush.msra.mxu2 %v4784_v6  ;;  %v4409_v6 = vld [vmem:[#allocation10 + $0x2b0] sm:$0xff] }
 0x64b   :  { %v4928_v50 = vld [vmem:[#allocation10 + $0x12e8] sm:$0xff]  ;;  %5341 = vmatpush.msrb.mxu3 %v4864_v41  ;;  %v4489_v41 = vld [vmem:[#allocation10 + $0x530] sm:$0xff] }
 0x64c   :  { %v4716_v7 = vld [vmem:[#allocation10 + $0xc48] sm:$0xff]  ;;  %5361 = vmatpush.msrb.mxu0 %v4928_v50  ;;  %v4553_v50 = vld [vmem:[#allocation10 + $0x730] sm:$0xff] }
 0x64d   :  { %v4780_v31 = vld [vmem:[#allocation10 + $0xe48] sm:$0xff]  ;;  %5306 = vmatpush.msra.mxu1 %v4716_v7  ;;  %v4341_v7 = vld [vmem:[#allocation10 + $0x90] sm:$0xff] }
 0x64e   :  { %v4860_v3 = vld [vmem:[#allocation10 + $0x10c8] sm:$0xff]  ;;  %5326 = vmatpush.msra.mxu2 %v4780_v31  ;;  %v4405_v31 = vld [vmem:[#allocation10 + $0x290] sm:$0xff] }
 0x64f   :  { %v4924_v61 = vld [vmem:[#allocation10 + $0x12c8] sm:$0xff]  ;;  %5342 = vmatpush.msrb.mxu3 %v4860_v3  ;;  %v4485_v3 = vld [vmem:[#allocation10 + $0x510] sm:$0xff] }
 0x650   :  { %v4712_v34 = vld [vmem:[#allocation10 + $0xc28] sm:$0xff]  ;;  %5362 = vmatpush.msrb.mxu0 %v4924_v61  ;;  %v4549_v61 = vld [vmem:[#allocation10 + $0x710] sm:$0xff] }
 0x651   :  { %v4776_v51 = vld [vmem:[#allocation10 + $0xe28] sm:$0xff]  ;;  %5307 = vmatpush.msra.mxu1 %v4712_v34  ;;  %v4337_v34 = vld [vmem:[#allocation10 + $0x70] sm:$0xff] }
 0x652   :  { %v4856_v10 = vld [vmem:[#allocation10 + $0x10a8] sm:$0xff]  ;;  %5327 = vmatpush.msra.mxu2 %v4776_v51  ;;  %v4401_v51 = vld [vmem:[#allocation10 + $0x270] sm:$0xff] }
 0x653   :  { %v4920_v38 = vld [vmem:[#allocation10 + $0x12a8] sm:$0xff]  ;;  %5343 = vmatpush.msrb.mxu3 %v4856_v10  ;;  %v4481_v10 = vld [vmem:[#allocation10 + $0x4f0] sm:$0xff] }
 0x654   :  { %v4708_v32 = vld [vmem:[#allocation10 + $0xc08] sm:$0xff]  ;;  %5363 = vmatpush.msrb.mxu0 %v4920_v38  ;;  %v4545_v38 = vld [vmem:[#allocation10 + $0x6f0] sm:$0xff] }
 0x655   :  { %v4772_v12 = vld [vmem:[#allocation10 + $0xe08] sm:$0xff]  ;;  %5308 = vmatpush.msra.mxu1 %v4708_v32  ;;  %v4333_v32 = vld [vmem:[#allocation10 + $0x50] sm:$0xff] }
 0x656   :  { %v4852_v36 = vld [vmem:[#allocation10 + $0x1088] sm:$0xff]  ;;  %5328 = vmatpush.msra.mxu2 %v4772_v12  ;;  %5309 = vmatmul.f32.vlgmr.msra.gmra.mxu1 %v10012_v52  ;;  %v4397_v12 = vld [vmem:[#allocation10 + $0x250] sm:$0xff] }
 0x657   :  { %v4916_v47 = vld [vmem:[#allocation10 + $0x1288] sm:$0xff]  ;;  %5344 = vmatpush.msrb.mxu3 %v4852_v36  ;;  %5329 = vmatmul.f32.vlgmr.msra.gmra.mxu2 %v10014_v14  ;;  %v4477_v36 = vld [vmem:[#allocation10 + $0x4d0] sm:$0xff] }
 0x658   :  { %5364 = vmatpush.msrb.mxu0 %v4916_v47  ;;  %v4848_v42 = vld [vmem:[#allocation10 + $0x1068] sm:$0xff]  ;;  %5373 = vmatpush.msrb.mxu1 %v4385_v55  ;;  %v4541_v47 = vld [vmem:[#allocation10 + $0x6d0] sm:$0xff] }
 0x659   :  { %v4912_v48 = vld [vmem:[#allocation10 + $0x1268] sm:$0xff]  ;;  %5393 = vmatpush.msrb.mxu2 %v4449_v15  ;;  %5345 = vmatpush.msrb.mxu3 %v4848_v42  ;;  %v4329_v55 = vld [vmem:[#allocation10 + $0x30] sm:$0xff] }
 0x65a   :  { %v4844_v30 = vld [vmem:[#allocation10 + $0x1048] sm:$0xff]  ;;  %5365 = vmatpush.msrb.mxu0 %v4912_v48  ;;  %5374 = vmatpush.msrb.mxu1 %v4381_v22  ;;  %v4393_v15 = vld [vmem:[#allocation10 + $0x230] sm:$0xff] }
 0x65b   :  { %v4908_v5 = vld [vmem:[#allocation10 + $0x1248] sm:$0xff]  ;;  %5394 = vmatpush.msrb.mxu2 %v4445_v62  ;;  %5346 = vmatpush.msrb.mxu3 %v4844_v30  ;;  %v4473_v42 = vld [vmem:[#allocation10 + $0x4b0] sm:$0xff] }
 0x65c   :  { %v4840_v35 = vld [vmem:[#allocation10 + $0x1028] sm:$0xff]  ;;  %5366 = vmatpush.msrb.mxu0 %v4908_v5  ;;  %5375 = vmatpush.msrb.mxu1 %v4377_v53  ;;  %v4537_v48 = vld [vmem:[#allocation10 + $0x6b0] sm:$0xff] }
 0x65d   :  { %v4904_v17 = vld [vmem:[#allocation10 + $0x1228] sm:$0xff]  ;;  %5395 = vmatpush.msrb.mxu2 %v4441_v23  ;;  %5347 = vmatpush.msrb.mxu3 %v4840_v35  ;;  %v4325_v22 = vld [vmem:[#allocation10 + $0x10] sm:$0xff] }
 0x65e   :  { %v4836_v25 = vld [vmem:[#allocation10 + $0x1008] sm:$0xff]  ;;  %5367 = vmatpush.msrb.mxu0 %v4904_v17  ;;  %5376 = vmatpush.msrb.mxu1 %v4373_v8  ;;  %v4389_v62 = vld [vmem:[#allocation10 + $0x210] sm:$0xff] }
 0x65f   :  { %v4900_v33 = vld [vmem:[#allocation10 + $0x1208] sm:$0xff]  ;;  %5396 = vmatpush.msrb.mxu2 %v4437_v24  ;;  %5348 = vmatpush.msrb.mxu3 %v4836_v25  ;;  %v4469_v30 = vld [vmem:[#allocation10 + $0x490] sm:$0xff] }
 0x660   :  { %5368 = vmatpush.msrb.mxu0 %v4900_v33  ;;  %5349 = vmatmul.f32.vlgmr.msrb.gmra.mxu3 %v10018_v2  ;;  %v4421_v2 = vld [vmem:[#allocation10 + $0x310] sm:$0xff] }
 0x661   :  { %5369 = vmatmul.f32.vlgmr.msrb.gmra.mxu0 %v10020_v9  ;;  %5377 = vmatpush.msrb.mxu1 %v4369_v60  ;;  %v4501_v9 = vld [vmem:[#allocation10 + $0x590] sm:$0xff] }
 0x662   :  { %5397 = vmatpush.msrb.mxu2 %v4433_v1  ;;  %5413 = vmatpush.msra.mxu3 %v4513_v54  ;;  %v4533_v5 = vld [vmem:[#allocation10 + $0x690] sm:$0xff] }
 0x663   :  { %5433 = vmatpush.msra.mxu0 %v4577_v19  ;;  %5378 = vmatpush.msrb.mxu1 %v4365_v11  ;;  %v4641_v53 = vld [vmem:[#allocation10 + $0x9f0] sm:$0xff] }
 0x664   :  { %5398 = vmatpush.msrb.mxu2 %v4429_v16  ;;  %5414 = vmatpush.msra.mxu3 %v4509_v29  ;;  %v4705_v23 = vld [vmem:[#allocation10 + $0xbf0] sm:$0xff] }
 0x665   :  { %5434 = vmatpush.msra.mxu0 %v4573_v37  ;;  %5379 = vmatpush.msrb.mxu1 %v4361_v18  ;;  %v4465_v35 = vld [vmem:[#allocation10 + $0x470] sm:$0xff] }
 0x666   :  { %5399 = vmatpush.msrb.mxu2 %v4425_v49  ;;  %5415 = vmatpush.msra.mxu3 %v4505_v40  ;;  %v4529_v17 = vld [vmem:[#allocation10 + $0x670] sm:$0xff] }
 0x667   :  { %5435 = vmatpush.msra.mxu0 %v4569_v43  ;;  %5380 = vmatpush.msrb.mxu1 %v4357_v44  ;;  %v4637_v8 = vld [vmem:[#allocation10 + $0x9d0] sm:$0xff] }
 0x668   :  { %5400 = vmatpush.msrb.mxu2 %v4421_v2  ;;  %5416 = vmatpush.msra.mxu3 %v4501_v9  ;;  %v4701_v24 = vld [vmem:[#allocation10 + $0xbd0] sm:$0xff] }
 0x669   :  { %5436 = vmatpush.msra.mxu0 %v4565_v58  ;;  %5381 = vmatpush.msrb.mxu1 %v4353_v57  ;;  %v4461_v25 = vld [vmem:[#allocation10 + $0x450] sm:$0xff] }
 0x66a   :  { %5401 = vmatpush.msrb.mxu2 %v4417_v20  ;;  %5417 = vmatpush.msra.mxu3 %v4497_v56  ;;  %v4525_v33 = vld [vmem:[#allocation10 + $0x650] sm:$0xff] }
 0x66b   :  { %5437 = vmatpush.msra.mxu0 %v4561_v26  ;;  %5382 = vmatpush.msrb.mxu1 %v4349_v28  ;;  %v4633_v60 = vld [vmem:[#allocation10 + $0x9b0] sm:$0xff] }
 0x66c   :  { %5402 = vmatpush.msrb.mxu2 %v4413_v0  ;;  %5418 = vmatpush.msra.mxu3 %v4493_v45  ;;  %v4697_v1 = vld [vmem:[#allocation10 + $0xbb0] sm:$0xff] }
 0x66d   :  { %5438 = vmatpush.msra.mxu0 %v4557_v27  ;;  %5383 = vmatpush.msrb.mxu1 %v4345_v21  ;;  %v4457_v54 = vld [vmem:[#allocation10 + $0x430] sm:$0xff] }
 0x66e   :  { %5403 = vmatpush.msrb.mxu2 %v4409_v6  ;;  %5419 = vmatpush.msra.mxu3 %v4489_v41  ;;  %v4521_v19 = vld [vmem:[#allocation10 + $0x630] sm:$0xff] }
 0x66f   :  { %5439 = vmatpush.msra.mxu0 %v4553_v50  ;;  %5384 = vmatpush.msrb.mxu1 %v4341_v7  ;;  %v4629_v11 = vld [vmem:[#allocation10 + $0x990] sm:$0xff] }
 0x670   :  { %5404 = vmatpush.msrb.mxu2 %v4405_v31  ;;  %5420 = vmatpush.msra.mxu3 %v4485_v3  ;;  %v4693_v16 = vld [vmem:[#allocation10 + $0xb90] sm:$0xff] }
 0x671   :  { %5440 = vmatpush.msra.mxu0 %v4549_v61  ;;  %5385 = vmatpush.msrb.mxu1 %v4337_v34  ;;  %v4453_v29 = vld [vmem:[#allocation10 + $0x410] sm:$0xff] }
 0x672   :  { %5405 = vmatpush.msrb.mxu2 %v4401_v51  ;;  %5421 = vmatpush.msra.mxu3 %v4481_v10  ;;  %v4517_v37 = vld [vmem:[#allocation10 + $0x610] sm:$0xff] }
 0x673   :  { %5441 = vmatpush.msra.mxu0 %v4545_v38  ;;  %5386 = vmatpush.msrb.mxu1 %v4333_v32  ;;  %v4625_v18 = vld [vmem:[#allocation10 + $0x970] sm:$0xff] }
 0x674   :  { %5406 = vmatpush.msrb.mxu2 %v4397_v12  ;;  %5422 = vmatpush.msra.mxu3 %v4477_v36  ;;  %v4689_v49 = vld [vmem:[#allocation10 + $0xb70] sm:$0xff] }
 0x675   :  { %5442 = vmatpush.msra.mxu0 %v4541_v47  ;;  %5387 = vmatpush.msrb.mxu1 %v4329_v55  ;;  %v4769_v40 = vld [vmem:[#allocation10 + $0xdf0] sm:$0xff] }
 0x676   :  { %5407 = vmatpush.msrb.mxu2 %v4393_v15  ;;  %5423 = vmatpush.msra.mxu3 %v4473_v42  ;;  %v4833_v43 = vld [vmem:[#allocation10 + $0xff0] sm:$0xff] }
 0x677   :  { %5443 = vmatpush.msra.mxu0 %v4537_v48  ;;  %5388 = vmatpush.msrb.mxu1 %v4325_v22  ;;  %v4621_v44 = vld [vmem:[#allocation10 + $0x950] sm:$0xff] }
 0x678   :  { %5408 = vmatpush.msrb.mxu2 %v4389_v62  ;;  %5424 = vmatpush.msra.mxu3 %v4469_v30  ;;  %v4685_v2 = vld [vmem:[#allocation10 + $0xb50] sm:$0xff] }
 0x679   :  { %5444 = vmatpush.msra.mxu0 %v4533_v5  ;;  %5389 = vmatmul.f32.vlgmr.msrb.gmra.mxu1 %v9951_v13  ;;  %v4765_v9 = vld [vmem:[#allocation10 + $0xdd0] sm:$0xff] }
 0x67a   :  { %5409 = vmatmul.f32.vlgmr.msrb.gmra.mxu2 %v9953_v46  ;;  %5453 = vmatpush.msra.mxu1 %v4641_v53  ;;  %v4829_v58 = vld [vmem:[#allocation10 + $0xfd0] sm:$0xff] }
 0x67b   :  { %5473 = vmatpush.msra.mxu2 %v4705_v23  ;;  %5425 = vmatpush.msra.mxu3 %v4465_v35  ;;  %v4617_v57 = vld [vmem:[#allocation10 + $0x930] sm:$0xff] }
 0x67c   :  { %5445 = vmatpush.msra.mxu0 %v4529_v17  ;;  %5454 = vmatpush.msra.mxu1 %v4637_v8  ;;  %v4681_v20 = vld [vmem:[#allocation10 + $0xb30] sm:$0xff] }
 0x67d   :  { %5474 = vmatpush.msra.mxu2 %v4701_v24  ;;  %5426 = vmatpush.msra.mxu3 %v4461_v25  ;;  %v4761_v56 = vld [vmem:[#allocation10 + $0xdb0] sm:$0xff] }
 0x67e   :  { %5446 = vmatpush.msra.mxu0 %v4525_v33  ;;  %5455 = vmatpush.msra.mxu1 %v4633_v60  ;;  %v4825_v26 = vld [vmem:[#allocation10 + $0xfb0] sm:$0xff] }
 0x67f   :  { %5475 = vmatpush.msra.mxu2 %v4697_v1  ;;  %5427 = vmatpush.msra.mxu3 %v4457_v54  ;;  %v4613_v28 = vld [vmem:[#allocation10 + $0x910] sm:$0xff] }
 0x680   :  { %5447 = vmatpush.msra.mxu0 %v4521_v19  ;;  %5456 = vmatpush.msra.mxu1 %v4629_v11  ;;  %v4677_v0 = vld [vmem:[#allocation10 + $0xb10] sm:$0xff] }
 0x681   :  { %5476 = vmatpush.msra.mxu2 %v4693_v16  ;;  %5428 = vmatpush.msra.mxu3 %v4453_v29  ;;  %v4757_v45 = vld [vmem:[#allocation10 + $0xd90] sm:$0xff] }
 0x682   :  { %5448 = vmatpush.msra.mxu0 %v4517_v37  ;;  %5429 = vmatmul.f32.vlgmr.msra.gmra.mxu3 %v9976_v39  ;;  %v4821_v27 = vld [vmem:[#allocation10 + $0xf90] sm:$0xff] }
 0x683   :  { %5449 = vmatmul.f32.vlgmr.msra.gmra.mxu0 %v9978_v59  ;;  %5457 = vmatpush.msra.mxu1 %v4625_v18  ;;  %v4609_v21 = vld [vmem:[#allocation10 + $0x8f0] sm:$0xff] }
 0x684   :  { %5477 = vmatpush.msra.mxu2 %v4689_v49  ;;  %5493 = vmatpush.msrb.mxu3 %v4769_v40  ;;  %v4673_v6 = vld [vmem:[#allocation10 + $0xaf0] sm:$0xff] }
 0x685   :  { %5513 = vmatpush.msrb.mxu0 %v4833_v43  ;;  %5458 = vmatpush.msra.mxu1 %v4621_v44  ;;  %v4753_v41 = vld [vmem:[#allocation10 + $0xd70] sm:$0xff] }
 0x686   :  { %5478 = vmatpush.msra.mxu2 %v4685_v2  ;;  %5494 = vmatpush.msrb.mxu3 %v4765_v9  ;;  %v4817_v50 = vld [vmem:[#allocation10 + $0xf70] sm:$0xff] }
 0x687   :  { %5514 = vmatpush.msrb.mxu0 %v4829_v58  ;;  %5459 = vmatpush.msra.mxu1 %v4617_v57  ;;  %v4605_v7 = vld [vmem:[#allocation10 + $0x8d0] sm:$0xff] }
 0x688   :  { %5479 = vmatpush.msra.mxu2 %v4681_v20  ;;  %5495 = vmatpush.msrb.mxu3 %v4761_v56  ;;  %v4669_v31 = vld [vmem:[#allocation10 + $0xad0] sm:$0xff]  ;;  %v4386_v56 = vld [vmem:[#allocation10 + $0x1f8] sm:$0xff] }
 0x689   :  { %5515 = vmatpush.msrb.mxu0 %v4825_v26  ;;  %5460 = vmatpush.msra.mxu1 %v4613_v28  ;;  %v4749_v3 = vld [vmem:[#allocation10 + $0xd50] sm:$0xff]  ;;  %v4450_v26 = vld [vmem:[#allocation10 + $0x3f8] sm:$0xff] }
 0x68a   :  { %5480 = vmatpush.msra.mxu2 %v4677_v0  ;;  %5496 = vmatpush.msrb.mxu3 %v4757_v45  ;;  %v4813_v61 = vld [vmem:[#allocation10 + $0xf50] sm:$0xff]  ;;  %v4382_v45 = vld [vmem:[#allocation10 + $0x1d8] sm:$0xff] }
 0x68b   :  { %5516 = vmatpush.msrb.mxu0 %v4821_v27  ;;  %5461 = vmatpush.msra.mxu1 %v4609_v21  ;;  %v4601_v34 = vld [vmem:[#allocation10 + $0x8b0] sm:$0xff]  ;;  %v4446_v27 = vld [vmem:[#allocation10 + $0x3d8] sm:$0xff] }
 0x68c   :  { %5481 = vmatpush.msra.mxu2 %v4673_v6  ;;  %5497 = vmatpush.msrb.mxu3 %v4753_v41  ;;  %v4665_v51 = vld [vmem:[#allocation10 + $0xab0] sm:$0xff]  ;;  %v4378_v41 = vld [vmem:[#allocation10 + $0x1b8] sm:$0xff] }
 0x68d   :  { %5517 = vmatpush.msrb.mxu0 %v4817_v50  ;;  %5462 = vmatpush.msra.mxu1 %v4605_v7  ;;  %v4745_v10 = vld [vmem:[#allocation10 + $0xd30] sm:$0xff]  ;;  %v4442_v50 = vld [vmem:[#allocation10 + $0x3b8] sm:$0xff] }
 0x68e   :  { %5482 = vmatpush.msra.mxu2 %v4669_v31  ;;  %v4809_v38 = vld [vmem:[#allocation10 + $0xf30] sm:$0xff]  ;;  %5498 = vmatpush.msrb.mxu3 %v4749_v3  ;;  %v4374_v3 = vld [vmem:[#allocation10 + $0x198] sm:$0xff] }
 0x68f   :  { %5518 = vmatpush.msrb.mxu0 %v4813_v61  ;;  %v4597_v32 = vld [vmem:[#allocation10 + $0x890] sm:$0xff]  ;;  %5463 = vmatpush.msra.mxu1 %v4601_v34  ;;  %v4438_v61 = vld [vmem:[#allocation10 + $0x398] sm:$0xff] }
 0x690   :  { %v4661_v12 = vld [vmem:[#allocation10 + $0xa90] sm:$0xff]  ;;  %5483 = vmatpush.msra.mxu2 %v4665_v51  ;;  %5499 = vmatpush.msrb.mxu3 %v4745_v10  ;;  %v4370_v10 = vld [vmem:[#allocation10 + $0x178] sm:$0xff] }
 0x691   :  { %v4741_v36 = vld [vmem:[#allocation10 + $0xd10] sm:$0xff]  ;;  %5519 = vmatpush.msrb.mxu0 %v4809_v38  ;;  %5464 = vmatpush.msra.mxu1 %v4597_v32  ;;  %v4434_v38 = vld [vmem:[#allocation10 + $0x378] sm:$0xff] }
 0x692   :  { %v4805_v47 = vld [vmem:[#allocation10 + $0xf10] sm:$0xff]  ;;  %5484 = vmatpush.msra.mxu2 %v4661_v12  ;;  %5500 = vmatpush.msrb.mxu3 %v4741_v36  ;;  %v4366_v36 = vld [vmem:[#allocation10 + $0x158] sm:$0xff] }
 0x693   :  { %v4593_v55 = vld [vmem:[#allocation10 + $0x870] sm:$0xff]  ;;  %5520 = vmatpush.msrb.mxu0 %v4805_v47  ;;  %v4430_v47 = vld [vmem:[#allocation10 + $0x358] sm:$0xff] }
 0x694   :  { %v4657_v15 = vld [vmem:[#allocation10 + $0xa70] sm:$0xff]  ;;  %5465 = vmatpush.msra.mxu1 %v4593_v55 }
 0x695   :  { %v4737_v42 = vld [vmem:[#allocation10 + $0xcf0] sm:$0xff]  ;;  %5485 = vmatpush.msra.mxu2 %v4657_v15 }
 0x696   :  { %v4801_v48 = vld [vmem:[#allocation10 + $0xef0] sm:$0xff]  ;;  %5501 = vmatpush.msrb.mxu3 %v4737_v42  ;;  %v4362_v42 = vld [vmem:[#allocation10 + $0x138] sm:$0xff] }
 0x697   :  { %v4589_v22 = vld [vmem:[#allocation10 + $0x850] sm:$0xff]  ;;  %5521 = vmatpush.msrb.mxu0 %v4801_v48  ;;  %v4426_v48 = vld [vmem:[#allocation10 + $0x338] sm:$0xff] }
 0x698   :  { %v4653_v62 = vld [vmem:[#allocation10 + $0xa50] sm:$0xff]  ;;  %5466 = vmatpush.msra.mxu1 %v4589_v22 }
 0x699   :  { %v4733_v30 = vld [vmem:[#allocation10 + $0xcd0] sm:$0xff]  ;;  %5486 = vmatpush.msra.mxu2 %v4653_v62 }
 0x69a   :  { %v4797_v5 = vld [vmem:[#allocation10 + $0xed0] sm:$0xff]  ;;  %5502 = vmatpush.msrb.mxu3 %v4733_v30  ;;  %v4358_v30 = vld [vmem:[#allocation10 + $0x118] sm:$0xff] }
 0x69b   :  { %v4585_v53 = vld [vmem:[#allocation10 + $0x830] sm:$0xff]  ;;  %5522 = vmatpush.msrb.mxu0 %v4797_v5  ;;  %v4422_v5 = vld [vmem:[#allocation10 + $0x318] sm:$0xff] }
 0x69c   :  { %v4649_v23 = vld [vmem:[#allocation10 + $0xa30] sm:$0xff]  ;;  %5467 = vmatpush.msra.mxu1 %v4585_v53 }
 0x69d   :  { %v4729_v35 = vld [vmem:[#allocation10 + $0xcb0] sm:$0xff]  ;;  %5487 = vmatpush.msra.mxu2 %v4649_v23 }
 0x69e   :  { %v4793_v17 = vld [vmem:[#allocation10 + $0xeb0] sm:$0xff]  ;;  %5503 = vmatpush.msrb.mxu3 %v4729_v35  ;;  %v4354_v35 = vld [vmem:[#allocation10 + $0xf8] sm:$0xff] }
 0x69f   :  { %v4581_v8 = vld [vmem:[#allocation10 + $0x810] sm:$0xff]  ;;  %5523 = vmatpush.msrb.mxu0 %v4793_v17  ;;  %v4418_v17 = vld [vmem:[#allocation10 + $0x2f8] sm:$0xff] }
 0x6a0   :  { %v4645_v24 = vld [vmem:[#allocation10 + $0xa10] sm:$0xff]  ;;  %5468 = vmatpush.msra.mxu1 %v4581_v8 }
 0x6a1   :  { %v4725_v25 = vld [vmem:[#allocation10 + $0xc90] sm:$0xff]  ;;  %5488 = vmatpush.msra.mxu2 %v4645_v24  ;;  %5469 = vmatmul.f32.vlgmr.msra.gmra.mxu1 %v9991_v4 }
 0x6a2   :  { %v4789_v33 = vld [vmem:[#allocation10 + $0xe90] sm:$0xff]  ;;  %5504 = vmatpush.msrb.mxu3 %v4725_v25  ;;  %5489 = vmatmul.f32.vlgmr.msra.gmra.mxu2 %v9993_v63  ;;  %v4350_v25 = vld [vmem:[#allocation10 + $0xd8] sm:$0xff] }
 0x6a3   :  { %v4897_v60 = vld [vmem:[#allocation10 + $0x11f0] sm:$0xff]  ;;  %5524 = vmatpush.msrb.mxu0 %v4789_v33  ;;  %v4414_v33 = vld [vmem:[#allocation10 + $0x2d8] sm:$0xff] }
 0x6a4   :  { %v4961_v1 = vld [vmem:[#allocation10 + $0x13f0] sm:$0xff]  ;;  %5533 = vmatpush.msrb.mxu1 %v4897_v60 }
 0x6a5   :  { %v4721_v54 = vld [vmem:[#allocation10 + $0xc70] sm:$0xff]  ;;  %5553 = vmatpush.msrb.mxu2 %v4961_v1 }
 0x6a6   :  { %v4785_v19 = vld [vmem:[#allocation10 + $0xe70] sm:$0xff]  ;;  %5505 = vmatpush.msrb.mxu3 %v4721_v54  ;;  %v4346_v54 = vld [vmem:[#allocation10 + $0xb8] sm:$0xff] }
 0x6a7   :  { %v4893_v11 = vld [vmem:[#allocation10 + $0x11d0] sm:$0xff]  ;;  %5525 = vmatpush.msrb.mxu0 %v4785_v19  ;;  %v4410_v19 = vld [vmem:[#allocation10 + $0x2b8] sm:$0xff] }
 0x6a8   :  { %v4957_v16 = vld [vmem:[#allocation10 + $0x13d0] sm:$0xff]  ;;  %5534 = vmatpush.msrb.mxu1 %v4893_v11 }
 0x6a9   :  { %v4717_v29 = vld [vmem:[#allocation10 + $0xc50] sm:$0xff]  ;;  %5554 = vmatpush.msrb.mxu2 %v4957_v16 }
 0x6aa   :  { %v4781_v37 = vld [vmem:[#allocation10 + $0xe50] sm:$0xff]  ;;  %5506 = vmatpush.msrb.mxu3 %v4717_v29  ;;  %v4342_v29 = vld [vmem:[#allocation10 + $0x98] sm:$0xff] }
 0x6ab   :  { %v4889_v18 = vld [vmem:[#allocation10 + $0x11b0] sm:$0xff]  ;;  %5526 = vmatpush.msrb.mxu0 %v4781_v37  ;;  %v4406_v37 = vld [vmem:[#allocation10 + $0x298] sm:$0xff] }
 0x6ac   :  { %v4953_v49 = vld [vmem:[#allocation10 + $0x13b0] sm:$0xff]  ;;  %5535 = vmatpush.msrb.mxu1 %v4889_v18  ;;  %v4514_v18 = vld [vmem:[#allocation10 + $0x5f8] sm:$0xff] }
 0x6ad   :  { %v4713_v40 = vld [vmem:[#allocation10 + $0xc30] sm:$0xff]  ;;  %5555 = vmatpush.msrb.mxu2 %v4953_v49  ;;  %v4578_v49 = vld [vmem:[#allocation10 + $0x7f8] sm:$0xff] }
 0x6ae   :  { %v4777_v43 = vld [vmem:[#allocation10 + $0xe30] sm:$0xff]  ;;  %5507 = vmatpush.msrb.mxu3 %v4713_v40  ;;  %v4338_v40 = vld [vmem:[#allocation10 + $0x78] sm:$0xff] }
 0x6af   :  { %v4885_v44 = vld [vmem:[#allocation10 + $0x1190] sm:$0xff]  ;;  %5527 = vmatpush.msrb.mxu0 %v4777_v43  ;;  %v4402_v43 = vld [vmem:[#allocation10 + $0x278] sm:$0xff] }
 0x6b0   :  { %v4949_v2 = vld [vmem:[#allocation10 + $0x1390] sm:$0xff]  ;;  %5536 = vmatpush.msrb.mxu1 %v4885_v44 }
 0x6b1   :  { %v4709_v9 = vld [vmem:[#allocation10 + $0xc10] sm:$0xff]  ;;  %5556 = vmatpush.msrb.mxu2 %v4949_v2  ;;  %v10045_v2 = vld [vmem:[#allocation1 + $0x9] sm:$0xff] }
 0x6b2   :  { %v4773_v58 = vld [vmem:[#allocation10 + $0xe10] sm:$0xff]  ;;  %5508 = vmatpush.msrb.mxu3 %v4709_v9  ;;  %v4510_v9 = vld [vmem:[#allocation10 + $0x5d8] sm:$0xff] }
 0x6b3   :  { %v4881_v57 = vld [vmem:[#allocation10 + $0x1170] sm:$0xff]  ;;  %5528 = vmatpush.msrb.mxu0 %v4773_v58  ;;  %5509 = vmatmul.f32.vlgmr.msrb.gmra.mxu3 %v10012_v52  ;;  %v4574_v58 = vld [vmem:[#allocation10 + $0x7d8] sm:$0xff] }
 0x6b4   :  { %v4945_v20 = vld [vmem:[#allocation10 + $0x1370] sm:$0xff]  ;;  %5529 = vmatmul.f32.vlgmr.msrb.gmra.mxu0 %v10014_v14  ;;  %5537 = vmatpush.msrb.mxu1 %v4881_v57  ;;  %v4334_v57 = vld [vmem:[#allocation10 + $0x58] sm:$0xff] }
 0x6b5   :  { %v4877_v28 = vld [vmem:[#allocation10 + $0x1150] sm:$0xff]  ;;  %5557 = vmatpush.msrb.mxu2 %v4945_v20  ;;  %5573 = vmatpush.msra.mxu3 %v4386_v56  ;;  %v4398_v20 = vld [vmem:[#allocation10 + $0x258] sm:$0xff] }
 0x6b6   :  { %v4941_v0 = vld [vmem:[#allocation10 + $0x1350] sm:$0xff]  ;;  %5593 = vmatpush.msra.mxu0 %v4450_v26  ;;  %5538 = vmatpush.msrb.mxu1 %v4877_v28  ;;  %v4506_v56 = vld [vmem:[#allocation10 + $0x5b8] sm:$0xff] }
 0x6b7   :  { %v4873_v21 = vld [vmem:[#allocation10 + $0x1130] sm:$0xff]  ;;  %5558 = vmatpush.msrb.mxu2 %v4941_v0  ;;  %5574 = vmatpush.msra.mxu3 %v4382_v45  ;;  %v4570_v26 = vld [vmem:[#allocation10 + $0x7b8] sm:$0xff] }
 0x6b8   :  { %v4937_v6 = vld [vmem:[#allocation10 + $0x1330] sm:$0xff]  ;;  %5594 = vmatpush.msra.mxu0 %v4446_v27  ;;  %5539 = vmatpush.msrb.mxu1 %v4873_v21  ;;  %v4330_v28 = vld [vmem:[#allocation10 + $0x38] sm:$0xff] }
 0x6b9   :  { %v4869_v7 = vld [vmem:[#allocation10 + $0x1110] sm:$0xff]  ;;  %5559 = vmatpush.msrb.mxu2 %v4937_v6  ;;  %5575 = vmatpush.msra.mxu3 %v4378_v41  ;;  %v4394_v0 = vld [vmem:[#allocation10 + $0x238] sm:$0xff] }
 0x6ba   :  { %v4933_v31 = vld [vmem:[#allocation10 + $0x1310] sm:$0xff]  ;;  %5595 = vmatpush.msra.mxu0 %v4442_v50  ;;  %5540 = vmatpush.msrb.mxu1 %v4869_v7  ;;  %v4502_v45 = vld [vmem:[#allocation10 + $0x598] sm:$0xff] }
 0x6bb   :  { %v4865_v34 = vld [vmem:[#allocation10 + $0x10f0] sm:$0xff]  ;;  %5560 = vmatpush.msrb.mxu2 %v4933_v31  ;;  %5576 = vmatpush.msra.mxu3 %v4374_v3  ;;  %v4566_v27 = vld [vmem:[#allocation10 + $0x798] sm:$0xff] }
 0x6bc   :  { %v4929_v51 = vld [vmem:[#allocation10 + $0x12f0] sm:$0xff]  ;;  %5596 = vmatpush.msra.mxu0 %v4438_v61  ;;  %5541 = vmatpush.msrb.mxu1 %v4865_v34  ;;  %v4326_v21 = vld [vmem:[#allocation10 + $0x18] sm:$0xff] }
 0x6bd   :  { %v4861_v32 = vld [vmem:[#allocation10 + $0x10d0] sm:$0xff]  ;;  %5561 = vmatpush.msrb.mxu2 %v4929_v51  ;;  %5577 = vmatpush.msra.mxu3 %v4370_v10  ;;  %v4390_v6 = vld [vmem:[#allocation10 + $0x218] sm:$0xff] }
 0x6be   :  { %v4925_v12 = vld [vmem:[#allocation10 + $0x12d0] sm:$0xff]  ;;  %5597 = vmatpush.msra.mxu0 %v4434_v38  ;;  %5542 = vmatpush.msrb.mxu1 %v4861_v32  ;;  %v4498_v41 = vld [vmem:[#allocation10 + $0x578] sm:$0xff] }
 0x6bf   :  { %v4857_v55 = vld [vmem:[#allocation10 + $0x10b0] sm:$0xff]  ;;  %5562 = vmatpush.msrb.mxu2 %v4925_v12  ;;  %5578 = vmatpush.msra.mxu3 %v4366_v36  ;;  %v4562_v50 = vld [vmem:[#allocation10 + $0x778] sm:$0xff] }
 0x6c0   :  { %v4921_v15 = vld [vmem:[#allocation10 + $0x12b0] sm:$0xff]  ;;  %5598 = vmatpush.msra.mxu0 %v4430_v47  ;;  %5543 = vmatpush.msrb.mxu1 %v4857_v55  ;;  %v4642_v7 = vld [vmem:[#allocation10 + $0x9f8] sm:$0xff] }
 0x6c1   :  { %v4853_v22 = vld [vmem:[#allocation10 + $0x1090] sm:$0xff]  ;;  %5563 = vmatpush.msrb.mxu2 %v4921_v15  ;;  %5579 = vmatpush.msra.mxu3 %v4362_v42  ;;  %v4706_v31 = vld [vmem:[#allocation10 + $0xbf8] sm:$0xff] }
 0x6c2   :  { %v4917_v62 = vld [vmem:[#allocation10 + $0x1290] sm:$0xff]  ;;  %5599 = vmatpush.msra.mxu0 %v4426_v48  ;;  %5544 = vmatpush.msrb.mxu1 %v4853_v22  ;;  %v4494_v3 = vld [vmem:[#allocation10 + $0x558] sm:$0xff] }
 0x6c3   :  { %v4849_v53 = vld [vmem:[#allocation10 + $0x1070] sm:$0xff]  ;;  %5564 = vmatpush.msrb.mxu2 %v4917_v62  ;;  %5580 = vmatpush.msra.mxu3 %v4358_v30  ;;  %v4558_v61 = vld [vmem:[#allocation10 + $0x758] sm:$0xff] }
 0x6c4   :  { %v4913_v23 = vld [vmem:[#allocation10 + $0x1270] sm:$0xff]  ;;  %5600 = vmatpush.msra.mxu0 %v4422_v5  ;;  %5545 = vmatpush.msrb.mxu1 %v4849_v53  ;;  %v4638_v34 = vld [vmem:[#allocation10 + $0x9d8] sm:$0xff] }
 0x6c5   :  { %v4845_v8 = vld [vmem:[#allocation10 + $0x1050] sm:$0xff]  ;;  %5565 = vmatpush.msrb.mxu2 %v4913_v23  ;;  %5581 = vmatpush.msra.mxu3 %v4354_v35  ;;  %v4702_v51 = vld [vmem:[#allocation10 + $0xbd8] sm:$0xff] }
 0x6c6   :  { %v4909_v24 = vld [vmem:[#allocation10 + $0x1250] sm:$0xff]  ;;  %5601 = vmatpush.msra.mxu0 %v4418_v17  ;;  %5546 = vmatpush.msrb.mxu1 %v4845_v8  ;;  %v4490_v10 = vld [vmem:[#allocation10 + $0x538] sm:$0xff] }
 0x6c7   :  { %v4841_v60 = vld [vmem:[#allocation10 + $0x1030] sm:$0xff]  ;;  %5566 = vmatpush.msrb.mxu2 %v4909_v24  ;;  %5582 = vmatpush.msra.mxu3 %v4350_v25  ;;  %v4554_v38 = vld [vmem:[#allocation10 + $0x738] sm:$0xff] }
 0x6c8   :  { %v4905_v1 = vld [vmem:[#allocation10 + $0x1230] sm:$0xff]  ;;  %5602 = vmatpush.msra.mxu0 %v4414_v33  ;;  %5547 = vmatpush.msrb.mxu1 %v4841_v60  ;;  %v4634_v32 = vld [vmem:[#allocation10 + $0x9b8] sm:$0xff] }
 0x6c9   :  { %v4837_v11 = vld [vmem:[#allocation10 + $0x1010] sm:$0xff]  ;;  %5567 = vmatpush.msrb.mxu2 %v4905_v1  ;;  %5583 = vmatpush.msra.mxu3 %v4346_v54  ;;  %v4698_v12 = vld [vmem:[#allocation10 + $0xbb8] sm:$0xff] }
 0x6ca   :  { %v4901_v16 = vld [vmem:[#allocation10 + $0x1210] sm:$0xff]  ;;  %5603 = vmatpush.msra.mxu0 %v4410_v19  ;;  %5548 = vmatpush.msrb.mxu1 %v4837_v11  ;;  %v4486_v36 = vld [vmem:[#allocation10 + $0x518] sm:$0xff] }
 0x6cb   :  { %5568 = vmatpush.msrb.mxu2 %v4901_v16  ;;  %5584 = vmatpush.msra.mxu3 %v4342_v29  ;;  %v10042_v44 = vld [vmem:[#allocation1] sm:$0xff] }
 0x6cc   :  { %5604 = vmatpush.msra.mxu0 %v4406_v37  ;;  %5549 = vmatmul.f32.vlgmr.msrb.gmra.mxu1 %v10042_v44  ;;  %v4694_v47 = vld [vmem:[#allocation10 + $0xb98] sm:$0xff] }
 0x6cd   :  { %5569 = vmatmul.f32.vlgmr.msrb.gmra.mxu2 %v10045_v2  ;;  %5613 = vmatpush.msra.mxu1 %v4514_v18  ;;  %v4482_v55 = vld [vmem:[#allocation10 + $0x4f8] sm:$0xff] }
 0x6ce   :  { %5633 = vmatpush.msra.mxu2 %v4578_v49  ;;  %5585 = vmatpush.msra.mxu3 %v4338_v40  ;;  %v4546_v15 = vld [vmem:[#allocation10 + $0x6f8] sm:$0xff] }
 0x6cf   :  { %5605 = vmatpush.msra.mxu0 %v4402_v43  ;;  %5614 = vmatpush.msra.mxu1 %v4510_v9  ;;  %v4626_v42 = vld [vmem:[#allocation10 + $0x978] sm:$0xff] }
 0x6d0   :  { %5634 = vmatpush.msra.mxu2 %v4574_v58  ;;  %5586 = vmatpush.msra.mxu3 %v4334_v57  ;;  %v4690_v48 = vld [vmem:[#allocation10 + $0xb78] sm:$0xff] }
 0x6d1   :  { %5606 = vmatpush.msra.mxu0 %v4398_v20  ;;  %5615 = vmatpush.msra.mxu1 %v4506_v56  ;;  %v4478_v22 = vld [vmem:[#allocation10 + $0x4d8] sm:$0xff] }
 0x6d2   :  { %5635 = vmatpush.msra.mxu2 %v4570_v26  ;;  %5587 = vmatpush.msra.mxu3 %v4330_v28  ;;  %v4542_v62 = vld [vmem:[#allocation10 + $0x6d8] sm:$0xff] }
 0x6d3   :  { %5607 = vmatpush.msra.mxu0 %v4394_v0  ;;  %5616 = vmatpush.msra.mxu1 %v4502_v45  ;;  %v4622_v30 = vld [vmem:[#allocation10 + $0x958] sm:$0xff]  ;;  %v10050_v45 = vpop.f32.mrf.mxu1 }
 0x6d4   :  { %5636 = vmatpush.msra.mxu2 %v4566_v27  ;;  %5588 = vmatpush.msra.mxu3 %v4326_v21  ;;  %v4686_v5 = vld [vmem:[#allocation10 + $0xb58] sm:$0xff] }
 0x6d5   :  { %5608 = vmatpush.msra.mxu0 %v4390_v6  ;;  %5589 = vmatmul.f32.vlgmr.msra.gmra.mxu3 %v9951_v13  ;;  %v4550_v13 = vld [vmem:[#allocation10 + $0x718] sm:$0xff] }
 0x6d6   :  { %5609 = vmatmul.f32.vlgmr.msra.gmra.mxu0 %v9953_v46  ;;  %5617 = vmatpush.msra.mxu1 %v4498_v41  ;;  %v4630_v46 = vld [vmem:[#allocation10 + $0x998] sm:$0xff] }
 0x6d7   :  { %5637 = vmatpush.msra.mxu2 %v4562_v50  ;;  %5653 = vmatpush.msrb.mxu3 %v4642_v7  ;;  %v4474_v53 = vld [vmem:[#allocation10 + $0x4b8] sm:$0xff]  ;;  %v10054_v50 = vpop.f32.mrf.mxu2  ;;  %v10056_v7 = vpop.f32.mrf.mxu3 }
 0x6d8   :  { %5673 = vmatpush.msrb.mxu0 %v4706_v31  ;;  %5618 = vmatpush.msra.mxu1 %v4494_v3  ;;  %v4538_v23 = vld [vmem:[#allocation10 + $0x6b8] sm:$0xff] }
 0x6d9   :  { %5638 = vmatpush.msra.mxu2 %v4558_v61  ;;  %5654 = vmatpush.msrb.mxu3 %v4638_v34  ;;  %v4618_v35 = vld [vmem:[#allocation10 + $0x938] sm:$0xff] }
 0x6da   :  { %5674 = vmatpush.msrb.mxu0 %v4702_v51  ;;  %5619 = vmatpush.msra.mxu1 %v4490_v10  ;;  %v4682_v17 = vld [vmem:[#allocation10 + $0xb38] sm:$0xff] }
 0x6db   :  { %5639 = vmatpush.msra.mxu2 %v4554_v38  ;;  %5655 = vmatpush.msrb.mxu3 %v4634_v32  ;;  %v4470_v8 = vld [vmem:[#allocation10 + $0x498] sm:$0xff] }
 0x6dc   :  { %5675 = vmatpush.msrb.mxu0 %v4698_v12  ;;  %5620 = vmatpush.msra.mxu1 %v4486_v36  ;;  %v4534_v24 = vld [vmem:[#allocation10 + $0x698] sm:$0xff]  ;;  %v10058_v12 = vpop.f32.mrf.mxu0  ;;  %v10060_v36 = vpop.f32.mrf.mxu1 }
 0x6dd   :  { %5640 = vmatpush.msra.mxu2 %v4550_v13  ;;  %5656 = vmatpush.msrb.mxu3 %v4630_v46  ;;  %v4614_v25 = vld [vmem:[#allocation10 + $0x918] sm:$0xff] }
 0x6de   :  { %5676 = vmatpush.msrb.mxu0 %v4694_v47  ;;  %5621 = vmatpush.msra.mxu1 %v4482_v55  ;;  %v4678_v33 = vld [vmem:[#allocation10 + $0xb18] sm:$0xff] }
 0x6df   :  { %5641 = vmatpush.msra.mxu2 %v4546_v15  ;;  %5657 = vmatpush.msrb.mxu3 %v4626_v42  ;;  %v4466_v60 = vld [vmem:[#allocation10 + $0x478] sm:$0xff]  ;;  %v10064_v15 = vpop.f32.mrf.mxu2  ;;  %v10066_v42 = vpop.f32.mrf.mxu3 }
 0x6e0   :  { %5677 = vmatpush.msrb.mxu0 %v4690_v48  ;;  %5622 = vmatpush.msra.mxu1 %v4478_v22  ;;  %v4530_v1 = vld [vmem:[#allocation10 + $0x678] sm:$0xff] }
 0x6e1   :  { %5642 = vmatpush.msra.mxu2 %v4542_v62  ;;  %5658 = vmatpush.msrb.mxu3 %v4622_v30  ;;  %v4610_v54 = vld [vmem:[#allocation10 + $0x8f8] sm:$0xff]  ;;  %v10068_v62 = vld [vmem:[#allocation11] sm:$0xf] }
 0x6e2   :  { %5678 = vmatpush.msrb.mxu0 %v4686_v5  ;;  %5623 = vmatpush.msra.mxu1 %v4474_v53  ;;  %v4674_v19 = vld [vmem:[#allocation10 + $0xaf8] sm:$0xff] }
 0x6e3   :  { %5643 = vmatpush.msra.mxu2 %v4538_v23  ;;  %5659 = vmatpush.msrb.mxu3 %v4618_v35  ;;  %v4462_v11 = vld [vmem:[#allocation10 + $0x458] sm:$0xff]  ;;  %v4965_v35 = vperm.slane %v10068_v62, 0 }
 0x6e4   :  { %5679 = vmatpush.msrb.mxu0 %v4682_v17  ;;  %5624 = vmatpush.msra.mxu1 %v4470_v8  ;;  %v4526_v16 = vld [vmem:[#allocation10 + $0x658] sm:$0xff] }
 0x6e5   :  { %5644 = vmatpush.msra.mxu2 %v4534_v24  ;;  %5660 = vmatpush.msrb.mxu3 %v4614_v25  ;;  %v4606_v29 = vld [vmem:[#allocation10 + $0x8d8] sm:$0xff] }
 0x6e6   :  { %5680 = vmatpush.msrb.mxu0 %v4678_v33  ;;  %5625 = vmatpush.msra.mxu1 %v4466_v60  ;;  %v4670_v37 = vld [vmem:[#allocation10 + $0xad8] sm:$0xff]  ;;  %v10071_v33 = vpop.f32.mrf.mxu0  ;;  %v10073_v60 = vpop.f32.mrf.mxu1 }
 0x6e7   :  { %5645 = vmatpush.msra.mxu2 %v4530_v1  ;;  %5661 = vmatpush.msrb.mxu3 %v4610_v54  ;;  %v4458_v18 = vld [vmem:[#allocation10 + $0x438] sm:$0xff] }
 0x6e8   :  { %5681 = vmatpush.msrb.mxu0 %v4674_v19  ;;  %v4522_v49 = vld [vmem:[#allocation10 + $0x638] sm:$0xff]  ;;  %5626 = vmatpush.msra.mxu1 %v4462_v11  ;;  %v4966_v19 = vperm.slane %v10068_v62, 1 }
 0x6e9   :  { %5646 = vmatpush.msra.mxu2 %v4526_v16  ;;  %v4602_v40 = vld [vmem:[#allocation10 + $0x8b8] sm:$0xff]  ;;  %5662 = vmatpush.msrb.mxu3 %v4606_v29  ;;  %v4991_v29 = vadd.f32 %v10050_v45, %v4965_v35 }
 0x6ea   :  { %v4666_v43 = vld [vmem:[#allocation10 + $0xab8] sm:$0xff]  ;;  %5682 = vmatpush.msrb.mxu0 %v4670_v37  ;;  %5627 = vmatpush.msra.mxu1 %v4458_v18  ;;  %v10077_v37 = vpop.f32.mrf.mxu2  ;;  %v5190_v18 = vpop.f32.mrf.mxu3 }
 0x6eb   :  { %v4454_v9 = vld [vmem:[#allocation10 + $0x418] sm:$0xff]  ;;  %5647 = vmatpush.msra.mxu2 %v4522_v49  ;;  %5663 = vmatpush.msrb.mxu3 %v4602_v40 }
 0x6ec   :  { %v4518_v58 = vld [vmem:[#allocation10 + $0x618] sm:$0xff]  ;;  %5683 = vmatpush.msrb.mxu0 %v4666_v43  ;;  %5628 = vmatpush.msra.mxu1 %v4454_v9 }
 0x6ed   :  { %v4598_v57 = vld [vmem:[#allocation10 + $0x898] sm:$0xff]  ;;  %5648 = vmatpush.msra.mxu2 %v4518_v58  ;;  %5629 = vmatmul.f32.vlgmr.msra.gmra.mxu1 %v9976_v39  ;;  %v5011_v58 = vadd.f32 %v10054_v50, %v4991_v29 }
 0x6ee   :  { %v4662_v20 = vld [vmem:[#allocation10 + $0xa98] sm:$0xff]  ;;  %5664 = vmatpush.msrb.mxu3 %v4598_v57  ;;  %5649 = vmatmul.f32.vlgmr.msra.gmra.mxu2 %v9978_v59  ;;  %v5230_v50 = vpop.f32.mrf.mxu1 }
 0x6ef   :  { %v4770_v56 = vld [vmem:[#allocation10 + $0xdf8] sm:$0xff]  ;;  %5684 = vmatpush.msrb.mxu0 %v4662_v20 }
 0x6f0   :  { %v4834_v26 = vld [vmem:[#allocation10 + $0xff8] sm:$0xff]  ;;  %5693 = vmatpush.msrb.mxu1 %v4770_v56  ;;  %v5191_v56 = vadd.f32 %v5190_v18, %v4966_v19 }
 0x6f1   :  { %v4594_v28 = vld [vmem:[#allocation10 + $0x878] sm:$0xff]  ;;  %5713 = vmatpush.msrb.mxu2 %v4834_v26 }
 0x6f2   :  { %v4658_v0 = vld [vmem:[#allocation10 + $0xa78] sm:$0xff]  ;;  %5665 = vmatpush.msrb.mxu3 %v4594_v28 }
 0x6f3   :  { %v4766_v27 = vld [vmem:[#allocation10 + $0xdd8] sm:$0xff]  ;;  %5685 = vmatpush.msrb.mxu0 %v4658_v0  ;;  %v5031_v0 = vadd.f32 %v10056_v7, %v5011_v58 }
 0x6f4   :  { %v4830_v21 = vld [vmem:[#allocation10 + $0xfd8] sm:$0xff]  ;;  %5694 = vmatpush.msrb.mxu1 %v4766_v27 }
 0x6f5   :  { %v4590_v6 = vld [vmem:[#allocation10 + $0x858] sm:$0xff]  ;;  %5714 = vmatpush.msrb.mxu2 %v4830_v21  ;;  %v5051_v7 = vadd.f32 %v10058_v12, %v5031_v0 }
 0x6f6   :  { %v4654_v41 = vld [vmem:[#allocation10 + $0xa58] sm:$0xff]  ;;  %5666 = vmatpush.msrb.mxu3 %v4590_v6 }
 0x6f7   :  { %v4762_v31 = vld [vmem:[#allocation10 + $0xdb8] sm:$0xff]  ;;  %5686 = vmatpush.msrb.mxu0 %v4654_v41  ;;  %v5210_v41 = vpop.f32.mrf.mxu0 }
 0x6f8   :  { %v4826_v3 = vld [vmem:[#allocation10 + $0xfb8] sm:$0xff]  ;;  %5695 = vmatpush.msrb.mxu1 %v4762_v31 }
 0x6f9   :  { %v4586_v61 = vld [vmem:[#allocation10 + $0x838] sm:$0xff]  ;;  %5715 = vmatpush.msrb.mxu2 %v4826_v3 }
 0x6fa   :  { %v4650_v39 = vld [vmem:[#allocation10 + $0xa38] sm:$0xff]  ;;  %5667 = vmatpush.msrb.mxu3 %v4586_v61  ;;  %v5211_v61 = vadd.f32 %v5210_v41, %v5191_v56  ;;  %v5885_v41 = vld [vmem:[#allocation13 + $0x2e0] sm:$0xff] }
 0x6fb   :  { %v4758_v59 = vld [vmem:[#allocation10 + $0xd98] sm:$0xff]  ;;  %5687 = vmatpush.msrb.mxu0 %v4650_v39 }
 0x6fc   :  { %v4822_v34 = vld [vmem:[#allocation10 + $0xf98] sm:$0xff]  ;;  %5696 = vmatpush.msrb.mxu1 %v4758_v59 }
 0x6fd   :  { %v4582_v51 = vld [vmem:[#allocation10 + $0x818] sm:$0xff]  ;;  %5716 = vmatpush.msrb.mxu2 %v4822_v34  ;;  %v5250_v34 = vpop.f32.mrf.mxu2 }
 0x6fe   :  { %v4646_v10 = vld [vmem:[#allocation10 + $0xa18] sm:$0xff]  ;;  %5668 = vmatpush.msrb.mxu3 %v4582_v51 }
 0x6ff   :  { %v4754_v38 = vld [vmem:[#allocation10 + $0xd78] sm:$0xff]  ;;  %5688 = vmatpush.msrb.mxu0 %v4646_v10  ;;  %5669 = vmatmul.f32.vlgmr.msrb.gmra.mxu3 %v9991_v4 }
 0x700   :  { %v4818_v32 = vld [vmem:[#allocation10 + $0xf78] sm:$0xff]  ;;  %5689 = vmatmul.f32.vlgmr.msrb.gmra.mxu0 %v9993_v63  ;;  %5697 = vmatpush.msrb.mxu1 %v4754_v38  ;;  %v5231_v38 = vadd.f32 %v5230_v50, %v5211_v61  ;;  %v5841_v61 = vld [vmem:[#allocation13 + $0x180] sm:$0xff] }
 0x701   :  { %v4898_v13 = vld [vmem:[#allocation10 + $0x11f8] sm:$0xff]  ;;  %5717 = vmatpush.msrb.mxu2 %v4818_v32 }
 0x702   :  { %v4962_v46 = vld [vmem:[#allocation10 + $0x13f8] sm:$0xff]  ;;  %5733 = vmatpush.msra.mxu3 %v4898_v13 }
 0x703   :  { %v4750_v47 = vld [vmem:[#allocation10 + $0xd58] sm:$0xff]  ;;  %5753 = vmatpush.msra.mxu0 %v4962_v46  ;;  %v5270_v46 = vpop.f32.mrf.mxu3 }
 0x704   :  { %v4814_v55 = vld [vmem:[#allocation10 + $0xf58] sm:$0xff]  ;;  %5698 = vmatpush.msrb.mxu1 %v4750_v47 }
 0x705   :  { %v4894_v48 = vld [vmem:[#allocation10 + $0x11d8] sm:$0xff]  ;;  %5718 = vmatpush.msrb.mxu2 %v4814_v55 }
 0x706   :  { %v4958_v22 = vld [vmem:[#allocation10 + $0x13d8] sm:$0xff]  ;;  %5734 = vmatpush.msra.mxu3 %v4894_v48  ;;  %v5251_v48 = vadd.f32 %v5250_v34, %v5231_v38  ;;  %v5877_v38 = vld [vmem:[#allocation13 + $0x2a0] sm:$0xff] }
 0x707   :  { %v4746_v30 = vld [vmem:[#allocation10 + $0xd38] sm:$0xff]  ;;  %5754 = vmatpush.msra.mxu0 %v4958_v22 }
 0x708   :  { %v4810_v5 = vld [vmem:[#allocation10 + $0xf38] sm:$0xff]  ;;  %5699 = vmatpush.msrb.mxu1 %v4746_v30  ;;  %v5071_v30 = vadd.f32 %v10060_v36, %v5051_v7  ;;  %v5290_v36 = vpop.f32.mrf.mxu0 }
 0x709   :  { %v4890_v4 = vld [vmem:[#allocation10 + $0x11b8] sm:$0xff]  ;;  %5719 = vmatpush.msrb.mxu2 %v4810_v5 }
 0x70a   :  { %v4954_v63 = vld [vmem:[#allocation10 + $0x13b8] sm:$0xff]  ;;  %5735 = vmatpush.msra.mxu3 %v4890_v4 }
 0x70b   :  { %v4742_v53 = vld [vmem:[#allocation10 + $0xd18] sm:$0xff]  ;;  %5755 = vmatpush.msra.mxu0 %v4954_v63  ;;  %v5271_v63 = vadd.f32 %v5270_v46, %v5251_v48  ;;  %v5873_v48 = vld [vmem:[#allocation13 + $0x280] sm:$0xff] }
 0x70c   :  { %v4806_v23 = vld [vmem:[#allocation10 + $0xf18] sm:$0xff]  ;;  %5700 = vmatpush.msrb.mxu1 %v4742_v53  ;;  %v5091_v53 = vadd.f32 %v10064_v15, %v5071_v30 }
 0x70d   :  { %v4886_v17 = vld [vmem:[#allocation10 + $0x1198] sm:$0xff]  ;;  %5720 = vmatpush.msrb.mxu2 %v4806_v23  ;;  %v5291_v19 = vadd.f32 %v5290_v36, %v5271_v63  ;;  %v5797_v63 = vld [vmem:[#allocation13 + $0x20] sm:$0xff] }
 0x70e   :  { %v4950_v8 = vld [vmem:[#allocation10 + $0x1398] sm:$0xff]  ;;  %5736 = vmatpush.msra.mxu3 %v4886_v17 }
 0x70f   :  { %v4738_v24 = vld [vmem:[#allocation10 + $0xcf8] sm:$0xff]  ;;  %5756 = vmatpush.msra.mxu0 %v4950_v8 }
 0x710   :  { %v4802_v25 = vld [vmem:[#allocation10 + $0xef8] sm:$0xff]  ;;  %5701 = vmatpush.msrb.mxu1 %v4738_v24  ;;  %v5111_v24 = vadd.f32 %v10066_v42, %v5091_v53  ;;  %v5829_v53 = vld [vmem:[#allocation13 + $0x120] sm:$0xff] }
 0x711   :  { %v4882_v1 = vld [vmem:[#allocation10 + $0x1178] sm:$0xff]  ;;  %5721 = vmatpush.msrb.mxu2 %v4802_v25  ;;  %v5310_v25 = vpop.f32.mrf.mxu1 }
 0x712   :  { %v4946_v54 = vld [vmem:[#allocation10 + $0x1378] sm:$0xff]  ;;  %5737 = vmatpush.msra.mxu3 %v4882_v1  ;;  %v5821_v1 = vld [vmem:[#allocation13 + $0xe0] sm:$0xff] }
 0x713   :  { %v4734_v11 = vld [vmem:[#allocation10 + $0xcd8] sm:$0xff]  ;;  %5757 = vmatpush.msra.mxu0 %v4946_v54  ;;  %v5853_v54 = vld [vmem:[#allocation13 + $0x1e0] sm:$0xff] }
 0x714   :  { %v4798_v16 = vld [vmem:[#allocation10 + $0xed8] sm:$0xff]  ;;  %5702 = vmatpush.msrb.mxu1 %v4734_v11 }
 0x715   :  { %v4878_v49 = vld [vmem:[#allocation10 + $0x1158] sm:$0xff]  ;;  %5722 = vmatpush.msrb.mxu2 %v4798_v16  ;;  %v5330_v16 = vpop.f32.mrf.mxu2 }
 0x716   :  { %v4942_v40 = vld [vmem:[#allocation10 + $0x1358] sm:$0xff]  ;;  %5738 = vmatpush.msra.mxu3 %v4878_v49  ;;  %v5311_v49 = vadd.f32 %v5310_v25, %v5291_v19  ;;  %v5793_v25 = vld [vmem:[#allocation13] sm:$0xff] }
 0x717   :  { %v4730_v43 = vld [vmem:[#allocation10 + $0xcb8] sm:$0xff]  ;;  %5758 = vmatpush.msra.mxu0 %v4942_v40 }
 0x718   :  { %v4794_v9 = vld [vmem:[#allocation10 + $0xeb8] sm:$0xff]  ;;  %5703 = vmatpush.msrb.mxu1 %v4730_v43  ;;  %v5817_v43 = vld [vmem:[#allocation13 + $0xc0] sm:$0xff]  ;;  %v5331_v58 = vadd.f32 %v5330_v16, %v5311_v49 }
 0x719   :  { %v4874_v57 = vld [vmem:[#allocation10 + $0x1138] sm:$0xff]  ;;  %5723 = vmatpush.msrb.mxu2 %v4794_v9  ;;  %v5849_v9 = vld [vmem:[#allocation13 + $0x1c0] sm:$0xff] }
 0x71a   :  { %v4938_v20 = vld [vmem:[#allocation10 + $0x1338] sm:$0xff]  ;;  %5739 = vmatpush.msra.mxu3 %v4874_v57  ;;  %v5865_v16 = vld [vmem:[#allocation13 + $0x240] sm:$0xff] }
 0x71b   :  { %v4726_v26 = vld [vmem:[#allocation10 + $0xc98] sm:$0xff]  ;;  %5759 = vmatpush.msra.mxu0 %v4938_v20 }
 0x71c   :  { %v4790_v28 = vld [vmem:[#allocation10 + $0xe98] sm:$0xff]  ;;  %5704 = vmatpush.msrb.mxu1 %v4726_v26 }
 0x71d   :  { %v4870_v45 = vld [vmem:[#allocation10 + $0x1118] sm:$0xff]  ;;  %5724 = vmatpush.msrb.mxu2 %v4790_v28 }
 0x71e   :  { %v4934_v27 = vld [vmem:[#allocation10 + $0x1318] sm:$0xff]  ;;  %5740 = vmatpush.msra.mxu3 %v4870_v45  ;;  %v5813_v45 = vld [vmem:[#allocation13 + $0xa0] sm:$0xff] }
 0x71f   :  { %v4722_v21 = vld [vmem:[#allocation10 + $0xc78] sm:$0xff]  ;;  %5760 = vmatpush.msra.mxu0 %v4934_v27  ;;  %v5845_v27 = vld [vmem:[#allocation13 + $0x1a0] sm:$0xff] }
 0x720   :  { %v4786_v6 = vld [vmem:[#allocation10 + $0xe78] sm:$0xff]  ;;  %5705 = vmatpush.msrb.mxu1 %v4722_v21 }
 0x721   :  { %v4866_v31 = vld [vmem:[#allocation10 + $0x10f8] sm:$0xff]  ;;  %5725 = vmatpush.msrb.mxu2 %v4786_v6  ;;  %v5370_v6 = vpop.f32.mrf.mxu0 }
 0x722   :  { %v4930_v3 = vld [vmem:[#allocation10 + $0x12f8] sm:$0xff]  ;;  %5741 = vmatpush.msra.mxu3 %v4866_v31 }
 0x723   :  { %v4718_v39 = vld [vmem:[#allocation10 + $0xc58] sm:$0xff]  ;;  %5761 = vmatpush.msra.mxu0 %v4930_v3 }
 0x724   :  { %v4782_v59 = vld [vmem:[#allocation10 + $0xe58] sm:$0xff]  ;;  %5706 = vmatpush.msrb.mxu1 %v4718_v39 }
 0x725   :  { %v4862_v51 = vld [vmem:[#allocation10 + $0x10d8] sm:$0xff]  ;;  %5726 = vmatpush.msrb.mxu2 %v4782_v59 }
 0x726   :  { %v4926_v10 = vld [vmem:[#allocation10 + $0x12d8] sm:$0xff]  ;;  %5742 = vmatpush.msra.mxu3 %v4862_v51  ;;  %v5805_v51 = vld [vmem:[#allocation13 + $0x60] sm:$0xff] }
 0x727   :  { %v4714_v32 = vld [vmem:[#allocation10 + $0xc38] sm:$0xff]  ;;  %5762 = vmatpush.msra.mxu0 %v4926_v10  ;;  %v5837_v10 = vld [vmem:[#allocation13 + $0x160] sm:$0xff] }
 0x728   :  { %v4778_v13 = vld [vmem:[#allocation10 + $0xe38] sm:$0xff]  ;;  %5707 = vmatpush.msrb.mxu1 %v4714_v32 }
 0x729   :  { %v4858_v47 = vld [vmem:[#allocation10 + $0x10b8] sm:$0xff]  ;;  %5727 = vmatpush.msrb.mxu2 %v4778_v13 }
 0x72a   :  { %v4922_v55 = vld [vmem:[#allocation10 + $0x12b8] sm:$0xff]  ;;  %5743 = vmatpush.msra.mxu3 %v4858_v47  ;;  %v5801_v47 = vld [vmem:[#allocation13 + $0x40] sm:$0xff] }
 0x72b   :  { %v4710_v22 = vld [vmem:[#allocation10 + $0xc18] sm:$0xff]  ;;  %5763 = vmatpush.msra.mxu0 %v4922_v55  ;;  %v5833_v55 = vld [vmem:[#allocation13 + $0x140] sm:$0xff] }
 0x72c   :  { %v4774_v12 = vld [vmem:[#allocation10 + $0xe18] sm:$0xff]  ;;  %5708 = vmatpush.msrb.mxu1 %v4710_v22 }
 0x72d   :  { %v4854_v5 = vld [vmem:[#allocation10 + $0x1098] sm:$0xff]  ;;  %5728 = vmatpush.msrb.mxu2 %v4774_v12  ;;  %5709 = vmatmul.f32.vlgmr.msrb.gmra.mxu1 %v10012_v52  ;;  %v5131_v52 = vadd.f32 %v10071_v33, %v5111_v24 }
 0x72e   :  { %v4918_v4 = vld [vmem:[#allocation10 + $0x1298] sm:$0xff]  ;;  %5744 = vmatpush.msra.mxu3 %v4854_v5  ;;  %5729 = vmatmul.f32.vlgmr.msrb.gmra.mxu2 %v10014_v14  ;;  %v5350_v14 = vpop.f32.mrf.mxu3 }
 0x72f   :  { %v5823_v23 = vld [vmem:[#allocation13 + $0xf0] sm:$0xff]  ;;  %5764 = vmatpush.msra.mxu0 %v4918_v4  ;;  %v5351_v56 = vadd.f32 %v5350_v14, %v5331_v58  ;;  %v5151_v0 = vadd.f32 %v10073_v60, %v5131_v52  ;;  %v5856_v19 = vld [vmem:[#allocation13 + $0x1f8] sm:$0xff]  ;;  %v5861_v52 = vld [vmem:[#allocation13 + $0x220] sm:$0xff] }
 0x730   :  { %v5855_v35 = vld [vmem:[#allocation13 + $0x1f0] sm:$0xff]  ;;  %5927 = vmatpush.msra.mxu1 %v5823_v23  ;;  %v5869_v23 = vld [vmem:[#allocation13 + $0x260] sm:$0xff]  ;;  %v5818_v14 = vld [vmem:[#allocation13 + $0xc8] sm:$0xff] }
 0x731   :  { %v4850_v17 = vld [vmem:[#allocation10 + $0x1078] sm:$0xff]  ;;  %5947 = vmatpush.msra.mxu2 %v5855_v35  ;;  %v10092_v21 = vadd.f32 %v10077_v37, %v5151_v0  ;;  %v10094_v50 = vadd.f32 %v5370_v6, %v5351_v56  ;;  %v5881_v37 = vld [vmem:[#allocation13 + $0x2c0] sm:$0xff]  ;;  %v5814_v0 = vld [vmem:[#allocation13 + $0xa8] sm:$0xff] }
 0x732   :  { %v4914_v8 = vld [vmem:[#allocation10 + $0x1278] sm:$0xff]  ;;  %5745 = vmatpush.msra.mxu3 %v4850_v17  ;;  %5928 = vmatpush.msra.mxu1 %v5821_v1  ;;  %v5825_v1 = vld [vmem:[#allocation13 + $0x100] sm:$0xff] }
 0x733   :  { %v4846_v15 = vld [vmem:[#allocation10 + $0x1058] sm:$0xff]  ;;  %5765 = vmatpush.msra.mxu0 %v4914_v8  ;;  %5948 = vmatpush.msra.mxu2 %v5853_v54  ;;  %v5779_v39 = vmul.f32 1.442695, %v10094_v50  ;;  %vm5773_vm1 = vcmp.gt.f32.partialorder %v10092_v21, 0.0  ;;  %vm5774_vm2 = vcmp.gt.f32.partialorder %v10094_v50, 0.0 }
 0x734   :  { %v4910_v11 = vld [vmem:[#allocation10 + $0x1258] sm:$0xff]  ;;  %5746 = vmatpush.msra.mxu3 %v4846_v15 }
 0x735   :  { %v5819_v29 = vld [vmem:[#allocation13 + $0xd0] sm:$0xff]  ;;  %5766 = vmatpush.msra.mxu0 %v4910_v11  ;;  %v5824_v54 = vld [vmem:[#allocation13 + $0xf8] sm:$0xff] }
 0x736   :  { %v5851_v18 = vld [vmem:[#allocation13 + $0x1d0] sm:$0xff]  ;;  %5929 = vmatpush.msra.mxu1 %v5819_v29  ;;  %v5822_v29 = vld [vmem:[#allocation13 + $0xe8] sm:$0xff]  ;;  %v5848_v56 = vld [vmem:[#allocation13 + $0x1b8] sm:$0xff] }
 0x737   :  { %v4842_v42 = vld [vmem:[#allocation10 + $0x1038] sm:$0xff]  ;;  %5949 = vmatpush.msra.mxu2 %v5851_v18  ;;  %v5854_v18 = vld [vmem:[#allocation13 + $0x1e8] sm:$0xff] }
 0x738   :  { %v4906_v40 = vld [vmem:[#allocation10 + $0x1238] sm:$0xff]  ;;  %5747 = vmatpush.msra.mxu3 %v4842_v42  ;;  %5930 = vmatpush.msra.mxu1 %v5817_v43  ;;  %v5850_v43 = vld [vmem:[#allocation13 + $0x1c8] sm:$0xff] }
 0x739   :  { %v4838_v57 = vld [vmem:[#allocation10 + $0x1018] sm:$0xff]  ;;  %5767 = vmatpush.msra.mxu0 %v4906_v40  ;;  %5950 = vmatpush.msra.mxu2 %v5849_v9  ;;  %v4967_v9 = vperm.slane %v10068_v62, 2 }
 0x73a   :  { %v4902_v20 = vld [vmem:[#allocation10 + $0x1218] sm:$0xff]  ;;  %5748 = vmatpush.msra.mxu3 %v4838_v57  ;;  %v5390_v57 = vpop.f32.mrf.mxu1 }
 0x73b   :  { %v5815_v26 = vld [vmem:[#allocation13 + $0xb0] sm:$0xff]  ;;  %5768 = vmatpush.msra.mxu0 %v4902_v20  ;;  %5749 = vmatmul.f32.vlgmr.msra.gmra.mxu3 %v10042_v44  ;;  %v5809_v44 = vld [vmem:[#allocation13 + $0x80] sm:$0xff]  ;;  %v5820_v42 = vld [vmem:[#allocation13 + $0xd8] sm:$0xff] }
 0x73c   :  { %v5847_v28 = vld [vmem:[#allocation13 + $0x1b0] sm:$0xff]  ;;  %5769 = vmatmul.f32.vlgmr.msra.gmra.mxu0 %v10045_v2  ;;  %5931 = vmatpush.msra.mxu1 %v5815_v26  ;;  %v5777_v2 = vmul.f32 1.442695, %v10092_v21  ;;  %v5852_v40 = vld [vmem:[#allocation13 + $0x1d8] sm:$0xff]  ;;  %v5857_v26 = vld [vmem:[#allocation13 + $0x200] sm:$0xff] }
 0x73d   :  { %v5887_v33 = vld [vmem:[#allocation13 + $0x2f0] sm:$0xff]  ;;  %5951 = vmatpush.msra.mxu2 %v5847_v28  ;;  %v5816_v20 = vld [vmem:[#allocation13 + $0xb8] sm:$0xff]  ;;  %v5410_v28 = vpop.f32.mrf.mxu2 }
 0x73e   :  { %v5811_v31 = vld [vmem:[#allocation13 + $0x90] sm:$0xff]  ;;  %5967 = vmatpush.msrb.mxu3 %v5887_v33  ;;  %5932 = vmatpush.msra.mxu1 %v5813_v45  ;;  %6312 = vpow2.f32 %v5777_v2  ;;  %v5846_v33 = vld [vmem:[#allocation13 + $0x1a8] sm:$0xff]  ;;  %v5391_v45 = vadd.f32 %v5390_v57, %v4967_v9  ;;  %v5812_v6 = vld [vmem:[#allocation13 + $0x98] sm:$0xff] }
 0x73f   :  { %v5843_v60 = vld [vmem:[#allocation13 + $0x190] sm:$0xff]  ;;  %5952 = vmatpush.msra.mxu2 %v5845_v27  ;;  %6314 = vpow2.f32 %v5779_v39  ;;  %v5888_v27 = vld [vmem:[#allocation13 + $0x2f8] sm:$0xff]  ;;  %v5882_v39 = vld [vmem:[#allocation13 + $0x2c8] sm:$0xff] }
 0x740   :  { %v5883_v3 = vld [vmem:[#allocation13 + $0x2d0] sm:$0xff]  ;;  %5968 = vmatpush.msrb.mxu3 %v5885_v41  ;;  %5933 = vmatpush.msra.mxu1 %v5811_v31  ;;  %v5844_v41 = vld [vmem:[#allocation13 + $0x198] sm:$0xff]  ;;  %v5886_v31 = vld [vmem:[#allocation13 + $0x2e8] sm:$0xff] }
 0x741   :  { %5953 = vmatpush.msra.mxu2 %v5843_v60  ;;  %v5807_v59 = vld [vmem:[#allocation13 + $0x70] sm:$0xff]  ;;  %v5810_v60 = vld [vmem:[#allocation13 + $0x88] sm:$0xff]  ;;  %v5808_v2 = vld [vmem:[#allocation13 + $0x78] sm:$0xff] }
 0x742   :  { %v5839_v7 = vld [vmem:[#allocation13 + $0x170] sm:$0xff]  ;;  %5969 = vmatpush.msrb.mxu3 %v5883_v3  ;;  %5934 = vmatpush.msra.mxu1 %v5809_v44  ;;  %v5842_v3 = vld [vmem:[#allocation13 + $0x188] sm:$0xff] }
 0x743   :  { %5954 = vmatpush.msra.mxu2 %v5841_v61  ;;  %v5879_v34 = vld [vmem:[#allocation13 + $0x2b0] sm:$0xff]  ;;  %v5884_v61 = vld [vmem:[#allocation13 + $0x2d8] sm:$0xff]  ;;  %v5862_v57 = vld [vmem:[#allocation13 + $0x228] sm:$0xff] }
 0x744   :  { %5970 = vmatpush.msrb.mxu3 %v5881_v37  ;;  %5935 = vmatpush.msra.mxu1 %v5807_v59  ;;  %v5803_v32 = vld [vmem:[#allocation13 + $0x50] sm:$0xff]  ;;  %v6313_v30 = vpop.eup %6312  ;;  %v5840_v37 = vld [vmem:[#allocation13 + $0x178] sm:$0xff]  ;;  %v5450_v59 = vpop.f32.mrf.mxu0 }
 0x745   :  { %5955 = vmatpush.msra.mxu2 %v5839_v7  ;;  %v5835_v13 = vld [vmem:[#allocation13 + $0x150] sm:$0xff]  ;;  %v6315_v4 = vpop.eup %6314  ;;  %v6246_v8 = vadd.f32 -1.0, %v6313_v30  ;;  %v5470_v7 = vpop.f32.mrf.mxu1 }
 0x746   :  { %5971 = vmatpush.msrb.mxu3 %v5879_v34  ;;  %5936 = vmatpush.msra.mxu1 %v5805_v51  ;;  %v5875_v46 = vld [vmem:[#allocation13 + $0x290] sm:$0xff]  ;;  %v6247_v24 = vadd.f32 -1.0, %v6315_v4  ;;  %v5806_v34 = vld [vmem:[#allocation13 + $0x68] sm:$0xff]  ;;  %v5800_v4 = vld [vmem:[#allocation13 + $0x38] sm:$0xff] }
 0x747   :  { %5956 = vmatpush.msra.mxu2 %v5837_v10  ;;  %v5799_v22 = vld [vmem:[#allocation13 + $0x30] sm:$0xff]  ;;  %v10101_v15 = vsel %vm5773_vm1, %v10092_v21, %v6246_v8  ;;  %v5430_v21 = vpop.f32.mrf.mxu3  ;;  %v5838_v51 = vld [vmem:[#allocation13 + $0x168] sm:$0xff]  ;;  %v5872_v8 = vld [vmem:[#allocation13 + $0x278] sm:$0xff] }
 0x748   :  { %5972 = vmatpush.msrb.mxu3 %v5877_v38  ;;  %5937 = vmatpush.msra.mxu1 %v5803_v32  ;;  %v5831_v12 = vld [vmem:[#allocation13 + $0x130] sm:$0xff]  ;;  %v10104_v11 = vsel %vm5774_vm2, %v10094_v50, %v6247_v24  ;;  %v5411_v50 = vadd.f32 %v5410_v28, %v5391_v45  ;;  %v5880_v38 = vld [vmem:[#allocation13 + $0x2b8] sm:$0xff]  ;;  %v5490_v32 = vpop.f32.mrf.mxu2  ;;  %v5913_v28 = vld [vmem:[#allocation13 + $0x3c0] sm:$0xff] }
 0x749   :  { %5957 = vmatpush.msra.mxu2 %v5835_v13  ;;  %v5871_v5 = vld [vmem:[#allocation13 + $0x270] sm:$0xff]  ;;  %v5804_v13 = vld [vmem:[#allocation13 + $0x58] sm:$0xff]  ;;  %v5909_v45 = vld [vmem:[#allocation13 + $0x3a0] sm:$0xff] }
 0x74a   :  { %5973 = vmatpush.msrb.mxu3 %v5875_v46  ;;  %5938 = vmatpush.msra.mxu1 %v5801_v47  ;;  %v5795_v35 = vld [vmem:[#allocation13 + $0x10] sm:$0xff]  ;;  %v5431_v44 = vadd.f32 %v5430_v21, %v5411_v50  ;;  %v5836_v46 = vld [vmem:[#allocation13 + $0x158] sm:$0xff]  ;;  %v5905_v21 = vld [vmem:[#allocation13 + $0x380] sm:$0xff] }
 0x74b   :  { %5958 = vmatpush.msra.mxu2 %v5833_v55  ;;  %v5827_v17 = vld [vmem:[#allocation13 + $0x110] sm:$0xff]  ;;  %v5878_v55 = vld [vmem:[#allocation13 + $0x2a8] sm:$0xff] }
 0x74c   :  { %5974 = vmatpush.msrb.mxu3 %v5873_v48  ;;  %5939 = vmatpush.msra.mxu1 %v5799_v22  ;;  %v5867_v36 = vld [vmem:[#allocation13 + $0x250] sm:$0xff]  ;;  %v5451_v10 = vadd.f32 %v5450_v59, %v5431_v44  ;;  %v5802_v22 = vld [vmem:[#allocation13 + $0x48] sm:$0xff]  ;;  %v5530_v24 = vpop.f32.mrf.mxu0 }
 0x74d   :  { %5959 = vmatpush.msra.mxu2 %v5831_v12  ;;  %v5863_v49 = vld [vmem:[#allocation13 + $0x230] sm:$0xff]  ;;  %v5834_v12 = vld [vmem:[#allocation13 + $0x148] sm:$0xff] }
 0x74e   :  { %5975 = vmatpush.msrb.mxu3 %v5871_v5  ;;  %5940 = vmatpush.msra.mxu1 %v5797_v63  ;;  %v5859_v58 = vld [vmem:[#allocation13 + $0x210] sm:$0xff]  ;;  %v5471_v47 = vadd.f32 %v5470_v7, %v5451_v10  ;;  %v5876_v5 = vld [vmem:[#allocation13 + $0x298] sm:$0xff]  ;;  %v5914_v59 = vld [vmem:[#allocation13 + $0x3c8] sm:$0xff]  ;;  %v4968_v10 = vperm.slane %v10068_v62, 3 }
 0x74f   :  { %5960 = vmatpush.msra.mxu2 %v5829_v53  ;;  %v5510_v48 = vpop.f32.mrf.mxu3  ;;  %v5832_v63 = vld [vmem:[#allocation13 + $0x138] sm:$0xff]  ;;  %v5919_v9 = vld [vmem:[#allocation13 + $0x3f0] sm:$0xff] }
 0x750   :  { %5976 = vmatpush.msrb.mxu3 %v5869_v23  ;;  %5941 = vmatpush.msra.mxu1 %v5795_v35  ;;  %v5491_v30 = vadd.f32 %v5490_v32, %v5471_v47  ;;  %v5874_v23 = vld [vmem:[#allocation13 + $0x288] sm:$0xff]  ;;  %v5899_v50 = vld [vmem:[#allocation13 + $0x350] sm:$0xff]  ;;  %v5912_v7 = vld [vmem:[#allocation13 + $0x3b8] sm:$0xff] }
 0x751   :  { %5961 = vmatpush.msra.mxu2 %v5827_v17  ;;  %v5798_v35 = vld [vmem:[#allocation13 + $0x28] sm:$0xff]  ;;  %5987 = vmatpush.msrb.mxu0 %v5919_v9  ;;  %v5891_v44 = vld [vmem:[#allocation13 + $0x310] sm:$0xff]  ;;  %v6111_v9 = vld [vmem:[%s10246_s10 + $0x70] sm:$0xff] }
 0x752   :  { %5977 = vmatpush.msrb.mxu3 %v5867_v36  ;;  %5942 = vmatpush.msra.mxu1 %v5793_v25  ;;  %v5511_v53 = vadd.f32 %v5510_v48, %v5491_v30  ;;  %v5830_v17 = vld [vmem:[#allocation13 + $0x128] sm:$0xff]  ;;  %v5796_v36 = vld [vmem:[#allocation13 + $0x18] sm:$0xff] }
 0x753   :  { %5962 = vmatpush.msra.mxu2 %v5825_v1  ;;  %5943 = vmatmul.f32.vlgmr.msra.gmra.mxu1 %v10101_v15  ;;  %v5828_v25 = vld [vmem:[#allocation13 + $0x118] sm:$0xff]  ;;  %v5550_v1 = vpop.f32.mrf.mxu1  ;;  %v5902_v47 = vld [vmem:[#allocation13 + $0x368] sm:$0xff] }
 0x754   :  { %5963 = vmatmul.f32.vlgmr.msra.gmra.mxu2 %v10104_v11  ;;  %6007 = vmatpush.msrb.mxu1 %v5824_v54  ;;  %v5531_v54 = vadd.f32 %v5530_v24, %v5511_v53  ;;  %v5898_v48 = vld [vmem:[#allocation13 + $0x348] sm:$0xff] }
 0x755   :  { %6027 = vmatpush.msrb.mxu2 %v5856_v19  ;;  %5978 = vmatpush.msrb.mxu3 %v5865_v16  ;;  %v5870_v19 = vld [vmem:[#allocation13 + $0x268] sm:$0xff] }
 0x756   :  { %6008 = vmatpush.msrb.mxu1 %v5822_v29  ;;  %v5794_v16 = vld [vmem:[#allocation13 + $0x8] sm:$0xff] }
 0x757   :  { %6028 = vmatpush.msrb.mxu2 %v5854_v18  ;;  %5979 = vmatpush.msrb.mxu3 %v5863_v49  ;;  %v5826_v29 = vld [vmem:[#allocation13 + $0x108] sm:$0xff]  ;;  %v5551_v18 = vadd.f32 %v5550_v1, %v5531_v54  ;;  %v5570_v49 = vpop.f32.mrf.mxu2 }
 0x758   :  { %6009 = vmatpush.msrb.mxu1 %v5820_v42  ;;  %v5868_v42 = vld [vmem:[#allocation13 + $0x258] sm:$0xff]  ;;  %v5590_v32 = vpop.f32.mrf.mxu3  ;;  %v5894_v53 = vld [vmem:[#allocation13 + $0x328] sm:$0xff] }
 0x759   :  { %6029 = vmatpush.msrb.mxu2 %v5852_v40  ;;  %5980 = vmatpush.msrb.mxu3 %v5861_v52  ;;  %v5571_v40 = vadd.f32 %v5570_v49, %v5551_v18  ;;  %v5866_v52 = vld [vmem:[#allocation13 + $0x248] sm:$0xff] }
 0x75a   :  { %6010 = vmatpush.msrb.mxu1 %v5818_v14 }
 0x75b   :  { %6030 = vmatpush.msrb.mxu2 %v5850_v43  ;;  %5981 = vmatpush.msrb.mxu3 %v5859_v58  ;;  %v5781_v14 = vmul.f32 1.442695, %v5571_v40  ;;  %v5864_v43 = vld [vmem:[#allocation13 + $0x238] sm:$0xff]  ;;  %v5917_v58 = vld [vmem:[#allocation13 + $0x3e0] sm:$0xff]  ;;  %vm5775_vm10 = vcmp.gt.f32.partialorder %v5571_v40, 0.0 }
 0x75c   :  { %6011 = vmatpush.msrb.mxu1 %v5816_v20  ;;  %v5915_v20 = vld [vmem:[#allocation13 + $0x3d0] sm:$0xff]  ;;  %5988 = vmatpush.msrb.mxu0 %v5917_v58  ;;  %v6128_v58 = vld [vmem:[%s10246_s10 + $0xf8] sm:$0xff] }
 0x75d   :  { %6031 = vmatpush.msrb.mxu2 %v5848_v56  ;;  %5982 = vmatpush.msrb.mxu3 %v5857_v26  ;;  %6316 = vpow2.f32 %v5781_v14  ;;  %v5860_v56 = vld [vmem:[#allocation13 + $0x218] sm:$0xff]  ;;  %v5858_v26 = vld [vmem:[#allocation13 + $0x208] sm:$0xff] }
 0x75e   :  { %6012 = vmatpush.msrb.mxu1 %v5814_v0  ;;  %5989 = vmatpush.msrb.mxu0 %v5915_v20  ;;  %v5911_v0 = vld [vmem:[#allocation13 + $0x3b0] sm:$0xff]  ;;  %v6127_v20 = vld [vmem:[%s10246_s10 + $0xf0] sm:$0xff] }
 0x75f   :  { %6032 = vmatpush.msrb.mxu2 %v5846_v33  ;;  %6047 = vmatpush.msra.mxu3 %v5888_v27  ;;  %v5907_v27 = vld [vmem:[#allocation13 + $0x390] sm:$0xff] }
 0x760   :  { %6013 = vmatpush.msrb.mxu1 %v5812_v6  ;;  %5990 = vmatpush.msrb.mxu0 %v5913_v28  ;;  %v5903_v6 = vld [vmem:[#allocation13 + $0x370] sm:$0xff]  ;;  %v6107_v28 = vld [vmem:[%s10246_s10 + $0x50] sm:$0xff] }
 0x761   :  { %6033 = vmatpush.msrb.mxu2 %v5844_v41  ;;  %6048 = vmatpush.msra.mxu3 %v5886_v31  ;;  %v5901_v41 = vld [vmem:[#allocation13 + $0x360] sm:$0xff] }
 0x762   :  { %6014 = vmatpush.msrb.mxu1 %v5810_v60  ;;  %5991 = vmatpush.msrb.mxu0 %v5911_v0  ;;  %v5897_v31 = vld [vmem:[#allocation13 + $0x340] sm:$0xff]  ;;  %v5895_v60 = vld [vmem:[#allocation13 + $0x330] sm:$0xff] }
 0x763   :  { %6034 = vmatpush.msrb.mxu2 %v5842_v3  ;;  %6049 = vmatpush.msra.mxu3 %v5884_v61  ;;  %v5893_v3 = vld [vmem:[#allocation13 + $0x320] sm:$0xff]  ;;  %v6106_v0 = vld [vmem:[%s10246_s10 + $0x48] sm:$0xff] }
 0x764   :  { %6015 = vmatpush.msrb.mxu1 %v5808_v2  ;;  %5992 = vmatpush.msrb.mxu0 %v5909_v45  ;;  %v5889_v61 = vld [vmem:[#allocation13 + $0x300] sm:$0xff]  ;;  %v5920_v2 = vld [vmem:[#allocation13 + $0x3f8] sm:$0xff] }
 0x765   :  { %6035 = vmatpush.msrb.mxu2 %v5840_v37  ;;  %6050 = vmatpush.msra.mxu3 %v5882_v39  ;;  %v5918_v37 = vld [vmem:[#allocation13 + $0x3e8] sm:$0xff]  ;;  %v5916_v39 = vld [vmem:[#allocation13 + $0x3d8] sm:$0xff] }
 0x766   :  { %6016 = vmatpush.msrb.mxu1 %v5806_v34  ;;  %5993 = vmatpush.msrb.mxu0 %v5907_v27  ;;  %v5910_v34 = vld [vmem:[#allocation13 + $0x3a8] sm:$0xff] }
 0x767   :  { %6036 = vmatpush.msrb.mxu2 %v5838_v51  ;;  %6051 = vmatpush.msra.mxu3 %v5880_v38  ;;  %v5908_v51 = vld [vmem:[#allocation13 + $0x398] sm:$0xff]  ;;  %v5906_v38 = vld [vmem:[#allocation13 + $0x388] sm:$0xff] }
 0x768   :  { %6017 = vmatpush.msrb.mxu1 %v5804_v13  ;;  %5994 = vmatpush.msrb.mxu0 %v5905_v21  ;;  %v5904_v13 = vld [vmem:[#allocation13 + $0x378] sm:$0xff]  ;;  %v6104_v45 = vld [vmem:[%s10246_s10 + $0x38] sm:$0xff] }
 0x769   :  { %6037 = vmatpush.msrb.mxu2 %v5836_v46  ;;  %6052 = vmatpush.msra.mxu3 %v5878_v55  ;;  %v5591_v46 = vadd.f32 %v5590_v32, %v4968_v10  ;;  %v5900_v55 = vld [vmem:[#allocation13 + $0x358] sm:$0xff]  ;;  %v6124_v27 = vld [vmem:[%s10246_s10 + $0xd8] sm:$0xff]  ;;  %v5921_v10 = vld [vmem:[#allocation14] sm:$0x3] }
 0x76a   :  { %6018 = vmatpush.msrb.mxu1 %v5802_v22  ;;  %5995 = vmatpush.msrb.mxu0 %v5903_v6  ;;  %v5610_v22 = vpop.f32.mrf.mxu0  ;;  %v6103_v21 = vld [vmem:[%s10246_s10 + $0x30] sm:$0xff]  ;;  %v6113_v32 = vld [vmem:[%s10246_s10 + $0x80] sm:$0xff] }
 0x76b   :  { %6038 = vmatpush.msrb.mxu2 %v5834_v12  ;;  %6053 = vmatpush.msra.mxu3 %v5876_v5  ;;  %v5630_v12 = vpop.f32.mrf.mxu1  ;;  %v5611_v30 = vadd.f32 %v5610_v22, %v5591_v46  ;;  %v6123_v6 = vld [vmem:[%s10246_s10 + $0xd0] sm:$0xff] }
 0x76c   :  { %6019 = vmatpush.msrb.mxu1 %v5800_v4  ;;  %5996 = vmatpush.msrb.mxu0 %v5901_v41  ;;  %v6102_v41 = vld [vmem:[%s10246_s10 + $0x28] sm:$0xff] }
 0x76d   :  { %6039 = vmatpush.msrb.mxu2 %v5832_v63  ;;  %6054 = vmatpush.msra.mxu3 %v5874_v23  ;;  %v5631_v4 = vadd.f32 %v5630_v12, %v5611_v30  ;;  %v5896_v63 = vld [vmem:[#allocation13 + $0x338] sm:$0xff]  ;;  %v5924_v12 = vperm.slane %v5921_v10, 1 }
 0x76e   :  { %6020 = vmatpush.msrb.mxu1 %v5798_v35  ;;  %5997 = vmatpush.msrb.mxu0 %v5899_v50  ;;  %v5892_v35 = vld [vmem:[#allocation13 + $0x318] sm:$0xff] }
 0x76f   :  { %6040 = vmatpush.msrb.mxu2 %v5830_v17  ;;  %6055 = vmatpush.msra.mxu3 %v5872_v8  ;;  %v5890_v8 = vld [vmem:[#allocation13 + $0x308] sm:$0xff]  ;;  %v6122_v50 = vld [vmem:[%s10246_s10 + $0xc8] sm:$0xff] }
 0x770   :  { %6021 = vmatpush.msrb.mxu1 %v5796_v36  ;;  %5998 = vmatpush.msrb.mxu0 %v5897_v31  ;;  %v6101_v31 = vld [vmem:[%s10246_s10 + $0x20] sm:$0xff] }
 0x771   :  { %6041 = vmatpush.msrb.mxu2 %v5828_v25  ;;  %6056 = vmatpush.msra.mxu3 %v5870_v19  ;;  %v5650_v5 = vpop.f32.mrf.mxu2 }
 0x772   :  { %6022 = vmatpush.msrb.mxu1 %v5794_v16  ;;  %5999 = vmatpush.msrb.mxu0 %v5895_v60  ;;  %v5651_v23 = vadd.f32 %v5650_v5, %v5631_v4  ;;  %v6121_v60 = vld [vmem:[%s10246_s10 + $0xc0] sm:$0xff] }
 0x773   :  { %6042 = vmatpush.msrb.mxu2 %v5826_v29  ;;  %6023 = vmatmul.f32.vlgmr.msrb.gmra.mxu1 %v10101_v15  ;;  %v6317_v15 = vpop.eup %6316 }
 0x774   :  { %6043 = vmatmul.f32.vlgmr.msrb.gmra.mxu2 %v10104_v11  ;;  %6057 = vmatpush.msra.mxu3 %v5868_v42  ;;  %v6248_v11 = vadd.f32 -1.0, %v6317_v15  ;;  %v6125_v15 = vld [vmem:[%s10246_s10 + $0xe0] sm:$0xff] }
 0x775   :  { %6000 = vmatpush.msrb.mxu0 %v5893_v3  ;;  %6153 = vmatpush.msra.mxu2 %v6128_v58  ;;  %v6100_v3 = vld [vmem:[%s10246_s10 + $0x18] sm:$0xff]  ;;  %v6178_v58 = vld [vmem:[%s10248_s12] sm:$0xff] }
 0x776   :  { %6058 = vmatpush.msra.mxu3 %v5866_v52  ;;  %v5791_v33 = vsel %vm5775_vm10, %v5571_v40, %v6248_v11  ;;  %v6108_v11 = vld [vmem:[%s10246_s10 + $0x58] sm:$0xff] }
 0x777   :  { %5983 = vmatmul.f32.vlgmr.msrb.gmra.mxu3 %v5791_v33  ;;  %6001 = vmatpush.msrb.mxu0 %v5891_v44  ;;  %v6120_v44 = vld [vmem:[%s10246_s10 + $0xb8] sm:$0xff] }
 0x778   :  { %6059 = vmatpush.msra.mxu3 %v5864_v43  ;;  %v6112_v43 = vld [vmem:[%s10246_s10 + $0x78] sm:$0xff]  ;;  %6154 = vmatpush.msra.mxu2 %v6127_v20 }
 0x779   :  { %6002 = vmatpush.msrb.mxu0 %v5889_v61  ;;  %6133 = vmatpush.msra.mxu1 %v6112_v43  ;;  %v6099_v61 = vld [vmem:[%s10246_s10 + $0x10] sm:$0xff] }
 0x77a   :  { %6060 = vmatpush.msra.mxu3 %v5862_v57  ;;  %v6110_v57 = vld [vmem:[%s10246_s10 + $0x68] sm:$0xff]  ;;  %v6180_v43 = vld [vmem:[%s10248_s12 + $0x10] sm:$0xff] }
 0x77b   :  { %6067 = vmatpush.msra.mxu0 %v5920_v2  ;;  %6134 = vmatpush.msra.mxu1 %v6111_v9  ;;  %v6119_v2 = vld [vmem:[%s10246_s10 + $0xb0] sm:$0xff]  ;;  %v6179_v9 = vld [vmem:[%s10248_s12 + $0x8] sm:$0xff] }
 0x77c   :  { %6061 = vmatpush.msra.mxu3 %v5860_v56  ;;  %v6126_v56 = vld [vmem:[%s10246_s10 + $0xe8] sm:$0xff] }
 0x77d   :  { %6068 = vmatpush.msra.mxu0 %v5918_v37  ;;  %v5690_v24 = vpop.f32.mrf.mxu0  ;;  %6135 = vmatpush.msra.mxu1 %v6110_v57  ;;  %v6098_v37 = vld [vmem:[%s10246_s10 + $0x8] sm:$0xff]  ;;  %v6278_v57 = vld [vmem:[#allocation16] ss:$0 sm:$0xff] }
 0x77e   :  { %6062 = vmatpush.msra.mxu3 %v5858_v26  ;;  %v6109_v26 = vld [vmem:[%s10246_s10 + $0x60] sm:$0xff]  ;;  %6155 = vmatpush.msra.mxu2 %v6126_v56 }
 0x77f   :  { %6063 = vmatmul.f32.vlgmr.msra.gmra.mxu3 %v5791_v33  ;;  %6069 = vmatpush.msra.mxu0 %v5916_v39  ;;  %v6105_v33 = vld [vmem:[%s10246_s10 + $0x40] sm:$0xff]  ;;  %v6118_v39 = vld [vmem:[%s10246_s10 + $0xa8] sm:$0xff] }
 0x780   :  { %6136 = vmatpush.msra.mxu1 %v6109_v26  ;;  %6156 = vmatpush.msra.mxu2 %v6125_v15 }
 0x781   :  { %6070 = vmatpush.msra.mxu0 %v5914_v59  ;;  %v6097_v59 = vld [vmem:[%s10246_s10] sm:$0xff] }
 0x782   :  { %v5670_v62 = vpop.f32.mrf.mxu3  ;;  %6137 = vmatpush.msra.mxu1 %v6108_v11  ;;  %6157 = vmatpush.msra.mxu2 %v6124_v27 }
 0x783   :  { %6071 = vmatpush.msra.mxu0 %v5912_v7  ;;  %v5671_v17 = vadd.f32 %v5670_v62, %v5651_v23  ;;  %v6117_v7 = vld [vmem:[%s10246_s10 + $0xa0] sm:$0xff] }
 0x784   :  { %6138 = vmatpush.msra.mxu1 %v6107_v28  ;;  %6158 = vmatpush.msra.mxu2 %v6123_v6 }
 0x785   :  { %6072 = vmatpush.msra.mxu0 %v5910_v34  ;;  %v5691_v25 = vadd.f32 %v5690_v24, %v5671_v17  ;;  %v6116_v34 = vld [vmem:[%s10246_s10 + $0x98] sm:$0xff] }
 0x786   :  { %6139 = vmatpush.msra.mxu1 %v6106_v0  ;;  %6159 = vmatpush.msra.mxu2 %v6122_v50 }
 0x787   :  { %6073 = vmatpush.msra.mxu0 %v5908_v51  ;;  %v6115_v51 = vld [vmem:[%s10246_s10 + $0x90] sm:$0xff] }
 0x788   :  { %6140 = vmatpush.msra.mxu1 %v6105_v33  ;;  %6160 = vmatpush.msra.mxu2 %v6121_v60 }
 0x789   :  { %6074 = vmatpush.msra.mxu0 %v5906_v38  ;;  %v6114_v38 = vld [vmem:[%s10246_s10 + $0x88] sm:$0xff] }
 0x78a   :  { %6141 = vmatpush.msra.mxu1 %v6104_v45  ;;  %6161 = vmatpush.msra.mxu2 %v6120_v44  ;;  %v6279_v45 = vld [vmem:[#allocation2] ss:$0 sm:$0xff] }
 0x78b   :  { %6075 = vmatpush.msra.mxu0 %v5904_v13  ;;  %v5923_v13 = vperm.slane %v5921_v10, 0 }
 0x78c   :  { %6142 = vmatpush.msra.mxu1 %v6103_v21  ;;  %6162 = vmatpush.msra.mxu2 %v6119_v2 }
 0x78d   :  { %6076 = vmatpush.msra.mxu0 %v5902_v47 }
 0x78e   :  { %6143 = vmatpush.msra.mxu1 %v6102_v41  ;;  %6163 = vmatpush.msra.mxu2 %v6118_v39 }
 0x78f   :  { %6077 = vmatpush.msra.mxu0 %v5900_v55 }
 0x790   :  { %6144 = vmatpush.msra.mxu1 %v6101_v31  ;;  %6164 = vmatpush.msra.mxu2 %v6117_v7 }
 0x791   :  { %6078 = vmatpush.msra.mxu0 %v5898_v48 }
 0x792   :  { %6145 = vmatpush.msra.mxu1 %v6100_v3  ;;  %6165 = vmatpush.msra.mxu2 %v6116_v34 }
 0x793   :  { %6079 = vmatpush.msra.mxu0 %v5896_v63 }
 0x794   :  { %6146 = vmatpush.msra.mxu1 %v6099_v61  ;;  %6166 = vmatpush.msra.mxu2 %v6115_v51 }
 0x795   :  { %6080 = vmatpush.msra.mxu0 %v5894_v53 }
 0x796   :  { %6147 = vmatpush.msra.mxu1 %v6098_v37  ;;  %6167 = vmatpush.msra.mxu2 %v6114_v38 }
 0x797   :  { %6081 = vmatpush.msra.mxu0 %v5892_v35 }
 0x798   :  { %6148 = vmatpush.msra.mxu1 %v6097_v59  ;;  %6168 = vmatpush.msra.mxu2 %v6113_v32 }
 0x799   :  { %6082 = vmatpush.msra.mxu0 %v5890_v8 }
 0x7aa   :  { %v5710_v36 = vpop.f32.mrf.mxu1 }
 0x7ab   :  { %v5711_v54 = vadd.f32 %v5710_v36, %v5691_v25 }
 0x7b1   :  { %v5730_v1 = vpop.f32.mrf.mxu2 }
 0x7b2   :  { %v5731_v19 = vadd.f32 %v5730_v1, %v5711_v54 }
 0x7b9   :  { %v5770_v18 = vpop.f32.mrf.mxu0 }
 0x7be   :  { %v5750_v16 = vpop.f32.mrf.mxu3 }
 0x7bf   :  { %v5751_v29 = vadd.f32 %v5750_v16, %v5731_v19 }
 0x7c1   :  { %v5771_v49 = vadd.f32 %v5770_v18, %v5751_v29 }
 0x7c3   :  { %v5783_v42 = vmul.f32 1.442695, %v5771_v49  ;;  %vm5776_vm4 = vcmp.gt.f32.partialorder %v5771_v49, 0.0 }
 0x7c5   :  { %6318 = vpow2.f32 %v5783_v42  ;;  %v6184_v42 = vld [vmem:[%s10248_s12 + $0x30] sm:$0xff] }
 0x7cb   :  { %v6319_v40 = vpop.eup %6318 }
 0x7cc   :  { %v6249_v52 = vadd.f32 -1.0, %v6319_v40  ;;  %v6183_v40 = vld [vmem:[%s10248_s12 + $0x28] sm:$0xff] }
 0x7ce   :  { %v5792_v14 = vsel %vm5776_vm4, %v5771_v49, %v6249_v52  ;;  %v6185_v49 = vld [vmem:[%s10248_s12 + $0x38] sm:$0xff]  ;;  %v6182_v52 = vld [vmem:[%s10248_s12 + $0x20] sm:$0xff] }
 0x7cf   :  { %6003 = vmatmul.f32.vlgmr.msrb.gmra.mxu0 %v5792_v14  ;;  %6201 = vmatpush.msrb.mxu3 %v6185_v49 }
 0x7d0   :  { %v5944_v46 = vpop.f32.mrf.mxu1 }
 0x7d1   :  { %v5945_v48 = vadd.f32 %v5944_v46, %v5923_v13  ;;  %6202 = vmatpush.msrb.mxu3 %v6184_v42 }
 0x7d3   :  { %6203 = vmatpush.msrb.mxu3 %v6183_v40 }
 0x7d5   :  { %6204 = vmatpush.msrb.mxu3 %v6182_v52 }
 0x7d7   :  { %6083 = vmatmul.f32.vlgmr.msra.gmra.mxu0 %v5792_v14  ;;  %v5964_v47 = vpop.f32.mrf.mxu2  ;;  %v6181_v14 = vld [vmem:[%s10248_s12 + $0x18] sm:$0xff] }
 0x7d8   :  { %v5965_v22 = vadd.f32 %v5964_v47, %v5945_v48  ;;  %6205 = vmatpush.msrb.mxu3 %v6181_v14 }
 0x7da   :  { %6206 = vmatpush.msrb.mxu3 %v6180_v43 }
 0x7dc   :  { %6207 = vmatpush.msrb.mxu3 %v6179_v9 }
 0x7de   :  { %6208 = vmatpush.msrb.mxu3 %v6178_v58 }
 0x7f0   :  { %v6024_v5 = vpop.f32.mrf.mxu1 }
 0x7f1   :  { %v6025_v62 = vadd.f32 %v6024_v5, %v5924_v12 }
 0x7f7   :  { %v6044_v53 = vpop.f32.mrf.mxu2 }
 0x7f8   :  { %v6045_v17 = vadd.f32 %v6044_v53, %v6025_v62 }
 0x7fa   :  { %v5984_v55 = vpop.f32.mrf.mxu3 }
 0x7fb   :  { %v5985_v30 = vadd.f32 %v5984_v55, %v5965_v22 }
 0x802   :  { %v6064_v35 = vpop.f32.mrf.mxu3 }
 0x803   :  { %v6065_v8 = vadd.f32 %v6064_v35, %v6045_v17 }
 0x84c   :  { %v6004_v4 = vpop.f32.mrf.mxu0 }
 0x84d   :  { %v6005_v63 = vadd.f32 %v6004_v4, %v5985_v30 }
 0x84f   :  { %v6089_v23 = vmul.f32 1.442695, %v6005_v63  ;;  %vm6087_vm9 = vcmp.gt.f32.partialorder %v6005_v63, 0.0 }
 0x851   :  { %6320 = vpow2.f32 %v6089_v23 }
 0x854   :  { %v6084_v24 = vpop.f32.mrf.mxu0 }
 0x855   :  { %v6085_v36 = vadd.f32 %v6084_v24, %v6065_v8 }
 0x857   :  { %v6321_v25 = vpop.eup %6320  ;;  %v6091_v1 = vmul.f32 1.442695, %v6085_v36  ;;  %vm6088_vm5 = vcmp.gt.f32.partialorder %v6085_v36, 0.0 }
 0x858   :  { %v6250_v54 = vadd.f32 -1.0, %v6321_v25 }
 0x859   :  { %6322 = vpow2.f32 %v6091_v1 }
 0x85a   :  { %v6095_v19 = vsel %vm6087_vm9, %v6005_v63, %v6250_v54 }
 0x85b   :  { %6149 = vmatmul.f32.vlgmr.msra.gmra.mxu1 %v6095_v19 }
 0x85f   :  { %v6323_v16 = vpop.eup %6322 }
 0x860   :  { %v6251_v29 = vadd.f32 -1.0, %v6323_v16 }
 0x862   :  { %v6096_v18 = vsel %vm6088_vm5, %v6085_v36, %v6251_v29 }
 0x863   :  { %6169 = vmatmul.f32.vlgmr.msra.gmra.mxu2 %v6096_v18 }
 0x8d8   :  { %v6150_v20 = vpop.f32.mrf.mxu1 }
 0x8d9   :  { %v6151_v56 = vadd.f32 %v6278_v57, %v6150_v20 }
 0x8e6   :  { %v6170_v26 = vpop.f32.mrf.mxu2 }
 0x8e7   :  { %v6171_v15 = vadd.f32 %v6170_v26, %v6151_v56 }
 0x8e9   :  { %v6174_v11 = vmul.f32 1.442695, %v6171_v15  ;;  %vm6173_vm14 = vcmp.gt.f32.partialorder %v6171_v15, 0.0 }
 0x8eb   :  { %6324 = vpow2.f32 %v6174_v11 }
 0x8f1   :  { %v6325_v28 = vpop.eup %6324 }
 0x8f2   :  { %v6252_v0 = vadd.f32 -1.0, %v6325_v28 }
 0x8f4   :  { %v6177_v33 = vsel %vm6173_vm14, %v6171_v15, %v6252_v0 }
 0x8f5   :  { %6253 = vmatmul.msk.f32.vlgmr.msrb.gmra.mxu3 %vm797_vm12, %v6177_v33 }
 0x978   :  { %v6210_v27 = vpop.f32.mrf.mxu3 }
 0x979   :  { %v6211_v21 = vadd.f32 %v6279_v45, %v6210_v27 }
 0x97b   :  { %6214 = vst.msk [vmem:[%s10250_s14] sm:$0xf] %vm6213_vm6, %v6211_v21 }
 0x97c   :  { %6219 = vsyncpa [#allocation4], 1 }
 0x97d   :  { %6220 = vsyncpa [#allocation6], 1 }
 0x97e   :  { %6221 = vsyncpa [#allocation9], 1 }
 0x97f   :  { %6222 = vsyncpa [#allocation12], 1 }
 0x980   :  { %6223 = vsyncpa [#allocation15], 1 }

</bundles_post_ra>
